<compile_context>
chip_gen: v6e
topology: v6e:2x2x1
jax: 0.10.0
libtpu: 0.0.40
codegen_flags: <defaults>
</compile_context>

<pallas_src>
import functools

import jax
import jax.numpy as jnp
import numpy as np
from jax.experimental import pallas as pl
from jax.experimental.pallas import tpu as pltpu

BN_EPS = 1e-5
VMEM_LIMIT = 40 * 1024 * 1024   # < v7x 64 MiB physical; > v5e/v6e/v7x defaults


# ----------------------------- Pallas kernels ------------------------------ #

def _gemm_kernel(w_ref, x_ref, o_ref):
    # (tn, K) @ (K, tm) on the MXU: bf16 operands, f32 accumulation, bf16 store.
    o_ref[...] = jnp.dot(w_ref[...], x_ref[...],
                         preferred_element_type=jnp.float32).astype(o_ref.dtype)


def _bn_relu_kernel(x_ref, g_ref, b_ref, o_ref):
    # x: (tc, M) channels-first bf16. Training-mode batch norm per channel over
    # all B*H*W positions (biased variance), folded into scale/shift; f32 math.
    # The conv bias is intentionally omitted: it is cancelled exactly by the
    # BN mean subtraction (bit-for-bit identical output, one less VPU op/DMA).
    z = x_ref[...].astype(jnp.float32)
    mean = jnp.mean(z, axis=1, keepdims=True)
    var = jnp.mean(jnp.square(z - mean), axis=1, keepdims=True)     # biased
    scale = g_ref[...] * jax.lax.rsqrt(var + BN_EPS)
    shift = b_ref[...] - mean * scale
    o_ref[...] = jnp.maximum(z * scale + shift, 0.0).astype(o_ref.dtype)


def _bias_tanh_kernel(x_ref, b_ref, o_ref):
    # x: (C, tHW) bf16 for one batch element; output (C, tHW) f32 written
    # straight into the (B, C, H*W) NCHW-ordered output (batch dim squeezed).
    z = x_ref[...].astype(jnp.float32) + b_ref[...]
    o_ref[...] = jnp.tanh(z)


# ------------------------------ Pallas wrappers ----------------------------- #

def gemm_cf(wt, xt, tm=2048, tn=1024):
    """Yt (N, M) = Wt (N, K) @ Xt (K, M); bf16 in/out, f32 MXU accumulation.
    Tiled over the lane-dense M axis and (for big weights) the N axis; tails
    are zero-padded so the pipeline never degenerates to one giant block."""
    N, K = wt.shape
    M = xt.shape[1]
    tn = tn if N > tn else N
    tm = tm if M > tm else M
    Np = pl.cdiv(N, tn) * tn
    Mp = pl.cdiv(M, tm) * tm
    if Np != N:
        wt = jnp.pad(wt, ((0, Np - N), (0, 0)))
    if Mp != M:
        xt = jnp.pad(xt, ((0, 0), (0, Mp - M)))
    grid = (Np // tn, Mp // tm)
    yt = pl.pallas_call(
        _gemm_kernel,
        out_shape=jax.ShapeDtypeStruct((Np, Mp), jnp.bfloat16),
        grid=grid,
        in_specs=[pl.BlockSpec((tn, K), lambda j, i: (j, 0)),
                  pl.BlockSpec((K, tm), lambda j, i: (0, i))],
        out_specs=pl.BlockSpec((tn, tm), lambda j, i: (j, i)),
        compiler_params=pltpu.CompilerParams(
            dimension_semantics=("parallel", "parallel"),
            vmem_limit_bytes=VMEM_LIMIT),
    )(wt, xt)
    if Np != N or Mp != M:
        yt = yt[:N, :M]
    return yt


def _pick_tc(C, M, budget_bytes=2 << 20):
    """Channel-tile for the BN kernel: byte-budgeted, legal for bf16 tiling
    (multiple of 16 or the full channel dim), and >= 4 blocks when possible
    so v7x's two TensorCores have something to split."""
    tc = C
    while tc % 2 == 0 and (tc // 2) % 16 == 0 and tc * M * 2 > budget_bytes:
        tc //= 2
    while tc % 2 == 0 and (tc // 2) % 16 == 0 and C // tc < 4:
        tc //= 2
    return tc


def bn_relu(x_cm, gamma, beta):
    """x_cm (C, B*H*W) bf16 -> bf16. Grid over channels only, so BN statistics
    stay exact per channel; blocks are byte-budgeted and "parallel"."""
    C, M = x_cm.shape
    tc = _pick_tc(C, M)
    grid = (C // tc,)
    col = lambda v: v.reshape(C, 1).astype(jnp.float32)
    vec_spec = pl.BlockSpec((tc, 1), lambda i: (i, 0))
    return pl.pallas_call(
        _bn_relu_kernel,
        out_shape=jax.ShapeDtypeStruct((C, M), jnp.bfloat16),
        grid=grid,
        in_specs=[pl.BlockSpec((tc, M), lambda i: (i, 0)), vec_spec, vec_spec],
        out_specs=pl.BlockSpec((tc, M), lambda i: (i, 0)),
        compiler_params=pltpu.CompilerParams(
            dimension_semantics=("parallel",)),
    )(x_cm, col(gamma), col(beta))


def bias_tanh_nchw(x_cm, bias, B, H, W, thw=8192):
    """Fused bias + tanh + NCHW layout: input (C, B*H*W) bf16 channels-first,
    output (B, C, H, W) f32 written directly (no trailing XLA transpose)."""
    C, M = x_cm.shape
    HW = H * W
    assert M == B * HW
    if HW % thw != 0:
        thw = HW
    n_m = HW // thw
    out = pl.pallas_call(
        _bias_tanh_kernel,
        out_shape=jax.ShapeDtypeStruct((B, C, HW), jnp.float32),
        grid=(B, n_m),
        in_specs=[pl.BlockSpec((C, thw), lambda b, m: (0, b * n_m + m)),
                  pl.BlockSpec((C, 1), lambda b, m: (0, 0))],
        out_specs=pl.BlockSpec((None, C, thw), lambda b, m: (b, 0, m)),
        compiler_params=pltpu.CompilerParams(
            dimension_semantics=("parallel", "parallel")),
    )(x_cm, bias.reshape(C, 1).astype(jnp.float32))
    return out.reshape(B, C, H, W)


# ------------------------------- XLA glue ----------------------------------- #

def _weight_matrix(w):
    """torch ConvTranspose2d weight (C_in, C_out, k, k) -> (k*k*C_out, C_in),
    rows ordered (kh, kw, c_out). No spatial flip in the direct-scatter
    (GEMM + col2im) formulation of transposed convolution."""
    c_in, c_out, k, _ = w.shape
    return jnp.transpose(w, (2, 3, 1, 0)).reshape(k * k * c_out, c_in)


def _col2im_1x1(yt, c_out, B, k):
    """stride=1, padding=0, 1x1 input: no overlap, pure layout change (bf16)."""
    y = jnp.transpose(yt.reshape(k, k, c_out, B), (2, 3, 0, 1))  # (C, B, k, k)
    return y.reshape(c_out, B * k * k)


def _col2im_s2(yt, c_out, B, H, W, k=4):
    """Overlap-add for kernel=4, stride=2, padding=1 (sub-pixel decomposition):
    out[c, b, 2h+kh-1, 2w+kw-1] += Y[kh, kw, c, b, h, w]. Four pad-and-add
    terms, accumulated in f32, cropped by the padding=1 border, handed off bf16."""
    y = yt.reshape(k, k, c_out, B, H, W)
    y = jnp.transpose(y, (2, 3, 4, 0, 5, 1))             # (C, B, H, kh, W, kw)
    z = None
    for qh in (0, 1):
        for qw in (0, 1):
            t = y[:, :, :, 2 * qh:2 * qh + 2, :, 2 * qw:2 * qw + 2]
            t = t.astype(jnp.float32)
            t = jnp.pad(t, ((0, 0), (0, 0), (qh, 1 - qh), (0, 0),
                            (qw, 1 - qw), (0, 0)))
            z = t if z is None else z + t                 # (C, B, H+1, 2, W+1, 2)
    z = z.reshape(c_out, B, 2 * (H + 1), 2 * (W + 1))
    z = z[:, :, 1:2 * H + 1, 1:2 * W + 1]                 # (C, B, 2H, 2W)
    return z.astype(jnp.bfloat16).reshape(c_out, B * 2 * H * 2 * W)


def wave_field_decoder_forward(mu, sigma, params):
    """mu, sigma: (B, latent_dim, 1, 1) -> (B, out_channels, 128, 128)."""
    B = mu.shape[0]
    x = jnp.concatenate([mu, sigma], axis=1)              # (B, 2*latent, 1, 1)
    c_in = x.shape[1]
    xt = jnp.transpose(x.reshape(B, c_in)).astype(jnp.bfloat16)    # (C_in, B)
    H = W = 1

    # module_c1 ... module_c5: ConvTranspose2d + BatchNorm2d (train) + ReLU
    for idx, name in enumerate(["c1", "c2", "c3", "c4", "c5"]):
        w, _b_unused, g, beta = params[name]   # conv bias cancelled by BN mean
        c_out = w.shape[1]
        wt = _weight_matrix(w).astype(jnp.bfloat16)
        yt = gemm_cf(wt, xt)                               # bf16 (16*C_out, B*H*W)
        if idx == 0:                                       # k=4,s=1,p=0: 1x1 -> 4x4
            out_cm = _col2im_1x1(yt, c_out, B, 4)
            H = W = 4
        else:                                              # k=4,s=2,p=1: HxW -> 2Hx2W
            out_cm = _col2im_s2(yt, c_out, B, H, W, 4)
            H, W = 2 * H, 2 * W
        xt = bn_relu(out_cm, g, beta)                      # bf16 (C_out, B*H*W)

    # module_d: ConvTranspose2d(k=4, s=2, p=1) + Tanh
    w, b = params["d"]
    c_out = w.shape[1]
    wt = _weight_matrix(w).astype(jnp.bfloat16)
    yt = gemm_cf(wt, xt)
    out_cm = _col2im_s2(yt, c_out, B, H, W, 4)             # (C, B*128*128) bf16
    H, W = 2 * H, 2 * W
    return bias_tanh_nchw(out_cm, b, B, H, W)              # (B, C, 128, 128) f32


# --------------------------- deterministic params --------------------------- #

def _init_convt(key, c_in, c_out, k):
    k1, k2 = jax.random.split(key)
    bound = 1.0 / np.sqrt(c_in * k * k)
    w = jax.random.uniform(k1, (c_in, c_out, k, k), jnp.float32, -bound, bound)
    b = jax.random.uniform(k2, (c_out,), jnp.float32, -bound, bound)
    return w, b


def make_params(key, latent_dim, out_channels, base=16):
    # reference channels [1024, 512, 256, 128, 64] scaled by base/128
    chans = [8 * base, 4 * base, 2 * base, base, base // 2]
    params = {}
    c_in = 2 * latent_dim
    keys = jax.random.split(key, 6)
    for i, (name, c_out) in enumerate(zip(["c1", "c2", "c3", "c4", "c5"], chans)):
        w, b = _init_convt(keys[i], c_in, c_out, 4)
        gamma = jnp.ones((c_out,), jnp.float32)
        beta = jnp.zeros((c_out,), jnp.float32)
        params[name] = (w, b, gamma, beta)
        c_in = c_out
    w, b = _init_convt(keys[5], c_in, out_channels, 4)
    params["d"] = (w, b)
    return params


# ---------------------------------- main ------------------------------------ #

if __name__ == "__main__":
    LATENT_DIM = 32      # scaled-down stand-in for 512
    OUT_CHANNELS = 4
    BATCH = 2

    root = jax.random.PRNGKey(0)
    k_mu, k_sigma, k_params = jax.random.split(root, 3)
    mu = jax.random.normal(k_mu, (BATCH, LATENT_DIM, 1, 1), jnp.float32)
    sigma = jax.random.normal(k_sigma, (BATCH, LATENT_DIM, 1, 1), jnp.float32)
    params = make_params(k_params, LATENT_DIM, OUT_CHANNELS, base=16)

    fwd = jax.jit(functools.partial(wave_field_decoder_forward, params=params))
    out = fwd(mu, sigma)
    out = jax.block_until_ready(out)

    assert out.shape == (BATCH, OUT_CHANNELS, 128, 128), out.shape
    assert out.dtype == jnp.float32
    assert bool(jnp.all(jnp.isfinite(out)))
    assert bool(jnp.all(jnp.abs(out) <= 1.0 + 1e-6))   # tanh range
    print("KERNEL_OK")
</pallas_src>

<mosaic_0001>
module attributes {stable_mosaic.version = 11 : i64} {
  func.func @_gemm_kernel(%arg0: i32, %arg1: i32, %arg2: memref<1024x64xbf16, #tpu.memory_space<vmem>>, %arg3: memref<64x2xbf16, #tpu.memory_space<vmem>>, %arg4: memref<1024x2xbf16, #tpu.memory_space<vmem>>) attributes {dimension_semantics = [#tpu.dimension_semantics<parallel>, #tpu.dimension_semantics<parallel>], iteration_bounds = array<i64: 2, 1>, scalar_prefetch = 0 : i64, scratch_operands = 0 : i64, tpu.core_type = #tpu.core_type<tc>, window_params = [{transform_indices = @transform_0, window_bounds = array<i64: 1024, 64>}, {transform_indices = @transform_1, window_bounds = array<i64: 64, 2>}, {transform_indices = @transform_2, window_bounds = array<i64: 1024, 2>}]} {
    %c0 = arith.constant 0 : index
    %c0_0 = arith.constant 0 : index
    %0 = vector.load %arg2[%c0, %c0_0] : memref<1024x64xbf16, #tpu.memory_space<vmem>>, vector<1024x64xbf16>
    %c0_1 = arith.constant 0 : index
    %c0_2 = arith.constant 0 : index
    %1 = vector.load %arg3[%c0_1, %c0_2] : memref<64x2xbf16, #tpu.memory_space<vmem>>, vector<64x2xbf16>
    %cst = arith.constant dense<0.000000e+00> : vector<1024x2xf32>
    %2 = tpu.matmul %0, %1, %cst {dimension_numbers = #tpu.dot_dimension_numbers<[1], [0], [0], [1], [0, 0, 1, 1], [], []>} : vector<1024x64xbf16>, vector<64x2xbf16>, vector<1024x2xf32> -> vector<1024x2xf32>
    %3 = arith.truncf %2 : vector<1024x2xf32> to vector<1024x2xbf16>
    %c0_3 = arith.constant 0 : index
    %c0_4 = arith.constant 0 : index
    %4 = vector.load %arg4[%c0_3, %c0_4] : memref<1024x2xbf16, #tpu.memory_space<vmem>>, vector<1024x2xbf16>
    tpu.vector_store %arg4[%c0_3, %c0_4], %3 {strides = array<i32>} : memref<1024x2xbf16, #tpu.memory_space<vmem>>, vector<1024x2xbf16>,
    return
  }
  func.func @transform_0(%arg0: i32, %arg1: i32) -> (i32, i32) {
    %c0_i32 = arith.constant 0 : i32
    %c0_i32_0 = arith.constant 0 : i32
    return %arg0, %c0_i32 : i32, i32
  }
  func.func @transform_1(%arg0: i32, %arg1: i32) -> (i32, i32) {
    %c0_i32 = arith.constant 0 : i32
    %c0_i32_0 = arith.constant 0 : i32
    return %c0_i32, %arg1 : i32, i32
  }
  func.func @transform_2(%arg0: i32, %arg1: i32) -> (i32, i32) {
    %c0_i32 = arith.constant 0 : i32
    return %arg0, %arg1 : i32, i32
  }
}

module attributes {stable_mosaic.version = 11 : i64} {
  func.func @_gemm_kernel(%arg0: i32, %arg1: i32, %arg2: memref<1024x128xbf16, #tpu.memory_space<vmem>>, %arg3: memref<128x32xbf16, #tpu.memory_space<vmem>>, %arg4: memref<1024x32xbf16, #tpu.memory_space<vmem>>) attributes {dimension_semantics = [#tpu.dimension_semantics<parallel>, #tpu.dimension_semantics<parallel>], iteration_bounds = array<i64: 1, 1>, scalar_prefetch = 0 : i64, scratch_operands = 0 : i64, tpu.core_type = #tpu.core_type<tc>, window_params = [{transform_indices = @transform_0, window_bounds = array<i64: 1024, 128>}, {transform_indices = @transform_1, window_bounds = array<i64: 128, 32>}, {transform_indices = @transform_2, window_bounds = array<i64: 1024, 32>}]} {
    %c0 = arith.constant 0 : index
    %c0_0 = arith.constant 0 : index
    %0 = vector.load %arg2[%c0, %c0_0] : memref<1024x128xbf16, #tpu.memory_space<vmem>>, vector<1024x128xbf16>
    %c0_1 = arith.constant 0 : index
    %c0_2 = arith.constant 0 : index
    %1 = vector.load %arg3[%c0_1, %c0_2] : memref<128x32xbf16, #tpu.memory_space<vmem>>, vector<128x32xbf16>
    %cst = arith.constant dense<0.000000e+00> : vector<1024x32xf32>
    %2 = tpu.matmul %0, %1, %cst {dimension_numbers = #tpu.dot_dimension_numbers<[1], [0], [0], [1], [0, 0, 1, 1], [], []>} : vector<1024x128xbf16>, vector<128x32xbf16>, vector<1024x32xf32> -> vector<1024x32xf32>
    %3 = arith.truncf %2 : vector<1024x32xf32> to vector<1024x32xbf16>
    %c0_3 = arith.constant 0 : index
    %c0_4 = arith.constant 0 : index
    %4 = vector.load %arg4[%c0_3, %c0_4] : memref<1024x32xbf16, #tpu.memory_space<vmem>>, vector<1024x32xbf16>
    tpu.vector_store %arg4[%c0_3, %c0_4], %3 {strides = array<i32>} : memref<1024x32xbf16, #tpu.memory_space<vmem>>, vector<1024x32xbf16>,
    return
  }
  func.func @transform_0(%arg0: i32, %arg1: i32) -> (i32, i32) {
    %c0_i32 = arith.constant 0 : i32
    %c0_i32_0 = arith.constant 0 : i32
    return %arg0, %c0_i32 : i32, i32
  }
  func.func @transform_1(%arg0: i32, %arg1: i32) -> (i32, i32) {
    %c0_i32 = arith.constant 0 : i32
    %c0_i32_0 = arith.constant 0 : i32
    return %c0_i32, %arg1 : i32, i32
  }
  func.func @transform_2(%arg0: i32, %arg1: i32) -> (i32, i32) {
    %c0_i32 = arith.constant 0 : i32
    return %arg0, %arg1 : i32, i32
  }
}

module attributes {stable_mosaic.version = 11 : i64} {
  func.func @_bn_relu_kernel(%arg0: i32, %arg1: memref<32x32xbf16, #tpu.memory_space<vmem>>, %arg2: memref<32x1xf32, #tpu.memory_space<vmem>>, %arg3: memref<32x1xf32, #tpu.memory_space<vmem>>, %arg4: memref<32x32xbf16, #tpu.memory_space<vmem>>) attributes {dimension_semantics = [#tpu.dimension_semantics<parallel>], iteration_bounds = array<i64: 4>, scalar_prefetch = 0 : i64, scratch_operands = 0 : i64, tpu.core_type = #tpu.core_type<tc>, window_params = [{transform_indices = @transform_0, window_bounds = array<i64: 32, 32>}, {transform_indices = @transform_1, window_bounds = array<i64: 32, 1>}, {transform_indices = @transform_2, window_bounds = array<i64: 32, 1>}, {transform_indices = @transform_3, window_bounds = array<i64: 32, 32>}]} {
    %c0 = arith.constant 0 : index
    %c0_0 = arith.constant 0 : index
    %0 = vector.load %arg1[%c0, %c0_0] : memref<32x32xbf16, #tpu.memory_space<vmem>>, vector<32x32xbf16>
    %1 = arith.extf %0 : vector<32x32xbf16> to vector<32x32xf32>
    %cst = arith.constant dense<0.000000e+00> : vector<32xf32>
    %2 = vector.multi_reduction <add>, %1, %cst [1] : vector<32x32xf32> to vector<32xf32>
    %3 = vector.shape_cast %2 : vector<32xf32> to vector<32x1xf32>
    %cst_1 = arith.constant 3.200000e+01 : f32
    %4 = vector.broadcast %cst_1 : f32 to vector<32x1xf32>
    %5 = arith.divf %3, %4 : vector<32x1xf32>
    %6 = vector.broadcast %5 : vector<32x1xf32> to vector<32x32xf32>
    %7 = arith.subf %1, %6 : vector<32x32xf32>
    %8 = arith.mulf %7, %7 : vector<32x32xf32>
    %cst_2 = arith.constant dense<0.000000e+00> : vector<32xf32>
    %9 = vector.multi_reduction <add>, %8, %cst_2 [1] : vector<32x32xf32> to vector<32xf32>
    %10 = vector.shape_cast %9 : vector<32xf32> to vector<32x1xf32>
    %cst_3 = arith.constant 3.200000e+01 : f32
    %11 = vector.broadcast %cst_3 : f32 to vector<32x1xf32>
    %12 = arith.divf %10, %11 : vector<32x1xf32>
    %c0_4 = arith.constant 0 : index
    %c0_5 = arith.constant 0 : index
    %13 = vector.load %arg2[%c0_4, %c0_5] : memref<32x1xf32, #tpu.memory_space<vmem>>, vector<32x1xf32>
    %cst_6 = arith.constant 9.99999974E-6 : f32
    %14 = vector.broadcast %cst_6 : f32 to vector<32x1xf32>
    %15 = arith.addf %12, %14 : vector<32x1xf32>
    %16 = math.rsqrt %15 : vector<32x1xf32>
    %17 = arith.mulf %13, %16 : vector<32x1xf32>
    %c0_7 = arith.constant 0 : index
    %c0_8 = arith.constant 0 : index
    %18 = vector.load %arg3[%c0_7, %c0_8] : memref<32x1xf32, #tpu.memory_space<vmem>>, vector<32x1xf32>
    %19 = arith.mulf %5, %17 : vector<32x1xf32>
    %20 = arith.subf %18, %19 : vector<32x1xf32>
    %21 = vector.broadcast %17 : vector<32x1xf32> to vector<32x32xf32>
    %22 = arith.mulf %1, %21 : vector<32x32xf32>
    %23 = vector.broadcast %20 : vector<32x1xf32> to vector<32x32xf32>
    %24 = arith.addf %22, %23 : vector<32x32xf32>
    %cst_9 = arith.constant 0.000000e+00 : f32
    %25 = vector.broadcast %cst_9 : f32 to vector<32x32xf32>
    %26 = arith.maximumf %24, %25 : vector<32x32xf32>
    %27 = arith.truncf %26 : vector<32x32xf32> to vector<32x32xbf16>
    %c0_10 = arith.constant 0 : index
    %c0_11 = arith.constant 0 : index
    %28 = vector.load %arg4[%c0_10, %c0_11] : memref<32x32xbf16, #tpu.memory_space<vmem>>, vector<32x32xbf16>
    tpu.vector_store %arg4[%c0_10, %c0_11], %27 {strides = array<i32>} : memref<32x32xbf16, #tpu.memory_space<vmem>>, vector<32x32xbf16>,
    return
  }
  func.func @transform_0(%arg0: i32) -> (i32, i32) {
    %c0_i32 = arith.constant 0 : i32
    %c0_i32_0 = arith.constant 0 : i32
    return %arg0, %c0_i32 : i32, i32
  }
  func.func @transform_1(%arg0: i32) -> (i32, i32) {
    %c0_i32 = arith.constant 0 : i32
    %c0_i32_0 = arith.constant 0 : i32
    return %arg0, %c0_i32 : i32, i32
  }
  func.func @transform_2(%arg0: i32) -> (i32, i32) {
    %c0_i32 = arith.constant 0 : i32
    %c0_i32_0 = arith.constant 0 : i32
    return %arg0, %c0_i32 : i32, i32
  }
  func.func @transform_3(%arg0: i32) -> (i32, i32) {
    %c0_i32 = arith.constant 0 : i32
    %c0_i32_0 = arith.constant 0 : i32
    return %arg0, %c0_i32 : i32, i32
  }
}

module attributes {stable_mosaic.version = 11 : i64} {
  func.func @_gemm_kernel(%arg0: i32, %arg1: i32, %arg2: memref<512x64xbf16, #tpu.memory_space<vmem>>, %arg3: memref<64x128xbf16, #tpu.memory_space<vmem>>, %arg4: memref<512x128xbf16, #tpu.memory_space<vmem>>) attributes {dimension_semantics = [#tpu.dimension_semantics<parallel>, #tpu.dimension_semantics<parallel>], iteration_bounds = array<i64: 1, 1>, scalar_prefetch = 0 : i64, scratch_operands = 0 : i64, tpu.core_type = #tpu.core_type<tc>, window_params = [{transform_indices = @transform_0, window_bounds = array<i64: 512, 64>}, {transform_indices = @transform_1, window_bounds = array<i64: 64, 128>}, {transform_indices = @transform_2, window_bounds = array<i64: 512, 128>}]} {
    %c0 = arith.constant 0 : index
    %c0_0 = arith.constant 0 : index
    %0 = vector.load %arg2[%c0, %c0_0] : memref<512x64xbf16, #tpu.memory_space<vmem>>, vector<512x64xbf16>
    %c0_1 = arith.constant 0 : index
    %c0_2 = arith.constant 0 : index
    %1 = vector.load %arg3[%c0_1, %c0_2] : memref<64x128xbf16, #tpu.memory_space<vmem>>, vector<64x128xbf16>
    %cst = arith.constant dense<0.000000e+00> : vector<512x128xf32>
    %2 = tpu.matmul %0, %1, %cst {dimension_numbers = #tpu.dot_dimension_numbers<[1], [0], [0], [1], [0, 0, 1, 1], [], []>} : vector<512x64xbf16>, vector<64x128xbf16>, vector<512x128xf32> -> vector<512x128xf32>
    %3 = arith.truncf %2 : vector<512x128xf32> to vector<512x128xbf16>
    %c0_3 = arith.constant 0 : index
    %c0_4 = arith.constant 0 : index
    %4 = vector.load %arg4[%c0_3, %c0_4] : memref<512x128xbf16, #tpu.memory_space<vmem>>, vector<512x128xbf16>
    tpu.vector_store %arg4[%c0_3, %c0_4], %3 {strides = array<i32>} : memref<512x128xbf16, #tpu.memory_space<vmem>>, vector<512x128xbf16>,
    return
  }
  func.func @transform_0(%arg0: i32, %arg1: i32) -> (i32, i32) {
    %c0_i32 = arith.constant 0 : i32
    %c0_i32_0 = arith.constant 0 : i32
    return %arg0, %c0_i32 : i32, i32
  }
  func.func @transform_1(%arg0: i32, %arg1: i32) -> (i32, i32) {
    %c0_i32 = arith.constant 0 : i32
    %c0_i32_0 = arith.constant 0 : i32
    return %c0_i32, %arg1 : i32, i32
  }
  func.func @transform_2(%arg0: i32, %arg1: i32) -> (i32, i32) {
    %c0_i32 = arith.constant 0 : i32
    return %arg0, %arg1 : i32, i32
  }
}

module attributes {stable_mosaic.version = 11 : i64} {
  func.func @_bn_relu_kernel(%arg0: i32, %arg1: memref<16x128xbf16, #tpu.memory_space<vmem>>, %arg2: memref<16x1xf32, #tpu.memory_space<vmem>>, %arg3: memref<16x1xf32, #tpu.memory_space<vmem>>, %arg4: memref<16x128xbf16, #tpu.memory_space<vmem>>) attributes {dimension_semantics = [#tpu.dimension_semantics<parallel>], iteration_bounds = array<i64: 4>, scalar_prefetch = 0 : i64, scratch_operands = 0 : i64, tpu.core_type = #tpu.core_type<tc>, window_params = [{transform_indices = @transform_0, window_bounds = array<i64: 16, 128>}, {transform_indices = @transform_1, window_bounds = array<i64: 16, 1>}, {transform_indices = @transform_2, window_bounds = array<i64: 16, 1>}, {transform_indices = @transform_3, window_bounds = array<i64: 16, 128>}]} {
    %c0 = arith.constant 0 : index
    %c0_0 = arith.constant 0 : index
    %0 = vector.load %arg1[%c0, %c0_0] : memref<16x128xbf16, #tpu.memory_space<vmem>>, vector<16x128xbf16>
    %1 = arith.extf %0 : vector<16x128xbf16> to vector<16x128xf32>
    %cst = arith.constant dense<0.000000e+00> : vector<16xf32>
    %2 = vector.multi_reduction <add>, %1, %cst [1] : vector<16x128xf32> to vector<16xf32>
    %3 = vector.shape_cast %2 : vector<16xf32> to vector<16x1xf32>
    %cst_1 = arith.constant 1.280000e+02 : f32
    %4 = vector.broadcast %cst_1 : f32 to vector<16x1xf32>
    %5 = arith.divf %3, %4 : vector<16x1xf32>
    %6 = vector.broadcast %5 : vector<16x1xf32> to vector<16x128xf32>
    %7 = arith.subf %1, %6 : vector<16x128xf32>
    %8 = arith.mulf %7, %7 : vector<16x128xf32>
    %cst_2 = arith.constant dense<0.000000e+00> : vector<16xf32>
    %9 = vector.multi_reduction <add>, %8, %cst_2 [1] : vector<16x128xf32> to vector<16xf32>
    %10 = vector.shape_cast %9 : vector<16xf32> to vector<16x1xf32>
    %cst_3 = arith.constant 1.280000e+02 : f32
    %11 = vector.broadcast %cst_3 : f32 to vector<16x1xf32>
    %12 = arith.divf %10, %11 : vector<16x1xf32>
    %c0_4 = arith.constant 0 : index
    %c0_5 = arith.constant 0 : index
    %13 = vector.load %arg2[%c0_4, %c0_5] : memref<16x1xf32, #tpu.memory_space<vmem>>, vector<16x1xf32>
    %cst_6 = arith.constant 9.99999974E-6 : f32
    %14 = vector.broadcast %cst_6 : f32 to vector<16x1xf32>
    %15 = arith.addf %12, %14 : vector<16x1xf32>
    %16 = math.rsqrt %15 : vector<16x1xf32>
    %17 = arith.mulf %13, %16 : vector<16x1xf32>
    %c0_7 = arith.constant 0 : index
    %c0_8 = arith.constant 0 : index
    %18 = vector.load %arg3[%c0_7, %c0_8] : memref<16x1xf32, #tpu.memory_space<vmem>>, vector<16x1xf32>
    %19 = arith.mulf %5, %17 : vector<16x1xf32>
    %20 = arith.subf %18, %19 : vector<16x1xf32>
    %21 = vector.broadcast %17 : vector<16x1xf32> to vector<16x128xf32>
    %22 = arith.mulf %1, %21 : vector<16x128xf32>
    %23 = vector.broadcast %20 : vector<16x1xf32> to vector<16x128xf32>
    %24 = arith.addf %22, %23 : vector<16x128xf32>
    %cst_9 = arith.constant 0.000000e+00 : f32
    %25 = vector.broadcast %cst_9 : f32 to vector<16x128xf32>
    %26 = arith.maximumf %24, %25 : vector<16x128xf32>
    %27 = arith.truncf %26 : vector<16x128xf32> to vector<16x128xbf16>
    %c0_10 = arith.constant 0 : index
    %c0_11 = arith.constant 0 : index
    %28 = vector.load %arg4[%c0_10, %c0_11] : memref<16x128xbf16, #tpu.memory_space<vmem>>, vector<16x128xbf16>
    tpu.vector_store %arg4[%c0_10, %c0_11], %27 {strides = array<i32>} : memref<16x128xbf16, #tpu.memory_space<vmem>>, vector<16x128xbf16>,
    return
  }
  func.func @transform_0(%arg0: i32) -> (i32, i32) {
    %c0_i32 = arith.constant 0 : i32
    %c0_i32_0 = arith.constant 0 : i32
    return %arg0, %c0_i32 : i32, i32
  }
  func.func @transform_1(%arg0: i32) -> (i32, i32) {
    %c0_i32 = arith.constant 0 : i32
    %c0_i32_0 = arith.constant 0 : i32
    return %arg0, %c0_i32 : i32, i32
  }
  func.func @transform_2(%arg0: i32) -> (i32, i32) {
    %c0_i32 = arith.constant 0 : i32
    %c0_i32_0 = arith.constant 0 : i32
    return %arg0, %c0_i32 : i32, i32
  }
  func.func @transform_3(%arg0: i32) -> (i32, i32) {
    %c0_i32 = arith.constant 0 : i32
    %c0_i32_0 = arith.constant 0 : i32
    return %arg0, %c0_i32 : i32, i32
  }
}

module attributes {stable_mosaic.version = 11 : i64} {
  func.func @_bn_relu_kernel(%arg0: i32, %arg1: memref<16x512xbf16, #tpu.memory_space<vmem>>, %arg2: memref<16x1xf32, #tpu.memory_space<vmem>>, %arg3: memref<16x1xf32, #tpu.memory_space<vmem>>, %arg4: memref<16x512xbf16, #tpu.memory_space<vmem>>) attributes {dimension_semantics = [#tpu.dimension_semantics<parallel>], iteration_bounds = array<i64: 2>, scalar_prefetch = 0 : i64, scratch_operands = 0 : i64, tpu.core_type = #tpu.core_type<tc>, window_params = [{transform_indices = @transform_0, window_bounds = array<i64: 16, 512>}, {transform_indices = @transform_1, window_bounds = array<i64: 16, 1>}, {transform_indices = @transform_2, window_bounds = array<i64: 16, 1>}, {transform_indices = @transform_3, window_bounds = array<i64: 16, 512>}]} {
    %c0 = arith.constant 0 : index
    %c0_0 = arith.constant 0 : index
    %0 = vector.load %arg1[%c0, %c0_0] : memref<16x512xbf16, #tpu.memory_space<vmem>>, vector<16x512xbf16>
    %1 = arith.extf %0 : vector<16x512xbf16> to vector<16x512xf32>
    %cst = arith.constant dense<0.000000e+00> : vector<16xf32>
    %2 = vector.multi_reduction <add>, %1, %cst [1] : vector<16x512xf32> to vector<16xf32>
    %3 = vector.shape_cast %2 : vector<16xf32> to vector<16x1xf32>
    %cst_1 = arith.constant 5.120000e+02 : f32
    %4 = vector.broadcast %cst_1 : f32 to vector<16x1xf32>
    %5 = arith.divf %3, %4 : vector<16x1xf32>
    %6 = vector.broadcast %5 : vector<16x1xf32> to vector<16x512xf32>
    %7 = arith.subf %1, %6 : vector<16x512xf32>
    %8 = arith.mulf %7, %7 : vector<16x512xf32>
    %cst_2 = arith.constant dense<0.000000e+00> : vector<16xf32>
    %9 = vector.multi_reduction <add>, %8, %cst_2 [1] : vector<16x512xf32> to vector<16xf32>
    %10 = vector.shape_cast %9 : vector<16xf32> to vector<16x1xf32>
    %cst_3 = arith.constant 5.120000e+02 : f32
    %11 = vector.broadcast %cst_3 : f32 to vector<16x1xf32>
    %12 = arith.divf %10, %11 : vector<16x1xf32>
    %c0_4 = arith.constant 0 : index
    %c0_5 = arith.constant 0 : index
    %13 = vector.load %arg2[%c0_4, %c0_5] : memref<16x1xf32, #tpu.memory_space<vmem>>, vector<16x1xf32>
    %cst_6 = arith.constant 9.99999974E-6 : f32
    %14 = vector.broadcast %cst_6 : f32 to vector<16x1xf32>
    %15 = arith.addf %12, %14 : vector<16x1xf32>
    %16 = math.rsqrt %15 : vector<16x1xf32>
    %17 = arith.mulf %13, %16 : vector<16x1xf32>
    %c0_7 = arith.constant 0 : index
    %c0_8 = arith.constant 0 : index
    %18 = vector.load %arg3[%c0_7, %c0_8] : memref<16x1xf32, #tpu.memory_space<vmem>>, vector<16x1xf32>
    %19 = arith.mulf %5, %17 : vector<16x1xf32>
    %20 = arith.subf %18, %19 : vector<16x1xf32>
    %21 = vector.broadcast %17 : vector<16x1xf32> to vector<16x512xf32>
    %22 = arith.mulf %1, %21 : vector<16x512xf32>
    %23 = vector.broadcast %20 : vector<16x1xf32> to vector<16x512xf32>
    %24 = arith.addf %22, %23 : vector<16x512xf32>
    %cst_9 = arith.constant 0.000000e+00 : f32
    %25 = vector.broadcast %cst_9 : f32 to vector<16x512xf32>
    %26 = arith.maximumf %24, %25 : vector<16x512xf32>
    %27 = arith.truncf %26 : vector<16x512xf32> to vector<16x512xbf16>
    %c0_10 = arith.constant 0 : index
    %c0_11 = arith.constant 0 : index
    %28 = vector.load %arg4[%c0_10, %c0_11] : memref<16x512xbf16, #tpu.memory_space<vmem>>, vector<16x512xbf16>
    tpu.vector_store %arg4[%c0_10, %c0_11], %27 {strides = array<i32>} : memref<16x512xbf16, #tpu.memory_space<vmem>>, vector<16x512xbf16>,
    return
  }
  func.func @transform_0(%arg0: i32) -> (i32, i32) {
    %c0_i32 = arith.constant 0 : i32
    %c0_i32_0 = arith.constant 0 : i32
    return %arg0, %c0_i32 : i32, i32
  }
  func.func @transform_1(%arg0: i32) -> (i32, i32) {
    %c0_i32 = arith.constant 0 : i32
    %c0_i32_0 = arith.constant 0 : i32
    return %arg0, %c0_i32 : i32, i32
  }
  func.func @transform_2(%arg0: i32) -> (i32, i32) {
    %c0_i32 = arith.constant 0 : i32
    %c0_i32_0 = arith.constant 0 : i32
    return %arg0, %c0_i32 : i32, i32
  }
  func.func @transform_3(%arg0: i32) -> (i32, i32) {
    %c0_i32 = arith.constant 0 : i32
    %c0_i32_0 = arith.constant 0 : i32
    return %arg0, %c0_i32 : i32, i32
  }
}

module attributes {stable_mosaic.version = 11 : i64} {
  func.func @_gemm_kernel(%arg0: i32, %arg1: i32, %arg2: memref<256x32xbf16, #tpu.memory_space<vmem>>, %arg3: memref<32x512xbf16, #tpu.memory_space<vmem>>, %arg4: memref<256x512xbf16, #tpu.memory_space<vmem>>) attributes {dimension_semantics = [#tpu.dimension_semantics<parallel>, #tpu.dimension_semantics<parallel>], iteration_bounds = array<i64: 1, 1>, scalar_prefetch = 0 : i64, scratch_operands = 0 : i64, tpu.core_type = #tpu.core_type<tc>, window_params = [{transform_indices = @transform_0, window_bounds = array<i64: 256, 32>}, {transform_indices = @transform_1, window_bounds = array<i64: 32, 512>}, {transform_indices = @transform_2, window_bounds = array<i64: 256, 512>}]} {
    %c0 = arith.constant 0 : index
    %c0_0 = arith.constant 0 : index
    %0 = vector.load %arg2[%c0, %c0_0] : memref<256x32xbf16, #tpu.memory_space<vmem>>, vector<256x32xbf16>
    %c0_1 = arith.constant 0 : index
    %c0_2 = arith.constant 0 : index
    %1 = vector.load %arg3[%c0_1, %c0_2] : memref<32x512xbf16, #tpu.memory_space<vmem>>, vector<32x512xbf16>
    %cst = arith.constant dense<0.000000e+00> : vector<256x512xf32>
    %2 = tpu.matmul %0, %1, %cst {dimension_numbers = #tpu.dot_dimension_numbers<[1], [0], [0], [1], [0, 0, 1, 1], [], []>} : vector<256x32xbf16>, vector<32x512xbf16>, vector<256x512xf32> -> vector<256x512xf32>
    %3 = arith.truncf %2 : vector<256x512xf32> to vector<256x512xbf16>
    %c0_3 = arith.constant 0 : index
    %c0_4 = arith.constant 0 : index
    %4 = vector.load %arg4[%c0_3, %c0_4] : memref<256x512xbf16, #tpu.memory_space<vmem>>, vector<256x512xbf16>
    tpu.vector_store %arg4[%c0_3, %c0_4], %3 {strides = array<i32>} : memref<256x512xbf16, #tpu.memory_space<vmem>>, vector<256x512xbf16>,
    return
  }
  func.func @transform_0(%arg0: i32, %arg1: i32) -> (i32, i32) {
    %c0_i32 = arith.constant 0 : i32
    %c0_i32_0 = arith.constant 0 : i32
    return %arg0, %c0_i32 : i32, i32
  }
  func.func @transform_1(%arg0: i32, %arg1: i32) -> (i32, i32) {
    %c0_i32 = arith.constant 0 : i32
    %c0_i32_0 = arith.constant 0 : i32
    return %c0_i32, %arg1 : i32, i32
  }
  func.func @transform_2(%arg0: i32, %arg1: i32) -> (i32, i32) {
    %c0_i32 = arith.constant 0 : i32
    return %arg0, %arg1 : i32, i32
  }
}

module attributes {stable_mosaic.version = 11 : i64} {
  func.func @_bn_relu_kernel(%arg0: i32, %arg1: memref<16x2048xbf16, #tpu.memory_space<vmem>>, %arg2: memref<16x1xf32, #tpu.memory_space<vmem>>, %arg3: memref<16x1xf32, #tpu.memory_space<vmem>>, %arg4: memref<16x2048xbf16, #tpu.memory_space<vmem>>) attributes {dimension_semantics = [#tpu.dimension_semantics<parallel>], iteration_bounds = array<i64: 1>, scalar_prefetch = 0 : i64, scratch_operands = 0 : i64, tpu.core_type = #tpu.core_type<tc>, window_params = [{transform_indices = @transform_0, window_bounds = array<i64: 16, 2048>}, {transform_indices = @transform_1, window_bounds = array<i64: 16, 1>}, {transform_indices = @transform_2, window_bounds = array<i64: 16, 1>}, {transform_indices = @transform_3, window_bounds = array<i64: 16, 2048>}]} {
    %c0 = arith.constant 0 : index
    %c0_0 = arith.constant 0 : index
    %0 = vector.load %arg1[%c0, %c0_0] : memref<16x2048xbf16, #tpu.memory_space<vmem>>, vector<16x2048xbf16>
    %1 = arith.extf %0 : vector<16x2048xbf16> to vector<16x2048xf32>
    %cst = arith.constant dense<0.000000e+00> : vector<16xf32>
    %2 = vector.multi_reduction <add>, %1, %cst [1] : vector<16x2048xf32> to vector<16xf32>
    %3 = vector.shape_cast %2 : vector<16xf32> to vector<16x1xf32>
    %cst_1 = arith.constant 2.048000e+03 : f32
    %4 = vector.broadcast %cst_1 : f32 to vector<16x1xf32>
    %5 = arith.divf %3, %4 : vector<16x1xf32>
    %6 = vector.broadcast %5 : vector<16x1xf32> to vector<16x2048xf32>
    %7 = arith.subf %1, %6 : vector<16x2048xf32>
    %8 = arith.mulf %7, %7 : vector<16x2048xf32>
    %cst_2 = arith.constant dense<0.000000e+00> : vector<16xf32>
    %9 = vector.multi_reduction <add>, %8, %cst_2 [1] : vector<16x2048xf32> to vector<16xf32>
    %10 = vector.shape_cast %9 : vector<16xf32> to vector<16x1xf32>
    %cst_3 = arith.constant 2.048000e+03 : f32
    %11 = vector.broadcast %cst_3 : f32 to vector<16x1xf32>
    %12 = arith.divf %10, %11 : vector<16x1xf32>
    %c0_4 = arith.constant 0 : index
    %c0_5 = arith.constant 0 : index
    %13 = vector.load %arg2[%c0_4, %c0_5] : memref<16x1xf32, #tpu.memory_space<vmem>>, vector<16x1xf32>
    %cst_6 = arith.constant 9.99999974E-6 : f32
    %14 = vector.broadcast %cst_6 : f32 to vector<16x1xf32>
    %15 = arith.addf %12, %14 : vector<16x1xf32>
    %16 = math.rsqrt %15 : vector<16x1xf32>
    %17 = arith.mulf %13, %16 : vector<16x1xf32>
    %c0_7 = arith.constant 0 : index
    %c0_8 = arith.constant 0 : index
    %18 = vector.load %arg3[%c0_7, %c0_8] : memref<16x1xf32, #tpu.memory_space<vmem>>, vector<16x1xf32>
    %19 = arith.mulf %5, %17 : vector<16x1xf32>
    %20 = arith.subf %18, %19 : vector<16x1xf32>
    %21 = vector.broadcast %17 : vector<16x1xf32> to vector<16x2048xf32>
    %22 = arith.mulf %1, %21 : vector<16x2048xf32>
    %23 = vector.broadcast %20 : vector<16x1xf32> to vector<16x2048xf32>
    %24 = arith.addf %22, %23 : vector<16x2048xf32>
    %cst_9 = arith.constant 0.000000e+00 : f32
    %25 = vector.broadcast %cst_9 : f32 to vector<16x2048xf32>
    %26 = arith.maximumf %24, %25 : vector<16x2048xf32>
    %27 = arith.truncf %26 : vector<16x2048xf32> to vector<16x2048xbf16>
    %c0_10 = arith.constant 0 : index
    %c0_11 = arith.constant 0 : index
    %28 = vector.load %arg4[%c0_10, %c0_11] : memref<16x2048xbf16, #tpu.memory_space<vmem>>, vector<16x2048xbf16>
    tpu.vector_store %arg4[%c0_10, %c0_11], %27 {strides = array<i32>} : memref<16x2048xbf16, #tpu.memory_space<vmem>>, vector<16x2048xbf16>,
    return
  }
  func.func @transform_0(%arg0: i32) -> (i32, i32) {
    %c0_i32 = arith.constant 0 : i32
    %c0_i32_0 = arith.constant 0 : i32
    return %arg0, %c0_i32 : i32, i32
  }
  func.func @transform_1(%arg0: i32) -> (i32, i32) {
    %c0_i32 = arith.constant 0 : i32
    %c0_i32_0 = arith.constant 0 : i32
    return %arg0, %c0_i32 : i32, i32
  }
  func.func @transform_2(%arg0: i32) -> (i32, i32) {
    %c0_i32 = arith.constant 0 : i32
    %c0_i32_0 = arith.constant 0 : i32
    return %arg0, %c0_i32 : i32, i32
  }
  func.func @transform_3(%arg0: i32) -> (i32, i32) {
    %c0_i32 = arith.constant 0 : i32
    %c0_i32_0 = arith.constant 0 : i32
    return %arg0, %c0_i32 : i32, i32
  }
}

module attributes {stable_mosaic.version = 11 : i64} {
  func.func @_gemm_kernel(%arg0: i32, %arg1: i32, %arg2: memref<128x16xbf16, #tpu.memory_space<vmem>>, %arg3: memref<16x2048xbf16, #tpu.memory_space<vmem>>, %arg4: memref<128x2048xbf16, #tpu.memory_space<vmem>>) attributes {dimension_semantics = [#tpu.dimension_semantics<parallel>, #tpu.dimension_semantics<parallel>], iteration_bounds = array<i64: 1, 1>, scalar_prefetch = 0 : i64, scratch_operands = 0 : i64, tpu.core_type = #tpu.core_type<tc>, window_params = [{transform_indices = @transform_0, window_bounds = array<i64: 128, 16>}, {transform_indices = @transform_1, window_bounds = array<i64: 16, 2048>}, {transform_indices = @transform_2, window_bounds = array<i64: 128, 2048>}]} {
    %c0 = arith.constant 0 : index
    %c0_0 = arith.constant 0 : index
    %0 = vector.load %arg2[%c0, %c0_0] : memref<128x16xbf16, #tpu.memory_space<vmem>>, vector<128x16xbf16>
    %c0_1 = arith.constant 0 : index
    %c0_2 = arith.constant 0 : index
    %1 = vector.load %arg3[%c0_1, %c0_2] : memref<16x2048xbf16, #tpu.memory_space<vmem>>, vector<16x2048xbf16>
    %cst = arith.constant dense<0.000000e+00> : vector<128x2048xf32>
    %2 = tpu.matmul %0, %1, %cst {dimension_numbers = #tpu.dot_dimension_numbers<[1], [0], [0], [1], [0, 0, 1, 1], [], []>} : vector<128x16xbf16>, vector<16x2048xbf16>, vector<128x2048xf32> -> vector<128x2048xf32>
    %3 = arith.truncf %2 : vector<128x2048xf32> to vector<128x2048xbf16>
    %c0_3 = arith.constant 0 : index
    %c0_4 = arith.constant 0 : index
    %4 = vector.load %arg4[%c0_3, %c0_4] : memref<128x2048xbf16, #tpu.memory_space<vmem>>, vector<128x2048xbf16>
    tpu.vector_store %arg4[%c0_3, %c0_4], %3 {strides = array<i32>} : memref<128x2048xbf16, #tpu.memory_space<vmem>>, vector<128x2048xbf16>,
    return
  }
  func.func @transform_0(%arg0: i32, %arg1: i32) -> (i32, i32) {
    %c0_i32 = arith.constant 0 : i32
    %c0_i32_0 = arith.constant 0 : i32
    return %arg0, %c0_i32 : i32, i32
  }
  func.func @transform_1(%arg0: i32, %arg1: i32) -> (i32, i32) {
    %c0_i32 = arith.constant 0 : i32
    %c0_i32_0 = arith.constant 0 : i32
    return %c0_i32, %arg1 : i32, i32
  }
  func.func @transform_2(%arg0: i32, %arg1: i32) -> (i32, i32) {
    %c0_i32 = arith.constant 0 : i32
    return %arg0, %arg1 : i32, i32
  }
}

module attributes {stable_mosaic.version = 11 : i64} {
  func.func @_bn_relu_kernel(%arg0: i32, %arg1: memref<8x8192xbf16, #tpu.memory_space<vmem>>, %arg2: memref<8x1xf32, #tpu.memory_space<vmem>>, %arg3: memref<8x1xf32, #tpu.memory_space<vmem>>, %arg4: memref<8x8192xbf16, #tpu.memory_space<vmem>>) attributes {dimension_semantics = [#tpu.dimension_semantics<parallel>], iteration_bounds = array<i64: 1>, scalar_prefetch = 0 : i64, scratch_operands = 0 : i64, tpu.core_type = #tpu.core_type<tc>, window_params = [{transform_indices = @transform_0, window_bounds = array<i64: 8, 8192>}, {transform_indices = @transform_1, window_bounds = array<i64: 8, 1>}, {transform_indices = @transform_2, window_bounds = array<i64: 8, 1>}, {transform_indices = @transform_3, window_bounds = array<i64: 8, 8192>}]} {
    %c0 = arith.constant 0 : index
    %c0_0 = arith.constant 0 : index
    %0 = vector.load %arg1[%c0, %c0_0] : memref<8x8192xbf16, #tpu.memory_space<vmem>>, vector<8x8192xbf16>
    %1 = arith.extf %0 : vector<8x8192xbf16> to vector<8x8192xf32>
    %cst = arith.constant dense<0.000000e+00> : vector<8xf32>
    %2 = vector.multi_reduction <add>, %1, %cst [1] : vector<8x8192xf32> to vector<8xf32>
    %3 = vector.shape_cast %2 : vector<8xf32> to vector<8x1xf32>
    %cst_1 = arith.constant 8.192000e+03 : f32
    %4 = vector.broadcast %cst_1 : f32 to vector<8x1xf32>
    %5 = arith.divf %3, %4 : vector<8x1xf32>
    %6 = vector.broadcast %5 : vector<8x1xf32> to vector<8x8192xf32>
    %7 = arith.subf %1, %6 : vector<8x8192xf32>
    %8 = arith.mulf %7, %7 : vector<8x8192xf32>
    %cst_2 = arith.constant dense<0.000000e+00> : vector<8xf32>
    %9 = vector.multi_reduction <add>, %8, %cst_2 [1] : vector<8x8192xf32> to vector<8xf32>
    %10 = vector.shape_cast %9 : vector<8xf32> to vector<8x1xf32>
    %cst_3 = arith.constant 8.192000e+03 : f32
    %11 = vector.broadcast %cst_3 : f32 to vector<8x1xf32>
    %12 = arith.divf %10, %11 : vector<8x1xf32>
    %c0_4 = arith.constant 0 : index
    %c0_5 = arith.constant 0 : index
    %13 = vector.load %arg2[%c0_4, %c0_5] : memref<8x1xf32, #tpu.memory_space<vmem>>, vector<8x1xf32>
    %cst_6 = arith.constant 9.99999974E-6 : f32
    %14 = vector.broadcast %cst_6 : f32 to vector<8x1xf32>
    %15 = arith.addf %12, %14 : vector<8x1xf32>
    %16 = math.rsqrt %15 : vector<8x1xf32>
    %17 = arith.mulf %13, %16 : vector<8x1xf32>
    %c0_7 = arith.constant 0 : index
    %c0_8 = arith.constant 0 : index
    %18 = vector.load %arg3[%c0_7, %c0_8] : memref<8x1xf32, #tpu.memory_space<vmem>>, vector<8x1xf32>
    %19 = arith.mulf %5, %17 : vector<8x1xf32>
    %20 = arith.subf %18, %19 : vector<8x1xf32>
    %21 = vector.broadcast %17 : vector<8x1xf32> to vector<8x8192xf32>
    %22 = arith.mulf %1, %21 : vector<8x8192xf32>
    %23 = vector.broadcast %20 : vector<8x1xf32> to vector<8x8192xf32>
    %24 = arith.addf %22, %23 : vector<8x8192xf32>
    %cst_9 = arith.constant 0.000000e+00 : f32
    %25 = vector.broadcast %cst_9 : f32 to vector<8x8192xf32>
    %26 = arith.maximumf %24, %25 : vector<8x8192xf32>
    %27 = arith.truncf %26 : vector<8x8192xf32> to vector<8x8192xbf16>
    %c0_10 = arith.constant 0 : index
    %c0_11 = arith.constant 0 : index
    %28 = vector.load %arg4[%c0_10, %c0_11] : memref<8x8192xbf16, #tpu.memory_space<vmem>>, vector<8x8192xbf16>
    tpu.vector_store %arg4[%c0_10, %c0_11], %27 {strides = array<i32>} : memref<8x8192xbf16, #tpu.memory_space<vmem>>, vector<8x8192xbf16>,
    return
  }
  func.func @transform_0(%arg0: i32) -> (i32, i32) {
    %c0_i32 = arith.constant 0 : i32
    %c0_i32_0 = arith.constant 0 : i32
    return %arg0, %c0_i32 : i32, i32
  }
  func.func @transform_1(%arg0: i32) -> (i32, i32) {
    %c0_i32 = arith.constant 0 : i32
    %c0_i32_0 = arith.constant 0 : i32
    return %arg0, %c0_i32 : i32, i32
  }
  func.func @transform_2(%arg0: i32) -> (i32, i32) {
    %c0_i32 = arith.constant 0 : i32
    %c0_i32_0 = arith.constant 0 : i32
    return %arg0, %c0_i32 : i32, i32
  }
  func.func @transform_3(%arg0: i32) -> (i32, i32) {
    %c0_i32 = arith.constant 0 : i32
    %c0_i32_0 = arith.constant 0 : i32
    return %arg0, %c0_i32 : i32, i32
  }
}

module attributes {stable_mosaic.version = 11 : i64} {
  func.func @_gemm_kernel(%arg0: i32, %arg1: i32, %arg2: memref<64x8xbf16, #tpu.memory_space<vmem>>, %arg3: memref<8x2048xbf16, #tpu.memory_space<vmem>>, %arg4: memref<64x2048xbf16, #tpu.memory_space<vmem>>) attributes {dimension_semantics = [#tpu.dimension_semantics<parallel>, #tpu.dimension_semantics<parallel>], iteration_bounds = array<i64: 1, 4>, scalar_prefetch = 0 : i64, scratch_operands = 0 : i64, tpu.core_type = #tpu.core_type<tc>, window_params = [{transform_indices = @transform_0, window_bounds = array<i64: 64, 8>}, {transform_indices = @transform_1, window_bounds = array<i64: 8, 2048>}, {transform_indices = @transform_2, window_bounds = array<i64: 64, 2048>}]} {
    %c0 = arith.constant 0 : index
    %c0_0 = arith.constant 0 : index
    %0 = vector.load %arg2[%c0, %c0_0] : memref<64x8xbf16, #tpu.memory_space<vmem>>, vector<64x8xbf16>
    %c0_1 = arith.constant 0 : index
    %c0_2 = arith.constant 0 : index
    %1 = vector.load %arg3[%c0_1, %c0_2] : memref<8x2048xbf16, #tpu.memory_space<vmem>>, vector<8x2048xbf16>
    %cst = arith.constant dense<0.000000e+00> : vector<64x2048xf32>
    %2 = tpu.matmul %0, %1, %cst {dimension_numbers = #tpu.dot_dimension_numbers<[1], [0], [0], [1], [0, 0, 1, 1], [], []>} : vector<64x8xbf16>, vector<8x2048xbf16>, vector<64x2048xf32> -> vector<64x2048xf32>
    %3 = arith.truncf %2 : vector<64x2048xf32> to vector<64x2048xbf16>
    %c0_3 = arith.constant 0 : index
    %c0_4 = arith.constant 0 : index
    %4 = vector.load %arg4[%c0_3, %c0_4] : memref<64x2048xbf16, #tpu.memory_space<vmem>>, vector<64x2048xbf16>
    tpu.vector_store %arg4[%c0_3, %c0_4], %3 {strides = array<i32>} : memref<64x2048xbf16, #tpu.memory_space<vmem>>, vector<64x2048xbf16>,
    return
  }
  func.func @transform_0(%arg0: i32, %arg1: i32) -> (i32, i32) {
    %c0_i32 = arith.constant 0 : i32
    %c0_i32_0 = arith.constant 0 : i32
    return %arg0, %c0_i32 : i32, i32
  }
  func.func @transform_1(%arg0: i32, %arg1: i32) -> (i32, i32) {
    %c0_i32 = arith.constant 0 : i32
    %c0_i32_0 = arith.constant 0 : i32
    return %c0_i32, %arg1 : i32, i32
  }
  func.func @transform_2(%arg0: i32, %arg1: i32) -> (i32, i32) {
    %c0_i32 = arith.constant 0 : i32
    return %arg0, %arg1 : i32, i32
  }
}

module attributes {stable_mosaic.version = 11 : i64} {
  func.func @_bias_tanh_kernel(%arg0: i32, %arg1: i32, %arg2: memref<4x8192xbf16, #tpu.memory_space<vmem>>, %arg3: memref<4x1xf32, #tpu.memory_space<vmem>>, %arg4: memref<1x4x8192xf32, #tpu.memory_space<vmem>>) attributes {dimension_semantics = [#tpu.dimension_semantics<parallel>, #tpu.dimension_semantics<parallel>], iteration_bounds = array<i64: 2, 2>, scalar_prefetch = 0 : i64, scratch_operands = 0 : i64, tpu.core_type = #tpu.core_type<tc>, window_params = [{transform_indices = @transform_0, window_bounds = array<i64: 4, 8192>}, {pipeline_mode = #tpu.pipeline_mode<synchronous>, transform_indices = @transform_1, window_bounds = array<i64: 4, 1>}, {transform_indices = @transform_2, window_bounds = array<i64: 1, 4, 8192>}]} {
    %c0 = arith.constant 0 : index
    %c0_0 = arith.constant 0 : index
    %0 = vector.load %arg2[%c0, %c0_0] : memref<4x8192xbf16, #tpu.memory_space<vmem>>, vector<4x8192xbf16>
    %1 = arith.extf %0 : vector<4x8192xbf16> to vector<4x8192xf32>
    %c0_1 = arith.constant 0 : index
    %c0_2 = arith.constant 0 : index
    %2 = vector.load %arg3[%c0_1, %c0_2] : memref<4x1xf32, #tpu.memory_space<vmem>>, vector<4x1xf32>
    %3 = vector.broadcast %2 : vector<4x1xf32> to vector<4x8192xf32>
    %4 = arith.addf %1, %3 : vector<4x8192xf32>
    %5 = math.tanh %4 : vector<4x8192xf32>
    %c0_3 = arith.constant 0 : index
    %c0_4 = arith.constant 0 : index
    %c0_5 = arith.constant 0 : index
    %6 = vector.load %arg4[%c0_3, %c0_4, %c0_5] : memref<1x4x8192xf32, #tpu.memory_space<vmem>>, vector<1x4x8192xf32>
    %7 = vector.shape_cast %6 : vector<1x4x8192xf32> to vector<4x8192xf32>
    %8 = vector.shape_cast %5 : vector<4x8192xf32> to vector<1x4x8192xf32>
    tpu.vector_store %arg4[%c0_3, %c0_4, %c0_5], %8 {strides = array<i32>} : memref<1x4x8192xf32, #tpu.memory_space<vmem>>, vector<1x4x8192xf32>,
    return
  }
  func.func @transform_0(%arg0: i32, %arg1: i32) -> (i32, i32) {
    %c2_i32 = arith.constant 2 : i32
    %0 = arith.muli %arg0, %c2_i32 : i32
    %1 = arith.addi %0, %arg1 : i32
    %c0_i32 = arith.constant 0 : i32
    %c0_i32_0 = arith.constant 0 : i32
    return %c0_i32, %1 : i32, i32
  }
  func.func @transform_1(%arg0: i32, %arg1: i32) -> (i32, i32) {
    %c0_i32 = arith.constant 0 : i32
    %c0_i32_0 = arith.constant 0 : i32
    %c0_i32_1 = arith.constant 0 : i32
    return %c0_i32, %c0_i32_0 : i32, i32
  }
  func.func @transform_2(%arg0: i32, %arg1: i32) -> (i32, i32, i32) {
    %c0_i32 = arith.constant 0 : i32
    %c0_i32_0 = arith.constant 0 : i32
    return %arg0, %c0_i32, %arg1 : i32, i32, i32
  }
}

</mosaic_0001>

<bundles_post_ra>
// kernel: wave_field_decoder_forward.13
= control target key start
LH: loop header
LB: loop body
LE: loop exit
PB: predicated region body
PF: predicated region fallthrough
CT: control target
= control target key end

     0   :  { %s529_s12 = smov 0   ;;  %s600_s0 = inlined_call_operand.vmem [shape: bf16[128,32], index: 0, kind: input, shape index: {}]   ;;  %s601_s1 = inlined_call_operand.vmem [shape: f32[128,1], index: 1, kind: input, shape index: {}]   ;;  %s602_s2 = inlined_call_operand.vmem [shape: f32[128,1], index: 2, kind: input, shape index: {}]   ;;  %s603_s3 = inlined_call_operand.vmem [shape: bf16[128,32], index: 3, kind: output, shape index: {}]  }
   0x1 LB: > { %s449_s13 = sadd.s32 4294967295, %s506_s12   ;;  %p453_p0 = scmp.ge.s32.totalorder %s506_s12, 1  ;;  %s506_s12 = sphi %s529_s12, %s13_s12  }
   0x2   : > { %p160_p1 = scmp.lt.s32.totalorder %s506_s12, 5 }
   0x4   : > { %p161_p2 = pnand %p453_p0, %p160_p1 }
   0x5   : > { %s454_s14 = sshll.u32 (!%p161_p2), %s449_s13, 2 }
   0x6   : > { %164 = sbr.rel (%p161_p2) target bundleno = 480 (0x1e0), region = 32  ;;  %p195_p3 = scmp.lt.s32.totalorder (!%p161_p2), %s454_s14, 15 }
   0xb   : > { %s605_s14 = smov (!%p195_p3, %s454_s14), 15  ;;  %vm226_vm0 = vcmask 261120   ;;  %v508_v30 = vmov 0   ;;  %vm364_vm1 = vcmask 257024  }
   0xc   : > { %s455_s15 = sshll.u32 %s605_s14, 2  ;;  %490 = vset.pattern.permute.xlu0 %v508_v30  ;;  %491 = vset.pattern.permute.xlu1 %v508_v30  ;;  %s457_s19 = sshll.u32 %s605_s14, 3 }
   0xd   : > { %s198_s18 = scalar_lea.vmem %s600_s0, %s455_s15  ;;  %s204_s22 = scalar_lea.vmem %s601_s1, %s457_s19 }
   0xe   : > { %v473_v0 = vld [vmem:[%s198_s18] sm:$0xff]   ;;  %v480_v1 = vld [vmem:[%s198_s18 + $0x8] sm:$0xff]   ;;  %v270_v50 = vld [vmem:[%s204_s22 + $0x10] sm:$0xff]  ;;  %s210_s25 = scalar_lea.vmem %s602_s2, %s457_s19  ;;  %s216_s28 = scalar_lea.vmem %s603_s3, %s455_s15 }
   0xf   : > { %v545_v2 = vunpack.c.l.bf16 %v473_v0  ;;  %v547_v3 = vunpack.c.l.bf16 %v480_v1  ;;  %v549_v4 = vunpack.c.h.bf16 %v473_v0  ;;  %v551_v5 = vunpack.c.h.bf16 %v480_v1  ;;  %v268_v43 = vld [vmem:[%s204_s22] sm:$0xff]  ;;  %v269_v46 = vld [vmem:[%s204_s22 + $0x8] sm:$0xff]  ;;  %v271_v53 = vld [vmem:[%s204_s22 + $0x18] sm:$0xff] }
  0x10   : > { %v284_v56 = vld [vmem:[%s210_s25] sm:$0xff]  ;;  %v285_v59 = vld [vmem:[%s210_s25 + $0x8] sm:$0xff]  ;;  %v286_v62 = vld [vmem:[%s210_s25 + $0x10] sm:$0xff] }
  0x11   : > { %v227_v6 = vsel %vm226_vm0, %v545_v2, 0.0  ;;  %v233_v7 = vsel %vm226_vm0, %v547_v3, 0.0  ;;  %v230_v8 = vsel %vm226_vm0, %v549_v4, 0.0  ;;  %v236_v9 = vsel %vm226_vm0, %v551_v5, 0.0  ;;  %v287_v1 = vld [vmem:[%s210_s25 + $0x18] sm:$0xff] }
  0x12   : > { %228 = vadd.xlane.f32.xlu0 %v227_v6  ;;  %234 = vadd.xlane.f32.xlu1 %v233_v7 }
  0x16   : > { %231 = vadd.xlane.f32.xlu0 %v230_v8  ;;  %237 = vadd.xlane.f32.xlu1 %v236_v9 }
  0x9b   : > { %v229_v10 = vpop.xlane.xlu0 %228  ;;  %v235_v11 = vpop.xlane.xlu1 %234 }
  0x9c   : > { %v240_v12 = vmul.f32 0.03125, %v229_v10  ;;  %v561_v13 = vmul.f32 0.03125, %v235_v11 }
  0x9e   : > { %v244_v14 = vsub.f32 %v545_v2, %v240_v12  ;;  %v246_v15 = vsub.f32 %v547_v3, %v561_v13 }
  0x9f   : > { %v232_v16 = vpop.xlane.xlu0 %231  ;;  %v238_v17 = vpop.xlane.xlu1 %237 }
  0xa0   : > { %v241_v18 = vmul.f32 0.03125, %v232_v16  ;;  %v566_v19 = vmul.f32 0.03125, %v238_v17  ;;  %v248_v20 = vmul.f32 %v244_v14, %v244_v14  ;;  %v250_v21 = vmul.f32 %v246_v15, %v246_v15 }
  0xa2   : > { %v245_v22 = vsub.f32 %v549_v4, %v241_v18  ;;  %v247_v23 = vsub.f32 %v551_v5, %v566_v19  ;;  %v252_v24 = vsel %vm226_vm0, %v248_v20, 0.0  ;;  %v258_v25 = vsel %vm226_vm0, %v250_v21, 0.0 }
  0xa3   : > { %253 = vadd.xlane.f32.xlu0 %v252_v24 }
  0xa4   : > { %v249_v26 = vmul.f32 %v245_v22, %v245_v22  ;;  %v251_v27 = vmul.f32 %v247_v23, %v247_v23 }
  0xa6   : > { %v255_v28 = vsel %vm226_vm0, %v249_v26, 0.0  ;;  %v261_v29 = vsel %vm226_vm0, %v251_v27, 0.0 }
  0xa7   : > { %259 = vadd.xlane.f32.xlu0 %v258_v25  ;;  %256 = vadd.xlane.f32.xlu1 %v255_v28 }
  0xab   : > { %262 = vadd.xlane.f32.xlu1 %v261_v29 }
 0x12c   : > { %v254_v31 = vpop.xlane.xlu0 %253 }
 0x12d   : > { %v264_v32 = vmul.f32 0.03125, %v254_v31 }
 0x12f   : > { %v272_v33 = vadd.f32 1e-05, %v264_v32 }
 0x130   : > { %v257_v34 = vpop.xlane.xlu1 %256  ;;  %v260_v35 = vpop.xlane.xlu0 %259 }
 0x131   : > { %492 = vrsqrt.f32 %v272_v33  ;;  %v265_v36 = vmul.f32 0.03125, %v257_v34  ;;  %v266_v37 = vmul.f32 0.03125, %v260_v35 }
 0x133   : > { %v273_v38 = vadd.f32 1e-05, %v265_v36  ;;  %v274_v39 = vadd.f32 1e-05, %v266_v37 }
 0x134   : > { %v263_v40 = vpop.xlane.xlu1 %262 }
 0x135   : > { %494 = vrsqrt.f32 %v273_v38  ;;  %v267_v41 = vmul.f32 0.03125, %v263_v40 }
 0x136   : > { %496 = vrsqrt.f32 %v274_v39 }
 0x137   : > { %v275_v42 = vadd.f32 1e-05, %v267_v41 }
 0x139   : > { %498 = vrsqrt.f32 %v275_v42 }
 0x13e   : > { %v493_v44 = vpop.eup %492 }
 0x13f   : > { %v280_v45 = vmul.f32 %v493_v44, %v268_v43 }
 0x141   : > { %298 = vperm.xlu0 %490, %v280_v45   ;;  %v288_v55 = vmul.f32 %v280_v45, %v240_v12 }
 0x142   : > { %v495_v47 = vpop.eup %494 }
 0x143   : > { %v281_v48 = vmul.f32 %v495_v47, %v269_v46  ;;  %v497_v49 = vpop.eup %496  ;;  %v292_v57 = vsub.f32 %v284_v56, %v288_v55 }
 0x144   : > { %v282_v51 = vmul.f32 %v497_v49, %v270_v50 }
 0x145   : > { %303 = vperm.xlu1 %491, %v281_v48   ;;  %v289_v58 = vmul.f32 %v281_v48, %v241_v18 }
 0x146   : > { %v499_v52 = vpop.eup %498  ;;  %v290_v61 = vmul.f32 %v282_v51, %v561_v13 }
 0x147   : > { %v283_v54 = vmul.f32 %v499_v52, %v271_v53  ;;  %v293_v60 = vsub.f32 %v285_v59, %v289_v58 }
 0x148   : > { %v294_v63 = vsub.f32 %v286_v62, %v290_v61 }
 0x149   : > { %308 = vperm.xlu1 %491, %v282_v51   ;;  %v291_v0 = vmul.f32 %v283_v54, %v566_v19 }
 0x14b   : > { %v295_v6 = vsub.f32 %v287_v1, %v291_v0 }
 0x14d   : > { %313 = vperm.xlu1 %491, %v283_v54  }
 0x151   : > { %322 = vperm.xlu1 %491, %v292_v57  }
 0x155   : > { %327 = vperm.xlu1 %491, %v293_v60  }
 0x159   : > { %332 = vperm.xlu1 %491, %v294_v63  }
 0x15d   : > { %337 = vperm.xlu1 %491, %v295_v6  }
 0x1bc   : > { %v299_v9 = vpop.permute.xlu0 %298 }
 0x1bd   : > { %v316_v11 = vmul.f32 %v545_v2, %v299_v9 }
 0x1c0   : > { %v304_v7 = vpop.permute.xlu1 %303 }
 0x1c1   : > { %v317_v13 = vmul.f32 %v549_v4, %v304_v7 }
 0x1c4   : > { %v309_v8 = vpop.permute.xlu1 %308 }
 0x1c5   : > { %v318_v19 = vmul.f32 %v547_v3, %v309_v8 }
 0x1c8   : > { %v314_v10 = vpop.permute.xlu1 %313 }
 0x1c9   : > { %v319_v4 = vmul.f32 %v551_v5, %v314_v10 }
 0x1cc   : > { %v323_v12 = vpop.permute.xlu1 %322 }
 0x1cd   : > { %v340_v14 = vadd.f32 %v323_v12, %v316_v11 }
 0x1cf   : > { %v344_v15 = vmax.f32 %v340_v14, 0.0 }
 0x1d0   : > { %v328_v16 = vpop.permute.xlu1 %327 }
 0x1d1   : > { %v468_v17 = vpack.c.bf16 %v344_v15, %v344_v15  ;;  %v341_v18 = vadd.f32 %v328_v16, %v317_v13 }
 0x1d3   : > { %365 = vst.msk [vmem:[%s216_s28] sm:$0xf] %vm364_vm1, %v468_v17  ;;  %v345_v20 = vmax.f32 %v341_v18, 0.0 }
 0x1d4   : > { %v333_v2 = vpop.permute.xlu1 %332 }
 0x1d5   : > { %v469_v21 = vpack.c.bf16 %v345_v20, %v345_v20  ;;  %v342_v22 = vadd.f32 %v333_v2, %v318_v19 }
 0x1d7   : > { %366 = vst.msk [vmem:[%s216_s28 + $0x4] sm:$0xf] %vm364_vm1, %v469_v21  ;;  %v346_v23 = vmax.f32 %v342_v22, 0.0 }
 0x1d8   : > { %v338_v24 = vpop.permute.xlu1 %337 }
 0x1d9   : > { %v470_v25 = vpack.c.bf16 %v346_v23, %v346_v23  ;;  %v343_v26 = vadd.f32 %v338_v24, %v319_v4 }
 0x1db   : > { %367 = vst.msk [vmem:[%s216_s28 + $0x8] sm:$0xf] %vm364_vm1, %v470_v25  ;;  %v347_v27 = vmax.f32 %v343_v26, 0.0 }
 0x1dd   : > { %v471_v28 = vpack.c.bf16 %v347_v27, %v347_v27 }
 0x1df   : > { %368 = vst.msk [vmem:[%s216_s28 + $0xc] sm:$0xf] %vm364_vm1, %v471_v28 }
 0x1e0 PF: > { %s13_s12 = sadd.s32 1, %s506_s12  }
 0x1e1   : > { %p10_p4 = scmp.ge.s32.totalorder %s13_s12, 6  }
 0x1e3   :  { %12 = sbr.rel (!%p10_p4) target bundleno = 1 (0x1), region = 68 }

// kernel: wave_field_decoder_forward.12
= control target key start
LH: loop header
LB: loop body
LE: loop exit
PB: predicated region body
PF: predicated region fallthrough
CT: control target
= control target key end

     0   :  { %7 = vsyncpa [#allocation3], 0  ;;  %s3497_s0 = inlined_call_operand.hbm [shape: bf16[2048,64], index: 0, kind: input, shape index: {}]   ;;  %s3498_s1 = inlined_call_operand.vmem [shape: bf16[64,2], index: 1, kind: input, shape index: {}]   ;;  %s3499_s2 = inlined_call_operand.vmem [shape: bf16[2048,2], index: 2, kind: output, shape index: {}]  }
   0x1   :  { %9 = vsyncpa [#allocation3 + $0x1], 0  ;;  %s3002_s9 = smov 0   ;;  %s3004_s10 = smov 0  }
   0x2   :  { %s3006_s11 = smov 0   ;;  %s3008_s12 = smov 0  }
   0x3   :  { %s3010_s13 = smov 0   ;;  %s3012_s14 = smov 0  }
   0x4 LB: > { %s2164_s15 = sadd.s32 4294967295, %s2982_s14   ;;  %s27_s16 = sadd.s32 1, %s2978_s13  ;;  %s2982_s14 = sphi %s3012_s14, %s15_s14   ;;  %s2978_s13 = sphi %s3010_s13, %s3507_s13   ;;  %s2974_s12 = sphi %s3008_s12, %s3506_s12   ;;  %s2970_s11 = sphi %s3006_s11, %s3505_s11   ;;  %s2966_s10 = sphi %s3004_s10, %s3504_s10   ;;  %s2962_s9 = sphi %s3002_s9, %s3503_s9  }
   0x5   : > { %p29_p0 = scmp.ge.s32.totalorder %s27_s16, 2  ;;  %s34_s17 = sadd.s32 1, %s2970_s11 }
   0x6   : > { %p41_p1 = scmp.ne.s32.totalorder %s2970_s11, %s2966_s10  ;;  %p42_p2 = scmp.eq.s32.totalorder %s2982_s14, 0 }
   0x7   : > { %s3509_s16 = smov (%p29_p0, %s27_s16), 0  ;;  %p47_p4 = scmp.ne.s32.totalorder %s2966_s10, %s2962_s9 }
   0x8   : > { %p3038_p3 = por %p42_p2, %p41_p1  ;;  %s31_s19 = ssub.s32 %s2978_s13, %s3509_s16 }
   0x9   : > { %p48_p5 = scmp.eq.s32.totalorder %s2164_s15, 0  ;;  %p32_p6 = scmp.eq.s32.totalorder %s31_s19, 0 }
   0xa   : > { %p2785_p8 = scmp.lt.s32.totalorder %s2982_s14, 2  ;;  %s132_s22 = sand.u32 1, %s2970_s11  }
   0xb   : > { %p3045_p7 = por %p48_p5, %p47_p4  ;;  %s2438_s23 = sshll.u32 %s2978_s13, 13 }
   0xc   : > { %s3051_s21 = scalar_select %p32_p6, %s2970_s11, %s34_s17  }
   0xd   : > { %s2169_s24 = sshll.u32 %s132_s22, 9  ;;  %s142_s27 = scalar_lea.hbm %s3497_s0, %s2438_s23 }
   0xe   : > { %s136_s28 = scalar_lea.vmem [#allocation2], %s2169_s24  ;;  %p3060_p9 = pnand %p2785_p8, %p3038_p3 }
   0xf   : > { %s143_s29 = sshll.u32 %s136_s28, 4  ;;  %s133_s3 = scalar_lea.sflag [#allocation3], %s132_s22  ;;  %s144_s29 = int_to_ptr.vmem [resolvable:$true] %s143_s29 }
  0x10   : > { %p2906_p10 = pneg %p3060_p9  ;;  %s2917_s4 = scalar_lea.vmem %s144_s29, 8192 }
  0x11   : > { %p2918_p11 = scmp.ne.s32.totalorder %s144_s29, %s2917_s4  ;;  %s2984_s5 = smov [#allocation2]  }
  0x12   : > { %s2922_s6 = sshll.u32 %s2984_s5, 4  ;;  %s2923_s6 = int_to_ptr.vmem [resolvable:$false] %s2922_s6 }
  0x13   : > { %p2920_p12 = pnand %p2918_p11, %p2906_p10  ;;  %s2924_s7 = scalar_lea.vmem %s2923_s6, 16384 }
  0x14   : > { %p2925_p0 = scmp.lt.s32.totalorder %s144_s29, %s2923_s6  ;;  %p2926_p1 = scmp.lt.s32.totalorder %s2924_s7, %s2917_s4 }
  0x15   : > { %p2921_p13 = pneg %p2920_p12 }
  0x16   : > { %p2927_p2 = por %p2926_p1, %p2925_p0 }
  0x18   : > { %p2928_p3 = pnand %p2927_p2, %p2921_p13 }
  0x1a   : > { %2931 = shalt.err (!%p2928_p3)
}
  0x1b   : > { %s2985_s8 = smov 64   ;;  %s2986_s9 = smov 4  }
  0x1c   : > { %2784 = dma.hbm_to_vmem [thread:$0]  (!%p3060_p9), %s142_s27, 8192, %s144_s29, %s133_s3, %s2985_s8, %s2985_s8, %s2986_s9  }
  0x1d   : > { %p2172_p4 = scmp.ge.s32.totalorder %s2982_s14, 1  ;;  %p151_p5 = scmp.lt.s32.totalorder %s2982_s14, 3 }
  0x1f   : > { %p152_p6 = pnand %p2172_p4, %p151_p5 }
  0x20   : > { %s157_s15 = sand.u32 (!%p152_p6), 1, %s2966_s10  }
  0x21   : > { %155 = sbr.rel (%p152_p6) target bundleno = 378 (0x17a), region = 28  ;;  %s2173_s17 = sshll.u32 (!%p152_p6), %s157_s15, 9 }
  0x22   : > { %s158_s18 = scalar_lea.sflag (!%p152_p6), [#allocation3], %s157_s15  ;;  %s3071_s19 = scalar_lea.vmem (!%p152_p6), [#allocation2], %s2173_s17 }
  0x26   : > { %2957 = dma.done.wait (%p3045_p7), %s158_s18, 8192  }
  0x27   : > { %2959 = vsyncadd (%p3045_p7), %s158_s18, 4294959104  ;;  %v2836_v0 = vld [vmem:[%s3498_s1 + $0x18] sm:$0xff]   ;;  %v2837_v1 = vld [vmem:[%s3498_s1 + $0x10] sm:$0xff]   ;;  %vm684_vm0 = vcmask 523264   ;;  %s2174_s29 = sshll.u32 %s2974_s12, 7  ;;  %vm1934_vm1 = vcmask 11264  }
  0x28   : > { %2635 = vmatprep.subr.bf16.mxu0 %v2836_v0  ;;  %2771 = vmatprep.subr.bf16.mxu1 %v2836_v0  ;;  %v2838_v2 = vld [vmem:[%s3498_s1 + $0x8] sm:$0xff]   ;;  %v2840_v3 = vld [vmem:[%s3071_s19] sm:$0xff]   ;;  %v2844_v8 = vld [vmem:[%s3071_s19 + $0x10] sm:$0xff]   ;;  %p195_p7 = scmp.lt.s32.totalorder %s2174_s29, 255 }
  0x29   : > { %2636 = vmatpush3.bf16.msra.mxu0 %v2836_v0  ;;  %2775 = vmatpush3.bf16.msra.mxu1 %v2836_v0  ;;  %v2841_v4 = vld [vmem:[%s3071_s19 + $0x100] sm:$0xff]   ;;  %v2842_v6 = vld [vmem:[%s3071_s19 + $0x8] sm:$0xff]   ;;  %v2845_v9 = vld [vmem:[%s3071_s19 + $0x110] sm:$0xff]  }
  0x2a   : > { %2637 = vmatprep.subr.bf16.mxu0 %v2837_v1  ;;  %2772 = vmatprep.subr.bf16.mxu1 %v2837_v1  ;;  %v2839_v5 = vld [vmem:[%s3498_s1] sm:$0xff]   ;;  %v2843_v7 = vld [vmem:[%s3071_s19 + $0x108] sm:$0xff]   ;;  %v2846_v10 = vld [vmem:[%s3071_s19 + $0x18] sm:$0xff]   ;;  %s3511_s29 = smov (!%p195_p7, %s2174_s29), 255 }
  0x2b   : > { %2643 = vmatprep.mubr.msk.bf16.mxu0 %vm684_vm0, %v2840_v3  ;;  %2707 = vmatprep.mubr.msk.bf16.mxu1 %vm684_vm0, %v2841_v4  ;;  %v2847_v11 = vld [vmem:[%s3071_s19 + $0x118] sm:$0xff]   ;;  %v2848_v12 = vld [vmem:[%s3071_s19 + $0x20] sm:$0xff]   ;;  %v2850_v14 = vld [vmem:[%s3071_s19 + $0x28] sm:$0xff]   ;;  %s2175_s30 = sshll.u32 %s3511_s29, 2 }
  0x2c   : > { %v2849_v13 = vld [vmem:[%s3071_s19 + $0x120] sm:$0xff]   ;;  %v2851_v15 = vld [vmem:[%s3071_s19 + $0x128] sm:$0xff]   ;;  %v2852_v16 = vld [vmem:[%s3071_s19 + $0x30] sm:$0xff]   ;;  %s3221_s5 = scalar_lea.vmem %s3499_s2, %s2175_s30 }
  0x2d   : > { %2638 = vmatpush3.bf16.msra.mxu0 %v2837_v1  ;;  %2776 = vmatpush3.bf16.msra.mxu1 %v2837_v1  ;;  %v2853_v17 = vld [vmem:[%s3071_s19 + $0x130] sm:$0xff]   ;;  %v2854_v18 = vld [vmem:[%s3071_s19 + $0x38] sm:$0xff]   ;;  %v2856_v20 = vld [vmem:[%s3071_s19 + $0x40] sm:$0xff]  }
  0x2e   : > { %2639 = vmatprep.subr.bf16.mxu0 %v2838_v2  ;;  %2773 = vmatprep.subr.bf16.mxu1 %v2838_v2  ;;  %v2855_v19 = vld [vmem:[%s3071_s19 + $0x138] sm:$0xff]   ;;  %v2857_v21 = vld [vmem:[%s3071_s19 + $0x140] sm:$0xff]   ;;  %v2858_v22 = vld [vmem:[%s3071_s19 + $0x48] sm:$0xff]  }
  0x2f   : > { %v2859_v23 = vld [vmem:[%s3071_s19 + $0x148] sm:$0xff]   ;;  %v2860_v24 = vld [vmem:[%s3071_s19 + $0x50] sm:$0xff]   ;;  %v2862_v26 = vld [vmem:[%s3071_s19 + $0x58] sm:$0xff]  }
  0x30   : > { %v2861_v25 = vld [vmem:[%s3071_s19 + $0x150] sm:$0xff]   ;;  %v2863_v27 = vld [vmem:[%s3071_s19 + $0x158] sm:$0xff]   ;;  %v2864_v28 = vld [vmem:[%s3071_s19 + $0x60] sm:$0xff]  }
  0x31   : > { %2640 = vmatpush3.bf16.msra.mxu0 %v2838_v2  ;;  %2777 = vmatpush3.bf16.msra.mxu1 %v2838_v2  ;;  %v2865_v29 = vld [vmem:[%s3071_s19 + $0x160] sm:$0xff]   ;;  %v2866_v30 = vld [vmem:[%s3071_s19 + $0x68] sm:$0xff]   ;;  %v2868_v32 = vld [vmem:[%s3071_s19 + $0x70] sm:$0xff]  }
  0x32   : > { %2641 = vmatprep.subr.bf16.mxu0 %v2839_v5  ;;  %2774 = vmatprep.subr.bf16.mxu1 %v2839_v5  ;;  %v2867_v31 = vld [vmem:[%s3071_s19 + $0x168] sm:$0xff]   ;;  %v2869_v33 = vld [vmem:[%s3071_s19 + $0x170] sm:$0xff]   ;;  %v2870_v34 = vld [vmem:[%s3071_s19 + $0x78] sm:$0xff]  }
  0x33   : > { %v2871_v35 = vld [vmem:[%s3071_s19 + $0x178] sm:$0xff]   ;;  %v2872_v36 = vld [vmem:[%s3071_s19 + $0x80] sm:$0xff]   ;;  %v2874_v38 = vld [vmem:[%s3071_s19 + $0x88] sm:$0xff]  }
  0x34   : > { %v2873_v37 = vld [vmem:[%s3071_s19 + $0x180] sm:$0xff]   ;;  %v2875_v39 = vld [vmem:[%s3071_s19 + $0x188] sm:$0xff]   ;;  %v2876_v40 = vld [vmem:[%s3071_s19 + $0x90] sm:$0xff]  }
  0x35   : > { %2642 = vmatpush3.bf16.msra.mxu0 %v2839_v5  ;;  %2778 = vmatpush3.bf16.msra.mxu1 %v2839_v5  ;;  %v2877_v41 = vld [vmem:[%s3071_s19 + $0x190] sm:$0xff]   ;;  %v2878_v42 = vld [vmem:[%s3071_s19 + $0x98] sm:$0xff]   ;;  %v2880_v44 = vld [vmem:[%s3071_s19 + $0xa0] sm:$0xff]  }
  0x36   : > { %v2879_v43 = vld [vmem:[%s3071_s19 + $0x198] sm:$0xff]   ;;  %v2881_v45 = vld [vmem:[%s3071_s19 + $0x1a0] sm:$0xff]   ;;  %v2882_v46 = vld [vmem:[%s3071_s19 + $0xa8] sm:$0xff]  }
  0x37   : > { %v2883_v47 = vld [vmem:[%s3071_s19 + $0x1a8] sm:$0xff]   ;;  %v2884_v48 = vld [vmem:[%s3071_s19 + $0xb0] sm:$0xff]   ;;  %v2886_v50 = vld [vmem:[%s3071_s19 + $0xb8] sm:$0xff]  }
  0x38   : > { %2644 = vmatmul.mubr.msk.bf16.vlgmr.msra.gmra.mxu0 %vm684_vm0, %v2842_v6  ;;  %2708 = vmatmul.mubr.msk.bf16.vlgmr.msra.gmra.mxu1 %vm684_vm0, %v2843_v7  ;;  %v2885_v49 = vld [vmem:[%s3071_s19 + $0x1b0] sm:$0xff]   ;;  %v2887_v51 = vld [vmem:[%s3071_s19 + $0x1b8] sm:$0xff]   ;;  %v2888_v52 = vld [vmem:[%s3071_s19 + $0xc0] sm:$0xff]  }
  0x39   : > { %2647 = vmatprep.mubr.msk.bf16.mxu0 %vm684_vm0, %v2844_v8  ;;  %2711 = vmatprep.mubr.msk.bf16.mxu1 %vm684_vm0, %v2845_v9  ;;  %v2889_v53 = vld [vmem:[%s3071_s19 + $0x1c0] sm:$0xff]   ;;  %v2890_v54 = vld [vmem:[%s3071_s19 + $0xc8] sm:$0xff]   ;;  %v2892_v56 = vld [vmem:[%s3071_s19 + $0xd0] sm:$0xff]  }
  0x3a   : > { %v2891_v55 = vld [vmem:[%s3071_s19 + $0x1c8] sm:$0xff]   ;;  %v2893_v57 = vld [vmem:[%s3071_s19 + $0x1d0] sm:$0xff]   ;;  %v2894_v58 = vld [vmem:[%s3071_s19 + $0xd8] sm:$0xff]  }
  0x3b   : > { %v2895_v59 = vld [vmem:[%s3071_s19 + $0x1d8] sm:$0xff]   ;;  %v2896_v60 = vld [vmem:[%s3071_s19 + $0xe0] sm:$0xff]   ;;  %v2898_v62 = vld [vmem:[%s3071_s19 + $0xe8] sm:$0xff]  }
  0x3c   : > { %v2897_v61 = vld [vmem:[%s3071_s19 + $0x1e0] sm:$0xff]   ;;  %v2899_v63 = vld [vmem:[%s3071_s19 + $0x1e8] sm:$0xff]   ;;  %v2900_v0 = vld [vmem:[%s3071_s19 + $0xf0] sm:$0xff]  }
  0x3d   : > { %v2901_v1 = vld [vmem:[%s3071_s19 + $0x1f0] sm:$0xff]   ;;  %v2902_v2 = vld [vmem:[%s3071_s19 + $0xf8] sm:$0xff]  }
  0x3e   : > { %v2903_v3 = vld [vmem:[%s3071_s19 + $0x1f8] sm:$0xff]  }
  0x40   : > { %2648 = vmatmul.mubr.msk.bf16.gmra.mxu0 %vm684_vm0, %v2846_v10  ;;  %2712 = vmatmul.mubr.msk.bf16.gmra.mxu1 %vm684_vm0, %v2847_v11 }
  0x41   : > { %2651 = vmatprep.mubr.msk.bf16.mxu0 %vm684_vm0, %v2848_v12  ;;  %2715 = vmatprep.mubr.msk.bf16.mxu1 %vm684_vm0, %v2849_v13 }
  0x48   : > { %2652 = vmatmul.mubr.msk.bf16.gmra.mxu0 %vm684_vm0, %v2850_v14  ;;  %2716 = vmatmul.mubr.msk.bf16.gmra.mxu1 %vm684_vm0, %v2851_v15 }
  0x49   : > { %2655 = vmatprep.mubr.msk.bf16.mxu0 %vm684_vm0, %v2852_v16  ;;  %2719 = vmatprep.mubr.msk.bf16.mxu1 %vm684_vm0, %v2853_v17 }
  0x50   : > { %2656 = vmatmul.mubr.msk.bf16.gmra.mxu0 %vm684_vm0, %v2854_v18  ;;  %2720 = vmatmul.mubr.msk.bf16.gmra.mxu1 %vm684_vm0, %v2855_v19 }
  0x51   : > { %2659 = vmatprep.mubr.msk.bf16.mxu0 %vm684_vm0, %v2856_v20  ;;  %2723 = vmatprep.mubr.msk.bf16.mxu1 %vm684_vm0, %v2857_v21 }
  0x58   : > { %2660 = vmatmul.mubr.msk.bf16.gmra.mxu0 %vm684_vm0, %v2858_v22  ;;  %2724 = vmatmul.mubr.msk.bf16.gmra.mxu1 %vm684_vm0, %v2859_v23 }
  0x59   : > { %2663 = vmatprep.mubr.msk.bf16.mxu0 %vm684_vm0, %v2860_v24  ;;  %2727 = vmatprep.mubr.msk.bf16.mxu1 %vm684_vm0, %v2861_v25 }
  0x60   : > { %2664 = vmatmul.mubr.msk.bf16.gmra.mxu0 %vm684_vm0, %v2862_v26  ;;  %2728 = vmatmul.mubr.msk.bf16.gmra.mxu1 %vm684_vm0, %v2863_v27 }
  0x61   : > { %2667 = vmatprep.mubr.msk.bf16.mxu0 %vm684_vm0, %v2864_v28  ;;  %2731 = vmatprep.mubr.msk.bf16.mxu1 %vm684_vm0, %v2865_v29 }
  0x68   : > { %2668 = vmatmul.mubr.msk.bf16.gmra.mxu0 %vm684_vm0, %v2866_v30  ;;  %2732 = vmatmul.mubr.msk.bf16.gmra.mxu1 %vm684_vm0, %v2867_v31 }
  0x69   : > { %2671 = vmatprep.mubr.msk.bf16.mxu0 %vm684_vm0, %v2868_v32  ;;  %2735 = vmatprep.mubr.msk.bf16.mxu1 %vm684_vm0, %v2869_v33 }
  0x70   : > { %2672 = vmatmul.mubr.msk.bf16.gmra.mxu0 %vm684_vm0, %v2870_v34  ;;  %2736 = vmatmul.mubr.msk.bf16.gmra.mxu1 %vm684_vm0, %v2871_v35 }
  0x71   : > { %2675 = vmatprep.mubr.msk.bf16.mxu0 %vm684_vm0, %v2872_v36  ;;  %2739 = vmatprep.mubr.msk.bf16.mxu1 %vm684_vm0, %v2873_v37 }
  0x78   : > { %2676 = vmatmul.mubr.msk.bf16.gmra.mxu0 %vm684_vm0, %v2874_v38  ;;  %2740 = vmatmul.mubr.msk.bf16.gmra.mxu1 %vm684_vm0, %v2875_v39 }
  0x79   : > { %2679 = vmatprep.mubr.msk.bf16.mxu0 %vm684_vm0, %v2876_v40  ;;  %2743 = vmatprep.mubr.msk.bf16.mxu1 %vm684_vm0, %v2877_v41 }
  0x80   : > { %2680 = vmatmul.mubr.msk.bf16.gmra.mxu0 %vm684_vm0, %v2878_v42  ;;  %2744 = vmatmul.mubr.msk.bf16.gmra.mxu1 %vm684_vm0, %v2879_v43 }
  0x81   : > { %2683 = vmatprep.mubr.msk.bf16.mxu0 %vm684_vm0, %v2880_v44  ;;  %2747 = vmatprep.mubr.msk.bf16.mxu1 %vm684_vm0, %v2881_v45 }
  0x88   : > { %2684 = vmatmul.mubr.msk.bf16.gmra.mxu0 %vm684_vm0, %v2882_v46  ;;  %2748 = vmatmul.mubr.msk.bf16.gmra.mxu1 %vm684_vm0, %v2883_v47 }
  0x89   : > { %2687 = vmatprep.mubr.msk.bf16.mxu0 %vm684_vm0, %v2884_v48  ;;  %2751 = vmatprep.mubr.msk.bf16.mxu1 %vm684_vm0, %v2885_v49 }
  0x90   : > { %2688 = vmatmul.mubr.msk.bf16.gmra.mxu0 %vm684_vm0, %v2886_v50  ;;  %2752 = vmatmul.mubr.msk.bf16.gmra.mxu1 %vm684_vm0, %v2887_v51 }
  0x91   : > { %2691 = vmatprep.mubr.msk.bf16.mxu0 %vm684_vm0, %v2888_v52  ;;  %2755 = vmatprep.mubr.msk.bf16.mxu1 %vm684_vm0, %v2889_v53 }
  0x98   : > { %2692 = vmatmul.mubr.msk.bf16.gmra.mxu0 %vm684_vm0, %v2890_v54  ;;  %2756 = vmatmul.mubr.msk.bf16.gmra.mxu1 %vm684_vm0, %v2891_v55 }
  0x99   : > { %2695 = vmatprep.mubr.msk.bf16.mxu0 %vm684_vm0, %v2892_v56  ;;  %2759 = vmatprep.mubr.msk.bf16.mxu1 %vm684_vm0, %v2893_v57 }
  0xa0   : > { %2696 = vmatmul.mubr.msk.bf16.gmra.mxu0 %vm684_vm0, %v2894_v58  ;;  %2760 = vmatmul.mubr.msk.bf16.gmra.mxu1 %vm684_vm0, %v2895_v59 }
  0xa1   : > { %2699 = vmatprep.mubr.msk.bf16.mxu0 %vm684_vm0, %v2896_v60  ;;  %2763 = vmatprep.mubr.msk.bf16.mxu1 %vm684_vm0, %v2897_v61 }
  0xa8   : > { %2700 = vmatmul.mubr.msk.bf16.gmra.mxu0 %vm684_vm0, %v2898_v62  ;;  %2764 = vmatmul.mubr.msk.bf16.gmra.mxu1 %vm684_vm0, %v2899_v63 }
  0xa9   : > { %2703 = vmatprep.mubr.msk.bf16.mxu0 %vm684_vm0, %v2900_v0  ;;  %2767 = vmatprep.mubr.msk.bf16.mxu1 %vm684_vm0, %v2901_v1 }
  0xb0   : > { %2704 = vmatmul.mubr.msk.bf16.gmra.mxu0 %vm684_vm0, %v2902_v2  ;;  %2768 = vmatmul.mubr.msk.bf16.gmra.mxu1 %vm684_vm0, %v2903_v3 }
  0xf8   : > { %v2645_v4 = vpop.f32.mrf.mxu0  ;;  %v2709_v5 = vpop.f32.mrf.mxu1 }
  0xf9   : > { %v2441_v6 = vpack.c.bf16 %v2645_v4, %v2645_v4  ;;  %v2505_v7 = vpack.c.bf16 %v2709_v5, %v2709_v5 }
  0xfa   : > { %v911_v8 = vpop.f32.mrf.mxu0  ;;  %v1167_v9 = vpop.f32.mrf.mxu1 }
  0xfb   : > { %1937 = vst.msk [vmem:[%s3221_s5 + $0x8] sm:$0xf] %vm1934_vm1, %v2441_v6  ;;  %2001 = vst.msk [vmem:[%s3221_s5 + $0x108] sm:$0xf] %vm1934_vm1, %v2505_v7  ;;  %v2439_v10 = vpack.c.bf16 %v911_v8, %v911_v8  ;;  %v2503_v11 = vpack.c.bf16 %v1167_v9, %v1167_v9 }
  0xfc   : > { %v2646_v12 = vpop.f32.mrf.mxu0  ;;  %v2710_v13 = vpop.f32.mrf.mxu1 }
  0xfd   : > { %1935 = vst.msk [vmem:[%s3221_s5] sm:$0xf] %vm1934_vm1, %v2439_v10  ;;  %1999 = vst.msk [vmem:[%s3221_s5 + $0x100] sm:$0xf] %vm1934_vm1, %v2503_v11  ;;  %v2442_v14 = vpack.c.bf16 %v2646_v12, %v2646_v12  ;;  %v2506_v15 = vpack.c.bf16 %v2710_v13, %v2710_v13 }
  0xfe   : > { %v914_v16 = vpop.f32.mrf.mxu0  ;;  %v1170_v17 = vpop.f32.mrf.mxu1 }
  0xff   : > { %1938 = vst.msk [vmem:[%s3221_s5 + $0xc] sm:$0xf] %vm1934_vm1, %v2442_v14  ;;  %2002 = vst.msk [vmem:[%s3221_s5 + $0x10c] sm:$0xf] %vm1934_vm1, %v2506_v15  ;;  %v2440_v18 = vpack.c.bf16 %v914_v16, %v914_v16  ;;  %v2504_v19 = vpack.c.bf16 %v1170_v17, %v1170_v17 }
 0x100   : > { %v2649_v20 = vpop.f32.mrf.mxu0  ;;  %v2713_v21 = vpop.f32.mrf.mxu1 }
 0x101   : > { %1936 = vst.msk [vmem:[%s3221_s5 + $0x4] sm:$0xf] %vm1934_vm1, %v2440_v18  ;;  %2000 = vst.msk [vmem:[%s3221_s5 + $0x104] sm:$0xf] %vm1934_vm1, %v2504_v19  ;;  %v2445_v22 = vpack.c.bf16 %v2649_v20, %v2649_v20  ;;  %v2509_v23 = vpack.c.bf16 %v2713_v21, %v2713_v21 }
 0x102   : > { %v927_v24 = vpop.f32.mrf.mxu0  ;;  %v1183_v25 = vpop.f32.mrf.mxu1 }
 0x103   : > { %1941 = vst.msk [vmem:[%s3221_s5 + $0x18] sm:$0xf] %vm1934_vm1, %v2445_v22  ;;  %2005 = vst.msk [vmem:[%s3221_s5 + $0x118] sm:$0xf] %vm1934_vm1, %v2509_v23  ;;  %v2443_v26 = vpack.c.bf16 %v927_v24, %v927_v24  ;;  %v2507_v27 = vpack.c.bf16 %v1183_v25, %v1183_v25 }
 0x104   : > { %v2650_v28 = vpop.f32.mrf.mxu0  ;;  %v2714_v29 = vpop.f32.mrf.mxu1 }
 0x105   : > { %1939 = vst.msk [vmem:[%s3221_s5 + $0x10] sm:$0xf] %vm1934_vm1, %v2443_v26  ;;  %2003 = vst.msk [vmem:[%s3221_s5 + $0x110] sm:$0xf] %vm1934_vm1, %v2507_v27  ;;  %v2446_v30 = vpack.c.bf16 %v2650_v28, %v2650_v28  ;;  %v2510_v31 = vpack.c.bf16 %v2714_v29, %v2714_v29 }
 0x106   : > { %v930_v32 = vpop.f32.mrf.mxu0  ;;  %v1186_v33 = vpop.f32.mrf.mxu1 }
 0x107   : > { %1942 = vst.msk [vmem:[%s3221_s5 + $0x1c] sm:$0xf] %vm1934_vm1, %v2446_v30  ;;  %2006 = vst.msk [vmem:[%s3221_s5 + $0x11c] sm:$0xf] %vm1934_vm1, %v2510_v31  ;;  %v2444_v34 = vpack.c.bf16 %v930_v32, %v930_v32  ;;  %v2508_v35 = vpack.c.bf16 %v1186_v33, %v1186_v33 }
 0x108   : > { %v2653_v36 = vpop.f32.mrf.mxu0  ;;  %v2717_v37 = vpop.f32.mrf.mxu1 }
 0x109   : > { %1940 = vst.msk [vmem:[%s3221_s5 + $0x14] sm:$0xf] %vm1934_vm1, %v2444_v34  ;;  %2004 = vst.msk [vmem:[%s3221_s5 + $0x114] sm:$0xf] %vm1934_vm1, %v2508_v35  ;;  %v2449_v38 = vpack.c.bf16 %v2653_v36, %v2653_v36  ;;  %v2513_v39 = vpack.c.bf16 %v2717_v37, %v2717_v37 }
 0x10a   : > { %v943_v40 = vpop.f32.mrf.mxu0  ;;  %v1199_v41 = vpop.f32.mrf.mxu1 }
 0x10b   : > { %1945 = vst.msk [vmem:[%s3221_s5 + $0x28] sm:$0xf] %vm1934_vm1, %v2449_v38  ;;  %2009 = vst.msk [vmem:[%s3221_s5 + $0x128] sm:$0xf] %vm1934_vm1, %v2513_v39  ;;  %v2447_v42 = vpack.c.bf16 %v943_v40, %v943_v40  ;;  %v2511_v43 = vpack.c.bf16 %v1199_v41, %v1199_v41 }
 0x10c   : > { %v2654_v44 = vpop.f32.mrf.mxu0  ;;  %v2718_v45 = vpop.f32.mrf.mxu1 }
 0x10d   : > { %1943 = vst.msk [vmem:[%s3221_s5 + $0x20] sm:$0xf] %vm1934_vm1, %v2447_v42  ;;  %2007 = vst.msk [vmem:[%s3221_s5 + $0x120] sm:$0xf] %vm1934_vm1, %v2511_v43  ;;  %v2450_v46 = vpack.c.bf16 %v2654_v44, %v2654_v44  ;;  %v2514_v47 = vpack.c.bf16 %v2718_v45, %v2718_v45 }
 0x10e   : > { %v946_v48 = vpop.f32.mrf.mxu0  ;;  %v1202_v49 = vpop.f32.mrf.mxu1 }
 0x10f   : > { %1946 = vst.msk [vmem:[%s3221_s5 + $0x2c] sm:$0xf] %vm1934_vm1, %v2450_v46  ;;  %2010 = vst.msk [vmem:[%s3221_s5 + $0x12c] sm:$0xf] %vm1934_vm1, %v2514_v47  ;;  %v2448_v50 = vpack.c.bf16 %v946_v48, %v946_v48  ;;  %v2512_v51 = vpack.c.bf16 %v1202_v49, %v1202_v49 }
 0x110   : > { %v2657_v52 = vpop.f32.mrf.mxu0  ;;  %v2721_v53 = vpop.f32.mrf.mxu1 }
 0x111   : > { %1944 = vst.msk [vmem:[%s3221_s5 + $0x24] sm:$0xf] %vm1934_vm1, %v2448_v50  ;;  %2008 = vst.msk [vmem:[%s3221_s5 + $0x124] sm:$0xf] %vm1934_vm1, %v2512_v51  ;;  %v2453_v54 = vpack.c.bf16 %v2657_v52, %v2657_v52  ;;  %v2517_v55 = vpack.c.bf16 %v2721_v53, %v2721_v53 }
 0x112   : > { %v959_v56 = vpop.f32.mrf.mxu0  ;;  %v1215_v57 = vpop.f32.mrf.mxu1 }
 0x113   : > { %1949 = vst.msk [vmem:[%s3221_s5 + $0x38] sm:$0xf] %vm1934_vm1, %v2453_v54  ;;  %2013 = vst.msk [vmem:[%s3221_s5 + $0x138] sm:$0xf] %vm1934_vm1, %v2517_v55  ;;  %v2451_v58 = vpack.c.bf16 %v959_v56, %v959_v56  ;;  %v2515_v59 = vpack.c.bf16 %v1215_v57, %v1215_v57 }
 0x114   : > { %v2658_v60 = vpop.f32.mrf.mxu0  ;;  %v2722_v61 = vpop.f32.mrf.mxu1 }
 0x115   : > { %1947 = vst.msk [vmem:[%s3221_s5 + $0x30] sm:$0xf] %vm1934_vm1, %v2451_v58  ;;  %2011 = vst.msk [vmem:[%s3221_s5 + $0x130] sm:$0xf] %vm1934_vm1, %v2515_v59  ;;  %v2454_v62 = vpack.c.bf16 %v2658_v60, %v2658_v60  ;;  %v2518_v63 = vpack.c.bf16 %v2722_v61, %v2722_v61 }
 0x116   : > { %v962_v0 = vpop.f32.mrf.mxu0  ;;  %v1218_v1 = vpop.f32.mrf.mxu1 }
 0x117   : > { %1950 = vst.msk [vmem:[%s3221_s5 + $0x3c] sm:$0xf] %vm1934_vm1, %v2454_v62  ;;  %2014 = vst.msk [vmem:[%s3221_s5 + $0x13c] sm:$0xf] %vm1934_vm1, %v2518_v63  ;;  %v2452_v2 = vpack.c.bf16 %v962_v0, %v962_v0  ;;  %v2516_v3 = vpack.c.bf16 %v1218_v1, %v1218_v1 }
 0x118   : > { %v2661_v4 = vpop.f32.mrf.mxu0  ;;  %v2725_v5 = vpop.f32.mrf.mxu1 }
 0x119   : > { %1948 = vst.msk [vmem:[%s3221_s5 + $0x34] sm:$0xf] %vm1934_vm1, %v2452_v2  ;;  %2012 = vst.msk [vmem:[%s3221_s5 + $0x134] sm:$0xf] %vm1934_vm1, %v2516_v3  ;;  %v2457_v6 = vpack.c.bf16 %v2661_v4, %v2661_v4  ;;  %v2521_v7 = vpack.c.bf16 %v2725_v5, %v2725_v5 }
 0x11a   : > { %v975_v8 = vpop.f32.mrf.mxu0  ;;  %v1231_v9 = vpop.f32.mrf.mxu1 }
 0x11b   : > { %1953 = vst.msk [vmem:[%s3221_s5 + $0x48] sm:$0xf] %vm1934_vm1, %v2457_v6  ;;  %2017 = vst.msk [vmem:[%s3221_s5 + $0x148] sm:$0xf] %vm1934_vm1, %v2521_v7  ;;  %v2455_v10 = vpack.c.bf16 %v975_v8, %v975_v8  ;;  %v2519_v11 = vpack.c.bf16 %v1231_v9, %v1231_v9 }
 0x11c   : > { %v2662_v12 = vpop.f32.mrf.mxu0  ;;  %v2726_v13 = vpop.f32.mrf.mxu1 }
 0x11d   : > { %1951 = vst.msk [vmem:[%s3221_s5 + $0x40] sm:$0xf] %vm1934_vm1, %v2455_v10  ;;  %2015 = vst.msk [vmem:[%s3221_s5 + $0x140] sm:$0xf] %vm1934_vm1, %v2519_v11  ;;  %v2458_v14 = vpack.c.bf16 %v2662_v12, %v2662_v12  ;;  %v2522_v15 = vpack.c.bf16 %v2726_v13, %v2726_v13 }
 0x11e   : > { %v978_v16 = vpop.f32.mrf.mxu0  ;;  %v1234_v17 = vpop.f32.mrf.mxu1 }
 0x11f   : > { %1954 = vst.msk [vmem:[%s3221_s5 + $0x4c] sm:$0xf] %vm1934_vm1, %v2458_v14  ;;  %2018 = vst.msk [vmem:[%s3221_s5 + $0x14c] sm:$0xf] %vm1934_vm1, %v2522_v15  ;;  %v2456_v18 = vpack.c.bf16 %v978_v16, %v978_v16  ;;  %v2520_v19 = vpack.c.bf16 %v1234_v17, %v1234_v17 }
 0x120   : > { %v2665_v20 = vpop.f32.mrf.mxu0  ;;  %v2729_v21 = vpop.f32.mrf.mxu1 }
 0x121   : > { %1952 = vst.msk [vmem:[%s3221_s5 + $0x44] sm:$0xf] %vm1934_vm1, %v2456_v18  ;;  %2016 = vst.msk [vmem:[%s3221_s5 + $0x144] sm:$0xf] %vm1934_vm1, %v2520_v19  ;;  %v2461_v22 = vpack.c.bf16 %v2665_v20, %v2665_v20  ;;  %v2525_v23 = vpack.c.bf16 %v2729_v21, %v2729_v21 }
 0x122   : > { %v991_v24 = vpop.f32.mrf.mxu0  ;;  %v1247_v25 = vpop.f32.mrf.mxu1 }
 0x123   : > { %1957 = vst.msk [vmem:[%s3221_s5 + $0x58] sm:$0xf] %vm1934_vm1, %v2461_v22  ;;  %2021 = vst.msk [vmem:[%s3221_s5 + $0x158] sm:$0xf] %vm1934_vm1, %v2525_v23  ;;  %v2459_v26 = vpack.c.bf16 %v991_v24, %v991_v24  ;;  %v2523_v27 = vpack.c.bf16 %v1247_v25, %v1247_v25 }
 0x124   : > { %v2666_v28 = vpop.f32.mrf.mxu0  ;;  %v2730_v29 = vpop.f32.mrf.mxu1 }
 0x125   : > { %1955 = vst.msk [vmem:[%s3221_s5 + $0x50] sm:$0xf] %vm1934_vm1, %v2459_v26  ;;  %2019 = vst.msk [vmem:[%s3221_s5 + $0x150] sm:$0xf] %vm1934_vm1, %v2523_v27  ;;  %v2462_v30 = vpack.c.bf16 %v2666_v28, %v2666_v28  ;;  %v2526_v31 = vpack.c.bf16 %v2730_v29, %v2730_v29 }
 0x126   : > { %v994_v32 = vpop.f32.mrf.mxu0  ;;  %v1250_v33 = vpop.f32.mrf.mxu1 }
 0x127   : > { %1958 = vst.msk [vmem:[%s3221_s5 + $0x5c] sm:$0xf] %vm1934_vm1, %v2462_v30  ;;  %2022 = vst.msk [vmem:[%s3221_s5 + $0x15c] sm:$0xf] %vm1934_vm1, %v2526_v31  ;;  %v2460_v34 = vpack.c.bf16 %v994_v32, %v994_v32  ;;  %v2524_v35 = vpack.c.bf16 %v1250_v33, %v1250_v33 }
 0x128   : > { %v2669_v36 = vpop.f32.mrf.mxu0  ;;  %v2733_v37 = vpop.f32.mrf.mxu1 }
 0x129   : > { %1956 = vst.msk [vmem:[%s3221_s5 + $0x54] sm:$0xf] %vm1934_vm1, %v2460_v34  ;;  %2020 = vst.msk [vmem:[%s3221_s5 + $0x154] sm:$0xf] %vm1934_vm1, %v2524_v35  ;;  %v2465_v38 = vpack.c.bf16 %v2669_v36, %v2669_v36  ;;  %v2529_v39 = vpack.c.bf16 %v2733_v37, %v2733_v37 }
 0x12a   : > { %v1007_v40 = vpop.f32.mrf.mxu0  ;;  %v1263_v41 = vpop.f32.mrf.mxu1 }
 0x12b   : > { %1961 = vst.msk [vmem:[%s3221_s5 + $0x68] sm:$0xf] %vm1934_vm1, %v2465_v38  ;;  %2025 = vst.msk [vmem:[%s3221_s5 + $0x168] sm:$0xf] %vm1934_vm1, %v2529_v39  ;;  %v2463_v42 = vpack.c.bf16 %v1007_v40, %v1007_v40  ;;  %v2527_v43 = vpack.c.bf16 %v1263_v41, %v1263_v41 }
 0x12c   : > { %v2670_v44 = vpop.f32.mrf.mxu0  ;;  %v2734_v45 = vpop.f32.mrf.mxu1 }
 0x12d   : > { %1959 = vst.msk [vmem:[%s3221_s5 + $0x60] sm:$0xf] %vm1934_vm1, %v2463_v42  ;;  %2023 = vst.msk [vmem:[%s3221_s5 + $0x160] sm:$0xf] %vm1934_vm1, %v2527_v43  ;;  %v2466_v46 = vpack.c.bf16 %v2670_v44, %v2670_v44  ;;  %v2530_v47 = vpack.c.bf16 %v2734_v45, %v2734_v45 }
 0x12e   : > { %v1010_v48 = vpop.f32.mrf.mxu0  ;;  %v1266_v49 = vpop.f32.mrf.mxu1 }
 0x12f   : > { %1962 = vst.msk [vmem:[%s3221_s5 + $0x6c] sm:$0xf] %vm1934_vm1, %v2466_v46  ;;  %2026 = vst.msk [vmem:[%s3221_s5 + $0x16c] sm:$0xf] %vm1934_vm1, %v2530_v47  ;;  %v2464_v50 = vpack.c.bf16 %v1010_v48, %v1010_v48  ;;  %v2528_v51 = vpack.c.bf16 %v1266_v49, %v1266_v49 }
 0x130   : > { %v2673_v52 = vpop.f32.mrf.mxu0  ;;  %v2737_v53 = vpop.f32.mrf.mxu1 }
 0x131   : > { %1960 = vst.msk [vmem:[%s3221_s5 + $0x64] sm:$0xf] %vm1934_vm1, %v2464_v50  ;;  %2024 = vst.msk [vmem:[%s3221_s5 + $0x164] sm:$0xf] %vm1934_vm1, %v2528_v51  ;;  %v2469_v54 = vpack.c.bf16 %v2673_v52, %v2673_v52  ;;  %v2533_v55 = vpack.c.bf16 %v2737_v53, %v2737_v53 }
 0x132   : > { %v1023_v56 = vpop.f32.mrf.mxu0  ;;  %v1279_v57 = vpop.f32.mrf.mxu1 }
 0x133   : > { %1965 = vst.msk [vmem:[%s3221_s5 + $0x78] sm:$0xf] %vm1934_vm1, %v2469_v54  ;;  %2029 = vst.msk [vmem:[%s3221_s5 + $0x178] sm:$0xf] %vm1934_vm1, %v2533_v55  ;;  %v2467_v58 = vpack.c.bf16 %v1023_v56, %v1023_v56  ;;  %v2531_v59 = vpack.c.bf16 %v1279_v57, %v1279_v57 }
 0x134   : > { %v2674_v60 = vpop.f32.mrf.mxu0  ;;  %v2738_v61 = vpop.f32.mrf.mxu1 }
 0x135   : > { %1963 = vst.msk [vmem:[%s3221_s5 + $0x70] sm:$0xf] %vm1934_vm1, %v2467_v58  ;;  %2027 = vst.msk [vmem:[%s3221_s5 + $0x170] sm:$0xf] %vm1934_vm1, %v2531_v59  ;;  %v2470_v62 = vpack.c.bf16 %v2674_v60, %v2674_v60  ;;  %v2534_v63 = vpack.c.bf16 %v2738_v61, %v2738_v61 }
 0x136   : > { %v1026_v0 = vpop.f32.mrf.mxu0  ;;  %v1282_v1 = vpop.f32.mrf.mxu1 }
 0x137   : > { %1966 = vst.msk [vmem:[%s3221_s5 + $0x7c] sm:$0xf] %vm1934_vm1, %v2470_v62  ;;  %2030 = vst.msk [vmem:[%s3221_s5 + $0x17c] sm:$0xf] %vm1934_vm1, %v2534_v63  ;;  %v2468_v2 = vpack.c.bf16 %v1026_v0, %v1026_v0  ;;  %v2532_v3 = vpack.c.bf16 %v1282_v1, %v1282_v1 }
 0x138   : > { %v2677_v4 = vpop.f32.mrf.mxu0  ;;  %v2741_v5 = vpop.f32.mrf.mxu1 }
 0x139   : > { %1964 = vst.msk [vmem:[%s3221_s5 + $0x74] sm:$0xf] %vm1934_vm1, %v2468_v2  ;;  %2028 = vst.msk [vmem:[%s3221_s5 + $0x174] sm:$0xf] %vm1934_vm1, %v2532_v3  ;;  %v2473_v6 = vpack.c.bf16 %v2677_v4, %v2677_v4  ;;  %v2537_v7 = vpack.c.bf16 %v2741_v5, %v2741_v5 }
 0x13a   : > { %v1039_v8 = vpop.f32.mrf.mxu0  ;;  %v1295_v9 = vpop.f32.mrf.mxu1 }
 0x13b   : > { %1969 = vst.msk [vmem:[%s3221_s5 + $0x88] sm:$0xf] %vm1934_vm1, %v2473_v6  ;;  %2033 = vst.msk [vmem:[%s3221_s5 + $0x188] sm:$0xf] %vm1934_vm1, %v2537_v7  ;;  %v2471_v10 = vpack.c.bf16 %v1039_v8, %v1039_v8  ;;  %v2535_v11 = vpack.c.bf16 %v1295_v9, %v1295_v9 }
 0x13c   : > { %v2678_v12 = vpop.f32.mrf.mxu0  ;;  %v2742_v13 = vpop.f32.mrf.mxu1 }
 0x13d   : > { %1967 = vst.msk [vmem:[%s3221_s5 + $0x80] sm:$0xf] %vm1934_vm1, %v2471_v10  ;;  %2031 = vst.msk [vmem:[%s3221_s5 + $0x180] sm:$0xf] %vm1934_vm1, %v2535_v11  ;;  %v2474_v14 = vpack.c.bf16 %v2678_v12, %v2678_v12  ;;  %v2538_v15 = vpack.c.bf16 %v2742_v13, %v2742_v13 }
 0x13e   : > { %v1042_v16 = vpop.f32.mrf.mxu0  ;;  %v1298_v17 = vpop.f32.mrf.mxu1 }
 0x13f   : > { %1970 = vst.msk [vmem:[%s3221_s5 + $0x8c] sm:$0xf] %vm1934_vm1, %v2474_v14  ;;  %2034 = vst.msk [vmem:[%s3221_s5 + $0x18c] sm:$0xf] %vm1934_vm1, %v2538_v15  ;;  %v2472_v18 = vpack.c.bf16 %v1042_v16, %v1042_v16  ;;  %v2536_v19 = vpack.c.bf16 %v1298_v17, %v1298_v17 }
 0x140   : > { %v2681_v20 = vpop.f32.mrf.mxu0  ;;  %v2745_v21 = vpop.f32.mrf.mxu1 }
 0x141   : > { %1968 = vst.msk [vmem:[%s3221_s5 + $0x84] sm:$0xf] %vm1934_vm1, %v2472_v18  ;;  %2032 = vst.msk [vmem:[%s3221_s5 + $0x184] sm:$0xf] %vm1934_vm1, %v2536_v19  ;;  %v2477_v22 = vpack.c.bf16 %v2681_v20, %v2681_v20  ;;  %v2541_v23 = vpack.c.bf16 %v2745_v21, %v2745_v21 }
 0x142   : > { %v1055_v24 = vpop.f32.mrf.mxu0  ;;  %v1311_v25 = vpop.f32.mrf.mxu1 }
 0x143   : > { %1973 = vst.msk [vmem:[%s3221_s5 + $0x98] sm:$0xf] %vm1934_vm1, %v2477_v22  ;;  %2037 = vst.msk [vmem:[%s3221_s5 + $0x198] sm:$0xf] %vm1934_vm1, %v2541_v23  ;;  %v2475_v26 = vpack.c.bf16 %v1055_v24, %v1055_v24  ;;  %v2539_v27 = vpack.c.bf16 %v1311_v25, %v1311_v25 }
 0x144   : > { %v2682_v28 = vpop.f32.mrf.mxu0  ;;  %v2746_v29 = vpop.f32.mrf.mxu1 }
 0x145   : > { %1971 = vst.msk [vmem:[%s3221_s5 + $0x90] sm:$0xf] %vm1934_vm1, %v2475_v26  ;;  %2035 = vst.msk [vmem:[%s3221_s5 + $0x190] sm:$0xf] %vm1934_vm1, %v2539_v27  ;;  %v2478_v30 = vpack.c.bf16 %v2682_v28, %v2682_v28  ;;  %v2542_v31 = vpack.c.bf16 %v2746_v29, %v2746_v29 }
 0x146   : > { %v1058_v32 = vpop.f32.mrf.mxu0  ;;  %v1314_v33 = vpop.f32.mrf.mxu1 }
 0x147   : > { %1974 = vst.msk [vmem:[%s3221_s5 + $0x9c] sm:$0xf] %vm1934_vm1, %v2478_v30  ;;  %2038 = vst.msk [vmem:[%s3221_s5 + $0x19c] sm:$0xf] %vm1934_vm1, %v2542_v31  ;;  %v2476_v34 = vpack.c.bf16 %v1058_v32, %v1058_v32  ;;  %v2540_v35 = vpack.c.bf16 %v1314_v33, %v1314_v33 }
 0x148   : > { %v2685_v36 = vpop.f32.mrf.mxu0  ;;  %v2749_v37 = vpop.f32.mrf.mxu1 }
 0x149   : > { %1972 = vst.msk [vmem:[%s3221_s5 + $0x94] sm:$0xf] %vm1934_vm1, %v2476_v34  ;;  %2036 = vst.msk [vmem:[%s3221_s5 + $0x194] sm:$0xf] %vm1934_vm1, %v2540_v35  ;;  %v2481_v38 = vpack.c.bf16 %v2685_v36, %v2685_v36  ;;  %v2545_v39 = vpack.c.bf16 %v2749_v37, %v2749_v37 }
 0x14a   : > { %v1071_v40 = vpop.f32.mrf.mxu0  ;;  %v1327_v41 = vpop.f32.mrf.mxu1 }
 0x14b   : > { %1977 = vst.msk [vmem:[%s3221_s5 + $0xa8] sm:$0xf] %vm1934_vm1, %v2481_v38  ;;  %2041 = vst.msk [vmem:[%s3221_s5 + $0x1a8] sm:$0xf] %vm1934_vm1, %v2545_v39  ;;  %v2479_v42 = vpack.c.bf16 %v1071_v40, %v1071_v40  ;;  %v2543_v43 = vpack.c.bf16 %v1327_v41, %v1327_v41 }
 0x14c   : > { %v2686_v44 = vpop.f32.mrf.mxu0  ;;  %v2750_v45 = vpop.f32.mrf.mxu1 }
 0x14d   : > { %1975 = vst.msk [vmem:[%s3221_s5 + $0xa0] sm:$0xf] %vm1934_vm1, %v2479_v42  ;;  %2039 = vst.msk [vmem:[%s3221_s5 + $0x1a0] sm:$0xf] %vm1934_vm1, %v2543_v43  ;;  %v2482_v46 = vpack.c.bf16 %v2686_v44, %v2686_v44  ;;  %v2546_v47 = vpack.c.bf16 %v2750_v45, %v2750_v45 }
 0x14e   : > { %v1074_v48 = vpop.f32.mrf.mxu0  ;;  %v1330_v49 = vpop.f32.mrf.mxu1 }
 0x14f   : > { %1978 = vst.msk [vmem:[%s3221_s5 + $0xac] sm:$0xf] %vm1934_vm1, %v2482_v46  ;;  %2042 = vst.msk [vmem:[%s3221_s5 + $0x1ac] sm:$0xf] %vm1934_vm1, %v2546_v47  ;;  %v2480_v50 = vpack.c.bf16 %v1074_v48, %v1074_v48  ;;  %v2544_v51 = vpack.c.bf16 %v1330_v49, %v1330_v49 }
 0x150   : > { %v2689_v52 = vpop.f32.mrf.mxu0  ;;  %v2753_v53 = vpop.f32.mrf.mxu1 }
 0x151   : > { %1976 = vst.msk [vmem:[%s3221_s5 + $0xa4] sm:$0xf] %vm1934_vm1, %v2480_v50  ;;  %2040 = vst.msk [vmem:[%s3221_s5 + $0x1a4] sm:$0xf] %vm1934_vm1, %v2544_v51  ;;  %v2485_v54 = vpack.c.bf16 %v2689_v52, %v2689_v52  ;;  %v2549_v55 = vpack.c.bf16 %v2753_v53, %v2753_v53 }
 0x152   : > { %v1087_v56 = vpop.f32.mrf.mxu0  ;;  %v1343_v57 = vpop.f32.mrf.mxu1 }
 0x153   : > { %1981 = vst.msk [vmem:[%s3221_s5 + $0xb8] sm:$0xf] %vm1934_vm1, %v2485_v54  ;;  %2045 = vst.msk [vmem:[%s3221_s5 + $0x1b8] sm:$0xf] %vm1934_vm1, %v2549_v55  ;;  %v2483_v58 = vpack.c.bf16 %v1087_v56, %v1087_v56  ;;  %v2547_v59 = vpack.c.bf16 %v1343_v57, %v1343_v57 }
 0x154   : > { %v2690_v60 = vpop.f32.mrf.mxu0  ;;  %v2754_v61 = vpop.f32.mrf.mxu1 }
 0x155   : > { %1979 = vst.msk [vmem:[%s3221_s5 + $0xb0] sm:$0xf] %vm1934_vm1, %v2483_v58  ;;  %2043 = vst.msk [vmem:[%s3221_s5 + $0x1b0] sm:$0xf] %vm1934_vm1, %v2547_v59  ;;  %v2486_v62 = vpack.c.bf16 %v2690_v60, %v2690_v60  ;;  %v2550_v63 = vpack.c.bf16 %v2754_v61, %v2754_v61 }
 0x156   : > { %v1090_v0 = vpop.f32.mrf.mxu0  ;;  %v1346_v1 = vpop.f32.mrf.mxu1 }
 0x157   : > { %1982 = vst.msk [vmem:[%s3221_s5 + $0xbc] sm:$0xf] %vm1934_vm1, %v2486_v62  ;;  %2046 = vst.msk [vmem:[%s3221_s5 + $0x1bc] sm:$0xf] %vm1934_vm1, %v2550_v63  ;;  %v2484_v2 = vpack.c.bf16 %v1090_v0, %v1090_v0  ;;  %v2548_v3 = vpack.c.bf16 %v1346_v1, %v1346_v1 }
 0x158   : > { %v2693_v4 = vpop.f32.mrf.mxu0  ;;  %v2757_v5 = vpop.f32.mrf.mxu1 }
 0x159   : > { %1980 = vst.msk [vmem:[%s3221_s5 + $0xb4] sm:$0xf] %vm1934_vm1, %v2484_v2  ;;  %2044 = vst.msk [vmem:[%s3221_s5 + $0x1b4] sm:$0xf] %vm1934_vm1, %v2548_v3  ;;  %v2489_v6 = vpack.c.bf16 %v2693_v4, %v2693_v4  ;;  %v2553_v7 = vpack.c.bf16 %v2757_v5, %v2757_v5 }
 0x15a   : > { %v1103_v8 = vpop.f32.mrf.mxu0  ;;  %v1359_v9 = vpop.f32.mrf.mxu1 }
 0x15b   : > { %1985 = vst.msk [vmem:[%s3221_s5 + $0xc8] sm:$0xf] %vm1934_vm1, %v2489_v6  ;;  %2049 = vst.msk [vmem:[%s3221_s5 + $0x1c8] sm:$0xf] %vm1934_vm1, %v2553_v7  ;;  %v2487_v10 = vpack.c.bf16 %v1103_v8, %v1103_v8  ;;  %v2551_v11 = vpack.c.bf16 %v1359_v9, %v1359_v9 }
 0x15c   : > { %v2694_v12 = vpop.f32.mrf.mxu0  ;;  %v2758_v13 = vpop.f32.mrf.mxu1 }
 0x15d   : > { %1983 = vst.msk [vmem:[%s3221_s5 + $0xc0] sm:$0xf] %vm1934_vm1, %v2487_v10  ;;  %2047 = vst.msk [vmem:[%s3221_s5 + $0x1c0] sm:$0xf] %vm1934_vm1, %v2551_v11  ;;  %v2490_v14 = vpack.c.bf16 %v2694_v12, %v2694_v12  ;;  %v2554_v15 = vpack.c.bf16 %v2758_v13, %v2758_v13 }
 0x15e   : > { %v1106_v16 = vpop.f32.mrf.mxu0  ;;  %v1362_v17 = vpop.f32.mrf.mxu1 }
 0x15f   : > { %1986 = vst.msk [vmem:[%s3221_s5 + $0xcc] sm:$0xf] %vm1934_vm1, %v2490_v14  ;;  %2050 = vst.msk [vmem:[%s3221_s5 + $0x1cc] sm:$0xf] %vm1934_vm1, %v2554_v15  ;;  %v2488_v18 = vpack.c.bf16 %v1106_v16, %v1106_v16  ;;  %v2552_v19 = vpack.c.bf16 %v1362_v17, %v1362_v17 }
 0x160   : > { %v2697_v20 = vpop.f32.mrf.mxu0  ;;  %v2761_v21 = vpop.f32.mrf.mxu1 }
 0x161   : > { %1984 = vst.msk [vmem:[%s3221_s5 + $0xc4] sm:$0xf] %vm1934_vm1, %v2488_v18  ;;  %2048 = vst.msk [vmem:[%s3221_s5 + $0x1c4] sm:$0xf] %vm1934_vm1, %v2552_v19  ;;  %v2493_v22 = vpack.c.bf16 %v2697_v20, %v2697_v20  ;;  %v2557_v23 = vpack.c.bf16 %v2761_v21, %v2761_v21 }
 0x162   : > { %v1119_v24 = vpop.f32.mrf.mxu0  ;;  %v1375_v25 = vpop.f32.mrf.mxu1 }
 0x163   : > { %1989 = vst.msk [vmem:[%s3221_s5 + $0xd8] sm:$0xf] %vm1934_vm1, %v2493_v22  ;;  %2053 = vst.msk [vmem:[%s3221_s5 + $0x1d8] sm:$0xf] %vm1934_vm1, %v2557_v23  ;;  %v2491_v26 = vpack.c.bf16 %v1119_v24, %v1119_v24  ;;  %v2555_v27 = vpack.c.bf16 %v1375_v25, %v1375_v25 }
 0x164   : > { %v2698_v28 = vpop.f32.mrf.mxu0  ;;  %v2762_v29 = vpop.f32.mrf.mxu1 }
 0x165   : > { %1987 = vst.msk [vmem:[%s3221_s5 + $0xd0] sm:$0xf] %vm1934_vm1, %v2491_v26  ;;  %2051 = vst.msk [vmem:[%s3221_s5 + $0x1d0] sm:$0xf] %vm1934_vm1, %v2555_v27  ;;  %v2494_v30 = vpack.c.bf16 %v2698_v28, %v2698_v28  ;;  %v2558_v31 = vpack.c.bf16 %v2762_v29, %v2762_v29 }
 0x166   : > { %v1122_v32 = vpop.f32.mrf.mxu0  ;;  %v1378_v33 = vpop.f32.mrf.mxu1 }
 0x167   : > { %1990 = vst.msk [vmem:[%s3221_s5 + $0xdc] sm:$0xf] %vm1934_vm1, %v2494_v30  ;;  %2054 = vst.msk [vmem:[%s3221_s5 + $0x1dc] sm:$0xf] %vm1934_vm1, %v2558_v31  ;;  %v2492_v34 = vpack.c.bf16 %v1122_v32, %v1122_v32  ;;  %v2556_v35 = vpack.c.bf16 %v1378_v33, %v1378_v33 }
 0x168   : > { %v2701_v36 = vpop.f32.mrf.mxu0  ;;  %v2765_v37 = vpop.f32.mrf.mxu1 }
 0x169   : > { %1988 = vst.msk [vmem:[%s3221_s5 + $0xd4] sm:$0xf] %vm1934_vm1, %v2492_v34  ;;  %2052 = vst.msk [vmem:[%s3221_s5 + $0x1d4] sm:$0xf] %vm1934_vm1, %v2556_v35  ;;  %v2497_v38 = vpack.c.bf16 %v2701_v36, %v2701_v36  ;;  %v2561_v39 = vpack.c.bf16 %v2765_v37, %v2765_v37 }
 0x16a   : > { %v1135_v40 = vpop.f32.mrf.mxu0  ;;  %v1391_v41 = vpop.f32.mrf.mxu1 }
 0x16b   : > { %1993 = vst.msk [vmem:[%s3221_s5 + $0xe8] sm:$0xf] %vm1934_vm1, %v2497_v38  ;;  %2057 = vst.msk [vmem:[%s3221_s5 + $0x1e8] sm:$0xf] %vm1934_vm1, %v2561_v39  ;;  %v2495_v42 = vpack.c.bf16 %v1135_v40, %v1135_v40  ;;  %v2559_v43 = vpack.c.bf16 %v1391_v41, %v1391_v41 }
 0x16c   : > { %v2702_v44 = vpop.f32.mrf.mxu0  ;;  %v2766_v45 = vpop.f32.mrf.mxu1 }
 0x16d   : > { %1991 = vst.msk [vmem:[%s3221_s5 + $0xe0] sm:$0xf] %vm1934_vm1, %v2495_v42  ;;  %2055 = vst.msk [vmem:[%s3221_s5 + $0x1e0] sm:$0xf] %vm1934_vm1, %v2559_v43  ;;  %v2498_v46 = vpack.c.bf16 %v2702_v44, %v2702_v44  ;;  %v2562_v47 = vpack.c.bf16 %v2766_v45, %v2766_v45 }
 0x16e   : > { %v1138_v48 = vpop.f32.mrf.mxu0  ;;  %v1394_v49 = vpop.f32.mrf.mxu1 }
 0x16f   : > { %1994 = vst.msk [vmem:[%s3221_s5 + $0xec] sm:$0xf] %vm1934_vm1, %v2498_v46  ;;  %2058 = vst.msk [vmem:[%s3221_s5 + $0x1ec] sm:$0xf] %vm1934_vm1, %v2562_v47  ;;  %v2496_v50 = vpack.c.bf16 %v1138_v48, %v1138_v48  ;;  %v2560_v51 = vpack.c.bf16 %v1394_v49, %v1394_v49 }
 0x170   : > { %v2705_v52 = vpop.f32.mrf.mxu0  ;;  %v2769_v53 = vpop.f32.mrf.mxu1 }
 0x171   : > { %1992 = vst.msk [vmem:[%s3221_s5 + $0xe4] sm:$0xf] %vm1934_vm1, %v2496_v50  ;;  %2056 = vst.msk [vmem:[%s3221_s5 + $0x1e4] sm:$0xf] %vm1934_vm1, %v2560_v51  ;;  %v2501_v54 = vpack.c.bf16 %v2705_v52, %v2705_v52  ;;  %v2565_v55 = vpack.c.bf16 %v2769_v53, %v2769_v53 }
 0x172   : > { %v1151_v56 = vpop.f32.mrf.mxu0  ;;  %v1407_v57 = vpop.f32.mrf.mxu1 }
 0x173   : > { %1997 = vst.msk [vmem:[%s3221_s5 + $0xf8] sm:$0xf] %vm1934_vm1, %v2501_v54  ;;  %2061 = vst.msk [vmem:[%s3221_s5 + $0x1f8] sm:$0xf] %vm1934_vm1, %v2565_v55  ;;  %v2499_v58 = vpack.c.bf16 %v1151_v56, %v1151_v56  ;;  %v2563_v59 = vpack.c.bf16 %v1407_v57, %v1407_v57 }
 0x174   : > { %v2706_v60 = vpop.f32.mrf.mxu0  ;;  %v2770_v61 = vpop.f32.mrf.mxu1 }
 0x175   : > { %1995 = vst.msk [vmem:[%s3221_s5 + $0xf0] sm:$0xf] %vm1934_vm1, %v2499_v58  ;;  %2059 = vst.msk [vmem:[%s3221_s5 + $0x1f0] sm:$0xf] %vm1934_vm1, %v2563_v59  ;;  %v2502_v62 = vpack.c.bf16 %v2706_v60, %v2706_v60  ;;  %v2566_v63 = vpack.c.bf16 %v2770_v61, %v2770_v61 }
 0x176   : > { %v1154_v0 = vpop.f32.mrf.mxu0  ;;  %v1410_v1 = vpop.f32.mrf.mxu1 }
 0x177   : > { %1998 = vst.msk [vmem:[%s3221_s5 + $0xfc] sm:$0xf] %vm1934_vm1, %v2502_v62  ;;  %2062 = vst.msk [vmem:[%s3221_s5 + $0x1fc] sm:$0xf] %vm1934_vm1, %v2566_v63  ;;  %v2500_v2 = vpack.c.bf16 %v1154_v0, %v1154_v0  ;;  %v2564_v3 = vpack.c.bf16 %v1410_v1, %v1410_v1 }
 0x179   : > { %1996 = vst.msk [vmem:[%s3221_s5 + $0xf4] sm:$0xf] %vm1934_vm1, %v2500_v2  ;;  %2060 = vst.msk [vmem:[%s3221_s5 + $0x1f4] sm:$0xf] %vm1934_vm1, %v2564_v3 }
 0x17a PF: > { %s15_s14 = sadd.s32 1, %s2982_s14   ;;  %s3503_s9 = smov %s2966_s10 }
 0x17b   : > { %p12_p8 = scmp.ge.s32.totalorder %s15_s14, 4   ;;  %s3504_s10 = smov %s2970_s11 }
 0x17c   : > { %s3505_s11 = smov %s3051_s21  ;;  %s3506_s12 = smov %s2978_s13 }
 0x17d   : > { %s3507_s13 = smov %s3509_s16  ;;  %14 = sbr.rel (!%p12_p8) target bundleno = 4 (0x4), region = 71 }
 0x182   :  { %2091 = vsyncpa [#allocation3], 1 }
 0x183   :  { %2093 = vsyncpa [#allocation3 + $0x1], 1 }

// kernel: wave_field_decoder_forward.14
= control target key start
LH: loop header
LB: loop body
LE: loop exit
PB: predicated region body
PF: predicated region fallthrough
CT: control target
= control target key end

     0   :  { %vm1645_vm0 = vcmask 257024   ;;  %s3153_s1 = inlined_call_operand.vmem [shape: bf16[128,32], index: 1, kind: input, shape index: {}]   ;;  %s3154_s0 = inlined_call_operand.vmem [shape: bf16[1024,128], index: 0, kind: input, shape index: {}]   ;;  %s3155_s2 = inlined_call_operand.vmem [shape: bf16[1024,32], index: 2, kind: output, shape index: {}]  }
   0x1   :  { %v2338_v0 = vld [vmem:[%s3153_s1 + $0x38] sm:$0xff]   ;;  %v2339_v1 = vld [vmem:[%s3153_s1 + $0x30] sm:$0xff]   ;;  %v2340_v2 = vld [vmem:[%s3153_s1 + $0x28] sm:$0xff]  }
   0x2   :  { %2178 = vmatprep.subr.bf16.mxu0 %v2338_v0  ;;  %2322 = vmatprep.subr.bf16.mxu1 %v2338_v0  ;;  %v2341_v3 = vld [vmem:[%s3153_s1 + $0x20] sm:$0xff]   ;;  %v2342_v6 = vld [vmem:[%s3153_s1 + $0x18] sm:$0xff]   ;;  %v2343_v7 = vld [vmem:[%s3153_s1 + $0x10] sm:$0xff]  }
   0x3   :  { %2179 = vmatpush3.bf16.msra.mxu0 %v2338_v0  ;;  %2330 = vmatpush3.bf16.msra.mxu1 %v2338_v0  ;;  %v2346_v4 = vld [vmem:[%s3154_s0] sm:$0xff]   ;;  %v2344_v8 = vld [vmem:[%s3153_s1 + $0x8] sm:$0xff]   ;;  %v2350_v12 = vld [vmem:[%s3154_s0 + $0x10] sm:$0xff]  }
   0x4   :  { %2180 = vmatprep.subr.bf16.mxu0 %v2339_v1  ;;  %2323 = vmatprep.subr.bf16.mxu1 %v2339_v1  ;;  %v2347_v5 = vld [vmem:[%s3154_s0 + $0x100] sm:$0xff]   ;;  %v2348_v10 = vld [vmem:[%s3154_s0 + $0x8] sm:$0xff]   ;;  %v2351_v13 = vld [vmem:[%s3154_s0 + $0x110] sm:$0xff]  }
   0x5   :  { %2194 = vmatprep.mubr.bf16.mxu0 %v2346_v4  ;;  %2258 = vmatprep.mubr.bf16.mxu1 %v2347_v5  ;;  %v2345_v9 = vld [vmem:[%s3153_s1] sm:$0xff]   ;;  %v2349_v11 = vld [vmem:[%s3154_s0 + $0x108] sm:$0xff]   ;;  %v2352_v14 = vld [vmem:[%s3154_s0 + $0x18] sm:$0xff]  }
   0x6   :  { %v2353_v15 = vld [vmem:[%s3154_s0 + $0x118] sm:$0xff]   ;;  %v2354_v16 = vld [vmem:[%s3154_s0 + $0x20] sm:$0xff]   ;;  %v2356_v18 = vld [vmem:[%s3154_s0 + $0x28] sm:$0xff]  }
   0x7   :  { %2181 = vmatpush3.bf16.msra.mxu0 %v2339_v1  ;;  %2331 = vmatpush3.bf16.msra.mxu1 %v2339_v1  ;;  %v2355_v17 = vld [vmem:[%s3154_s0 + $0x120] sm:$0xff]   ;;  %v2357_v19 = vld [vmem:[%s3154_s0 + $0x128] sm:$0xff]   ;;  %v2358_v20 = vld [vmem:[%s3154_s0 + $0x30] sm:$0xff]  }
   0x8   :  { %2182 = vmatprep.subr.bf16.mxu0 %v2340_v2  ;;  %2324 = vmatprep.subr.bf16.mxu1 %v2340_v2  ;;  %v2359_v21 = vld [vmem:[%s3154_s0 + $0x130] sm:$0xff]   ;;  %v2360_v22 = vld [vmem:[%s3154_s0 + $0x38] sm:$0xff]   ;;  %v2362_v24 = vld [vmem:[%s3154_s0 + $0x40] sm:$0xff]  }
   0x9   :  { %v2361_v23 = vld [vmem:[%s3154_s0 + $0x138] sm:$0xff]   ;;  %v2363_v25 = vld [vmem:[%s3154_s0 + $0x140] sm:$0xff]   ;;  %v2364_v26 = vld [vmem:[%s3154_s0 + $0x48] sm:$0xff]  }
   0xa   :  { %v2365_v27 = vld [vmem:[%s3154_s0 + $0x148] sm:$0xff]   ;;  %v2366_v28 = vld [vmem:[%s3154_s0 + $0x50] sm:$0xff]   ;;  %v2368_v30 = vld [vmem:[%s3154_s0 + $0x58] sm:$0xff]  }
   0xb   :  { %2183 = vmatpush3.bf16.msra.mxu0 %v2340_v2  ;;  %2332 = vmatpush3.bf16.msra.mxu1 %v2340_v2  ;;  %v2367_v29 = vld [vmem:[%s3154_s0 + $0x150] sm:$0xff]   ;;  %v2369_v31 = vld [vmem:[%s3154_s0 + $0x158] sm:$0xff]   ;;  %v2370_v32 = vld [vmem:[%s3154_s0 + $0x60] sm:$0xff]  }
   0xc   :  { %2184 = vmatprep.subr.bf16.mxu0 %v2341_v3  ;;  %2325 = vmatprep.subr.bf16.mxu1 %v2341_v3  ;;  %v2371_v33 = vld [vmem:[%s3154_s0 + $0x160] sm:$0xff]   ;;  %v2372_v34 = vld [vmem:[%s3154_s0 + $0x68] sm:$0xff]   ;;  %v2374_v36 = vld [vmem:[%s3154_s0 + $0x70] sm:$0xff]  }
   0xd   :  { %v2373_v35 = vld [vmem:[%s3154_s0 + $0x168] sm:$0xff]   ;;  %v2375_v37 = vld [vmem:[%s3154_s0 + $0x170] sm:$0xff]   ;;  %v2376_v38 = vld [vmem:[%s3154_s0 + $0x78] sm:$0xff]  }
   0xe   :  { %v2377_v39 = vld [vmem:[%s3154_s0 + $0x178] sm:$0xff]   ;;  %v2378_v40 = vld [vmem:[%s3154_s0 + $0x80] sm:$0xff]   ;;  %v2380_v42 = vld [vmem:[%s3154_s0 + $0x88] sm:$0xff]  }
   0xf   :  { %2185 = vmatpush3.bf16.msra.mxu0 %v2341_v3  ;;  %2333 = vmatpush3.bf16.msra.mxu1 %v2341_v3  ;;  %v2379_v41 = vld [vmem:[%s3154_s0 + $0x180] sm:$0xff]   ;;  %v2381_v43 = vld [vmem:[%s3154_s0 + $0x188] sm:$0xff]   ;;  %v2382_v44 = vld [vmem:[%s3154_s0 + $0x90] sm:$0xff]  }
  0x10   :  { %2186 = vmatprep.subr.bf16.mxu0 %v2342_v6  ;;  %2326 = vmatprep.subr.bf16.mxu1 %v2342_v6  ;;  %v2383_v45 = vld [vmem:[%s3154_s0 + $0x190] sm:$0xff]   ;;  %v2384_v46 = vld [vmem:[%s3154_s0 + $0x98] sm:$0xff]   ;;  %v2386_v48 = vld [vmem:[%s3154_s0 + $0xa0] sm:$0xff]  }
  0x11   :  { %v2385_v47 = vld [vmem:[%s3154_s0 + $0x198] sm:$0xff]   ;;  %v2387_v49 = vld [vmem:[%s3154_s0 + $0x1a0] sm:$0xff]   ;;  %v2388_v50 = vld [vmem:[%s3154_s0 + $0xa8] sm:$0xff]  }
  0x12   :  { %v2389_v51 = vld [vmem:[%s3154_s0 + $0x1a8] sm:$0xff]   ;;  %v2390_v52 = vld [vmem:[%s3154_s0 + $0xb0] sm:$0xff]   ;;  %v2392_v54 = vld [vmem:[%s3154_s0 + $0xb8] sm:$0xff]  }
  0x13   :  { %2187 = vmatpush3.bf16.msra.mxu0 %v2342_v6  ;;  %2334 = vmatpush3.bf16.msra.mxu1 %v2342_v6  ;;  %v2391_v53 = vld [vmem:[%s3154_s0 + $0x1b0] sm:$0xff]   ;;  %v2393_v55 = vld [vmem:[%s3154_s0 + $0x1b8] sm:$0xff]   ;;  %v2394_v56 = vld [vmem:[%s3154_s0 + $0xc0] sm:$0xff]  }
  0x14   :  { %2188 = vmatprep.subr.bf16.mxu0 %v2343_v7  ;;  %2327 = vmatprep.subr.bf16.mxu1 %v2343_v7  ;;  %v2395_v57 = vld [vmem:[%s3154_s0 + $0x1c0] sm:$0xff]   ;;  %v2396_v58 = vld [vmem:[%s3154_s0 + $0xc8] sm:$0xff]   ;;  %v2398_v60 = vld [vmem:[%s3154_s0 + $0xd0] sm:$0xff]  }
  0x15   :  { %v2397_v59 = vld [vmem:[%s3154_s0 + $0x1c8] sm:$0xff]   ;;  %v2399_v61 = vld [vmem:[%s3154_s0 + $0x1d0] sm:$0xff]   ;;  %v2400_v62 = vld [vmem:[%s3154_s0 + $0xd8] sm:$0xff]  }
  0x16   :  { %v2401_v63 = vld [vmem:[%s3154_s0 + $0x1d8] sm:$0xff]   ;;  %v2402_v0 = vld [vmem:[%s3154_s0 + $0xe0] sm:$0xff]   ;;  %v2404_v2 = vld [vmem:[%s3154_s0 + $0xe8] sm:$0xff]  }
  0x17   :  { %2189 = vmatpush3.bf16.msra.mxu0 %v2343_v7  ;;  %2335 = vmatpush3.bf16.msra.mxu1 %v2343_v7  ;;  %v2403_v1 = vld [vmem:[%s3154_s0 + $0x1e0] sm:$0xff]   ;;  %v2405_v3 = vld [vmem:[%s3154_s0 + $0x1e8] sm:$0xff]   ;;  %v2406_v4 = vld [vmem:[%s3154_s0 + $0xf0] sm:$0xff]  }
  0x18   :  { %2190 = vmatprep.subr.bf16.mxu0 %v2344_v8  ;;  %2328 = vmatprep.subr.bf16.mxu1 %v2344_v8  ;;  %v2407_v5 = vld [vmem:[%s3154_s0 + $0x1f0] sm:$0xff]   ;;  %v2408_v6 = vld [vmem:[%s3154_s0 + $0xf8] sm:$0xff]  }
  0x19   :  { %v2409_v7 = vld [vmem:[%s3154_s0 + $0x1f8] sm:$0xff]  }
  0x1b   :  { %2191 = vmatpush3.bf16.msra.mxu0 %v2344_v8  ;;  %2336 = vmatpush3.bf16.msra.mxu1 %v2344_v8 }
  0x1c   :  { %2192 = vmatprep.subr.bf16.mxu0 %v2345_v9  ;;  %2329 = vmatprep.subr.bf16.mxu1 %v2345_v9 }
  0x1f   :  { %2193 = vmatpush3.bf16.msra.mxu0 %v2345_v9  ;;  %2337 = vmatpush3.bf16.msra.mxu1 %v2345_v9 }
  0x22   :  { %2195 = vmatmul.mubr.bf16.vlgmr.msra.gmra.mxu0 %v2348_v10  ;;  %2259 = vmatmul.mubr.bf16.vlgmr.msra.gmra.mxu1 %v2349_v11 }
  0x23   :  { %2198 = vmatprep.mubr.bf16.mxu0 %v2350_v12  ;;  %2262 = vmatprep.mubr.bf16.mxu1 %v2351_v13 }
  0x2a   :  { %2199 = vmatmul.mubr.bf16.gmra.mxu0 %v2352_v14  ;;  %2263 = vmatmul.mubr.bf16.gmra.mxu1 %v2353_v15 }
  0x2b   :  { %2202 = vmatprep.mubr.bf16.mxu0 %v2354_v16  ;;  %2266 = vmatprep.mubr.bf16.mxu1 %v2355_v17 }
  0x32   :  { %2203 = vmatmul.mubr.bf16.gmra.mxu0 %v2356_v18  ;;  %2267 = vmatmul.mubr.bf16.gmra.mxu1 %v2357_v19 }
  0x33   :  { %2206 = vmatprep.mubr.bf16.mxu0 %v2358_v20  ;;  %2270 = vmatprep.mubr.bf16.mxu1 %v2359_v21 }
  0x3a   :  { %2207 = vmatmul.mubr.bf16.gmra.mxu0 %v2360_v22  ;;  %2271 = vmatmul.mubr.bf16.gmra.mxu1 %v2361_v23 }
  0x3b   :  { %2210 = vmatprep.mubr.bf16.mxu0 %v2362_v24  ;;  %2274 = vmatprep.mubr.bf16.mxu1 %v2363_v25 }
  0x42   :  { %2211 = vmatmul.mubr.bf16.gmra.mxu0 %v2364_v26  ;;  %2275 = vmatmul.mubr.bf16.gmra.mxu1 %v2365_v27 }
  0x43   :  { %2214 = vmatprep.mubr.bf16.mxu0 %v2366_v28  ;;  %2278 = vmatprep.mubr.bf16.mxu1 %v2367_v29 }
  0x4a   :  { %2215 = vmatmul.mubr.bf16.gmra.mxu0 %v2368_v30  ;;  %2279 = vmatmul.mubr.bf16.gmra.mxu1 %v2369_v31 }
  0x4b   :  { %2218 = vmatprep.mubr.bf16.mxu0 %v2370_v32  ;;  %2282 = vmatprep.mubr.bf16.mxu1 %v2371_v33 }
  0x52   :  { %2219 = vmatmul.mubr.bf16.gmra.mxu0 %v2372_v34  ;;  %2283 = vmatmul.mubr.bf16.gmra.mxu1 %v2373_v35 }
  0x53   :  { %2222 = vmatprep.mubr.bf16.mxu0 %v2374_v36  ;;  %2286 = vmatprep.mubr.bf16.mxu1 %v2375_v37 }
  0x5a   :  { %2223 = vmatmul.mubr.bf16.gmra.mxu0 %v2376_v38  ;;  %2287 = vmatmul.mubr.bf16.gmra.mxu1 %v2377_v39 }
  0x5b   :  { %2226 = vmatprep.mubr.bf16.mxu0 %v2378_v40  ;;  %2290 = vmatprep.mubr.bf16.mxu1 %v2379_v41 }
  0x62   :  { %2227 = vmatmul.mubr.bf16.gmra.mxu0 %v2380_v42  ;;  %2291 = vmatmul.mubr.bf16.gmra.mxu1 %v2381_v43 }
  0x63   :  { %2230 = vmatprep.mubr.bf16.mxu0 %v2382_v44  ;;  %2294 = vmatprep.mubr.bf16.mxu1 %v2383_v45 }
  0x6a   :  { %2231 = vmatmul.mubr.bf16.gmra.mxu0 %v2384_v46  ;;  %2295 = vmatmul.mubr.bf16.gmra.mxu1 %v2385_v47 }
  0x6b   :  { %2234 = vmatprep.mubr.bf16.mxu0 %v2386_v48  ;;  %2298 = vmatprep.mubr.bf16.mxu1 %v2387_v49 }
  0x72   :  { %2235 = vmatmul.mubr.bf16.gmra.mxu0 %v2388_v50  ;;  %2299 = vmatmul.mubr.bf16.gmra.mxu1 %v2389_v51 }
  0x73   :  { %2238 = vmatprep.mubr.bf16.mxu0 %v2390_v52  ;;  %2302 = vmatprep.mubr.bf16.mxu1 %v2391_v53 }
  0x7a   :  { %2239 = vmatmul.mubr.bf16.gmra.mxu0 %v2392_v54  ;;  %2303 = vmatmul.mubr.bf16.gmra.mxu1 %v2393_v55 }
  0x7b   :  { %2242 = vmatprep.mubr.bf16.mxu0 %v2394_v56  ;;  %2306 = vmatprep.mubr.bf16.mxu1 %v2395_v57 }
  0x82   :  { %2243 = vmatmul.mubr.bf16.gmra.mxu0 %v2396_v58  ;;  %2307 = vmatmul.mubr.bf16.gmra.mxu1 %v2397_v59 }
  0x83   :  { %2246 = vmatprep.mubr.bf16.mxu0 %v2398_v60  ;;  %2310 = vmatprep.mubr.bf16.mxu1 %v2399_v61 }
  0x8a   :  { %2247 = vmatmul.mubr.bf16.gmra.mxu0 %v2400_v62  ;;  %2311 = vmatmul.mubr.bf16.gmra.mxu1 %v2401_v63 }
  0x8b   :  { %2250 = vmatprep.mubr.bf16.mxu0 %v2402_v0  ;;  %2314 = vmatprep.mubr.bf16.mxu1 %v2403_v1 }
  0x92   :  { %2251 = vmatmul.mubr.bf16.gmra.mxu0 %v2404_v2  ;;  %2315 = vmatmul.mubr.bf16.gmra.mxu1 %v2405_v3 }
  0x93   :  { %2254 = vmatprep.mubr.bf16.mxu0 %v2406_v4  ;;  %2318 = vmatprep.mubr.bf16.mxu1 %v2407_v5 }
  0x9a   :  { %2255 = vmatmul.mubr.bf16.gmra.mxu0 %v2408_v6  ;;  %2319 = vmatmul.mubr.bf16.gmra.mxu1 %v2409_v7 }
  0xe2   :  { %v2196_v8 = vpop.f32.mrf.mxu0  ;;  %v2260_v9 = vpop.f32.mrf.mxu1 }
  0xe3   :  { %v1980_v10 = vpack.c.bf16 %v2196_v8, %v2196_v8  ;;  %v2044_v11 = vpack.c.bf16 %v2260_v9, %v2260_v9 }
  0xe4   :  { %v622_v12 = vpop.f32.mrf.mxu0  ;;  %v878_v13 = vpop.f32.mrf.mxu1 }
  0xe5   :  { %1648 = vst.msk [vmem:[%s3155_s2 + $0x8] sm:$0xf] %vm1645_vm0, %v1980_v10  ;;  %1712 = vst.msk [vmem:[%s3155_s2 + $0x108] sm:$0xf] %vm1645_vm0, %v2044_v11  ;;  %v1978_v14 = vpack.c.bf16 %v622_v12, %v622_v12  ;;  %v2042_v15 = vpack.c.bf16 %v878_v13, %v878_v13 }
  0xe6   :  { %v2197_v16 = vpop.f32.mrf.mxu0  ;;  %v2261_v17 = vpop.f32.mrf.mxu1 }
  0xe7   :  { %1646 = vst.msk [vmem:[%s3155_s2] sm:$0xf] %vm1645_vm0, %v1978_v14  ;;  %1710 = vst.msk [vmem:[%s3155_s2 + $0x100] sm:$0xf] %vm1645_vm0, %v2042_v15  ;;  %v1981_v18 = vpack.c.bf16 %v2197_v16, %v2197_v16  ;;  %v2045_v19 = vpack.c.bf16 %v2261_v17, %v2261_v17 }
  0xe8   :  { %v625_v20 = vpop.f32.mrf.mxu0  ;;  %v881_v21 = vpop.f32.mrf.mxu1 }
  0xe9   :  { %1649 = vst.msk [vmem:[%s3155_s2 + $0xc] sm:$0xf] %vm1645_vm0, %v1981_v18  ;;  %1713 = vst.msk [vmem:[%s3155_s2 + $0x10c] sm:$0xf] %vm1645_vm0, %v2045_v19  ;;  %v1979_v22 = vpack.c.bf16 %v625_v20, %v625_v20  ;;  %v2043_v23 = vpack.c.bf16 %v881_v21, %v881_v21 }
  0xea   :  { %v2200_v24 = vpop.f32.mrf.mxu0  ;;  %v2264_v25 = vpop.f32.mrf.mxu1 }
  0xeb   :  { %1647 = vst.msk [vmem:[%s3155_s2 + $0x4] sm:$0xf] %vm1645_vm0, %v1979_v22  ;;  %1711 = vst.msk [vmem:[%s3155_s2 + $0x104] sm:$0xf] %vm1645_vm0, %v2043_v23  ;;  %v1984_v26 = vpack.c.bf16 %v2200_v24, %v2200_v24  ;;  %v2048_v27 = vpack.c.bf16 %v2264_v25, %v2264_v25 }
  0xec   :  { %v638_v28 = vpop.f32.mrf.mxu0  ;;  %v894_v29 = vpop.f32.mrf.mxu1 }
  0xed   :  { %1652 = vst.msk [vmem:[%s3155_s2 + $0x18] sm:$0xf] %vm1645_vm0, %v1984_v26  ;;  %1716 = vst.msk [vmem:[%s3155_s2 + $0x118] sm:$0xf] %vm1645_vm0, %v2048_v27  ;;  %v1982_v30 = vpack.c.bf16 %v638_v28, %v638_v28  ;;  %v2046_v31 = vpack.c.bf16 %v894_v29, %v894_v29 }
  0xee   :  { %v2201_v32 = vpop.f32.mrf.mxu0  ;;  %v2265_v33 = vpop.f32.mrf.mxu1 }
  0xef   :  { %1650 = vst.msk [vmem:[%s3155_s2 + $0x10] sm:$0xf] %vm1645_vm0, %v1982_v30  ;;  %1714 = vst.msk [vmem:[%s3155_s2 + $0x110] sm:$0xf] %vm1645_vm0, %v2046_v31  ;;  %v1985_v34 = vpack.c.bf16 %v2201_v32, %v2201_v32  ;;  %v2049_v35 = vpack.c.bf16 %v2265_v33, %v2265_v33 }
  0xf0   :  { %v641_v36 = vpop.f32.mrf.mxu0  ;;  %v897_v37 = vpop.f32.mrf.mxu1 }
  0xf1   :  { %1653 = vst.msk [vmem:[%s3155_s2 + $0x1c] sm:$0xf] %vm1645_vm0, %v1985_v34  ;;  %1717 = vst.msk [vmem:[%s3155_s2 + $0x11c] sm:$0xf] %vm1645_vm0, %v2049_v35  ;;  %v1983_v38 = vpack.c.bf16 %v641_v36, %v641_v36  ;;  %v2047_v39 = vpack.c.bf16 %v897_v37, %v897_v37 }
  0xf2   :  { %v2204_v40 = vpop.f32.mrf.mxu0  ;;  %v2268_v41 = vpop.f32.mrf.mxu1 }
  0xf3   :  { %1651 = vst.msk [vmem:[%s3155_s2 + $0x14] sm:$0xf] %vm1645_vm0, %v1983_v38  ;;  %1715 = vst.msk [vmem:[%s3155_s2 + $0x114] sm:$0xf] %vm1645_vm0, %v2047_v39  ;;  %v1988_v42 = vpack.c.bf16 %v2204_v40, %v2204_v40  ;;  %v2052_v43 = vpack.c.bf16 %v2268_v41, %v2268_v41 }
  0xf4   :  { %v654_v44 = vpop.f32.mrf.mxu0  ;;  %v910_v45 = vpop.f32.mrf.mxu1 }
  0xf5   :  { %1656 = vst.msk [vmem:[%s3155_s2 + $0x28] sm:$0xf] %vm1645_vm0, %v1988_v42  ;;  %1720 = vst.msk [vmem:[%s3155_s2 + $0x128] sm:$0xf] %vm1645_vm0, %v2052_v43  ;;  %v1986_v46 = vpack.c.bf16 %v654_v44, %v654_v44  ;;  %v2050_v47 = vpack.c.bf16 %v910_v45, %v910_v45 }
  0xf6   :  { %v2205_v48 = vpop.f32.mrf.mxu0  ;;  %v2269_v49 = vpop.f32.mrf.mxu1 }
  0xf7   :  { %1654 = vst.msk [vmem:[%s3155_s2 + $0x20] sm:$0xf] %vm1645_vm0, %v1986_v46  ;;  %1718 = vst.msk [vmem:[%s3155_s2 + $0x120] sm:$0xf] %vm1645_vm0, %v2050_v47  ;;  %v1989_v50 = vpack.c.bf16 %v2205_v48, %v2205_v48  ;;  %v2053_v51 = vpack.c.bf16 %v2269_v49, %v2269_v49 }
  0xf8   :  { %v657_v52 = vpop.f32.mrf.mxu0  ;;  %v913_v53 = vpop.f32.mrf.mxu1 }
  0xf9   :  { %1657 = vst.msk [vmem:[%s3155_s2 + $0x2c] sm:$0xf] %vm1645_vm0, %v1989_v50  ;;  %1721 = vst.msk [vmem:[%s3155_s2 + $0x12c] sm:$0xf] %vm1645_vm0, %v2053_v51  ;;  %v1987_v54 = vpack.c.bf16 %v657_v52, %v657_v52  ;;  %v2051_v55 = vpack.c.bf16 %v913_v53, %v913_v53 }
  0xfa   :  { %v2208_v56 = vpop.f32.mrf.mxu0  ;;  %v2272_v57 = vpop.f32.mrf.mxu1 }
  0xfb   :  { %1655 = vst.msk [vmem:[%s3155_s2 + $0x24] sm:$0xf] %vm1645_vm0, %v1987_v54  ;;  %1719 = vst.msk [vmem:[%s3155_s2 + $0x124] sm:$0xf] %vm1645_vm0, %v2051_v55  ;;  %v1992_v58 = vpack.c.bf16 %v2208_v56, %v2208_v56  ;;  %v2056_v59 = vpack.c.bf16 %v2272_v57, %v2272_v57 }
  0xfc   :  { %v670_v60 = vpop.f32.mrf.mxu0  ;;  %v926_v61 = vpop.f32.mrf.mxu1 }
  0xfd   :  { %1660 = vst.msk [vmem:[%s3155_s2 + $0x38] sm:$0xf] %vm1645_vm0, %v1992_v58  ;;  %1724 = vst.msk [vmem:[%s3155_s2 + $0x138] sm:$0xf] %vm1645_vm0, %v2056_v59  ;;  %v1990_v62 = vpack.c.bf16 %v670_v60, %v670_v60  ;;  %v2054_v63 = vpack.c.bf16 %v926_v61, %v926_v61 }
  0xfe   :  { %v2209_v0 = vpop.f32.mrf.mxu0  ;;  %v2273_v1 = vpop.f32.mrf.mxu1 }
  0xff   :  { %1658 = vst.msk [vmem:[%s3155_s2 + $0x30] sm:$0xf] %vm1645_vm0, %v1990_v62  ;;  %1722 = vst.msk [vmem:[%s3155_s2 + $0x130] sm:$0xf] %vm1645_vm0, %v2054_v63  ;;  %v1993_v2 = vpack.c.bf16 %v2209_v0, %v2209_v0  ;;  %v2057_v3 = vpack.c.bf16 %v2273_v1, %v2273_v1 }
 0x100   :  { %v673_v4 = vpop.f32.mrf.mxu0  ;;  %v929_v5 = vpop.f32.mrf.mxu1 }
 0x101   :  { %1661 = vst.msk [vmem:[%s3155_s2 + $0x3c] sm:$0xf] %vm1645_vm0, %v1993_v2  ;;  %1725 = vst.msk [vmem:[%s3155_s2 + $0x13c] sm:$0xf] %vm1645_vm0, %v2057_v3  ;;  %v1991_v6 = vpack.c.bf16 %v673_v4, %v673_v4  ;;  %v2055_v7 = vpack.c.bf16 %v929_v5, %v929_v5 }
 0x102   :  { %v2212_v8 = vpop.f32.mrf.mxu0  ;;  %v2276_v9 = vpop.f32.mrf.mxu1 }
 0x103   :  { %1659 = vst.msk [vmem:[%s3155_s2 + $0x34] sm:$0xf] %vm1645_vm0, %v1991_v6  ;;  %1723 = vst.msk [vmem:[%s3155_s2 + $0x134] sm:$0xf] %vm1645_vm0, %v2055_v7  ;;  %v1996_v10 = vpack.c.bf16 %v2212_v8, %v2212_v8  ;;  %v2060_v11 = vpack.c.bf16 %v2276_v9, %v2276_v9 }
 0x104   :  { %v686_v12 = vpop.f32.mrf.mxu0  ;;  %v942_v13 = vpop.f32.mrf.mxu1 }
 0x105   :  { %1664 = vst.msk [vmem:[%s3155_s2 + $0x48] sm:$0xf] %vm1645_vm0, %v1996_v10  ;;  %1728 = vst.msk [vmem:[%s3155_s2 + $0x148] sm:$0xf] %vm1645_vm0, %v2060_v11  ;;  %v1994_v14 = vpack.c.bf16 %v686_v12, %v686_v12  ;;  %v2058_v15 = vpack.c.bf16 %v942_v13, %v942_v13 }
 0x106   :  { %v2213_v16 = vpop.f32.mrf.mxu0  ;;  %v2277_v17 = vpop.f32.mrf.mxu1 }
 0x107   :  { %1662 = vst.msk [vmem:[%s3155_s2 + $0x40] sm:$0xf] %vm1645_vm0, %v1994_v14  ;;  %1726 = vst.msk [vmem:[%s3155_s2 + $0x140] sm:$0xf] %vm1645_vm0, %v2058_v15  ;;  %v1997_v18 = vpack.c.bf16 %v2213_v16, %v2213_v16  ;;  %v2061_v19 = vpack.c.bf16 %v2277_v17, %v2277_v17 }
 0x108   :  { %v689_v20 = vpop.f32.mrf.mxu0  ;;  %v945_v21 = vpop.f32.mrf.mxu1 }
 0x109   :  { %1665 = vst.msk [vmem:[%s3155_s2 + $0x4c] sm:$0xf] %vm1645_vm0, %v1997_v18  ;;  %1729 = vst.msk [vmem:[%s3155_s2 + $0x14c] sm:$0xf] %vm1645_vm0, %v2061_v19  ;;  %v1995_v22 = vpack.c.bf16 %v689_v20, %v689_v20  ;;  %v2059_v23 = vpack.c.bf16 %v945_v21, %v945_v21 }
 0x10a   :  { %v2216_v24 = vpop.f32.mrf.mxu0  ;;  %v2280_v25 = vpop.f32.mrf.mxu1 }
 0x10b   :  { %1663 = vst.msk [vmem:[%s3155_s2 + $0x44] sm:$0xf] %vm1645_vm0, %v1995_v22  ;;  %1727 = vst.msk [vmem:[%s3155_s2 + $0x144] sm:$0xf] %vm1645_vm0, %v2059_v23  ;;  %v2000_v26 = vpack.c.bf16 %v2216_v24, %v2216_v24  ;;  %v2064_v27 = vpack.c.bf16 %v2280_v25, %v2280_v25 }
 0x10c   :  { %v702_v28 = vpop.f32.mrf.mxu0  ;;  %v958_v29 = vpop.f32.mrf.mxu1 }
 0x10d   :  { %1668 = vst.msk [vmem:[%s3155_s2 + $0x58] sm:$0xf] %vm1645_vm0, %v2000_v26  ;;  %1732 = vst.msk [vmem:[%s3155_s2 + $0x158] sm:$0xf] %vm1645_vm0, %v2064_v27  ;;  %v1998_v30 = vpack.c.bf16 %v702_v28, %v702_v28  ;;  %v2062_v31 = vpack.c.bf16 %v958_v29, %v958_v29 }
 0x10e   :  { %v2217_v32 = vpop.f32.mrf.mxu0  ;;  %v2281_v33 = vpop.f32.mrf.mxu1 }
 0x10f   :  { %1666 = vst.msk [vmem:[%s3155_s2 + $0x50] sm:$0xf] %vm1645_vm0, %v1998_v30  ;;  %1730 = vst.msk [vmem:[%s3155_s2 + $0x150] sm:$0xf] %vm1645_vm0, %v2062_v31  ;;  %v2001_v34 = vpack.c.bf16 %v2217_v32, %v2217_v32  ;;  %v2065_v35 = vpack.c.bf16 %v2281_v33, %v2281_v33 }
 0x110   :  { %v705_v36 = vpop.f32.mrf.mxu0  ;;  %v961_v37 = vpop.f32.mrf.mxu1 }
 0x111   :  { %1669 = vst.msk [vmem:[%s3155_s2 + $0x5c] sm:$0xf] %vm1645_vm0, %v2001_v34  ;;  %1733 = vst.msk [vmem:[%s3155_s2 + $0x15c] sm:$0xf] %vm1645_vm0, %v2065_v35  ;;  %v1999_v38 = vpack.c.bf16 %v705_v36, %v705_v36  ;;  %v2063_v39 = vpack.c.bf16 %v961_v37, %v961_v37 }
 0x112   :  { %v2220_v40 = vpop.f32.mrf.mxu0  ;;  %v2284_v41 = vpop.f32.mrf.mxu1 }
 0x113   :  { %1667 = vst.msk [vmem:[%s3155_s2 + $0x54] sm:$0xf] %vm1645_vm0, %v1999_v38  ;;  %1731 = vst.msk [vmem:[%s3155_s2 + $0x154] sm:$0xf] %vm1645_vm0, %v2063_v39  ;;  %v2004_v42 = vpack.c.bf16 %v2220_v40, %v2220_v40  ;;  %v2068_v43 = vpack.c.bf16 %v2284_v41, %v2284_v41 }
 0x114   :  { %v718_v44 = vpop.f32.mrf.mxu0  ;;  %v974_v45 = vpop.f32.mrf.mxu1 }
 0x115   :  { %1672 = vst.msk [vmem:[%s3155_s2 + $0x68] sm:$0xf] %vm1645_vm0, %v2004_v42  ;;  %1736 = vst.msk [vmem:[%s3155_s2 + $0x168] sm:$0xf] %vm1645_vm0, %v2068_v43  ;;  %v2002_v46 = vpack.c.bf16 %v718_v44, %v718_v44  ;;  %v2066_v47 = vpack.c.bf16 %v974_v45, %v974_v45 }
 0x116   :  { %v2221_v48 = vpop.f32.mrf.mxu0  ;;  %v2285_v49 = vpop.f32.mrf.mxu1 }
 0x117   :  { %1670 = vst.msk [vmem:[%s3155_s2 + $0x60] sm:$0xf] %vm1645_vm0, %v2002_v46  ;;  %1734 = vst.msk [vmem:[%s3155_s2 + $0x160] sm:$0xf] %vm1645_vm0, %v2066_v47  ;;  %v2005_v50 = vpack.c.bf16 %v2221_v48, %v2221_v48  ;;  %v2069_v51 = vpack.c.bf16 %v2285_v49, %v2285_v49 }
 0x118   :  { %v721_v52 = vpop.f32.mrf.mxu0  ;;  %v977_v53 = vpop.f32.mrf.mxu1 }
 0x119   :  { %1673 = vst.msk [vmem:[%s3155_s2 + $0x6c] sm:$0xf] %vm1645_vm0, %v2005_v50  ;;  %1737 = vst.msk [vmem:[%s3155_s2 + $0x16c] sm:$0xf] %vm1645_vm0, %v2069_v51  ;;  %v2003_v54 = vpack.c.bf16 %v721_v52, %v721_v52  ;;  %v2067_v55 = vpack.c.bf16 %v977_v53, %v977_v53 }
 0x11a   :  { %v2224_v56 = vpop.f32.mrf.mxu0  ;;  %v2288_v57 = vpop.f32.mrf.mxu1 }
 0x11b   :  { %1671 = vst.msk [vmem:[%s3155_s2 + $0x64] sm:$0xf] %vm1645_vm0, %v2003_v54  ;;  %1735 = vst.msk [vmem:[%s3155_s2 + $0x164] sm:$0xf] %vm1645_vm0, %v2067_v55  ;;  %v2008_v58 = vpack.c.bf16 %v2224_v56, %v2224_v56  ;;  %v2072_v59 = vpack.c.bf16 %v2288_v57, %v2288_v57 }
 0x11c   :  { %v734_v60 = vpop.f32.mrf.mxu0  ;;  %v990_v61 = vpop.f32.mrf.mxu1 }
 0x11d   :  { %1676 = vst.msk [vmem:[%s3155_s2 + $0x78] sm:$0xf] %vm1645_vm0, %v2008_v58  ;;  %1740 = vst.msk [vmem:[%s3155_s2 + $0x178] sm:$0xf] %vm1645_vm0, %v2072_v59  ;;  %v2006_v62 = vpack.c.bf16 %v734_v60, %v734_v60  ;;  %v2070_v63 = vpack.c.bf16 %v990_v61, %v990_v61 }
 0x11e   :  { %v2225_v0 = vpop.f32.mrf.mxu0  ;;  %v2289_v1 = vpop.f32.mrf.mxu1 }
 0x11f   :  { %1674 = vst.msk [vmem:[%s3155_s2 + $0x70] sm:$0xf] %vm1645_vm0, %v2006_v62  ;;  %1738 = vst.msk [vmem:[%s3155_s2 + $0x170] sm:$0xf] %vm1645_vm0, %v2070_v63  ;;  %v2009_v2 = vpack.c.bf16 %v2225_v0, %v2225_v0  ;;  %v2073_v3 = vpack.c.bf16 %v2289_v1, %v2289_v1 }
 0x120   :  { %v737_v4 = vpop.f32.mrf.mxu0  ;;  %v993_v5 = vpop.f32.mrf.mxu1 }
 0x121   :  { %1677 = vst.msk [vmem:[%s3155_s2 + $0x7c] sm:$0xf] %vm1645_vm0, %v2009_v2  ;;  %1741 = vst.msk [vmem:[%s3155_s2 + $0x17c] sm:$0xf] %vm1645_vm0, %v2073_v3  ;;  %v2007_v6 = vpack.c.bf16 %v737_v4, %v737_v4  ;;  %v2071_v7 = vpack.c.bf16 %v993_v5, %v993_v5 }
 0x122   :  { %v2228_v8 = vpop.f32.mrf.mxu0  ;;  %v2292_v9 = vpop.f32.mrf.mxu1 }
 0x123   :  { %1675 = vst.msk [vmem:[%s3155_s2 + $0x74] sm:$0xf] %vm1645_vm0, %v2007_v6  ;;  %1739 = vst.msk [vmem:[%s3155_s2 + $0x174] sm:$0xf] %vm1645_vm0, %v2071_v7  ;;  %v2012_v10 = vpack.c.bf16 %v2228_v8, %v2228_v8  ;;  %v2076_v11 = vpack.c.bf16 %v2292_v9, %v2292_v9 }
 0x124   :  { %v750_v12 = vpop.f32.mrf.mxu0  ;;  %v1006_v13 = vpop.f32.mrf.mxu1 }
 0x125   :  { %1680 = vst.msk [vmem:[%s3155_s2 + $0x88] sm:$0xf] %vm1645_vm0, %v2012_v10  ;;  %1744 = vst.msk [vmem:[%s3155_s2 + $0x188] sm:$0xf] %vm1645_vm0, %v2076_v11  ;;  %v2010_v14 = vpack.c.bf16 %v750_v12, %v750_v12  ;;  %v2074_v15 = vpack.c.bf16 %v1006_v13, %v1006_v13 }
 0x126   :  { %v2229_v16 = vpop.f32.mrf.mxu0  ;;  %v2293_v17 = vpop.f32.mrf.mxu1 }
 0x127   :  { %1678 = vst.msk [vmem:[%s3155_s2 + $0x80] sm:$0xf] %vm1645_vm0, %v2010_v14  ;;  %1742 = vst.msk [vmem:[%s3155_s2 + $0x180] sm:$0xf] %vm1645_vm0, %v2074_v15  ;;  %v2013_v18 = vpack.c.bf16 %v2229_v16, %v2229_v16  ;;  %v2077_v19 = vpack.c.bf16 %v2293_v17, %v2293_v17 }
 0x128   :  { %v753_v20 = vpop.f32.mrf.mxu0  ;;  %v1009_v21 = vpop.f32.mrf.mxu1 }
 0x129   :  { %1681 = vst.msk [vmem:[%s3155_s2 + $0x8c] sm:$0xf] %vm1645_vm0, %v2013_v18  ;;  %1745 = vst.msk [vmem:[%s3155_s2 + $0x18c] sm:$0xf] %vm1645_vm0, %v2077_v19  ;;  %v2011_v22 = vpack.c.bf16 %v753_v20, %v753_v20  ;;  %v2075_v23 = vpack.c.bf16 %v1009_v21, %v1009_v21 }
 0x12a   :  { %v2232_v24 = vpop.f32.mrf.mxu0  ;;  %v2296_v25 = vpop.f32.mrf.mxu1 }
 0x12b   :  { %1679 = vst.msk [vmem:[%s3155_s2 + $0x84] sm:$0xf] %vm1645_vm0, %v2011_v22  ;;  %1743 = vst.msk [vmem:[%s3155_s2 + $0x184] sm:$0xf] %vm1645_vm0, %v2075_v23  ;;  %v2016_v26 = vpack.c.bf16 %v2232_v24, %v2232_v24  ;;  %v2080_v27 = vpack.c.bf16 %v2296_v25, %v2296_v25 }
 0x12c   :  { %v766_v28 = vpop.f32.mrf.mxu0  ;;  %v1022_v29 = vpop.f32.mrf.mxu1 }
 0x12d   :  { %1684 = vst.msk [vmem:[%s3155_s2 + $0x98] sm:$0xf] %vm1645_vm0, %v2016_v26  ;;  %1748 = vst.msk [vmem:[%s3155_s2 + $0x198] sm:$0xf] %vm1645_vm0, %v2080_v27  ;;  %v2014_v30 = vpack.c.bf16 %v766_v28, %v766_v28  ;;  %v2078_v31 = vpack.c.bf16 %v1022_v29, %v1022_v29 }
 0x12e   :  { %v2233_v32 = vpop.f32.mrf.mxu0  ;;  %v2297_v33 = vpop.f32.mrf.mxu1 }
 0x12f   :  { %1682 = vst.msk [vmem:[%s3155_s2 + $0x90] sm:$0xf] %vm1645_vm0, %v2014_v30  ;;  %1746 = vst.msk [vmem:[%s3155_s2 + $0x190] sm:$0xf] %vm1645_vm0, %v2078_v31  ;;  %v2017_v34 = vpack.c.bf16 %v2233_v32, %v2233_v32  ;;  %v2081_v35 = vpack.c.bf16 %v2297_v33, %v2297_v33 }
 0x130   :  { %v769_v36 = vpop.f32.mrf.mxu0  ;;  %v1025_v37 = vpop.f32.mrf.mxu1 }
 0x131   :  { %1685 = vst.msk [vmem:[%s3155_s2 + $0x9c] sm:$0xf] %vm1645_vm0, %v2017_v34  ;;  %1749 = vst.msk [vmem:[%s3155_s2 + $0x19c] sm:$0xf] %vm1645_vm0, %v2081_v35  ;;  %v2015_v38 = vpack.c.bf16 %v769_v36, %v769_v36  ;;  %v2079_v39 = vpack.c.bf16 %v1025_v37, %v1025_v37 }
 0x132   :  { %v2236_v40 = vpop.f32.mrf.mxu0  ;;  %v2300_v41 = vpop.f32.mrf.mxu1 }
 0x133   :  { %1683 = vst.msk [vmem:[%s3155_s2 + $0x94] sm:$0xf] %vm1645_vm0, %v2015_v38  ;;  %1747 = vst.msk [vmem:[%s3155_s2 + $0x194] sm:$0xf] %vm1645_vm0, %v2079_v39  ;;  %v2020_v42 = vpack.c.bf16 %v2236_v40, %v2236_v40  ;;  %v2084_v43 = vpack.c.bf16 %v2300_v41, %v2300_v41 }
 0x134   :  { %v782_v44 = vpop.f32.mrf.mxu0  ;;  %v1038_v45 = vpop.f32.mrf.mxu1 }
 0x135   :  { %1688 = vst.msk [vmem:[%s3155_s2 + $0xa8] sm:$0xf] %vm1645_vm0, %v2020_v42  ;;  %1752 = vst.msk [vmem:[%s3155_s2 + $0x1a8] sm:$0xf] %vm1645_vm0, %v2084_v43  ;;  %v2018_v46 = vpack.c.bf16 %v782_v44, %v782_v44  ;;  %v2082_v47 = vpack.c.bf16 %v1038_v45, %v1038_v45 }
 0x136   :  { %v2237_v48 = vpop.f32.mrf.mxu0  ;;  %v2301_v49 = vpop.f32.mrf.mxu1 }
 0x137   :  { %1686 = vst.msk [vmem:[%s3155_s2 + $0xa0] sm:$0xf] %vm1645_vm0, %v2018_v46  ;;  %1750 = vst.msk [vmem:[%s3155_s2 + $0x1a0] sm:$0xf] %vm1645_vm0, %v2082_v47  ;;  %v2021_v50 = vpack.c.bf16 %v2237_v48, %v2237_v48  ;;  %v2085_v51 = vpack.c.bf16 %v2301_v49, %v2301_v49 }
 0x138   :  { %v785_v52 = vpop.f32.mrf.mxu0  ;;  %v1041_v53 = vpop.f32.mrf.mxu1 }
 0x139   :  { %1689 = vst.msk [vmem:[%s3155_s2 + $0xac] sm:$0xf] %vm1645_vm0, %v2021_v50  ;;  %1753 = vst.msk [vmem:[%s3155_s2 + $0x1ac] sm:$0xf] %vm1645_vm0, %v2085_v51  ;;  %v2019_v54 = vpack.c.bf16 %v785_v52, %v785_v52  ;;  %v2083_v55 = vpack.c.bf16 %v1041_v53, %v1041_v53 }
 0x13a   :  { %v2240_v56 = vpop.f32.mrf.mxu0  ;;  %v2304_v57 = vpop.f32.mrf.mxu1 }
 0x13b   :  { %1687 = vst.msk [vmem:[%s3155_s2 + $0xa4] sm:$0xf] %vm1645_vm0, %v2019_v54  ;;  %1751 = vst.msk [vmem:[%s3155_s2 + $0x1a4] sm:$0xf] %vm1645_vm0, %v2083_v55  ;;  %v2024_v58 = vpack.c.bf16 %v2240_v56, %v2240_v56  ;;  %v2088_v59 = vpack.c.bf16 %v2304_v57, %v2304_v57 }
 0x13c   :  { %v798_v60 = vpop.f32.mrf.mxu0  ;;  %v1054_v61 = vpop.f32.mrf.mxu1 }
 0x13d   :  { %1692 = vst.msk [vmem:[%s3155_s2 + $0xb8] sm:$0xf] %vm1645_vm0, %v2024_v58  ;;  %1756 = vst.msk [vmem:[%s3155_s2 + $0x1b8] sm:$0xf] %vm1645_vm0, %v2088_v59  ;;  %v2022_v62 = vpack.c.bf16 %v798_v60, %v798_v60  ;;  %v2086_v63 = vpack.c.bf16 %v1054_v61, %v1054_v61 }
 0x13e   :  { %v2241_v0 = vpop.f32.mrf.mxu0  ;;  %v2305_v1 = vpop.f32.mrf.mxu1 }
 0x13f   :  { %1690 = vst.msk [vmem:[%s3155_s2 + $0xb0] sm:$0xf] %vm1645_vm0, %v2022_v62  ;;  %1754 = vst.msk [vmem:[%s3155_s2 + $0x1b0] sm:$0xf] %vm1645_vm0, %v2086_v63  ;;  %v2025_v2 = vpack.c.bf16 %v2241_v0, %v2241_v0  ;;  %v2089_v3 = vpack.c.bf16 %v2305_v1, %v2305_v1 }
 0x140   :  { %v801_v4 = vpop.f32.mrf.mxu0  ;;  %v1057_v5 = vpop.f32.mrf.mxu1 }
 0x141   :  { %1693 = vst.msk [vmem:[%s3155_s2 + $0xbc] sm:$0xf] %vm1645_vm0, %v2025_v2  ;;  %1757 = vst.msk [vmem:[%s3155_s2 + $0x1bc] sm:$0xf] %vm1645_vm0, %v2089_v3  ;;  %v2023_v6 = vpack.c.bf16 %v801_v4, %v801_v4  ;;  %v2087_v7 = vpack.c.bf16 %v1057_v5, %v1057_v5 }
 0x142   :  { %v2244_v8 = vpop.f32.mrf.mxu0  ;;  %v2308_v9 = vpop.f32.mrf.mxu1 }
 0x143   :  { %1691 = vst.msk [vmem:[%s3155_s2 + $0xb4] sm:$0xf] %vm1645_vm0, %v2023_v6  ;;  %1755 = vst.msk [vmem:[%s3155_s2 + $0x1b4] sm:$0xf] %vm1645_vm0, %v2087_v7  ;;  %v2028_v10 = vpack.c.bf16 %v2244_v8, %v2244_v8  ;;  %v2092_v11 = vpack.c.bf16 %v2308_v9, %v2308_v9 }
 0x144   :  { %v814_v12 = vpop.f32.mrf.mxu0  ;;  %v1070_v13 = vpop.f32.mrf.mxu1 }
 0x145   :  { %1696 = vst.msk [vmem:[%s3155_s2 + $0xc8] sm:$0xf] %vm1645_vm0, %v2028_v10  ;;  %1760 = vst.msk [vmem:[%s3155_s2 + $0x1c8] sm:$0xf] %vm1645_vm0, %v2092_v11  ;;  %v2026_v14 = vpack.c.bf16 %v814_v12, %v814_v12  ;;  %v2090_v15 = vpack.c.bf16 %v1070_v13, %v1070_v13 }
 0x146   :  { %v2245_v16 = vpop.f32.mrf.mxu0  ;;  %v2309_v17 = vpop.f32.mrf.mxu1 }
 0x147   :  { %1694 = vst.msk [vmem:[%s3155_s2 + $0xc0] sm:$0xf] %vm1645_vm0, %v2026_v14  ;;  %1758 = vst.msk [vmem:[%s3155_s2 + $0x1c0] sm:$0xf] %vm1645_vm0, %v2090_v15  ;;  %v2029_v18 = vpack.c.bf16 %v2245_v16, %v2245_v16  ;;  %v2093_v19 = vpack.c.bf16 %v2309_v17, %v2309_v17 }
 0x148   :  { %v817_v20 = vpop.f32.mrf.mxu0  ;;  %v1073_v21 = vpop.f32.mrf.mxu1 }
 0x149   :  { %1697 = vst.msk [vmem:[%s3155_s2 + $0xcc] sm:$0xf] %vm1645_vm0, %v2029_v18  ;;  %1761 = vst.msk [vmem:[%s3155_s2 + $0x1cc] sm:$0xf] %vm1645_vm0, %v2093_v19  ;;  %v2027_v22 = vpack.c.bf16 %v817_v20, %v817_v20  ;;  %v2091_v23 = vpack.c.bf16 %v1073_v21, %v1073_v21 }
 0x14a   :  { %v2248_v24 = vpop.f32.mrf.mxu0  ;;  %v2312_v25 = vpop.f32.mrf.mxu1 }
 0x14b   :  { %1695 = vst.msk [vmem:[%s3155_s2 + $0xc4] sm:$0xf] %vm1645_vm0, %v2027_v22  ;;  %1759 = vst.msk [vmem:[%s3155_s2 + $0x1c4] sm:$0xf] %vm1645_vm0, %v2091_v23  ;;  %v2032_v26 = vpack.c.bf16 %v2248_v24, %v2248_v24  ;;  %v2096_v27 = vpack.c.bf16 %v2312_v25, %v2312_v25 }
 0x14c   :  { %v830_v28 = vpop.f32.mrf.mxu0  ;;  %v1086_v29 = vpop.f32.mrf.mxu1 }
 0x14d   :  { %1700 = vst.msk [vmem:[%s3155_s2 + $0xd8] sm:$0xf] %vm1645_vm0, %v2032_v26  ;;  %1764 = vst.msk [vmem:[%s3155_s2 + $0x1d8] sm:$0xf] %vm1645_vm0, %v2096_v27  ;;  %v2030_v30 = vpack.c.bf16 %v830_v28, %v830_v28  ;;  %v2094_v31 = vpack.c.bf16 %v1086_v29, %v1086_v29 }
 0x14e   :  { %v2249_v32 = vpop.f32.mrf.mxu0  ;;  %v2313_v33 = vpop.f32.mrf.mxu1 }
 0x14f   :  { %1698 = vst.msk [vmem:[%s3155_s2 + $0xd0] sm:$0xf] %vm1645_vm0, %v2030_v30  ;;  %1762 = vst.msk [vmem:[%s3155_s2 + $0x1d0] sm:$0xf] %vm1645_vm0, %v2094_v31  ;;  %v2033_v34 = vpack.c.bf16 %v2249_v32, %v2249_v32  ;;  %v2097_v35 = vpack.c.bf16 %v2313_v33, %v2313_v33 }
 0x150   :  { %v833_v36 = vpop.f32.mrf.mxu0  ;;  %v1089_v37 = vpop.f32.mrf.mxu1 }
 0x151   :  { %1701 = vst.msk [vmem:[%s3155_s2 + $0xdc] sm:$0xf] %vm1645_vm0, %v2033_v34  ;;  %1765 = vst.msk [vmem:[%s3155_s2 + $0x1dc] sm:$0xf] %vm1645_vm0, %v2097_v35  ;;  %v2031_v38 = vpack.c.bf16 %v833_v36, %v833_v36  ;;  %v2095_v39 = vpack.c.bf16 %v1089_v37, %v1089_v37 }
 0x152   :  { %v2252_v40 = vpop.f32.mrf.mxu0  ;;  %v2316_v41 = vpop.f32.mrf.mxu1 }
 0x153   :  { %1699 = vst.msk [vmem:[%s3155_s2 + $0xd4] sm:$0xf] %vm1645_vm0, %v2031_v38  ;;  %1763 = vst.msk [vmem:[%s3155_s2 + $0x1d4] sm:$0xf] %vm1645_vm0, %v2095_v39  ;;  %v2036_v42 = vpack.c.bf16 %v2252_v40, %v2252_v40  ;;  %v2100_v43 = vpack.c.bf16 %v2316_v41, %v2316_v41 }
 0x154   :  { %v846_v44 = vpop.f32.mrf.mxu0  ;;  %v1102_v45 = vpop.f32.mrf.mxu1 }
 0x155   :  { %1704 = vst.msk [vmem:[%s3155_s2 + $0xe8] sm:$0xf] %vm1645_vm0, %v2036_v42  ;;  %1768 = vst.msk [vmem:[%s3155_s2 + $0x1e8] sm:$0xf] %vm1645_vm0, %v2100_v43  ;;  %v2034_v46 = vpack.c.bf16 %v846_v44, %v846_v44  ;;  %v2098_v47 = vpack.c.bf16 %v1102_v45, %v1102_v45 }
 0x156   :  { %v2253_v48 = vpop.f32.mrf.mxu0  ;;  %v2317_v49 = vpop.f32.mrf.mxu1 }
 0x157   :  { %1702 = vst.msk [vmem:[%s3155_s2 + $0xe0] sm:$0xf] %vm1645_vm0, %v2034_v46  ;;  %1766 = vst.msk [vmem:[%s3155_s2 + $0x1e0] sm:$0xf] %vm1645_vm0, %v2098_v47  ;;  %v2037_v50 = vpack.c.bf16 %v2253_v48, %v2253_v48  ;;  %v2101_v51 = vpack.c.bf16 %v2317_v49, %v2317_v49 }
 0x158   :  { %v849_v52 = vpop.f32.mrf.mxu0  ;;  %v1105_v53 = vpop.f32.mrf.mxu1 }
 0x159   :  { %1705 = vst.msk [vmem:[%s3155_s2 + $0xec] sm:$0xf] %vm1645_vm0, %v2037_v50  ;;  %1769 = vst.msk [vmem:[%s3155_s2 + $0x1ec] sm:$0xf] %vm1645_vm0, %v2101_v51  ;;  %v2035_v54 = vpack.c.bf16 %v849_v52, %v849_v52  ;;  %v2099_v55 = vpack.c.bf16 %v1105_v53, %v1105_v53 }
 0x15a   :  { %v2256_v56 = vpop.f32.mrf.mxu0  ;;  %v2320_v57 = vpop.f32.mrf.mxu1 }
 0x15b   :  { %1703 = vst.msk [vmem:[%s3155_s2 + $0xe4] sm:$0xf] %vm1645_vm0, %v2035_v54  ;;  %1767 = vst.msk [vmem:[%s3155_s2 + $0x1e4] sm:$0xf] %vm1645_vm0, %v2099_v55  ;;  %v2040_v58 = vpack.c.bf16 %v2256_v56, %v2256_v56  ;;  %v2104_v59 = vpack.c.bf16 %v2320_v57, %v2320_v57 }
 0x15c   :  { %v862_v60 = vpop.f32.mrf.mxu0  ;;  %v1118_v61 = vpop.f32.mrf.mxu1 }
 0x15d   :  { %1708 = vst.msk [vmem:[%s3155_s2 + $0xf8] sm:$0xf] %vm1645_vm0, %v2040_v58  ;;  %1772 = vst.msk [vmem:[%s3155_s2 + $0x1f8] sm:$0xf] %vm1645_vm0, %v2104_v59  ;;  %v2038_v62 = vpack.c.bf16 %v862_v60, %v862_v60  ;;  %v2102_v63 = vpack.c.bf16 %v1118_v61, %v1118_v61 }
 0x15e   :  { %v2257_v0 = vpop.f32.mrf.mxu0  ;;  %v2321_v1 = vpop.f32.mrf.mxu1 }
 0x15f   :  { %1706 = vst.msk [vmem:[%s3155_s2 + $0xf0] sm:$0xf] %vm1645_vm0, %v2038_v62  ;;  %1770 = vst.msk [vmem:[%s3155_s2 + $0x1f0] sm:$0xf] %vm1645_vm0, %v2102_v63  ;;  %v2041_v2 = vpack.c.bf16 %v2257_v0, %v2257_v0  ;;  %v2105_v3 = vpack.c.bf16 %v2321_v1, %v2321_v1 }
 0x160   :  { %v865_v4 = vpop.f32.mrf.mxu0  ;;  %v1121_v5 = vpop.f32.mrf.mxu1 }
 0x161   :  { %1709 = vst.msk [vmem:[%s3155_s2 + $0xfc] sm:$0xf] %vm1645_vm0, %v2041_v2  ;;  %1773 = vst.msk [vmem:[%s3155_s2 + $0x1fc] sm:$0xf] %vm1645_vm0, %v2105_v3  ;;  %v2039_v6 = vpack.c.bf16 %v865_v4, %v865_v4  ;;  %v2103_v7 = vpack.c.bf16 %v1121_v5, %v1121_v5 }
 0x163   :  { %1707 = vst.msk [vmem:[%s3155_s2 + $0xf4] sm:$0xf] %vm1645_vm0, %v2039_v6  ;;  %1771 = vst.msk [vmem:[%s3155_s2 + $0x1f4] sm:$0xf] %vm1645_vm0, %v2103_v7 }

// kernel: wave_field_decoder_forward.15
= control target key start
LH: loop header
LB: loop body
LE: loop exit
PB: predicated region body
PF: predicated region fallthrough
CT: control target
= control target key end

     0   :  { %s441_s12 = smov 0   ;;  %s472_s0 = inlined_call_operand.vmem [shape: bf16[64,128], index: 0, kind: input, shape index: {}]   ;;  %s473_s1 = inlined_call_operand.vmem [shape: f32[64,1], index: 1, kind: input, shape index: {}]   ;;  %s474_s2 = inlined_call_operand.vmem [shape: f32[64,1], index: 2, kind: input, shape index: {}]   ;;  %s475_s3 = inlined_call_operand.vmem [shape: bf16[64,128], index: 3, kind: output, shape index: {}]  }
   0x1 LB: > { %s369_s13 = sadd.s32 4294967295, %s418_s12   ;;  %p373_p0 = scmp.ge.s32.totalorder %s418_s12, 1  ;;  %s418_s12 = sphi %s441_s12, %s13_s12  }
   0x2   : > { %p160_p1 = scmp.lt.s32.totalorder %s418_s12, 5 }
   0x4   : > { %p161_p2 = pnand %p373_p0, %p160_p1 }
   0x5   : > { %s374_s14 = sshll.u32 (!%p161_p2), %s369_s13, 1 }
   0x6   : > { %164 = sbr.rel (%p161_p2) target bundleno = 462 (0x1ce), region = 32  ;;  %p195_p3 = scmp.lt.s32.totalorder (!%p161_p2), %s374_s14, 7 }
   0xb   : > { %s477_s14 = smov (!%p195_p3, %s374_s14), 7  ;;  %v420_v11 = vmov 0  }
   0xc   : > { %s375_s15 = sshll.u32 %s477_s14, 2  ;;  %406 = vset.pattern.permute.xlu0 %v420_v11  ;;  %407 = vset.pattern.permute.xlu1 %v420_v11  ;;  %s377_s19 = sshll.u32 %s477_s14, 3 }
   0xd   : > { %s198_s18 = scalar_lea.vmem %s472_s0, %s375_s15  ;;  %s204_s22 = scalar_lea.vmem %s473_s1, %s377_s19 }
   0xe   : > { %v389_v0 = vld [vmem:[%s198_s18] sm:$0xff]   ;;  %v240_v21 = vld [vmem:[%s204_s22 + $0x8] sm:$0xff]  ;;  %s210_s25 = scalar_lea.vmem %s474_s2, %s377_s19  ;;  %s216_s28 = scalar_lea.vmem %s475_s3, %s375_s15 }
   0xf   : > { %v390_v1 = vunpack.c.l.bf16 %v389_v0  ;;  %v391_v2 = vunpack.c.h.bf16 %v389_v0  ;;  %v239_v18 = vld [vmem:[%s204_s22] sm:$0xff]  ;;  %v248_v28 = vld [vmem:[%s210_s25 + $0x8] sm:$0xff] }
  0x10   : > { %v247_v25 = vld [vmem:[%s210_s25] sm:$0xff] }
  0x11   : > { %222 = vadd.xlane.f32.xlu0 %v390_v1 }
  0x15   : > { %224 = vadd.xlane.f32.xlu0 %v391_v2 }
  0x9a   : > { %v223_v3 = vpop.xlane.xlu0 %222 }
  0x9b   : > { %v227_v4 = vmul.f32 0.0078125, %v223_v3 }
  0x9d   : > { %v229_v5 = vsub.f32 %v390_v1, %v227_v4 }
  0x9e   : > { %v225_v6 = vpop.xlane.xlu0 %224 }
  0x9f   : > { %v228_v7 = vmul.f32 0.0078125, %v225_v6  ;;  %v231_v8 = vmul.f32 %v229_v5, %v229_v5 }
  0xa1   : > { %233 = vadd.xlane.f32.xlu1 %v231_v8  ;;  %v230_v9 = vsub.f32 %v391_v2, %v228_v7 }
  0xa3   : > { %v232_v10 = vmul.f32 %v230_v9, %v230_v9 }
  0xa5   : > { %235 = vadd.xlane.f32.xlu1 %v232_v10 }
 0x12a   : > { %v234_v12 = vpop.xlane.xlu1 %233 }
 0x12b   : > { %v237_v13 = vmul.f32 0.0078125, %v234_v12 }
 0x12d   : > { %v241_v14 = vadd.f32 1e-05, %v237_v13 }
 0x12e   : > { %v236_v15 = vpop.xlane.xlu1 %235 }
 0x12f   : > { %408 = vrsqrt.f32 %v241_v14  ;;  %v238_v16 = vmul.f32 0.0078125, %v236_v15 }
 0x131   : > { %v242_v17 = vadd.f32 1e-05, %v238_v16 }
 0x133   : > { %410 = vrsqrt.f32 %v242_v17 }
 0x13c   : > { %v409_v19 = vpop.eup %408 }
 0x13d   : > { %v245_v20 = vmul.f32 %v409_v19, %v239_v18 }
 0x13f   : > { %255 = vperm.xlu0 %406, %v245_v20   ;;  %v249_v24 = vmul.f32 %v245_v20, %v227_v4 }
 0x140   : > { %v411_v22 = vpop.eup %410 }
 0x141   : > { %v246_v23 = vmul.f32 %v411_v22, %v240_v21  ;;  %v251_v26 = vsub.f32 %v247_v25, %v249_v24 }
 0x143   : > { %260 = vperm.xlu1 %407, %v246_v23   ;;  %v250_v27 = vmul.f32 %v246_v23, %v228_v7 }
 0x145   : > { %v252_v29 = vsub.f32 %v248_v28, %v250_v27 }
 0x147   : > { %267 = vperm.xlu1 %407, %v251_v26  }
 0x14b   : > { %272 = vperm.xlu1 %407, %v252_v29  }
 0x1ba   : > { %v256_v31 = vpop.permute.xlu0 %255 }
 0x1bb   : > { %v263_v33 = vmul.f32 %v390_v1, %v256_v31 }
 0x1be   : > { %v261_v30 = vpop.permute.xlu1 %260 }
 0x1bf   : > { %v264_v34 = vmul.f32 %v391_v2, %v261_v30 }
 0x1c2   : > { %v268_v32 = vpop.permute.xlu1 %267 }
 0x1c3   : > { %v275_v35 = vadd.f32 %v268_v32, %v263_v33 }
 0x1c5   : > { %v277_v38 = vmax.f32 %v275_v35, 0.0 }
 0x1c6   : > { %v273_v36 = vpop.permute.xlu1 %272 }
 0x1c7   : > { %v276_v37 = vadd.f32 %v273_v36, %v264_v34 }
 0x1c9   : > { %v278_v39 = vmax.f32 %v276_v37, 0.0 }
 0x1cb   : > { %v395_v40 = vpack.c.bf16 %v278_v39, %v277_v38 }
 0x1cd   : > { %396 = vst [vmem:[%s216_s28] sm:$0xff] %v395_v40  }
 0x1ce PF: > { %s13_s12 = sadd.s32 1, %s418_s12  }
 0x1cf   : > { %p10_p4 = scmp.ge.s32.totalorder %s13_s12, 6  }
 0x1d1   :  { %12 = sbr.rel (!%p10_p4) target bundleno = 1 (0x1), region = 68 }

// kernel: wave_field_decoder_forward.16
= control target key start
LH: loop header
LB: loop body
LE: loop exit
PB: predicated region body
PF: predicated region fallthrough
CT: control target
= control target key end

     0   :  { %vm268_vm0 = vcmask 523264   ;;  %s1768_s1 = inlined_call_operand.vmem [shape: bf16[64,128], index: 1, kind: input, shape index: {}]   ;;  %s1769_s0 = inlined_call_operand.vmem [shape: bf16[512,64], index: 0, kind: input, shape index: {}]   ;;  %s1770_s2 = inlined_call_operand.vmem [shape: bf16[512,128], index: 2, kind: output, shape index: {}]  }
   0x1   :  { %v1481_v0 = vld [vmem:[%s1768_s1 + $0x18] sm:$0xff]   ;;  %v1482_v1 = vld [vmem:[%s1768_s1 + $0x10] sm:$0xff]   ;;  %v1483_v2 = vld [vmem:[%s1768_s1 + $0x8] sm:$0xff]  }
   0x2   :  { %1401 = vmatprep.subr.bf16.mxu0 %v1481_v0  ;;  %1473 = vmatprep.subr.bf16.mxu1 %v1481_v0  ;;  %v1485_v3 = vld [vmem:[%s1769_s0] sm:$0xff]   ;;  %v1487_v6 = vld [vmem:[%s1769_s0 + $0x8] sm:$0xff]   ;;  %v1489_v8 = vld [vmem:[%s1769_s0 + $0x10] sm:$0xff]  }
   0x3   :  { %1402 = vmatpush3.bf16.msra.mxu0 %v1481_v0  ;;  %1477 = vmatpush3.bf16.msra.mxu1 %v1481_v0  ;;  %v1486_v4 = vld [vmem:[%s1769_s0 + $0x80] sm:$0xff]   ;;  %v1488_v7 = vld [vmem:[%s1769_s0 + $0x88] sm:$0xff]   ;;  %v1490_v9 = vld [vmem:[%s1769_s0 + $0x90] sm:$0xff]  }
   0x4   :  { %1403 = vmatprep.subr.bf16.mxu0 %v1482_v1  ;;  %1474 = vmatprep.subr.bf16.mxu1 %v1482_v1  ;;  %v1484_v5 = vld [vmem:[%s1768_s1] sm:$0xff]   ;;  %v1491_v10 = vld [vmem:[%s1769_s0 + $0x18] sm:$0xff]   ;;  %v1495_v14 = vld [vmem:[%s1769_s0 + $0x28] sm:$0xff]  }
   0x5   :  { %1409 = vmatprep.mubr.msk.bf16.mxu0 %vm268_vm0, %v1485_v3  ;;  %1441 = vmatprep.mubr.msk.bf16.mxu1 %vm268_vm0, %v1486_v4  ;;  %v1492_v11 = vld [vmem:[%s1769_s0 + $0x98] sm:$0xff]   ;;  %v1493_v12 = vld [vmem:[%s1769_s0 + $0x20] sm:$0xff]   ;;  %v1496_v15 = vld [vmem:[%s1769_s0 + $0xa8] sm:$0xff]  }
   0x6   :  { %v1494_v13 = vld [vmem:[%s1769_s0 + $0xa0] sm:$0xff]   ;;  %v1497_v16 = vld [vmem:[%s1769_s0 + $0x30] sm:$0xff]   ;;  %v1499_v18 = vld [vmem:[%s1769_s0 + $0x38] sm:$0xff]  }
   0x7   :  { %1404 = vmatpush3.bf16.msra.mxu0 %v1482_v1  ;;  %1478 = vmatpush3.bf16.msra.mxu1 %v1482_v1  ;;  %v1498_v17 = vld [vmem:[%s1769_s0 + $0xb0] sm:$0xff]   ;;  %v1500_v19 = vld [vmem:[%s1769_s0 + $0xb8] sm:$0xff]   ;;  %v1501_v20 = vld [vmem:[%s1769_s0 + $0x40] sm:$0xff]  }
   0x8   :  { %1405 = vmatprep.subr.bf16.mxu0 %v1483_v2  ;;  %1475 = vmatprep.subr.bf16.mxu1 %v1483_v2  ;;  %v1502_v21 = vld [vmem:[%s1769_s0 + $0xc0] sm:$0xff]   ;;  %v1503_v22 = vld [vmem:[%s1769_s0 + $0x48] sm:$0xff]   ;;  %v1505_v24 = vld [vmem:[%s1769_s0 + $0x50] sm:$0xff]  }
   0x9   :  { %v1504_v23 = vld [vmem:[%s1769_s0 + $0xc8] sm:$0xff]   ;;  %v1506_v25 = vld [vmem:[%s1769_s0 + $0xd0] sm:$0xff]   ;;  %v1507_v26 = vld [vmem:[%s1769_s0 + $0x58] sm:$0xff]  }
   0xa   :  { %v1508_v27 = vld [vmem:[%s1769_s0 + $0xd8] sm:$0xff]   ;;  %v1509_v28 = vld [vmem:[%s1769_s0 + $0x60] sm:$0xff]   ;;  %v1511_v30 = vld [vmem:[%s1769_s0 + $0x68] sm:$0xff]  }
   0xb   :  { %1406 = vmatpush3.bf16.msra.mxu0 %v1483_v2  ;;  %1479 = vmatpush3.bf16.msra.mxu1 %v1483_v2  ;;  %v1510_v29 = vld [vmem:[%s1769_s0 + $0xe0] sm:$0xff]   ;;  %v1512_v31 = vld [vmem:[%s1769_s0 + $0xe8] sm:$0xff]   ;;  %v1513_v32 = vld [vmem:[%s1769_s0 + $0x70] sm:$0xff]  }
   0xc   :  { %1407 = vmatprep.subr.bf16.mxu0 %v1484_v5  ;;  %1476 = vmatprep.subr.bf16.mxu1 %v1484_v5  ;;  %v1514_v33 = vld [vmem:[%s1769_s0 + $0xf0] sm:$0xff]   ;;  %v1515_v34 = vld [vmem:[%s1769_s0 + $0x78] sm:$0xff]  }
   0xd   :  { %v1516_v35 = vld [vmem:[%s1769_s0 + $0xf8] sm:$0xff]  }
   0xf   :  { %1408 = vmatpush3.bf16.msra.mxu0 %v1484_v5  ;;  %1480 = vmatpush3.bf16.msra.mxu1 %v1484_v5 }
  0x12   :  { %1410 = vmatmul.mubr.msk.bf16.vlgmr.msra.gmra.mxu0 %vm268_vm0, %v1487_v6  ;;  %1442 = vmatmul.mubr.msk.bf16.vlgmr.msra.gmra.mxu1 %vm268_vm0, %v1488_v7 }
  0x13   :  { %1413 = vmatprep.mubr.msk.bf16.mxu0 %vm268_vm0, %v1489_v8  ;;  %1445 = vmatprep.mubr.msk.bf16.mxu1 %vm268_vm0, %v1490_v9 }
  0x1a   :  { %1414 = vmatmul.mubr.msk.bf16.gmra.mxu0 %vm268_vm0, %v1491_v10  ;;  %1446 = vmatmul.mubr.msk.bf16.gmra.mxu1 %vm268_vm0, %v1492_v11 }
  0x1b   :  { %1417 = vmatprep.mubr.msk.bf16.mxu0 %vm268_vm0, %v1493_v12  ;;  %1449 = vmatprep.mubr.msk.bf16.mxu1 %vm268_vm0, %v1494_v13 }
  0x22   :  { %1418 = vmatmul.mubr.msk.bf16.gmra.mxu0 %vm268_vm0, %v1495_v14  ;;  %1450 = vmatmul.mubr.msk.bf16.gmra.mxu1 %vm268_vm0, %v1496_v15 }
  0x23   :  { %1421 = vmatprep.mubr.msk.bf16.mxu0 %vm268_vm0, %v1497_v16  ;;  %1453 = vmatprep.mubr.msk.bf16.mxu1 %vm268_vm0, %v1498_v17 }
  0x2a   :  { %1422 = vmatmul.mubr.msk.bf16.gmra.mxu0 %vm268_vm0, %v1499_v18  ;;  %1454 = vmatmul.mubr.msk.bf16.gmra.mxu1 %vm268_vm0, %v1500_v19 }
  0x2b   :  { %1425 = vmatprep.mubr.msk.bf16.mxu0 %vm268_vm0, %v1501_v20  ;;  %1457 = vmatprep.mubr.msk.bf16.mxu1 %vm268_vm0, %v1502_v21 }
  0x32   :  { %1426 = vmatmul.mubr.msk.bf16.gmra.mxu0 %vm268_vm0, %v1503_v22  ;;  %1458 = vmatmul.mubr.msk.bf16.gmra.mxu1 %vm268_vm0, %v1504_v23 }
  0x33   :  { %1429 = vmatprep.mubr.msk.bf16.mxu0 %vm268_vm0, %v1505_v24  ;;  %1461 = vmatprep.mubr.msk.bf16.mxu1 %vm268_vm0, %v1506_v25 }
  0x3a   :  { %1430 = vmatmul.mubr.msk.bf16.gmra.mxu0 %vm268_vm0, %v1507_v26  ;;  %1462 = vmatmul.mubr.msk.bf16.gmra.mxu1 %vm268_vm0, %v1508_v27 }
  0x3b   :  { %1433 = vmatprep.mubr.msk.bf16.mxu0 %vm268_vm0, %v1509_v28  ;;  %1465 = vmatprep.mubr.msk.bf16.mxu1 %vm268_vm0, %v1510_v29 }
  0x42   :  { %1434 = vmatmul.mubr.msk.bf16.gmra.mxu0 %vm268_vm0, %v1511_v30  ;;  %1466 = vmatmul.mubr.msk.bf16.gmra.mxu1 %vm268_vm0, %v1512_v31 }
  0x43   :  { %1437 = vmatprep.mubr.msk.bf16.mxu0 %vm268_vm0, %v1513_v32  ;;  %1469 = vmatprep.mubr.msk.bf16.mxu1 %vm268_vm0, %v1514_v33 }
  0x4a   :  { %1438 = vmatmul.mubr.msk.bf16.gmra.mxu0 %vm268_vm0, %v1515_v34  ;;  %1470 = vmatmul.mubr.msk.bf16.gmra.mxu1 %vm268_vm0, %v1516_v35 }
  0xd2   :  { %v1411_v36 = vpop.f32.mrf.mxu0  ;;  %v1443_v37 = vpop.f32.mrf.mxu1 }
  0xd4   :  { %v399_v38 = vpop.f32.mrf.mxu0  ;;  %v527_v39 = vpop.f32.mrf.mxu1 }
  0xd6   :  { %v1412_v40 = vpop.f32.mrf.mxu0  ;;  %v1444_v41 = vpop.f32.mrf.mxu1 }
  0xd7   :  { %v1182_v42 = vpack.c.bf16 %v1412_v40, %v1411_v36  ;;  %v1262_v43 = vpack.c.bf16 %v1444_v41, %v1443_v37 }
  0xd8   :  { %v402_v44 = vpop.f32.mrf.mxu0  ;;  %v530_v45 = vpop.f32.mrf.mxu1 }
  0xd9   :  { %1334 = vst [vmem:[%s1770_s2 + $0x8] sm:$0xff] %v1182_v42   ;;  %1350 = vst [vmem:[%s1770_s2 + $0x88] sm:$0xff] %v1262_v43   ;;  %v1177_v46 = vpack.c.bf16 %v402_v44, %v399_v38  ;;  %v1257_v47 = vpack.c.bf16 %v530_v45, %v527_v39 }
  0xda   :  { %v1415_v48 = vpop.f32.mrf.mxu0  ;;  %v1447_v49 = vpop.f32.mrf.mxu1 }
  0xdb   :  { %1178 = vst [vmem:[%s1770_s2] sm:$0xff] %v1177_v46   ;;  %1349 = vst [vmem:[%s1770_s2 + $0x80] sm:$0xff] %v1257_v47  }
  0xdc   :  { %v415_v50 = vpop.f32.mrf.mxu0  ;;  %v543_v51 = vpop.f32.mrf.mxu1 }
  0xde   :  { %v1416_v52 = vpop.f32.mrf.mxu0  ;;  %v1448_v53 = vpop.f32.mrf.mxu1 }
  0xdf   :  { %v1192_v54 = vpack.c.bf16 %v1416_v52, %v1415_v48  ;;  %v1272_v55 = vpack.c.bf16 %v1448_v53, %v1447_v49 }
  0xe0   :  { %v418_v56 = vpop.f32.mrf.mxu0  ;;  %v546_v57 = vpop.f32.mrf.mxu1 }
  0xe1   :  { %1336 = vst [vmem:[%s1770_s2 + $0x18] sm:$0xff] %v1192_v54   ;;  %1352 = vst [vmem:[%s1770_s2 + $0x98] sm:$0xff] %v1272_v55   ;;  %v1187_v58 = vpack.c.bf16 %v418_v56, %v415_v50  ;;  %v1267_v59 = vpack.c.bf16 %v546_v57, %v543_v51 }
  0xe2   :  { %v1419_v60 = vpop.f32.mrf.mxu0  ;;  %v1451_v61 = vpop.f32.mrf.mxu1 }
  0xe3   :  { %1335 = vst [vmem:[%s1770_s2 + $0x10] sm:$0xff] %v1187_v58   ;;  %1351 = vst [vmem:[%s1770_s2 + $0x90] sm:$0xff] %v1267_v59  }
  0xe4   :  { %v431_v62 = vpop.f32.mrf.mxu0  ;;  %v559_v63 = vpop.f32.mrf.mxu1 }
  0xe6   :  { %v1420_v0 = vpop.f32.mrf.mxu0  ;;  %v1452_v1 = vpop.f32.mrf.mxu1 }
  0xe7   :  { %v1202_v2 = vpack.c.bf16 %v1420_v0, %v1419_v60  ;;  %v1282_v3 = vpack.c.bf16 %v1452_v1, %v1451_v61 }
  0xe8   :  { %v434_v4 = vpop.f32.mrf.mxu0  ;;  %v562_v5 = vpop.f32.mrf.mxu1 }
  0xe9   :  { %1338 = vst [vmem:[%s1770_s2 + $0x28] sm:$0xff] %v1202_v2   ;;  %1354 = vst [vmem:[%s1770_s2 + $0xa8] sm:$0xff] %v1282_v3   ;;  %v1197_v6 = vpack.c.bf16 %v434_v4, %v431_v62  ;;  %v1277_v7 = vpack.c.bf16 %v562_v5, %v559_v63 }
  0xea   :  { %v1423_v8 = vpop.f32.mrf.mxu0  ;;  %v1455_v9 = vpop.f32.mrf.mxu1 }
  0xeb   :  { %1337 = vst [vmem:[%s1770_s2 + $0x20] sm:$0xff] %v1197_v6   ;;  %1353 = vst [vmem:[%s1770_s2 + $0xa0] sm:$0xff] %v1277_v7  }
  0xec   :  { %v447_v10 = vpop.f32.mrf.mxu0  ;;  %v575_v11 = vpop.f32.mrf.mxu1 }
  0xee   :  { %v1424_v12 = vpop.f32.mrf.mxu0  ;;  %v1456_v13 = vpop.f32.mrf.mxu1 }
  0xef   :  { %v1212_v14 = vpack.c.bf16 %v1424_v12, %v1423_v8  ;;  %v1292_v15 = vpack.c.bf16 %v1456_v13, %v1455_v9 }
  0xf0   :  { %v450_v16 = vpop.f32.mrf.mxu0  ;;  %v578_v17 = vpop.f32.mrf.mxu1 }
  0xf1   :  { %1340 = vst [vmem:[%s1770_s2 + $0x38] sm:$0xff] %v1212_v14   ;;  %1356 = vst [vmem:[%s1770_s2 + $0xb8] sm:$0xff] %v1292_v15   ;;  %v1207_v18 = vpack.c.bf16 %v450_v16, %v447_v10  ;;  %v1287_v19 = vpack.c.bf16 %v578_v17, %v575_v11 }
  0xf2   :  { %v1427_v20 = vpop.f32.mrf.mxu0  ;;  %v1459_v21 = vpop.f32.mrf.mxu1 }
  0xf3   :  { %1339 = vst [vmem:[%s1770_s2 + $0x30] sm:$0xff] %v1207_v18   ;;  %1355 = vst [vmem:[%s1770_s2 + $0xb0] sm:$0xff] %v1287_v19  }
  0xf4   :  { %v463_v22 = vpop.f32.mrf.mxu0  ;;  %v591_v23 = vpop.f32.mrf.mxu1 }
  0xf6   :  { %v1428_v24 = vpop.f32.mrf.mxu0  ;;  %v1460_v25 = vpop.f32.mrf.mxu1 }
  0xf7   :  { %v1222_v26 = vpack.c.bf16 %v1428_v24, %v1427_v20  ;;  %v1302_v27 = vpack.c.bf16 %v1460_v25, %v1459_v21 }
  0xf8   :  { %v466_v28 = vpop.f32.mrf.mxu0  ;;  %v594_v29 = vpop.f32.mrf.mxu1 }
  0xf9   :  { %1342 = vst [vmem:[%s1770_s2 + $0x48] sm:$0xff] %v1222_v26   ;;  %1358 = vst [vmem:[%s1770_s2 + $0xc8] sm:$0xff] %v1302_v27   ;;  %v1217_v30 = vpack.c.bf16 %v466_v28, %v463_v22  ;;  %v1297_v31 = vpack.c.bf16 %v594_v29, %v591_v23 }
  0xfa   :  { %v1431_v32 = vpop.f32.mrf.mxu0  ;;  %v1463_v33 = vpop.f32.mrf.mxu1 }
  0xfb   :  { %1341 = vst [vmem:[%s1770_s2 + $0x40] sm:$0xff] %v1217_v30   ;;  %1357 = vst [vmem:[%s1770_s2 + $0xc0] sm:$0xff] %v1297_v31  }
  0xfc   :  { %v479_v34 = vpop.f32.mrf.mxu0  ;;  %v607_v35 = vpop.f32.mrf.mxu1 }
  0xfe   :  { %v1432_v36 = vpop.f32.mrf.mxu0  ;;  %v1464_v37 = vpop.f32.mrf.mxu1 }
  0xff   :  { %v1232_v38 = vpack.c.bf16 %v1432_v36, %v1431_v32  ;;  %v1312_v39 = vpack.c.bf16 %v1464_v37, %v1463_v33 }
 0x100   :  { %v482_v40 = vpop.f32.mrf.mxu0  ;;  %v610_v41 = vpop.f32.mrf.mxu1 }
 0x101   :  { %1344 = vst [vmem:[%s1770_s2 + $0x58] sm:$0xff] %v1232_v38   ;;  %1360 = vst [vmem:[%s1770_s2 + $0xd8] sm:$0xff] %v1312_v39   ;;  %v1227_v42 = vpack.c.bf16 %v482_v40, %v479_v34  ;;  %v1307_v43 = vpack.c.bf16 %v610_v41, %v607_v35 }
 0x102   :  { %v1435_v44 = vpop.f32.mrf.mxu0  ;;  %v1467_v45 = vpop.f32.mrf.mxu1 }
 0x103   :  { %1343 = vst [vmem:[%s1770_s2 + $0x50] sm:$0xff] %v1227_v42   ;;  %1359 = vst [vmem:[%s1770_s2 + $0xd0] sm:$0xff] %v1307_v43  }
 0x104   :  { %v495_v46 = vpop.f32.mrf.mxu0  ;;  %v623_v47 = vpop.f32.mrf.mxu1 }
 0x106   :  { %v1436_v48 = vpop.f32.mrf.mxu0  ;;  %v1468_v49 = vpop.f32.mrf.mxu1 }
 0x107   :  { %v1242_v50 = vpack.c.bf16 %v1436_v48, %v1435_v44  ;;  %v1322_v51 = vpack.c.bf16 %v1468_v49, %v1467_v45 }
 0x108   :  { %v498_v52 = vpop.f32.mrf.mxu0  ;;  %v626_v53 = vpop.f32.mrf.mxu1 }
 0x109   :  { %1346 = vst [vmem:[%s1770_s2 + $0x68] sm:$0xff] %v1242_v50   ;;  %1362 = vst [vmem:[%s1770_s2 + $0xe8] sm:$0xff] %v1322_v51   ;;  %v1237_v54 = vpack.c.bf16 %v498_v52, %v495_v46  ;;  %v1317_v55 = vpack.c.bf16 %v626_v53, %v623_v47 }
 0x10a   :  { %v1439_v56 = vpop.f32.mrf.mxu0  ;;  %v1471_v57 = vpop.f32.mrf.mxu1 }
 0x10b   :  { %1345 = vst [vmem:[%s1770_s2 + $0x60] sm:$0xff] %v1237_v54   ;;  %1361 = vst [vmem:[%s1770_s2 + $0xe0] sm:$0xff] %v1317_v55  }
 0x10c   :  { %v511_v58 = vpop.f32.mrf.mxu0  ;;  %v639_v59 = vpop.f32.mrf.mxu1 }
 0x10e   :  { %v1440_v60 = vpop.f32.mrf.mxu0  ;;  %v1472_v61 = vpop.f32.mrf.mxu1 }
 0x10f   :  { %v1252_v62 = vpack.c.bf16 %v1440_v60, %v1439_v56  ;;  %v1332_v63 = vpack.c.bf16 %v1472_v61, %v1471_v57 }
 0x110   :  { %v514_v0 = vpop.f32.mrf.mxu0  ;;  %v642_v1 = vpop.f32.mrf.mxu1 }
 0x111   :  { %1348 = vst [vmem:[%s1770_s2 + $0x78] sm:$0xff] %v1252_v62   ;;  %1364 = vst [vmem:[%s1770_s2 + $0xf8] sm:$0xff] %v1332_v63   ;;  %v1247_v2 = vpack.c.bf16 %v514_v0, %v511_v58  ;;  %v1327_v3 = vpack.c.bf16 %v642_v1, %v639_v59 }
 0x113   :  { %1347 = vst [vmem:[%s1770_s2 + $0x70] sm:$0xff] %v1247_v2   ;;  %1363 = vst [vmem:[%s1770_s2 + $0xf0] sm:$0xff] %v1327_v3  }

// kernel: wave_field_decoder_forward.17
= control target key start
LH: loop header
LB: loop body
LE: loop exit
PB: predicated region body
PF: predicated region fallthrough
CT: control target
= control target key end

     0   :  { %s515_s12 = smov 0   ;;  %s586_s0 = inlined_call_operand.vmem [shape: bf16[32,512], index: 0, kind: input, shape index: {}]   ;;  %s587_s1 = inlined_call_operand.vmem [shape: f32[32,1], index: 1, kind: input, shape index: {}]   ;;  %s588_s2 = inlined_call_operand.vmem [shape: f32[32,1], index: 2, kind: input, shape index: {}]   ;;  %s589_s3 = inlined_call_operand.vmem [shape: bf16[32,512], index: 3, kind: output, shape index: {}]  }
   0x1 LB: > { %s444_s13 = sadd.s32 4294967295, %s492_s12   ;;  %p448_p0 = scmp.ge.s32.totalorder %s492_s12, 1  ;;  %s492_s12 = sphi %s515_s12, %s13_s12  }
   0x2   : > { %p161_p1 = scmp.lt.s32.totalorder %s492_s12, 3 }
   0x4   : > { %p162_p2 = pnand %p448_p0, %p161_p1 }
   0x5   : > { %s449_s14 = sshll.u32 (!%p162_p2), %s444_s13, 1 }
   0x6   : > { %165 = sbr.rel (%p162_p2) target bundleno = 475 (0x1db), region = 32  ;;  %p198_p3 = scmp.lt.s32.totalorder (!%p162_p2), %s449_s14, 3 }
   0xb   : > { %s591_s14 = smov (!%p198_p3, %s449_s14), 3  ;;  %v494_v44 = vmov 0  }
   0xc   : > { %s465_s15 = sshll.u32 %s591_s14, 4  ;;  %480 = vset.pattern.permute.xlu0 %v494_v44  ;;  %481 = vset.pattern.permute.xlu1 %v494_v44  ;;  %s453_s19 = sshll.u32 %s591_s14, 3 }
   0xd   : > { %s202_s18 = scalar_lea.vmem %s586_s0, %s465_s15  ;;  %s208_s22 = scalar_lea.vmem %s587_s1, %s453_s19 }
   0xe   : > { %v223_v0 = vld [vmem:[%s202_s18] sm:$0xff]  ;;  %v224_v1 = vld [vmem:[%s202_s18 + $0x8] sm:$0xff]  ;;  %v225_v2 = vld [vmem:[%s202_s18 + $0x10] sm:$0xff]  ;;  %s214_s25 = scalar_lea.vmem %s588_s2, %s453_s19  ;;  %s221_s28 = scalar_lea.vmem %s589_s3, %s465_s15 }
   0xf   : > { %v531_v3 = vunpack.c.l.bf16 %v223_v0  ;;  %v533_v4 = vunpack.c.h.bf16 %v223_v0  ;;  %v535_v5 = vunpack.c.l.bf16 %v224_v1  ;;  %v226_v6 = vld [vmem:[%s202_s18 + $0x18] sm:$0xff]  ;;  %v537_v7 = vunpack.c.l.bf16 %v225_v2  ;;  %v276_v51 = vld [vmem:[%s208_s22] sm:$0xff]  ;;  %v277_v54 = vld [vmem:[%s208_s22 + $0x8] sm:$0xff] }
  0x10   : > { %v539_v8 = vunpack.c.h.bf16 %v225_v2  ;;  %v541_v9 = vunpack.c.l.bf16 %v226_v6  ;;  %v543_v10 = vunpack.c.h.bf16 %v224_v1  ;;  %v550_v14 = vunpack.c.h.bf16 %v226_v6  ;;  %v284_v58 = vld [vmem:[%s214_s25] sm:$0xff]  ;;  %v285_v61 = vld [vmem:[%s214_s25 + $0x8] sm:$0xff] }
  0x11   : > { %v235_v11 = vadd.f32 %v533_v4, %v531_v3 }
  0x12   : > { %v240_v12 = vadd.f32 %v539_v8, %v537_v7 }
  0x13   : > { %v236_v13 = vadd.f32 %v235_v11, %v535_v5 }
  0x14   : > { %v241_v15 = vadd.f32 %v240_v12, %v541_v9 }
  0x15   : > { %v237_v16 = vadd.f32 %v236_v13, %v543_v10 }
  0x16   : > { %v242_v17 = vadd.f32 %v241_v15, %v550_v14 }
  0x17   : > { %238 = vadd.xlane.f32.xlu0 %v237_v16 }
  0x1b   : > { %243 = vadd.xlane.f32.xlu0 %v242_v17 }
  0xa0   : > { %v239_v18 = vpop.xlane.xlu0 %238 }
  0xa1   : > { %v246_v19 = vmul.f32 0.001953125, %v239_v18 }
  0xa3   : > { %v248_v20 = vsub.f32 %v531_v3, %v246_v19  ;;  %v249_v21 = vsub.f32 %v533_v4, %v246_v19  ;;  %v250_v22 = vsub.f32 %v535_v5, %v246_v19  ;;  %v251_v24 = vsub.f32 %v543_v10, %v246_v19 }
  0xa4   : > { %v244_v23 = vpop.xlane.xlu0 %243 }
  0xa5   : > { %v247_v25 = vmul.f32 0.001953125, %v244_v23  ;;  %v256_v26 = vmul.f32 %v248_v20, %v248_v20  ;;  %v257_v27 = vmul.f32 %v249_v21, %v249_v21  ;;  %v258_v28 = vmul.f32 %v250_v22, %v250_v22 }
  0xa6   : > { %v259_v33 = vmul.f32 %v251_v24, %v251_v24 }
  0xa7   : > { %v264_v29 = vadd.f32 %v257_v27, %v256_v26  ;;  %v252_v30 = vsub.f32 %v537_v7, %v247_v25  ;;  %v253_v31 = vsub.f32 %v539_v8, %v247_v25  ;;  %v254_v32 = vsub.f32 %v541_v9, %v247_v25 }
  0xa8   : > { %v255_v35 = vsub.f32 %v550_v14, %v247_v25 }
  0xa9   : > { %v265_v34 = vadd.f32 %v264_v29, %v258_v28  ;;  %v260_v36 = vmul.f32 %v252_v30, %v252_v30  ;;  %v261_v37 = vmul.f32 %v253_v31, %v253_v31  ;;  %v262_v39 = vmul.f32 %v254_v32, %v254_v32 }
  0xaa   : > { %v263_v41 = vmul.f32 %v255_v35, %v255_v35 }
  0xab   : > { %v266_v38 = vadd.f32 %v265_v34, %v259_v33  ;;  %v269_v40 = vadd.f32 %v261_v37, %v260_v36 }
  0xad   : > { %267 = vadd.xlane.f32.xlu1 %v266_v38  ;;  %v270_v42 = vadd.f32 %v269_v40, %v262_v39 }
  0xaf   : > { %v271_v43 = vadd.f32 %v270_v42, %v263_v41 }
  0xb1   : > { %272 = vadd.xlane.f32.xlu1 %v271_v43 }
 0x136   : > { %v268_v45 = vpop.xlane.xlu1 %267 }
 0x137   : > { %v274_v46 = vmul.f32 0.001953125, %v268_v45 }
 0x139   : > { %v278_v47 = vadd.f32 1e-05, %v274_v46 }
 0x13a   : > { %v273_v48 = vpop.xlane.xlu1 %272 }
 0x13b   : > { %482 = vrsqrt.f32 %v278_v47  ;;  %v275_v49 = vmul.f32 0.001953125, %v273_v48 }
 0x13d   : > { %v279_v50 = vadd.f32 1e-05, %v275_v49 }
 0x13f   : > { %484 = vrsqrt.f32 %v279_v50 }
 0x148   : > { %v483_v52 = vpop.eup %482 }
 0x149   : > { %v282_v53 = vmul.f32 %v483_v52, %v276_v51 }
 0x14b   : > { %292 = vperm.xlu0 %480, %v282_v53   ;;  %v286_v57 = vmul.f32 %v282_v53, %v246_v19 }
 0x14c   : > { %v485_v55 = vpop.eup %484 }
 0x14d   : > { %v283_v56 = vmul.f32 %v485_v55, %v277_v54  ;;  %v288_v59 = vsub.f32 %v284_v58, %v286_v57 }
 0x14f   : > { %297 = vperm.xlu1 %481, %v283_v56   ;;  %v287_v60 = vmul.f32 %v283_v56, %v247_v25 }
 0x151   : > { %v289_v62 = vsub.f32 %v285_v61, %v287_v60 }
 0x153   : > { %310 = vperm.xlu1 %481, %v288_v59  }
 0x157   : > { %315 = vperm.xlu1 %481, %v289_v62  }
 0x1c6   : > { %v293_v63 = vpop.permute.xlu0 %292 }
 0x1c7   : > { %v300_v1 = vmul.f32 %v293_v63, %v531_v3  ;;  %v301_v2 = vmul.f32 %v293_v63, %v533_v4  ;;  %v302_v6 = vmul.f32 %v293_v63, %v535_v5  ;;  %v303_v11 = vmul.f32 %v293_v63, %v543_v10 }
 0x1ca   : > { %v298_v0 = vpop.permute.xlu1 %297 }
 0x1cb   : > { %v304_v18 = vmul.f32 %v298_v0, %v537_v7  ;;  %v305_v19 = vmul.f32 %v298_v0, %v539_v8  ;;  %v306_v3 = vmul.f32 %v298_v0, %v541_v9  ;;  %v307_v4 = vmul.f32 %v298_v0, %v550_v14 }
 0x1ce   : > { %v311_v12 = vpop.permute.xlu1 %310 }
 0x1cf   : > { %v318_v13 = vadd.f32 %v311_v12, %v300_v1  ;;  %v319_v15 = vadd.f32 %v311_v12, %v301_v2  ;;  %v320_v16 = vadd.f32 %v311_v12, %v302_v6  ;;  %v321_v17 = vadd.f32 %v311_v12, %v303_v11 }
 0x1d1   : > { %v326_v20 = vmax.f32 %v318_v13, 0.0  ;;  %v327_v21 = vmax.f32 %v319_v15, 0.0  ;;  %v328_v22 = vmax.f32 %v320_v16, 0.0  ;;  %v329_v23 = vmax.f32 %v321_v17, 0.0 }
 0x1d2   : > { %v316_v5 = vpop.permute.xlu1 %315 }
 0x1d3   : > { %v467_v10 = vpack.c.bf16 %v327_v21, %v326_v20  ;;  %v468_v24 = vpack.c.bf16 %v329_v23, %v328_v22  ;;  %v322_v25 = vadd.f32 %v316_v5, %v304_v18  ;;  %v323_v7 = vadd.f32 %v316_v5, %v305_v19 }
 0x1d4   : > { %v324_v26 = vadd.f32 %v316_v5, %v306_v3  ;;  %v325_v8 = vadd.f32 %v316_v5, %v307_v4 }
 0x1d5   : > { %358 = vst [vmem:[%s221_s28] sm:$0xff] %v467_v10  ;;  %359 = vst [vmem:[%s221_s28 + $0x8] sm:$0xff] %v468_v24  ;;  %v330_v27 = vmax.f32 %v322_v25, 0.0  ;;  %v331_v28 = vmax.f32 %v323_v7, 0.0 }
 0x1d6   : > { %v332_v29 = vmax.f32 %v324_v26, 0.0  ;;  %v333_v30 = vmax.f32 %v325_v8, 0.0 }
 0x1d7   : > { %v469_v31 = vpack.c.bf16 %v331_v28, %v330_v27 }
 0x1d8   : > { %v470_v32 = vpack.c.bf16 %v333_v30, %v332_v29 }
 0x1d9   : > { %360 = vst [vmem:[%s221_s28 + $0x10] sm:$0xff] %v469_v31 }
 0x1da   : > { %361 = vst [vmem:[%s221_s28 + $0x18] sm:$0xff] %v470_v32 }
 0x1db PF: > { %s13_s12 = sadd.s32 1, %s492_s12  }
 0x1dc   : > { %p10_p4 = scmp.ge.s32.totalorder %s13_s12, 4  }
 0x1de   :  { %12 = sbr.rel (!%p10_p4) target bundleno = 1 (0x1), region = 68 }

// kernel: wave_field_decoder_forward.18
= control target key start
LH: loop header
LB: loop body
LE: loop exit
PB: predicated region body
PF: predicated region fallthrough
CT: control target
= control target key end

     0   :  { %v1272_v1 = vmov 0   ;;  %vm172_vm0 = vcmask 261120   ;;  %s1616_s1 = inlined_call_operand.vmem [shape: bf16[32,512], index: 1, kind: input, shape index: {}]   ;;  %s1617_s0 = inlined_call_operand.vmem [shape: bf16[256,32], index: 0, kind: input, shape index: {}]   ;;  %s1618_s2 = inlined_call_operand.vmem [shape: bf16[256,512], index: 2, kind: output, shape index: {}]  }
   0x1   :  { %v1244_v0 = vld [vmem:[%s1616_s1 + $0x24] ss:$16 sps:$4 sm:$0xff]   ;;  %253 = vmatprep.mubr.bf16.mxu0 %v1272_v1  ;;  %446 = vmatprep.mubr.bf16.mxu1 %v1272_v1  ;;  %v1246_v2 = vld [vmem:[%s1616_s1 + $0x2c] ss:$16 sps:$4 sm:$0xff]   ;;  %v1248_v3 = vld [vmem:[%s1616_s1 + $0x20] ss:$16 sps:$4 sm:$0xff]  }
   0x2   :  { %233 = vmatprep.subr.bf16.mxu0 %v1244_v0  ;;  %v1249_v4 = vld [vmem:[%s1616_s1 + $0x28] ss:$16 sps:$4 sm:$0xff]   ;;  %426 = vmatprep.subr.bf16.mxu1 %v1246_v2  ;;  %v1250_v5 = vld [vmem:[%s1616_s1 + $0x4] ss:$16 sps:$4 sm:$0xff]   ;;  %v1252_v6 = vld [vmem:[%s1616_s1 + $0xc] ss:$16 sps:$4 sm:$0xff]  }
   0x3   :  { %234 = vmatpush1.bf16.msra.mxu0 %v1248_v3  ;;  %427 = vmatpush1.bf16.msra.mxu1 %v1249_v4  ;;  %v1254_v7 = vld [vmem:[%s1616_s1] ss:$16 sps:$4 sm:$0xff]   ;;  %v1255_v8 = vld [vmem:[%s1616_s1 + $0x8] ss:$16 sps:$4 sm:$0xff]  }
   0x4   :  { %235 = vmatprep.subr.bf16.mxu0 %v1250_v5  ;;  %428 = vmatprep.subr.bf16.mxu1 %v1252_v6  ;;  %v1256_v9 = vld [vmem:[%s1617_s0] sm:$0xff]   ;;  %v1257_v10 = vld [vmem:[%s1617_s0 + $0x8] sm:$0xff]   ;;  %v1258_v11 = vld [vmem:[%s1617_s0 + $0x10] sm:$0xff]  }
   0x5   :  { %v1259_v12 = vld [vmem:[%s1617_s0 + $0x18] sm:$0xff]   ;;  %v1260_v13 = vld [vmem:[%s1617_s0 + $0x20] sm:$0xff]   ;;  %v1261_v14 = vld [vmem:[%s1617_s0 + $0x28] sm:$0xff]  }
   0x6   :  { %v1262_v15 = vld [vmem:[%s1617_s0 + $0x30] sm:$0xff]   ;;  %v1263_v16 = vld [vmem:[%s1617_s0 + $0x38] sm:$0xff]   ;;  %v1264_v17 = vld [vmem:[%s1617_s0 + $0x40] sm:$0xff]  }
   0x7   :  { %236 = vmatpush1.bf16.msra.mxu0 %v1254_v7  ;;  %429 = vmatpush1.bf16.msra.mxu1 %v1255_v8  ;;  %v1265_v18 = vld [vmem:[%s1617_s0 + $0x48] sm:$0xff]   ;;  %v1266_v19 = vld [vmem:[%s1617_s0 + $0x50] sm:$0xff]   ;;  %v1267_v20 = vld [vmem:[%s1617_s0 + $0x58] sm:$0xff]  }
   0x8   :  { %v1268_v21 = vld [vmem:[%s1617_s0 + $0x60] sm:$0xff]   ;;  %v1269_v22 = vld [vmem:[%s1617_s0 + $0x68] sm:$0xff]   ;;  %v1270_v23 = vld [vmem:[%s1617_s0 + $0x70] sm:$0xff]  }
   0x9   :  { %v1271_v24 = vld [vmem:[%s1617_s0 + $0x78] sm:$0xff]  }
   0xa   :  { %1083 = vmatmul.mubr.msk.bf16.vlgmr.msra.gmra.mxu0 %vm172_vm0, %v1256_v9  ;;  %1099 = vmatmul.mubr.msk.bf16.vlgmr.msra.gmra.mxu1 %vm172_vm0, %v1256_v9 }
   0xb   :  { %263 = vmatprep.mubr.bf16.mxu0 %v1272_v1  ;;  %456 = vmatprep.mubr.bf16.mxu1 %v1272_v1 }
  0x12   :  { %1084 = vmatmul.mubr.msk.bf16.gmra.mxu0 %vm172_vm0, %v1257_v10  ;;  %1100 = vmatmul.mubr.msk.bf16.gmra.mxu1 %vm172_vm0, %v1257_v10 }
  0x13   :  { %273 = vmatprep.mubr.bf16.mxu0 %v1272_v1  ;;  %466 = vmatprep.mubr.bf16.mxu1 %v1272_v1 }
  0x1a   :  { %1085 = vmatmul.mubr.msk.bf16.gmra.mxu0 %vm172_vm0, %v1258_v11  ;;  %1101 = vmatmul.mubr.msk.bf16.gmra.mxu1 %vm172_vm0, %v1258_v11 }
  0x1b   :  { %283 = vmatprep.mubr.bf16.mxu0 %v1272_v1  ;;  %476 = vmatprep.mubr.bf16.mxu1 %v1272_v1 }
  0x22   :  { %1086 = vmatmul.mubr.msk.bf16.gmra.mxu0 %vm172_vm0, %v1259_v12  ;;  %1102 = vmatmul.mubr.msk.bf16.gmra.mxu1 %vm172_vm0, %v1259_v12 }
  0x23   :  { %293 = vmatprep.mubr.bf16.mxu0 %v1272_v1  ;;  %486 = vmatprep.mubr.bf16.mxu1 %v1272_v1 }
  0x2a   :  { %1087 = vmatmul.mubr.msk.bf16.gmra.mxu0 %vm172_vm0, %v1260_v13  ;;  %1103 = vmatmul.mubr.msk.bf16.gmra.mxu1 %vm172_vm0, %v1260_v13 }
  0x2b   :  { %303 = vmatprep.mubr.bf16.mxu0 %v1272_v1  ;;  %496 = vmatprep.mubr.bf16.mxu1 %v1272_v1 }
  0x32   :  { %1088 = vmatmul.mubr.msk.bf16.gmra.mxu0 %vm172_vm0, %v1261_v14  ;;  %1104 = vmatmul.mubr.msk.bf16.gmra.mxu1 %vm172_vm0, %v1261_v14 }
  0x33   :  { %313 = vmatprep.mubr.bf16.mxu0 %v1272_v1  ;;  %506 = vmatprep.mubr.bf16.mxu1 %v1272_v1 }
  0x3a   :  { %1089 = vmatmul.mubr.msk.bf16.gmra.mxu0 %vm172_vm0, %v1262_v15  ;;  %1105 = vmatmul.mubr.msk.bf16.gmra.mxu1 %vm172_vm0, %v1262_v15 }
  0x3b   :  { %323 = vmatprep.mubr.bf16.mxu0 %v1272_v1  ;;  %516 = vmatprep.mubr.bf16.mxu1 %v1272_v1 }
  0x42   :  { %1090 = vmatmul.mubr.msk.bf16.gmra.mxu0 %vm172_vm0, %v1263_v16  ;;  %1106 = vmatmul.mubr.msk.bf16.gmra.mxu1 %vm172_vm0, %v1263_v16 }
  0x43   :  { %333 = vmatprep.mubr.bf16.mxu0 %v1272_v1  ;;  %526 = vmatprep.mubr.bf16.mxu1 %v1272_v1 }
  0x4a   :  { %1091 = vmatmul.mubr.msk.bf16.gmra.mxu0 %vm172_vm0, %v1264_v17  ;;  %1107 = vmatmul.mubr.msk.bf16.gmra.mxu1 %vm172_vm0, %v1264_v17 }
  0x4b   :  { %343 = vmatprep.mubr.bf16.mxu0 %v1272_v1  ;;  %536 = vmatprep.mubr.bf16.mxu1 %v1272_v1 }
  0x52   :  { %1092 = vmatmul.mubr.msk.bf16.gmra.mxu0 %vm172_vm0, %v1265_v18  ;;  %1108 = vmatmul.mubr.msk.bf16.gmra.mxu1 %vm172_vm0, %v1265_v18 }
  0x53   :  { %353 = vmatprep.mubr.bf16.mxu0 %v1272_v1  ;;  %546 = vmatprep.mubr.bf16.mxu1 %v1272_v1 }
  0x5a   :  { %1093 = vmatmul.mubr.msk.bf16.gmra.mxu0 %vm172_vm0, %v1266_v19  ;;  %1109 = vmatmul.mubr.msk.bf16.gmra.mxu1 %vm172_vm0, %v1266_v19 }
  0x5b   :  { %363 = vmatprep.mubr.bf16.mxu0 %v1272_v1  ;;  %556 = vmatprep.mubr.bf16.mxu1 %v1272_v1 }
  0x62   :  { %1094 = vmatmul.mubr.msk.bf16.gmra.mxu0 %vm172_vm0, %v1267_v20  ;;  %1110 = vmatmul.mubr.msk.bf16.gmra.mxu1 %vm172_vm0, %v1267_v20 }
  0x63   :  { %373 = vmatprep.mubr.bf16.mxu0 %v1272_v1  ;;  %566 = vmatprep.mubr.bf16.mxu1 %v1272_v1 }
  0x6a   :  { %1095 = vmatmul.mubr.msk.bf16.gmra.mxu0 %vm172_vm0, %v1268_v21  ;;  %1111 = vmatmul.mubr.msk.bf16.gmra.mxu1 %vm172_vm0, %v1268_v21 }
  0x6b   :  { %383 = vmatprep.mubr.bf16.mxu0 %v1272_v1  ;;  %576 = vmatprep.mubr.bf16.mxu1 %v1272_v1 }
  0x72   :  { %1096 = vmatmul.mubr.msk.bf16.gmra.mxu0 %vm172_vm0, %v1269_v22  ;;  %1112 = vmatmul.mubr.msk.bf16.gmra.mxu1 %vm172_vm0, %v1269_v22 }
  0x73   :  { %393 = vmatprep.mubr.bf16.mxu0 %v1272_v1  ;;  %586 = vmatprep.mubr.bf16.mxu1 %v1272_v1 }
  0x7a   :  { %1097 = vmatmul.mubr.msk.bf16.gmra.mxu0 %vm172_vm0, %v1270_v23  ;;  %1113 = vmatmul.mubr.msk.bf16.gmra.mxu1 %vm172_vm0, %v1270_v23 }
  0x7b   :  { %403 = vmatprep.mubr.bf16.mxu0 %v1272_v1  ;;  %596 = vmatprep.mubr.bf16.mxu1 %v1272_v1 }
  0x82   :  { %1098 = vmatmul.mubr.msk.bf16.gmra.mxu0 %vm172_vm0, %v1271_v24  ;;  %1114 = vmatmul.mubr.msk.bf16.gmra.mxu1 %vm172_vm0, %v1271_v24 }
  0xca   :  { %v255_v25 = vpop.f32.mrf.mxu0  ;;  %v448_v26 = vpop.f32.mrf.mxu1 }
  0xcc   :  { %v257_v27 = vpop.f32.mrf.mxu0  ;;  %v450_v28 = vpop.f32.mrf.mxu1 }
  0xcd   :  { %v1179_v29 = vpack.c.bf16 %v257_v27, %v255_v25  ;;  %v1180_v30 = vpack.c.bf16 %v450_v28, %v448_v26 }
  0xce   :  { %v259_v31 = vpop.f32.mrf.mxu0  ;;  %v452_v32 = vpop.f32.mrf.mxu1 }
  0xcf   :  { %991 = vst [vmem:[%s1618_s2] sm:$0xff] %v1179_v29  ;;  %992 = vst [vmem:[%s1618_s2 + $0x8] sm:$0xff] %v1180_v30 }
  0xd0   :  { %v261_v33 = vpop.f32.mrf.mxu0  ;;  %v454_v34 = vpop.f32.mrf.mxu1 }
  0xd1   :  { %v1181_v35 = vpack.c.bf16 %v261_v33, %v259_v31  ;;  %v1182_v36 = vpack.c.bf16 %v454_v34, %v452_v32 }
  0xd2   :  { %v265_v37 = vpop.f32.mrf.mxu0  ;;  %v458_v38 = vpop.f32.mrf.mxu1 }
  0xd3   :  { %993 = vst [vmem:[%s1618_s2 + $0x10] sm:$0xff] %v1181_v35  ;;  %994 = vst [vmem:[%s1618_s2 + $0x18] sm:$0xff] %v1182_v36 }
  0xd4   :  { %v267_v39 = vpop.f32.mrf.mxu0  ;;  %v460_v40 = vpop.f32.mrf.mxu1 }
  0xd5   :  { %v1183_v41 = vpack.c.bf16 %v267_v39, %v265_v37  ;;  %v1184_v42 = vpack.c.bf16 %v460_v40, %v458_v38 }
  0xd6   :  { %v269_v43 = vpop.f32.mrf.mxu0  ;;  %v462_v44 = vpop.f32.mrf.mxu1 }
  0xd7   :  { %995 = vst [vmem:[%s1618_s2 + $0x20] sm:$0xff] %v1183_v41  ;;  %996 = vst [vmem:[%s1618_s2 + $0x28] sm:$0xff] %v1184_v42 }
  0xd8   :  { %v271_v45 = vpop.f32.mrf.mxu0  ;;  %v464_v46 = vpop.f32.mrf.mxu1 }
  0xd9   :  { %v1185_v47 = vpack.c.bf16 %v271_v45, %v269_v43  ;;  %v1186_v48 = vpack.c.bf16 %v464_v46, %v462_v44 }
  0xda   :  { %v275_v49 = vpop.f32.mrf.mxu0  ;;  %v468_v50 = vpop.f32.mrf.mxu1 }
  0xdb   :  { %997 = vst [vmem:[%s1618_s2 + $0x30] sm:$0xff] %v1185_v47  ;;  %998 = vst [vmem:[%s1618_s2 + $0x38] sm:$0xff] %v1186_v48 }
  0xdc   :  { %v277_v51 = vpop.f32.mrf.mxu0  ;;  %v470_v52 = vpop.f32.mrf.mxu1 }
  0xdd   :  { %v1187_v53 = vpack.c.bf16 %v277_v51, %v275_v49  ;;  %v1188_v54 = vpack.c.bf16 %v470_v52, %v468_v50 }
  0xde   :  { %v279_v55 = vpop.f32.mrf.mxu0  ;;  %v472_v56 = vpop.f32.mrf.mxu1 }
  0xdf   :  { %999 = vst [vmem:[%s1618_s2 + $0x40] sm:$0xff] %v1187_v53  ;;  %1000 = vst [vmem:[%s1618_s2 + $0x48] sm:$0xff] %v1188_v54 }
  0xe0   :  { %v281_v57 = vpop.f32.mrf.mxu0  ;;  %v474_v58 = vpop.f32.mrf.mxu1 }
  0xe1   :  { %v1189_v59 = vpack.c.bf16 %v281_v57, %v279_v55  ;;  %v1190_v60 = vpack.c.bf16 %v474_v58, %v472_v56 }
  0xe2   :  { %v285_v61 = vpop.f32.mrf.mxu0  ;;  %v478_v62 = vpop.f32.mrf.mxu1 }
  0xe3   :  { %1001 = vst [vmem:[%s1618_s2 + $0x50] sm:$0xff] %v1189_v59  ;;  %1002 = vst [vmem:[%s1618_s2 + $0x58] sm:$0xff] %v1190_v60 }
  0xe4   :  { %v287_v63 = vpop.f32.mrf.mxu0  ;;  %v480_v0 = vpop.f32.mrf.mxu1 }
  0xe5   :  { %v1191_v1 = vpack.c.bf16 %v287_v63, %v285_v61  ;;  %v1192_v2 = vpack.c.bf16 %v480_v0, %v478_v62 }
  0xe6   :  { %v289_v3 = vpop.f32.mrf.mxu0  ;;  %v482_v4 = vpop.f32.mrf.mxu1 }
  0xe7   :  { %1003 = vst [vmem:[%s1618_s2 + $0x60] sm:$0xff] %v1191_v1  ;;  %1004 = vst [vmem:[%s1618_s2 + $0x68] sm:$0xff] %v1192_v2 }
  0xe8   :  { %v291_v5 = vpop.f32.mrf.mxu0  ;;  %v484_v6 = vpop.f32.mrf.mxu1 }
  0xe9   :  { %v1193_v7 = vpack.c.bf16 %v291_v5, %v289_v3  ;;  %v1194_v8 = vpack.c.bf16 %v484_v6, %v482_v4 }
  0xea   :  { %v295_v9 = vpop.f32.mrf.mxu0  ;;  %v488_v10 = vpop.f32.mrf.mxu1 }
  0xeb   :  { %1005 = vst [vmem:[%s1618_s2 + $0x70] sm:$0xff] %v1193_v7  ;;  %1006 = vst [vmem:[%s1618_s2 + $0x78] sm:$0xff] %v1194_v8 }
  0xec   :  { %v297_v11 = vpop.f32.mrf.mxu0  ;;  %v490_v12 = vpop.f32.mrf.mxu1 }
  0xed   :  { %v1195_v13 = vpack.c.bf16 %v297_v11, %v295_v9  ;;  %v1196_v14 = vpack.c.bf16 %v490_v12, %v488_v10 }
  0xee   :  { %v299_v15 = vpop.f32.mrf.mxu0  ;;  %v492_v16 = vpop.f32.mrf.mxu1 }
  0xef   :  { %1007 = vst [vmem:[%s1618_s2 + $0x80] sm:$0xff] %v1195_v13  ;;  %1008 = vst [vmem:[%s1618_s2 + $0x88] sm:$0xff] %v1196_v14 }
  0xf0   :  { %v301_v17 = vpop.f32.mrf.mxu0  ;;  %v494_v18 = vpop.f32.mrf.mxu1 }
  0xf1   :  { %v1197_v19 = vpack.c.bf16 %v301_v17, %v299_v15  ;;  %v1198_v20 = vpack.c.bf16 %v494_v18, %v492_v16 }
  0xf2   :  { %v305_v21 = vpop.f32.mrf.mxu0  ;;  %v498_v22 = vpop.f32.mrf.mxu1 }
  0xf3   :  { %1009 = vst [vmem:[%s1618_s2 + $0x90] sm:$0xff] %v1197_v19  ;;  %1010 = vst [vmem:[%s1618_s2 + $0x98] sm:$0xff] %v1198_v20 }
  0xf4   :  { %v307_v23 = vpop.f32.mrf.mxu0  ;;  %v500_v24 = vpop.f32.mrf.mxu1 }
  0xf5   :  { %v1199_v25 = vpack.c.bf16 %v307_v23, %v305_v21  ;;  %v1200_v26 = vpack.c.bf16 %v500_v24, %v498_v22 }
  0xf6   :  { %v309_v27 = vpop.f32.mrf.mxu0  ;;  %v502_v28 = vpop.f32.mrf.mxu1 }
  0xf7   :  { %1011 = vst [vmem:[%s1618_s2 + $0xa0] sm:$0xff] %v1199_v25  ;;  %1012 = vst [vmem:[%s1618_s2 + $0xa8] sm:$0xff] %v1200_v26 }
  0xf8   :  { %v311_v29 = vpop.f32.mrf.mxu0  ;;  %v504_v30 = vpop.f32.mrf.mxu1 }
  0xf9   :  { %v1201_v31 = vpack.c.bf16 %v311_v29, %v309_v27  ;;  %v1202_v32 = vpack.c.bf16 %v504_v30, %v502_v28 }
  0xfa   :  { %v315_v33 = vpop.f32.mrf.mxu0  ;;  %v508_v34 = vpop.f32.mrf.mxu1 }
  0xfb   :  { %1013 = vst [vmem:[%s1618_s2 + $0xb0] sm:$0xff] %v1201_v31  ;;  %1014 = vst [vmem:[%s1618_s2 + $0xb8] sm:$0xff] %v1202_v32 }
  0xfc   :  { %v317_v35 = vpop.f32.mrf.mxu0  ;;  %v510_v36 = vpop.f32.mrf.mxu1 }
  0xfd   :  { %v1203_v37 = vpack.c.bf16 %v317_v35, %v315_v33  ;;  %v1204_v38 = vpack.c.bf16 %v510_v36, %v508_v34 }
  0xfe   :  { %v319_v39 = vpop.f32.mrf.mxu0  ;;  %v512_v40 = vpop.f32.mrf.mxu1 }
  0xff   :  { %1015 = vst [vmem:[%s1618_s2 + $0xc0] sm:$0xff] %v1203_v37  ;;  %1016 = vst [vmem:[%s1618_s2 + $0xc8] sm:$0xff] %v1204_v38 }
 0x100   :  { %v321_v41 = vpop.f32.mrf.mxu0  ;;  %v514_v42 = vpop.f32.mrf.mxu1 }
 0x101   :  { %v1205_v43 = vpack.c.bf16 %v321_v41, %v319_v39  ;;  %v1206_v44 = vpack.c.bf16 %v514_v42, %v512_v40 }
 0x102   :  { %v325_v45 = vpop.f32.mrf.mxu0  ;;  %v518_v46 = vpop.f32.mrf.mxu1 }
 0x103   :  { %1017 = vst [vmem:[%s1618_s2 + $0xd0] sm:$0xff] %v1205_v43  ;;  %1018 = vst [vmem:[%s1618_s2 + $0xd8] sm:$0xff] %v1206_v44 }
 0x104   :  { %v327_v47 = vpop.f32.mrf.mxu0  ;;  %v520_v48 = vpop.f32.mrf.mxu1 }
 0x105   :  { %v1207_v49 = vpack.c.bf16 %v327_v47, %v325_v45  ;;  %v1208_v50 = vpack.c.bf16 %v520_v48, %v518_v46 }
 0x106   :  { %v329_v51 = vpop.f32.mrf.mxu0  ;;  %v522_v52 = vpop.f32.mrf.mxu1 }
 0x107   :  { %1019 = vst [vmem:[%s1618_s2 + $0xe0] sm:$0xff] %v1207_v49  ;;  %1020 = vst [vmem:[%s1618_s2 + $0xe8] sm:$0xff] %v1208_v50 }
 0x108   :  { %v331_v53 = vpop.f32.mrf.mxu0  ;;  %v524_v54 = vpop.f32.mrf.mxu1 }
 0x109   :  { %v1209_v55 = vpack.c.bf16 %v331_v53, %v329_v51  ;;  %v1210_v56 = vpack.c.bf16 %v524_v54, %v522_v52 }
 0x10a   :  { %v335_v57 = vpop.f32.mrf.mxu0  ;;  %v528_v58 = vpop.f32.mrf.mxu1 }
 0x10b   :  { %1021 = vst [vmem:[%s1618_s2 + $0xf0] sm:$0xff] %v1209_v55  ;;  %1022 = vst [vmem:[%s1618_s2 + $0xf8] sm:$0xff] %v1210_v56 }
 0x10c   :  { %v337_v59 = vpop.f32.mrf.mxu0  ;;  %v530_v60 = vpop.f32.mrf.mxu1 }
 0x10d   :  { %v1211_v61 = vpack.c.bf16 %v337_v59, %v335_v57  ;;  %v1212_v62 = vpack.c.bf16 %v530_v60, %v528_v58 }
 0x10e   :  { %v339_v63 = vpop.f32.mrf.mxu0  ;;  %v532_v0 = vpop.f32.mrf.mxu1 }
 0x10f   :  { %1023 = vst [vmem:[%s1618_s2 + $0x100] sm:$0xff] %v1211_v61  ;;  %1024 = vst [vmem:[%s1618_s2 + $0x108] sm:$0xff] %v1212_v62 }
 0x110   :  { %v341_v1 = vpop.f32.mrf.mxu0  ;;  %v534_v2 = vpop.f32.mrf.mxu1 }
 0x111   :  { %v1213_v3 = vpack.c.bf16 %v341_v1, %v339_v63  ;;  %v1214_v4 = vpack.c.bf16 %v534_v2, %v532_v0 }
 0x112   :  { %v345_v5 = vpop.f32.mrf.mxu0  ;;  %v538_v6 = vpop.f32.mrf.mxu1 }
 0x113   :  { %1025 = vst [vmem:[%s1618_s2 + $0x110] sm:$0xff] %v1213_v3  ;;  %1026 = vst [vmem:[%s1618_s2 + $0x118] sm:$0xff] %v1214_v4 }
 0x114   :  { %v347_v7 = vpop.f32.mrf.mxu0  ;;  %v540_v8 = vpop.f32.mrf.mxu1 }
 0x115   :  { %v1215_v9 = vpack.c.bf16 %v347_v7, %v345_v5  ;;  %v1216_v10 = vpack.c.bf16 %v540_v8, %v538_v6 }
 0x116   :  { %v349_v11 = vpop.f32.mrf.mxu0  ;;  %v542_v12 = vpop.f32.mrf.mxu1 }
 0x117   :  { %1027 = vst [vmem:[%s1618_s2 + $0x120] sm:$0xff] %v1215_v9  ;;  %1028 = vst [vmem:[%s1618_s2 + $0x128] sm:$0xff] %v1216_v10 }
 0x118   :  { %v351_v13 = vpop.f32.mrf.mxu0  ;;  %v544_v14 = vpop.f32.mrf.mxu1 }
 0x119   :  { %v1217_v15 = vpack.c.bf16 %v351_v13, %v349_v11  ;;  %v1218_v16 = vpack.c.bf16 %v544_v14, %v542_v12 }
 0x11a   :  { %v355_v17 = vpop.f32.mrf.mxu0  ;;  %v548_v18 = vpop.f32.mrf.mxu1 }
 0x11b   :  { %1029 = vst [vmem:[%s1618_s2 + $0x130] sm:$0xff] %v1217_v15  ;;  %1030 = vst [vmem:[%s1618_s2 + $0x138] sm:$0xff] %v1218_v16 }
 0x11c   :  { %v357_v19 = vpop.f32.mrf.mxu0  ;;  %v550_v20 = vpop.f32.mrf.mxu1 }
 0x11d   :  { %v1219_v21 = vpack.c.bf16 %v357_v19, %v355_v17  ;;  %v1220_v22 = vpack.c.bf16 %v550_v20, %v548_v18 }
 0x11e   :  { %v359_v23 = vpop.f32.mrf.mxu0  ;;  %v552_v24 = vpop.f32.mrf.mxu1 }
 0x11f   :  { %1031 = vst [vmem:[%s1618_s2 + $0x140] sm:$0xff] %v1219_v21  ;;  %1032 = vst [vmem:[%s1618_s2 + $0x148] sm:$0xff] %v1220_v22 }
 0x120   :  { %v361_v25 = vpop.f32.mrf.mxu0  ;;  %v554_v26 = vpop.f32.mrf.mxu1 }
 0x121   :  { %v1221_v27 = vpack.c.bf16 %v361_v25, %v359_v23  ;;  %v1222_v28 = vpack.c.bf16 %v554_v26, %v552_v24 }
 0x122   :  { %v365_v29 = vpop.f32.mrf.mxu0  ;;  %v558_v30 = vpop.f32.mrf.mxu1 }
 0x123   :  { %1033 = vst [vmem:[%s1618_s2 + $0x150] sm:$0xff] %v1221_v27  ;;  %1034 = vst [vmem:[%s1618_s2 + $0x158] sm:$0xff] %v1222_v28 }
 0x124   :  { %v367_v31 = vpop.f32.mrf.mxu0  ;;  %v560_v32 = vpop.f32.mrf.mxu1 }
 0x125   :  { %v1223_v33 = vpack.c.bf16 %v367_v31, %v365_v29  ;;  %v1224_v34 = vpack.c.bf16 %v560_v32, %v558_v30 }
 0x126   :  { %v369_v35 = vpop.f32.mrf.mxu0  ;;  %v562_v36 = vpop.f32.mrf.mxu1 }
 0x127   :  { %1035 = vst [vmem:[%s1618_s2 + $0x160] sm:$0xff] %v1223_v33  ;;  %1036 = vst [vmem:[%s1618_s2 + $0x168] sm:$0xff] %v1224_v34 }
 0x128   :  { %v371_v37 = vpop.f32.mrf.mxu0  ;;  %v564_v38 = vpop.f32.mrf.mxu1 }
 0x129   :  { %v1225_v39 = vpack.c.bf16 %v371_v37, %v369_v35  ;;  %v1226_v40 = vpack.c.bf16 %v564_v38, %v562_v36 }
 0x12a   :  { %v375_v41 = vpop.f32.mrf.mxu0  ;;  %v568_v42 = vpop.f32.mrf.mxu1 }
 0x12b   :  { %1037 = vst [vmem:[%s1618_s2 + $0x170] sm:$0xff] %v1225_v39  ;;  %1038 = vst [vmem:[%s1618_s2 + $0x178] sm:$0xff] %v1226_v40 }
 0x12c   :  { %v377_v43 = vpop.f32.mrf.mxu0  ;;  %v570_v44 = vpop.f32.mrf.mxu1 }
 0x12d   :  { %v1227_v45 = vpack.c.bf16 %v377_v43, %v375_v41  ;;  %v1228_v46 = vpack.c.bf16 %v570_v44, %v568_v42 }
 0x12e   :  { %v379_v47 = vpop.f32.mrf.mxu0  ;;  %v572_v48 = vpop.f32.mrf.mxu1 }
 0x12f   :  { %1039 = vst [vmem:[%s1618_s2 + $0x180] sm:$0xff] %v1227_v45  ;;  %1040 = vst [vmem:[%s1618_s2 + $0x188] sm:$0xff] %v1228_v46 }
 0x130   :  { %v381_v49 = vpop.f32.mrf.mxu0  ;;  %v574_v50 = vpop.f32.mrf.mxu1 }
 0x131   :  { %v1229_v51 = vpack.c.bf16 %v381_v49, %v379_v47  ;;  %v1230_v52 = vpack.c.bf16 %v574_v50, %v572_v48 }
 0x132   :  { %v385_v53 = vpop.f32.mrf.mxu0  ;;  %v578_v54 = vpop.f32.mrf.mxu1 }
 0x133   :  { %1041 = vst [vmem:[%s1618_s2 + $0x190] sm:$0xff] %v1229_v51  ;;  %1042 = vst [vmem:[%s1618_s2 + $0x198] sm:$0xff] %v1230_v52 }
 0x134   :  { %v387_v55 = vpop.f32.mrf.mxu0  ;;  %v580_v56 = vpop.f32.mrf.mxu1 }
 0x135   :  { %v1231_v57 = vpack.c.bf16 %v387_v55, %v385_v53  ;;  %v1232_v58 = vpack.c.bf16 %v580_v56, %v578_v54 }
 0x136   :  { %v389_v59 = vpop.f32.mrf.mxu0  ;;  %v582_v60 = vpop.f32.mrf.mxu1 }
 0x137   :  { %1043 = vst [vmem:[%s1618_s2 + $0x1a0] sm:$0xff] %v1231_v57  ;;  %1044 = vst [vmem:[%s1618_s2 + $0x1a8] sm:$0xff] %v1232_v58 }
 0x138   :  { %v391_v61 = vpop.f32.mrf.mxu0  ;;  %v584_v62 = vpop.f32.mrf.mxu1 }
 0x139   :  { %v1233_v63 = vpack.c.bf16 %v391_v61, %v389_v59  ;;  %v1234_v0 = vpack.c.bf16 %v584_v62, %v582_v60 }
 0x13a   :  { %v395_v1 = vpop.f32.mrf.mxu0  ;;  %v588_v2 = vpop.f32.mrf.mxu1 }
 0x13b   :  { %1045 = vst [vmem:[%s1618_s2 + $0x1b0] sm:$0xff] %v1233_v63  ;;  %1046 = vst [vmem:[%s1618_s2 + $0x1b8] sm:$0xff] %v1234_v0 }
 0x13c   :  { %v397_v3 = vpop.f32.mrf.mxu0  ;;  %v590_v4 = vpop.f32.mrf.mxu1 }
 0x13d   :  { %v1235_v5 = vpack.c.bf16 %v397_v3, %v395_v1  ;;  %v1236_v6 = vpack.c.bf16 %v590_v4, %v588_v2 }
 0x13e   :  { %v399_v7 = vpop.f32.mrf.mxu0  ;;  %v592_v8 = vpop.f32.mrf.mxu1 }
 0x13f   :  { %1047 = vst [vmem:[%s1618_s2 + $0x1c0] sm:$0xff] %v1235_v5  ;;  %1048 = vst [vmem:[%s1618_s2 + $0x1c8] sm:$0xff] %v1236_v6 }
 0x140   :  { %v401_v9 = vpop.f32.mrf.mxu0  ;;  %v594_v10 = vpop.f32.mrf.mxu1 }
 0x141   :  { %v1237_v11 = vpack.c.bf16 %v401_v9, %v399_v7  ;;  %v1238_v12 = vpack.c.bf16 %v594_v10, %v592_v8 }
 0x142   :  { %v405_v13 = vpop.f32.mrf.mxu0  ;;  %v598_v14 = vpop.f32.mrf.mxu1 }
 0x143   :  { %1049 = vst [vmem:[%s1618_s2 + $0x1d0] sm:$0xff] %v1237_v11  ;;  %1050 = vst [vmem:[%s1618_s2 + $0x1d8] sm:$0xff] %v1238_v12 }
 0x144   :  { %v407_v15 = vpop.f32.mrf.mxu0  ;;  %v600_v16 = vpop.f32.mrf.mxu1 }
 0x145   :  { %v1239_v17 = vpack.c.bf16 %v407_v15, %v405_v13  ;;  %v1240_v18 = vpack.c.bf16 %v600_v16, %v598_v14 }
 0x146   :  { %v409_v19 = vpop.f32.mrf.mxu0  ;;  %v602_v20 = vpop.f32.mrf.mxu1 }
 0x147   :  { %1051 = vst [vmem:[%s1618_s2 + $0x1e0] sm:$0xff] %v1239_v17  ;;  %1052 = vst [vmem:[%s1618_s2 + $0x1e8] sm:$0xff] %v1240_v18 }
 0x148   :  { %v411_v21 = vpop.f32.mrf.mxu0  ;;  %v604_v22 = vpop.f32.mrf.mxu1 }
 0x149   :  { %v1241_v23 = vpack.c.bf16 %v411_v21, %v409_v19  ;;  %v1242_v24 = vpack.c.bf16 %v604_v22, %v602_v20 }
 0x14b   :  { %1053 = vst [vmem:[%s1618_s2 + $0x1f0] sm:$0xff] %v1241_v23  ;;  %1054 = vst [vmem:[%s1618_s2 + $0x1f8] sm:$0xff] %v1242_v24 }

// kernel: wave_field_decoder_forward.19
= control target key start
LH: loop header
LB: loop body
LE: loop exit
PB: predicated region body
PF: predicated region fallthrough
CT: control target
= control target key end

     0   :  { %s859_s0 = inlined_call_operand.vmem [shape: bf16[16,2048], index: 0, kind: input, shape index: {}]   ;;  %s860_s1 = inlined_call_operand.vmem [shape: f32[16,1], index: 1, kind: input, shape index: {}]   ;;  %s861_s2 = inlined_call_operand.vmem [shape: f32[16,1], index: 2, kind: input, shape index: {}]   ;;  %s862_s3 = inlined_call_operand.vmem [shape: bf16[16,2048], index: 3, kind: output, shape index: {}]  }
   0x1   :  { %v14_v0 = vld [vmem:[%s859_s0] sm:$0xff]  ;;  %v15_v1 = vld [vmem:[%s859_s0 + $0x8] sm:$0xff]  ;;  %v16_v6 = vld [vmem:[%s859_s0 + $0x10] sm:$0xff] }
   0x2   :  { %v511_v2 = vunpack.c.l.bf16 %v14_v0  ;;  %v513_v3 = vunpack.c.h.bf16 %v14_v0  ;;  %v22_v4 = vld [vmem:[%s859_s0 + $0x40] sm:$0xff]  ;;  %v518_v5 = vunpack.c.l.bf16 %v15_v1  ;;  %v23_v7 = vld [vmem:[%s859_s0 + $0x48] sm:$0xff]  ;;  %v526_v8 = vunpack.c.h.bf16 %v15_v1  ;;  %v17_v15 = vld [vmem:[%s859_s0 + $0x18] sm:$0xff] }
   0x3   :  { %v530_v10 = vunpack.c.l.bf16 %v22_v4  ;;  %v532_v11 = vunpack.c.h.bf16 %v22_v4  ;;  %v534_v12 = vunpack.c.l.bf16 %v16_v6  ;;  %v537_v14 = vunpack.c.l.bf16 %v23_v7  ;;  %v24_v16 = vld [vmem:[%s859_s0 + $0x50] sm:$0xff]  ;;  %v18_v25 = vld [vmem:[%s859_s0 + $0x20] sm:$0xff]  ;;  %v25_v26 = vld [vmem:[%s859_s0 + $0x58] sm:$0xff] }
   0x4   :  { %v62_v9 = vadd.f32 %v513_v3, %v511_v2  ;;  %v545_v17 = vunpack.c.h.bf16 %v16_v6  ;;  %v548_v19 = vunpack.c.h.bf16 %v23_v7  ;;  %v552_v21 = vunpack.c.l.bf16 %v17_v15  ;;  %v19_v35 = vld [vmem:[%s859_s0 + $0x28] sm:$0xff]  ;;  %v26_v36 = vld [vmem:[%s859_s0 + $0x60] sm:$0xff]  ;;  %v20_v45 = vld [vmem:[%s859_s0 + $0x30] sm:$0xff] }
   0x5   :  { %v79_v20 = vadd.f32 %v532_v11, %v530_v10  ;;  %v555_v23 = vunpack.c.l.bf16 %v24_v16  ;;  %v564_v27 = vunpack.c.h.bf16 %v17_v15  ;;  %v567_v29 = vunpack.c.h.bf16 %v24_v16  ;;  %v27_v46 = vld [vmem:[%s859_s0 + $0x68] sm:$0xff]  ;;  %v21_v55 = vld [vmem:[%s859_s0 + $0x38] sm:$0xff]  ;;  %v28_v56 = vld [vmem:[%s859_s0 + $0x70] sm:$0xff] }
   0x6   :  { %v63_v13 = vadd.f32 %v62_v9, %v518_v5  ;;  %v570_v31 = vunpack.c.l.bf16 %v18_v25  ;;  %v573_v33 = vunpack.c.l.bf16 %v25_v26  ;;  %v582_v37 = vunpack.c.h.bf16 %v18_v25  ;;  %v29_v1 = vld [vmem:[%s859_s0 + $0x78] sm:$0xff] }
   0x7   :  { %v80_v24 = vadd.f32 %v79_v20, %v537_v14  ;;  %v585_v39 = vunpack.c.h.bf16 %v25_v26  ;;  %v588_v41 = vunpack.c.l.bf16 %v19_v35  ;;  %v591_v43 = vunpack.c.l.bf16 %v26_v36 }
   0x8   :  { %v64_v18 = vadd.f32 %v63_v13, %v526_v8  ;;  %v600_v47 = vunpack.c.h.bf16 %v19_v35  ;;  %v603_v49 = vunpack.c.h.bf16 %v26_v36  ;;  %v606_v51 = vunpack.c.l.bf16 %v20_v45 }
   0x9   :  { %v81_v30 = vadd.f32 %v80_v24, %v548_v19  ;;  %v609_v53 = vunpack.c.l.bf16 %v27_v46  ;;  %v618_v57 = vunpack.c.h.bf16 %v20_v45  ;;  %v621_v59 = vunpack.c.h.bf16 %v27_v46 }
   0xa   :  { %v65_v22 = vadd.f32 %v64_v18, %v534_v12  ;;  %v624_v61 = vunpack.c.l.bf16 %v21_v55  ;;  %v627_v63 = vunpack.c.l.bf16 %v28_v56  ;;  %v633_v4 = vunpack.c.h.bf16 %v21_v55 }
   0xb   :  { %v82_v34 = vadd.f32 %v81_v30, %v555_v23  ;;  %v636_v7 = vunpack.c.h.bf16 %v28_v56  ;;  %v640_v15 = vunpack.c.l.bf16 %v29_v1  ;;  %v644_v20 = vunpack.c.h.bf16 %v29_v1 }
   0xc   :  { %v66_v28 = vadd.f32 %v65_v22, %v545_v17 }
   0xd   :  { %v83_v40 = vadd.f32 %v82_v34, %v567_v29 }
   0xe   :  { %v67_v32 = vadd.f32 %v66_v28, %v552_v21 }
   0xf   :  { %v84_v44 = vadd.f32 %v83_v40, %v573_v33 }
  0x10   :  { %v68_v38 = vadd.f32 %v67_v32, %v564_v27 }
  0x11   :  { %v85_v50 = vadd.f32 %v84_v44, %v585_v39 }
  0x12   :  { %v69_v42 = vadd.f32 %v68_v38, %v570_v31 }
  0x13   :  { %v86_v54 = vadd.f32 %v85_v50, %v591_v43 }
  0x14   :  { %v70_v48 = vadd.f32 %v69_v42, %v582_v37 }
  0x15   :  { %v87_v60 = vadd.f32 %v86_v54, %v603_v49 }
  0x16   :  { %v71_v52 = vadd.f32 %v70_v48, %v588_v41 }
  0x17   :  { %v88_v0 = vadd.f32 %v87_v60, %v609_v53 }
  0x18   :  { %v72_v58 = vadd.f32 %v71_v52, %v600_v47 }
  0x19   :  { %v89_v9 = vadd.f32 %v88_v0, %v621_v59 }
  0x1a   :  { %v73_v62 = vadd.f32 %v72_v58, %v606_v51 }
  0x1b   :  { %v90_v16 = vadd.f32 %v89_v9, %v627_v63 }
  0x1c   :  { %v74_v6 = vadd.f32 %v73_v62, %v618_v57 }
  0x1d   :  { %v91_v22 = vadd.f32 %v90_v16, %v636_v7 }
  0x1e   :  { %v75_v13 = vadd.f32 %v74_v6, %v624_v61 }
  0x1f   :  { %v92_v24 = vadd.f32 %v91_v22, %v640_v15 }
  0x20   :  { %v76_v18 = vadd.f32 %v75_v13, %v633_v4 }
  0x21   :  { %v93_v25 = vadd.f32 %v92_v24, %v644_v20 }
  0x22   :  { %77 = vadd.xlane.f32.xlu0 %v76_v18 }
  0x26   :  { %94 = vadd.xlane.f32.xlu0 %v93_v25 }
  0xab   :  { %v78_v26 = vpop.xlane.xlu0 %77 }
  0xac   :  { %v649_v28 = vmul.f32 0.00048828125, %v78_v26 }
  0xae   :  { %v99_v30 = vsub.f32 %v511_v2, %v649_v28  ;;  %v100_v32 = vsub.f32 %v513_v3, %v649_v28  ;;  %v101_v35 = vsub.f32 %v518_v5, %v649_v28  ;;  %v102_v42 = vsub.f32 %v526_v8, %v649_v28 }
  0xaf   :  { %v95_v34 = vpop.xlane.xlu0 %94  ;;  %v103_v44 = vsub.f32 %v534_v12, %v649_v28  ;;  %v104_v52 = vsub.f32 %v545_v17, %v649_v28  ;;  %v105_v56 = vsub.f32 %v552_v21, %v649_v28  ;;  %v106_v6 = vsub.f32 %v564_v27, %v649_v28 }
  0xb0   :  { %v131_v36 = vmul.f32 %v99_v30, %v99_v30  ;;  %v132_v38 = vmul.f32 %v100_v32, %v100_v32  ;;  %v657_v40 = vmul.f32 0.00048828125, %v95_v34  ;;  %v133_v45 = vmul.f32 %v101_v35, %v101_v35 }
  0xb1   :  { %v134_v54 = vmul.f32 %v102_v42, %v102_v42  ;;  %v135_v58 = vmul.f32 %v103_v44, %v103_v44  ;;  %v136_v9 = vmul.f32 %v104_v52, %v104_v52  ;;  %v107_v18 = vsub.f32 %v570_v31, %v649_v28 }
  0xb2   :  { %v163_v46 = vadd.f32 %v132_v38, %v131_v36  ;;  %v115_v48 = vsub.f32 %v530_v10, %v657_v40  ;;  %v116_v50 = vsub.f32 %v532_v11, %v657_v40  ;;  %v117_v62 = vsub.f32 %v537_v14, %v657_v40 }
  0xb3   :  { %v118_v16 = vsub.f32 %v548_v19, %v657_v40  ;;  %v137_v22 = vmul.f32 %v105_v56, %v105_v56  ;;  %v119_v25 = vsub.f32 %v555_v23, %v657_v40  ;;  %v108_v32 = vsub.f32 %v582_v37, %v649_v28 }
  0xb4   :  { %v164_v55 = vadd.f32 %v163_v46, %v133_v45  ;;  %v147_v0 = vmul.f32 %v115_v48, %v115_v48  ;;  %v148_v1 = vmul.f32 %v116_v50, %v116_v50  ;;  %v149_v26 = vmul.f32 %v117_v62, %v117_v62 }
  0xb5   :  { %v138_v34 = vmul.f32 %v106_v6, %v106_v6  ;;  %v120_v36 = vsub.f32 %v567_v29, %v657_v40  ;;  %v150_v38 = vmul.f32 %v118_v16, %v118_v16  ;;  %v109_v44 = vsub.f32 %v588_v41, %v649_v28 }
  0xb6   :  { %v165_v60 = vadd.f32 %v164_v55, %v134_v54  ;;  %v180_v30 = vadd.f32 %v148_v1, %v147_v0  ;;  %v139_v45 = vmul.f32 %v107_v18, %v107_v18  ;;  %v121_v48 = vsub.f32 %v573_v33, %v657_v40 }
  0xb7   :  { %v151_v50 = vmul.f32 %v119_v25, %v119_v25  ;;  %v110_v54 = vsub.f32 %v600_v47, %v649_v28  ;;  %v140_v55 = vmul.f32 %v108_v32, %v108_v32  ;;  %v111_v0 = vsub.f32 %v606_v51, %v649_v28 }
  0xb8   :  { %v166_v13 = vadd.f32 %v165_v60, %v135_v58  ;;  %v181_v42 = vadd.f32 %v180_v30, %v149_v26  ;;  %v122_v58 = vsub.f32 %v585_v39, %v657_v40  ;;  %v152_v60 = vmul.f32 %v120_v36, %v120_v36 }
  0xb9   :  { %v141_v1 = vmul.f32 %v109_v44, %v109_v44  ;;  %v112_v18 = vsub.f32 %v618_v57, %v649_v28  ;;  %v124_v25 = vsub.f32 %v603_v49, %v657_v40  ;;  %v113_v32 = vsub.f32 %v624_v61, %v649_v28 }
  0xba   :  { %v167_v24 = vadd.f32 %v166_v13, %v136_v9  ;;  %v182_v52 = vadd.f32 %v181_v42, %v150_v38  ;;  %v123_v9 = vsub.f32 %v591_v43, %v657_v40  ;;  %v153_v13 = vmul.f32 %v121_v48, %v121_v48 }
  0xbb   :  { %v154_v26 = vmul.f32 %v122_v58, %v122_v58  ;;  %v125_v36 = vsub.f32 %v609_v53, %v657_v40  ;;  %v114_v44 = vsub.f32 %v633_v4, %v649_v28  ;;  %v126_v48 = vsub.f32 %v621_v59, %v657_v40 }
  0xbc   :  { %v168_v35 = vadd.f32 %v167_v24, %v137_v22  ;;  %v183_v62 = vadd.f32 %v182_v52, %v151_v50  ;;  %v142_v22 = vmul.f32 %v110_v54, %v110_v54  ;;  %v155_v38 = vmul.f32 %v123_v9, %v123_v9 }
  0xbd   :  { %v156_v50 = vmul.f32 %v124_v25, %v124_v25  ;;  %v145_v54 = vmul.f32 %v113_v32, %v113_v32  ;;  %v157_v58 = vmul.f32 %v125_v36, %v125_v36 }
  0xbe   :  { %v169_v46 = vadd.f32 %v168_v35, %v138_v34  ;;  %v184_v16 = vadd.f32 %v183_v62, %v152_v60  ;;  %v143_v34 = vmul.f32 %v111_v0, %v111_v0  ;;  %v146_v62 = vmul.f32 %v114_v44, %v114_v44 }
  0xc0   :  { %v170_v56 = vadd.f32 %v169_v46, %v139_v45  ;;  %v185_v30 = vadd.f32 %v184_v16, %v153_v13  ;;  %v144_v45 = vmul.f32 %v112_v18, %v112_v18  ;;  %v129_v16 = vsub.f32 %v640_v15, %v657_v40 }
  0xc2   :  { %v171_v6 = vadd.f32 %v170_v56, %v140_v55  ;;  %v186_v42 = vadd.f32 %v185_v30, %v154_v26  ;;  %v127_v56 = vsub.f32 %v627_v63, %v657_v40  ;;  %v161_v30 = vmul.f32 %v129_v16, %v129_v16 }
  0xc4   :  { %v172_v24 = vadd.f32 %v171_v6, %v141_v1  ;;  %v187_v52 = vadd.f32 %v186_v42, %v155_v38  ;;  %v128_v1 = vsub.f32 %v636_v7, %v657_v40  ;;  %v158_v6 = vmul.f32 %v126_v48, %v126_v48 }
  0xc5   :  { %v159_v18 = vmul.f32 %v127_v56, %v127_v56  ;;  %v484_v38 = vmov 0   ;;  %v200_v56 = vld [vmem:[%s860_s1 + $0x8] sm:$0xff] }
  0xc6   :  { %v173_v35 = vadd.f32 %v172_v24, %v142_v22  ;;  %v188_v60 = vadd.f32 %v187_v52, %v156_v50  ;;  %v130_v24 = vsub.f32 %v644_v20, %v657_v40  ;;  %v160_v25 = vmul.f32 %v128_v1, %v128_v1  ;;  %478 = vset.pattern.permute.xlu0 %v484_v38  ;;  %v199_v52 = vld [vmem:[%s860_s1] sm:$0xff] }
  0xc7   :  { %479 = vset.pattern.permute.xlu1 %v484_v38 }
  0xc8   :  { %v174_v46 = vadd.f32 %v173_v35, %v143_v34  ;;  %v189_v9 = vadd.f32 %v188_v60, %v157_v58  ;;  %v162_v34 = vmul.f32 %v130_v24, %v130_v24 }
  0xca   :  { %v175_v55 = vadd.f32 %v174_v46, %v144_v45  ;;  %v190_v22 = vadd.f32 %v189_v9, %v158_v6  ;;  %v208_v9 = vld [vmem:[%s861_s2 + $0x8] sm:$0xff] }
  0xcc   :  { %v176_v0 = vadd.f32 %v175_v55, %v145_v54  ;;  %v191_v26 = vadd.f32 %v190_v22, %v159_v18 }
  0xce   :  { %v177_v13 = vadd.f32 %v176_v0, %v146_v62  ;;  %v192_v32 = vadd.f32 %v191_v26, %v160_v25  ;;  %v207_v0 = vld [vmem:[%s861_s2] sm:$0xff] }
  0xd0   :  { %178 = vadd.xlane.f32.xlu1 %v177_v13  ;;  %v193_v35 = vadd.f32 %v192_v32, %v161_v30 }
  0xd2   :  { %v194_v36 = vadd.f32 %v193_v35, %v162_v34 }
  0xd4   :  { %195 = vadd.xlane.f32.xlu1 %v194_v36 }
 0x159   :  { %v179_v42 = vpop.xlane.xlu1 %178 }
 0x15a   :  { %v197_v44 = vmul.f32 0.00048828125, %v179_v42 }
 0x15c   :  { %v201_v45 = vadd.f32 1e-05, %v197_v44 }
 0x15d   :  { %v196_v46 = vpop.xlane.xlu1 %195 }
 0x15e   :  { %480 = vrsqrt.f32 %v201_v45  ;;  %v198_v48 = vmul.f32 0.00048828125, %v196_v46 }
 0x160   :  { %v202_v50 = vadd.f32 1e-05, %v198_v48 }
 0x162   :  { %482 = vrsqrt.f32 %v202_v50 }
 0x16b   :  { %v481_v54 = vpop.eup %480 }
 0x16c   :  { %v205_v55 = vmul.f32 %v481_v54, %v199_v52 }
 0x16e   :  { %215 = vperm.xlu0 %478, %v205_v55   ;;  %v209_v62 = vmul.f32 %v205_v55, %v649_v28 }
 0x16f   :  { %v483_v58 = vpop.eup %482 }
 0x170   :  { %v206_v60 = vmul.f32 %v483_v58, %v200_v56  ;;  %v211_v1 = vsub.f32 %v207_v0, %v209_v62 }
 0x172   :  { %220 = vperm.xlu1 %479, %v206_v60   ;;  %v210_v6 = vmul.f32 %v206_v60, %v657_v40 }
 0x174   :  { %v212_v13 = vsub.f32 %v208_v9, %v210_v6 }
 0x176   :  { %257 = vperm.xlu1 %479, %v211_v1  }
 0x17a   :  { %262 = vperm.xlu1 %479, %v212_v13  }
 0x1e9   :  { %v216_v16 = vpop.permute.xlu0 %215 }
 0x1ea   :  { %v223_v18 = vmul.f32 %v216_v16, %v511_v2  ;;  %v224_v28 = vmul.f32 %v216_v16, %v513_v3  ;;  %v225_v22 = vmul.f32 %v216_v16, %v518_v5  ;;  %v226_v24 = vmul.f32 %v216_v16, %v526_v8 }
 0x1eb   :  { %v227_v25 = vmul.f32 %v216_v16, %v534_v12  ;;  %v228_v40 = vmul.f32 %v216_v16, %v545_v17  ;;  %v229_v26 = vmul.f32 %v216_v16, %v552_v21  ;;  %v230_v30 = vmul.f32 %v216_v16, %v564_v27 }
 0x1ec   :  { %v231_v32 = vmul.f32 %v216_v16, %v570_v31  ;;  %v232_v34 = vmul.f32 %v216_v16, %v582_v37  ;;  %v233_v2 = vmul.f32 %v216_v16, %v588_v41  ;;  %v234_v3 = vmul.f32 %v216_v16, %v600_v47 }
 0x1ed   :  { %v235_v5 = vmul.f32 %v216_v16, %v606_v51  ;;  %v236_v8 = vmul.f32 %v216_v16, %v618_v57  ;;  %v237_v12 = vmul.f32 %v216_v16, %v624_v61  ;;  %v238_v17 = vmul.f32 %v216_v16, %v633_v4  ;;  %v221_v35 = vpop.permute.xlu1 %220 }
 0x1ee   :  { %v748_v21 = vmul.f32 %v221_v35, %v530_v10  ;;  %v751_v27 = vmul.f32 %v221_v35, %v532_v11  ;;  %v754_v31 = vmul.f32 %v221_v35, %v537_v14  ;;  %v757_v37 = vmul.f32 %v221_v35, %v548_v19 }
 0x1ef   :  { %v760_v41 = vmul.f32 %v221_v35, %v555_v23  ;;  %v763_v47 = vmul.f32 %v221_v35, %v567_v29  ;;  %v766_v51 = vmul.f32 %v221_v35, %v573_v33  ;;  %v769_v10 = vmul.f32 %v221_v35, %v585_v39 }
 0x1f0   :  { %v772_v11 = vmul.f32 %v221_v35, %v591_v43  ;;  %v775_v14 = vmul.f32 %v221_v35, %v603_v49  ;;  %v778_v19 = vmul.f32 %v221_v35, %v609_v53  ;;  %v781_v23 = vmul.f32 %v221_v35, %v621_v59 }
 0x1f1   :  { %v258_v29 = vpop.permute.xlu1 %257  ;;  %v784_v57 = vmul.f32 %v221_v35, %v627_v63  ;;  %v787_v33 = vmul.f32 %v221_v35, %v636_v7  ;;  %v790_v39 = vmul.f32 %v221_v35, %v640_v15  ;;  %v793_v43 = vmul.f32 %v221_v35, %v644_v20 }
 0x1f2   :  { %v265_v49 = vadd.f32 %v258_v29, %v223_v18  ;;  %v266_v61 = vadd.f32 %v258_v29, %v224_v28  ;;  %v267_v53 = vadd.f32 %v258_v29, %v225_v22  ;;  %v268_v4 = vadd.f32 %v258_v29, %v226_v24 }
 0x1f3   :  { %v269_v36 = vadd.f32 %v258_v29, %v227_v25  ;;  %v270_v59 = vadd.f32 %v258_v29, %v228_v40  ;;  %v271_v38 = vadd.f32 %v258_v29, %v229_v26  ;;  %v272_v42 = vadd.f32 %v258_v29, %v230_v30 }
 0x1f4   :  { %v273_v44 = vadd.f32 %v258_v29, %v231_v32  ;;  %v274_v63 = vadd.f32 %v258_v29, %v232_v34  ;;  %v275_v45 = vadd.f32 %v258_v29, %v233_v2  ;;  %v276_v46 = vadd.f32 %v258_v29, %v234_v3 }
 0x1f5   :  { %v277_v7 = vadd.f32 %v258_v29, %v235_v5  ;;  %v278_v48 = vadd.f32 %v258_v29, %v236_v8  ;;  %v279_v50 = vadd.f32 %v258_v29, %v237_v12  ;;  %v280_v15 = vadd.f32 %v258_v29, %v238_v17  ;;  %v263_v22 = vpop.permute.xlu1 %262 }
 0x1f6   :  { %v297_v52 = vmax.f32 %v265_v49, 0.0  ;;  %v298_v54 = vmax.f32 %v266_v61, 0.0  ;;  %v299_v20 = vmax.f32 %v267_v53, 0.0  ;;  %v300_v55 = vmax.f32 %v268_v4, 0.0 }
 0x1f7   :  { %v301_v56 = vmax.f32 %v269_v36, 0.0  ;;  %v302_v58 = vmax.f32 %v270_v59, 0.0  ;;  %v303_v60 = vmax.f32 %v271_v38, 0.0  ;;  %v304_v62 = vmax.f32 %v272_v42, 0.0 }
 0x1f8   :  { %v305_v0 = vmax.f32 %v273_v44, 0.0  ;;  %v306_v1 = vmax.f32 %v274_v63, 0.0  ;;  %v307_v6 = vmax.f32 %v275_v45, 0.0  ;;  %v308_v9 = vmax.f32 %v276_v46, 0.0 }
 0x1f9   :  { %v309_v13 = vmax.f32 %v277_v7, 0.0  ;;  %v310_v16 = vmax.f32 %v278_v48, 0.0  ;;  %v311_v18 = vmax.f32 %v279_v50, 0.0  ;;  %v312_v28 = vmax.f32 %v280_v15, 0.0 }
 0x1fa   :  { %v461_v24 = vpack.c.bf16 %v298_v54, %v297_v52  ;;  %v462_v25 = vpack.c.bf16 %v300_v55, %v299_v20  ;;  %v463_v40 = vpack.c.bf16 %v302_v58, %v301_v56  ;;  %v464_v26 = vpack.c.bf16 %v304_v62, %v303_v60 }
 0x1fb   :  { %v465_v30 = vpack.c.bf16 %v306_v1, %v305_v0  ;;  %v466_v32 = vpack.c.bf16 %v308_v9, %v307_v6  ;;  %v467_v34 = vpack.c.bf16 %v310_v16, %v309_v13  ;;  %v468_v2 = vpack.c.bf16 %v312_v28, %v311_v18 }
 0x1fc   :  { %425 = vst [vmem:[%s862_s3] sm:$0xff] %v461_v24  ;;  %426 = vst [vmem:[%s862_s3 + $0x8] sm:$0xff] %v462_v25  ;;  %v281_v3 = vadd.f32 %v263_v22, %v748_v21  ;;  %v282_v5 = vadd.f32 %v263_v22, %v751_v27  ;;  %v283_v8 = vadd.f32 %v263_v22, %v754_v31 }
 0x1fd   :  { %427 = vst [vmem:[%s862_s3 + $0x10] sm:$0xff] %v463_v40  ;;  %428 = vst [vmem:[%s862_s3 + $0x18] sm:$0xff] %v464_v26  ;;  %v284_v12 = vadd.f32 %v263_v22, %v757_v37  ;;  %v285_v17 = vadd.f32 %v263_v22, %v760_v41  ;;  %v286_v35 = vadd.f32 %v263_v22, %v763_v47 }
 0x1fe   :  { %429 = vst [vmem:[%s862_s3 + $0x20] sm:$0xff] %v465_v30  ;;  %430 = vst [vmem:[%s862_s3 + $0x28] sm:$0xff] %v466_v32  ;;  %v287_v21 = vadd.f32 %v263_v22, %v766_v51  ;;  %v288_v27 = vadd.f32 %v263_v22, %v769_v10  ;;  %v289_v31 = vadd.f32 %v263_v22, %v772_v11  ;;  %v313_v4 = vmax.f32 %v281_v3, 0.0 }
 0x1ff   :  { %431 = vst [vmem:[%s862_s3 + $0x30] sm:$0xff] %v467_v34  ;;  %432 = vst [vmem:[%s862_s3 + $0x38] sm:$0xff] %v468_v2  ;;  %v290_v37 = vadd.f32 %v263_v22, %v775_v14  ;;  %v291_v29 = vadd.f32 %v263_v22, %v778_v19  ;;  %v292_v49 = vadd.f32 %v263_v22, %v781_v23  ;;  %v314_v51 = vmax.f32 %v282_v5, 0.0 }
 0x200   :  { %v293_v61 = vadd.f32 %v263_v22, %v784_v57  ;;  %v294_v53 = vadd.f32 %v263_v22, %v787_v33  ;;  %v295_v41 = vadd.f32 %v263_v22, %v790_v39  ;;  %v296_v47 = vadd.f32 %v263_v22, %v793_v43 }
 0x201   :  { %v315_v36 = vmax.f32 %v283_v8, 0.0  ;;  %v316_v10 = vmax.f32 %v284_v12, 0.0  ;;  %v317_v59 = vmax.f32 %v285_v17, 0.0  ;;  %v318_v11 = vmax.f32 %v286_v35, 0.0 }
 0x202   :  { %v319_v38 = vmax.f32 %v287_v21, 0.0  ;;  %v320_v14 = vmax.f32 %v288_v27, 0.0  ;;  %v321_v42 = vmax.f32 %v289_v31, 0.0  ;;  %v322_v19 = vmax.f32 %v290_v37, 0.0 }
 0x203   :  { %v323_v44 = vmax.f32 %v291_v29, 0.0  ;;  %v324_v23 = vmax.f32 %v292_v49, 0.0  ;;  %v325_v63 = vmax.f32 %v293_v61, 0.0  ;;  %v326_v57 = vmax.f32 %v294_v53, 0.0 }
 0x204   :  { %v327_v45 = vmax.f32 %v295_v41, 0.0  ;;  %v328_v33 = vmax.f32 %v296_v47, 0.0  ;;  %v469_v46 = vpack.c.bf16 %v314_v51, %v313_v4  ;;  %v470_v39 = vpack.c.bf16 %v316_v10, %v315_v36 }
 0x205   :  { %v471_v7 = vpack.c.bf16 %v318_v11, %v317_v59  ;;  %v472_v43 = vpack.c.bf16 %v320_v14, %v319_v38  ;;  %v473_v48 = vpack.c.bf16 %v322_v19, %v321_v42  ;;  %v474_v50 = vpack.c.bf16 %v324_v23, %v323_v44 }
 0x206   :  { %v475_v15 = vpack.c.bf16 %v326_v57, %v325_v63  ;;  %v476_v52 = vpack.c.bf16 %v328_v33, %v327_v45  ;;  %433 = vst [vmem:[%s862_s3 + $0x40] sm:$0xff] %v469_v46  ;;  %434 = vst [vmem:[%s862_s3 + $0x48] sm:$0xff] %v470_v39 }
 0x207   :  { %435 = vst [vmem:[%s862_s3 + $0x50] sm:$0xff] %v471_v7  ;;  %436 = vst [vmem:[%s862_s3 + $0x58] sm:$0xff] %v472_v43 }
 0x208   :  { %437 = vst [vmem:[%s862_s3 + $0x60] sm:$0xff] %v473_v48  ;;  %438 = vst [vmem:[%s862_s3 + $0x68] sm:$0xff] %v474_v50 }
 0x209   :  { %439 = vst [vmem:[%s862_s3 + $0x70] sm:$0xff] %v475_v15  ;;  %440 = vst [vmem:[%s862_s3 + $0x78] sm:$0xff] %v476_v52 }

// kernel: wave_field_decoder_forward.20
= control target key start
LH: loop header
LB: loop body
LE: loop exit
PB: predicated region body
PF: predicated region fallthrough
CT: control target
= control target key end

     0   :  { %v2346_v3 = vmov 0   ;;  %vm164_vm0 = vcmask 130048   ;;  %s3026_s1 = inlined_call_operand.vmem [shape: bf16[16,2048], index: 1, kind: input, shape index: {}]   ;;  %s3027_s0 = inlined_call_operand.vmem [shape: bf16[128,16], index: 0, kind: input, shape index: {}]   ;;  %s3028_s2 = inlined_call_operand.vmem [shape: bf16[128,2048], index: 2, kind: output, shape index: {}]  }
   0x1   :  { %v28_v0 = vld [vmem:[%s3026_s1] sm:$0xff]  ;;  %v29_v2 = vld [vmem:[%s3026_s1 + $0x8] sm:$0xff]  ;;  %221 = vmatprep.mubr.bf16.mxu0 %v2346_v3  ;;  %334 = vmatprep.mubr.bf16.mxu1 %v2346_v3  ;;  %v30_v10 = vld [vmem:[%s3026_s1 + $0x10] sm:$0xff] }
   0x2   :  { %v36_v1 = vld [vmem:[%s3026_s1 + $0x40] sm:$0xff]  ;;  %v37_v5 = vld [vmem:[%s3026_s1 + $0x48] sm:$0xff]  ;;  %v38_v11 = vld [vmem:[%s3026_s1 + $0x50] sm:$0xff] }
   0x3   :  { %v2002_v4 = vcombine.high %v28_v0, %v36_v1  ;;  %v2001_v6 = vcombine.low %v28_v0, %v36_v1  ;;  %v2004_v7 = vcombine.high %v29_v2, %v37_v5  ;;  %v2003_v8 = vcombine.low %v29_v2, %v37_v5  ;;  %v2379_v9 = vld [vmem:[%s3027_s0] sm:$0xff]   ;;  %v31_v13 = vld [vmem:[%s3026_s1 + $0x18] sm:$0xff]  ;;  %v2402_v18 = vld [vmem:[%s3027_s0 + $0x8] sm:$0xff]  }
   0x4   :  { %v2006_v12 = vcombine.high %v30_v10, %v38_v11  ;;  %v39_v14 = vld [vmem:[%s3026_s1 + $0x58] sm:$0xff]  ;;  %v2005_v15 = vcombine.low %v30_v10, %v38_v11  ;;  %v32_v19 = vld [vmem:[%s3026_s1 + $0x20] sm:$0xff]  ;;  %v33_v21 = vld [vmem:[%s3026_s1 + $0x28] sm:$0xff] }
   0x5   :  { %203 = vmatprep.subr.bf16.mxu0 %v2002_v4  ;;  %316 = vmatprep.subr.bf16.mxu1 %v2004_v7  ;;  %v2008_v16 = vcombine.high %v31_v13, %v39_v14  ;;  %v2007_v17 = vcombine.low %v31_v13, %v39_v14  ;;  %v40_v20 = vld [vmem:[%s3026_s1 + $0x60] sm:$0xff]  ;;  %v41_v22 = vld [vmem:[%s3026_s1 + $0x68] sm:$0xff]  ;;  %v2425_v25 = vld [vmem:[%s3027_s0 + $0x10] sm:$0xff]  }
   0x6   :  { %204 = vmatpush1.bf16.msra.mxu0 %v2001_v6  ;;  %317 = vmatpush1.bf16.msra.mxu1 %v2003_v8  ;;  %v2010_v23 = vcombine.high %v32_v19, %v40_v20  ;;  %v2012_v24 = vcombine.high %v33_v21, %v41_v22  ;;  %v2436_v26 = vld [vmem:[%s3027_s0 + $0x18] sm:$0xff]   ;;  %v2447_v27 = vld [vmem:[%s3027_s0 + $0x20] sm:$0xff]   ;;  %v2458_v28 = vld [vmem:[%s3027_s0 + $0x28] sm:$0xff]   ;;  %v2009_v33 = vcombine.low %v32_v19, %v40_v20 }
   0x7   :  { %429 = vmatprep.subr.bf16.mxu0 %v2006_v12  ;;  %542 = vmatprep.subr.bf16.mxu1 %v2008_v16  ;;  %v2469_v29 = vld [vmem:[%s3027_s0 + $0x30] sm:$0xff]   ;;  %v2480_v30 = vld [vmem:[%s3027_s0 + $0x38] sm:$0xff]   ;;  %v2011_v36 = vcombine.low %v33_v21, %v41_v22 }
   0x8   :  { %v34_v31 = vld [vmem:[%s3026_s1 + $0x30] sm:$0xff]  ;;  %v35_v34 = vld [vmem:[%s3026_s1 + $0x38] sm:$0xff] }
   0x9   :  { %2017 = vmatmul.mubr.msk.bf16.vlgmr.msra.gmra.mxu0 %vm164_vm0, %v2379_v9  ;;  %2025 = vmatmul.mubr.msk.bf16.vlgmr.msra.gmra.mxu1 %vm164_vm0, %v2379_v9  ;;  %v42_v32 = vld [vmem:[%s3026_s1 + $0x70] sm:$0xff]  ;;  %v43_v35 = vld [vmem:[%s3026_s1 + $0x78] sm:$0xff] }
   0xa   :  { %430 = vmatpush1.bf16.msra.mxu0 %v2005_v15  ;;  %543 = vmatpush1.bf16.msra.mxu1 %v2007_v17  ;;  %v2014_v37 = vcombine.high %v34_v31, %v42_v32  ;;  %v2016_v38 = vcombine.high %v35_v34, %v43_v35  ;;  %v2013_v39 = vcombine.low %v34_v31, %v42_v32 }
   0xb   :  { %231 = vmatprep.mubr.bf16.mxu0 %v2346_v3  ;;  %344 = vmatprep.mubr.bf16.mxu1 %v2346_v3  ;;  %v2015_v40 = vcombine.low %v35_v34, %v43_v35 }
   0xc   :  { %655 = vmatprep.subr.bf16.mxu0 %v2010_v23  ;;  %768 = vmatprep.subr.bf16.mxu1 %v2012_v24 }
  0x11   :  { %2018 = vmatmul.mubr.msk.bf16.gmra.mxu0 %vm164_vm0, %v2402_v18  ;;  %2026 = vmatmul.mubr.msk.bf16.gmra.mxu1 %vm164_vm0, %v2402_v18 }
  0x12   :  { %241 = vmatprep.mubr.bf16.mxu0 %v2346_v3  ;;  %354 = vmatprep.mubr.bf16.mxu1 %v2346_v3 }
  0x19   :  { %2019 = vmatmul.mubr.msk.bf16.gmra.mxu0 %vm164_vm0, %v2425_v25  ;;  %2027 = vmatmul.mubr.msk.bf16.gmra.mxu1 %vm164_vm0, %v2425_v25 }
  0x1a   :  { %251 = vmatprep.mubr.bf16.mxu0 %v2346_v3  ;;  %364 = vmatprep.mubr.bf16.mxu1 %v2346_v3 }
  0x21   :  { %2020 = vmatmul.mubr.msk.bf16.gmra.mxu0 %vm164_vm0, %v2436_v26  ;;  %2028 = vmatmul.mubr.msk.bf16.gmra.mxu1 %vm164_vm0, %v2436_v26 }
  0x22   :  { %261 = vmatprep.mubr.bf16.mxu0 %v2346_v3  ;;  %374 = vmatprep.mubr.bf16.mxu1 %v2346_v3 }
  0x29   :  { %2021 = vmatmul.mubr.msk.bf16.gmra.mxu0 %vm164_vm0, %v2447_v27  ;;  %2029 = vmatmul.mubr.msk.bf16.gmra.mxu1 %vm164_vm0, %v2447_v27 }
  0x2a   :  { %271 = vmatprep.mubr.bf16.mxu0 %v2346_v3  ;;  %384 = vmatprep.mubr.bf16.mxu1 %v2346_v3 }
  0x31   :  { %2022 = vmatmul.mubr.msk.bf16.gmra.mxu0 %vm164_vm0, %v2458_v28  ;;  %2030 = vmatmul.mubr.msk.bf16.gmra.mxu1 %vm164_vm0, %v2458_v28 }
  0x32   :  { %281 = vmatprep.mubr.bf16.mxu0 %v2346_v3  ;;  %394 = vmatprep.mubr.bf16.mxu1 %v2346_v3 }
  0x39   :  { %2023 = vmatmul.mubr.msk.bf16.gmra.mxu0 %vm164_vm0, %v2469_v29  ;;  %2031 = vmatmul.mubr.msk.bf16.gmra.mxu1 %vm164_vm0, %v2469_v29 }
  0x3a   :  { %291 = vmatprep.mubr.bf16.mxu0 %v2346_v3  ;;  %404 = vmatprep.mubr.bf16.mxu1 %v2346_v3 }
  0x41   :  { %2024 = vmatmul.mubr.msk.bf16.gmra.mxu0 %vm164_vm0, %v2480_v30  ;;  %2032 = vmatmul.mubr.msk.bf16.gmra.mxu1 %vm164_vm0, %v2480_v30 }
  0x42   :  { %447 = vmatprep.mubr.bf16.mxu0 %v2346_v3  ;;  %560 = vmatprep.mubr.bf16.mxu1 %v2346_v3 }
  0x49   :  { %2033 = vmatmul.mubr.msk.bf16.vlgmr.msra.gmra.mxu0 %vm164_vm0, %v2379_v9  ;;  %2041 = vmatmul.mubr.msk.bf16.vlgmr.msra.gmra.mxu1 %vm164_vm0, %v2379_v9 }
  0x4a   :  { %656 = vmatpush1.bf16.msra.mxu0 %v2009_v33  ;;  %769 = vmatpush1.bf16.msra.mxu1 %v2011_v36 }
  0x4b   :  { %457 = vmatprep.mubr.bf16.mxu0 %v2346_v3  ;;  %570 = vmatprep.mubr.bf16.mxu1 %v2346_v3 }
  0x4c   :  { %881 = vmatprep.subr.bf16.mxu0 %v2014_v37  ;;  %994 = vmatprep.subr.bf16.mxu1 %v2016_v38 }
  0x51   :  { %2034 = vmatmul.mubr.msk.bf16.gmra.mxu0 %vm164_vm0, %v2402_v18  ;;  %2042 = vmatmul.mubr.msk.bf16.gmra.mxu1 %vm164_vm0, %v2402_v18 }
  0x52   :  { %467 = vmatprep.mubr.bf16.mxu0 %v2346_v3  ;;  %580 = vmatprep.mubr.bf16.mxu1 %v2346_v3 }
  0x59   :  { %2035 = vmatmul.mubr.msk.bf16.gmra.mxu0 %vm164_vm0, %v2425_v25  ;;  %2043 = vmatmul.mubr.msk.bf16.gmra.mxu1 %vm164_vm0, %v2425_v25 }
  0x5a   :  { %477 = vmatprep.mubr.bf16.mxu0 %v2346_v3  ;;  %590 = vmatprep.mubr.bf16.mxu1 %v2346_v3 }
  0x61   :  { %2036 = vmatmul.mubr.msk.bf16.gmra.mxu0 %vm164_vm0, %v2436_v26  ;;  %2044 = vmatmul.mubr.msk.bf16.gmra.mxu1 %vm164_vm0, %v2436_v26 }
  0x62   :  { %487 = vmatprep.mubr.bf16.mxu0 %v2346_v3  ;;  %600 = vmatprep.mubr.bf16.mxu1 %v2346_v3 }
  0x69   :  { %2037 = vmatmul.mubr.msk.bf16.gmra.mxu0 %vm164_vm0, %v2447_v27  ;;  %2045 = vmatmul.mubr.msk.bf16.gmra.mxu1 %vm164_vm0, %v2447_v27 }
  0x6a   :  { %497 = vmatprep.mubr.bf16.mxu0 %v2346_v3  ;;  %610 = vmatprep.mubr.bf16.mxu1 %v2346_v3 }
  0x71   :  { %2038 = vmatmul.mubr.msk.bf16.gmra.mxu0 %vm164_vm0, %v2458_v28  ;;  %2046 = vmatmul.mubr.msk.bf16.gmra.mxu1 %vm164_vm0, %v2458_v28 }
  0x72   :  { %507 = vmatprep.mubr.bf16.mxu0 %v2346_v3  ;;  %620 = vmatprep.mubr.bf16.mxu1 %v2346_v3 }
  0x79   :  { %2039 = vmatmul.mubr.msk.bf16.gmra.mxu0 %vm164_vm0, %v2469_v29  ;;  %2047 = vmatmul.mubr.msk.bf16.gmra.mxu1 %vm164_vm0, %v2469_v29 }
  0x7a   :  { %517 = vmatprep.mubr.bf16.mxu0 %v2346_v3  ;;  %630 = vmatprep.mubr.bf16.mxu1 %v2346_v3 }
  0x81   :  { %2040 = vmatmul.mubr.msk.bf16.gmra.mxu0 %vm164_vm0, %v2480_v30  ;;  %2048 = vmatmul.mubr.msk.bf16.gmra.mxu1 %vm164_vm0, %v2480_v30 }
  0x82   :  { %673 = vmatprep.mubr.bf16.mxu0 %v2346_v3  ;;  %786 = vmatprep.mubr.bf16.mxu1 %v2346_v3 }
  0x89   :  { %2049 = vmatmul.mubr.msk.bf16.vlgmr.msra.gmra.mxu0 %vm164_vm0, %v2379_v9  ;;  %2057 = vmatmul.mubr.msk.bf16.vlgmr.msra.gmra.mxu1 %vm164_vm0, %v2379_v9 }
  0x8a   :  { %882 = vmatpush1.bf16.msra.mxu0 %v2013_v39  ;;  %995 = vmatpush1.bf16.msra.mxu1 %v2015_v40 }
  0x8b   :  { %683 = vmatprep.mubr.bf16.mxu0 %v2346_v3  ;;  %796 = vmatprep.mubr.bf16.mxu1 %v2346_v3 }
  0x91   :  { %2050 = vmatmul.mubr.msk.bf16.gmra.mxu0 %vm164_vm0, %v2402_v18  ;;  %2058 = vmatmul.mubr.msk.bf16.gmra.mxu1 %vm164_vm0, %v2402_v18 }
  0x92   :  { %693 = vmatprep.mubr.bf16.mxu0 %v2346_v3  ;;  %806 = vmatprep.mubr.bf16.mxu1 %v2346_v3 }
  0x99   :  { %2051 = vmatmul.mubr.msk.bf16.gmra.mxu0 %vm164_vm0, %v2425_v25  ;;  %2059 = vmatmul.mubr.msk.bf16.gmra.mxu1 %vm164_vm0, %v2425_v25 }
  0x9a   :  { %703 = vmatprep.mubr.bf16.mxu0 %v2346_v3  ;;  %816 = vmatprep.mubr.bf16.mxu1 %v2346_v3 }
  0xa1   :  { %2052 = vmatmul.mubr.msk.bf16.gmra.mxu0 %vm164_vm0, %v2436_v26  ;;  %2060 = vmatmul.mubr.msk.bf16.gmra.mxu1 %vm164_vm0, %v2436_v26 }
  0xa2   :  { %713 = vmatprep.mubr.bf16.mxu0 %v2346_v3  ;;  %826 = vmatprep.mubr.bf16.mxu1 %v2346_v3 }
  0xa9   :  { %2053 = vmatmul.mubr.msk.bf16.gmra.mxu0 %vm164_vm0, %v2447_v27  ;;  %2061 = vmatmul.mubr.msk.bf16.gmra.mxu1 %vm164_vm0, %v2447_v27 }
  0xaa   :  { %723 = vmatprep.mubr.bf16.mxu0 %v2346_v3  ;;  %836 = vmatprep.mubr.bf16.mxu1 %v2346_v3 }
  0xb1   :  { %2054 = vmatmul.mubr.msk.bf16.gmra.mxu0 %vm164_vm0, %v2458_v28  ;;  %2062 = vmatmul.mubr.msk.bf16.gmra.mxu1 %vm164_vm0, %v2458_v28 }
  0xb2   :  { %733 = vmatprep.mubr.bf16.mxu0 %v2346_v3  ;;  %846 = vmatprep.mubr.bf16.mxu1 %v2346_v3 }
  0xb9   :  { %2055 = vmatmul.mubr.msk.bf16.gmra.mxu0 %vm164_vm0, %v2469_v29  ;;  %2063 = vmatmul.mubr.msk.bf16.gmra.mxu1 %vm164_vm0, %v2469_v29 }
  0xba   :  { %743 = vmatprep.mubr.bf16.mxu0 %v2346_v3  ;;  %856 = vmatprep.mubr.bf16.mxu1 %v2346_v3 }
  0xc1   :  { %2056 = vmatmul.mubr.msk.bf16.gmra.mxu0 %vm164_vm0, %v2480_v30  ;;  %2064 = vmatmul.mubr.msk.bf16.gmra.mxu1 %vm164_vm0, %v2480_v30 }
  0xc2   :  { %899 = vmatprep.mubr.bf16.mxu0 %v2346_v3  ;;  %1012 = vmatprep.mubr.bf16.mxu1 %v2346_v3 }
  0xc9   :  { %v223_v41 = vpop.f32.mrf.mxu0  ;;  %2065 = vmatmul.mubr.msk.bf16.vlgmr.msra.gmra.mxu0 %vm164_vm0, %v2379_v9  ;;  %v336_v42 = vpop.f32.mrf.mxu1  ;;  %2073 = vmatmul.mubr.msk.bf16.vlgmr.msra.gmra.mxu1 %vm164_vm0, %v2379_v9 }
  0xca   :  { %909 = vmatprep.mubr.bf16.mxu0 %v2346_v3  ;;  %1022 = vmatprep.mubr.bf16.mxu1 %v2346_v3 }
  0xcb   :  { %v225_v43 = vpop.f32.mrf.mxu0  ;;  %v338_v45 = vpop.f32.mrf.mxu1 }
  0xcc   :  { %v2209_v44 = vpack.c.bf16 %v225_v43, %v223_v41  ;;  %v2210_v46 = vpack.c.bf16 %v338_v45, %v336_v42 }
  0xcd   :  { %v227_v47 = vpop.f32.mrf.mxu0  ;;  %v340_v48 = vpop.f32.mrf.mxu1 }
  0xce   :  { %1861 = vst [vmem:[%s3028_s2] sm:$0xff] %v2209_v44  ;;  %1862 = vst [vmem:[%s3028_s2 + $0x8] sm:$0xff] %v2210_v46 }
  0xcf   :  { %v229_v49 = vpop.f32.mrf.mxu0  ;;  %v342_v51 = vpop.f32.mrf.mxu1 }
  0xd0   :  { %v2217_v50 = vpack.c.bf16 %v229_v49, %v227_v47  ;;  %v2218_v52 = vpack.c.bf16 %v342_v51, %v340_v48 }
  0xd1   :  { %v233_v53 = vpop.f32.mrf.mxu0  ;;  %2066 = vmatmul.mubr.msk.bf16.gmra.mxu0 %vm164_vm0, %v2402_v18  ;;  %v346_v54 = vpop.f32.mrf.mxu1  ;;  %2074 = vmatmul.mubr.msk.bf16.gmra.mxu1 %vm164_vm0, %v2402_v18 }
  0xd2   :  { %1869 = vst [vmem:[%s3028_s2 + $0x40] sm:$0xff] %v2217_v50  ;;  %919 = vmatprep.mubr.bf16.mxu0 %v2346_v3  ;;  %1870 = vst [vmem:[%s3028_s2 + $0x48] sm:$0xff] %v2218_v52  ;;  %1032 = vmatprep.mubr.bf16.mxu1 %v2346_v3 }
  0xd3   :  { %v235_v55 = vpop.f32.mrf.mxu0  ;;  %v348_v57 = vpop.f32.mrf.mxu1 }
  0xd4   :  { %v2225_v56 = vpack.c.bf16 %v235_v55, %v233_v53  ;;  %v2226_v58 = vpack.c.bf16 %v348_v57, %v346_v54 }
  0xd5   :  { %v237_v59 = vpop.f32.mrf.mxu0  ;;  %v350_v60 = vpop.f32.mrf.mxu1 }
  0xd6   :  { %1877 = vst [vmem:[%s3028_s2 + $0x80] sm:$0xff] %v2225_v56  ;;  %1878 = vst [vmem:[%s3028_s2 + $0x88] sm:$0xff] %v2226_v58 }
  0xd7   :  { %v239_v61 = vpop.f32.mrf.mxu0  ;;  %v352_v63 = vpop.f32.mrf.mxu1 }
  0xd8   :  { %v2233_v62 = vpack.c.bf16 %v239_v61, %v237_v59  ;;  %v2234_v0 = vpack.c.bf16 %v352_v63, %v350_v60 }
  0xd9   :  { %v243_v1 = vpop.f32.mrf.mxu0  ;;  %2067 = vmatmul.mubr.msk.bf16.gmra.mxu0 %vm164_vm0, %v2425_v25  ;;  %v356_v2 = vpop.f32.mrf.mxu1  ;;  %2075 = vmatmul.mubr.msk.bf16.gmra.mxu1 %vm164_vm0, %v2425_v25 }
  0xda   :  { %1885 = vst [vmem:[%s3028_s2 + $0xc0] sm:$0xff] %v2233_v62  ;;  %929 = vmatprep.mubr.bf16.mxu0 %v2346_v3  ;;  %1886 = vst [vmem:[%s3028_s2 + $0xc8] sm:$0xff] %v2234_v0  ;;  %1042 = vmatprep.mubr.bf16.mxu1 %v2346_v3 }
  0xdb   :  { %v245_v4 = vpop.f32.mrf.mxu0  ;;  %v358_v6 = vpop.f32.mrf.mxu1 }
  0xdc   :  { %v2241_v5 = vpack.c.bf16 %v245_v4, %v243_v1  ;;  %v2242_v7 = vpack.c.bf16 %v358_v6, %v356_v2 }
  0xdd   :  { %v247_v8 = vpop.f32.mrf.mxu0  ;;  %v360_v9 = vpop.f32.mrf.mxu1 }
  0xde   :  { %1893 = vst [vmem:[%s3028_s2 + $0x100] sm:$0xff] %v2241_v5  ;;  %1894 = vst [vmem:[%s3028_s2 + $0x108] sm:$0xff] %v2242_v7 }
  0xdf   :  { %v249_v10 = vpop.f32.mrf.mxu0  ;;  %v362_v12 = vpop.f32.mrf.mxu1 }
  0xe0   :  { %v2249_v11 = vpack.c.bf16 %v249_v10, %v247_v8  ;;  %v2250_v13 = vpack.c.bf16 %v362_v12, %v360_v9 }
  0xe1   :  { %v253_v14 = vpop.f32.mrf.mxu0  ;;  %2068 = vmatmul.mubr.msk.bf16.gmra.mxu0 %vm164_vm0, %v2436_v26  ;;  %v366_v15 = vpop.f32.mrf.mxu1  ;;  %2076 = vmatmul.mubr.msk.bf16.gmra.mxu1 %vm164_vm0, %v2436_v26 }
  0xe2   :  { %1901 = vst [vmem:[%s3028_s2 + $0x140] sm:$0xff] %v2249_v11  ;;  %939 = vmatprep.mubr.bf16.mxu0 %v2346_v3  ;;  %1902 = vst [vmem:[%s3028_s2 + $0x148] sm:$0xff] %v2250_v13  ;;  %1052 = vmatprep.mubr.bf16.mxu1 %v2346_v3 }
  0xe3   :  { %v255_v16 = vpop.f32.mrf.mxu0  ;;  %v368_v18 = vpop.f32.mrf.mxu1 }
  0xe4   :  { %v2257_v17 = vpack.c.bf16 %v255_v16, %v253_v14  ;;  %v2258_v19 = vpack.c.bf16 %v368_v18, %v366_v15 }
  0xe5   :  { %v257_v20 = vpop.f32.mrf.mxu0  ;;  %v370_v21 = vpop.f32.mrf.mxu1 }
  0xe6   :  { %1909 = vst [vmem:[%s3028_s2 + $0x180] sm:$0xff] %v2257_v17  ;;  %1910 = vst [vmem:[%s3028_s2 + $0x188] sm:$0xff] %v2258_v19 }
  0xe7   :  { %v259_v22 = vpop.f32.mrf.mxu0  ;;  %v372_v24 = vpop.f32.mrf.mxu1 }
  0xe8   :  { %v2265_v23 = vpack.c.bf16 %v259_v22, %v257_v20  ;;  %v2266_v25 = vpack.c.bf16 %v372_v24, %v370_v21 }
  0xe9   :  { %v263_v26 = vpop.f32.mrf.mxu0  ;;  %2069 = vmatmul.mubr.msk.bf16.gmra.mxu0 %vm164_vm0, %v2447_v27  ;;  %v376_v31 = vpop.f32.mrf.mxu1  ;;  %2077 = vmatmul.mubr.msk.bf16.gmra.mxu1 %vm164_vm0, %v2447_v27 }
  0xea   :  { %1917 = vst [vmem:[%s3028_s2 + $0x1c0] sm:$0xff] %v2265_v23  ;;  %949 = vmatprep.mubr.bf16.mxu0 %v2346_v3  ;;  %1918 = vst [vmem:[%s3028_s2 + $0x1c8] sm:$0xff] %v2266_v25  ;;  %1062 = vmatprep.mubr.bf16.mxu1 %v2346_v3 }
  0xeb   :  { %v265_v32 = vpop.f32.mrf.mxu0  ;;  %v378_v34 = vpop.f32.mrf.mxu1 }
  0xec   :  { %v2273_v33 = vpack.c.bf16 %v265_v32, %v263_v26  ;;  %v2274_v35 = vpack.c.bf16 %v378_v34, %v376_v31 }
  0xed   :  { %v267_v36 = vpop.f32.mrf.mxu0  ;;  %v380_v37 = vpop.f32.mrf.mxu1 }
  0xee   :  { %1925 = vst [vmem:[%s3028_s2 + $0x200] sm:$0xff] %v2273_v33  ;;  %1926 = vst [vmem:[%s3028_s2 + $0x208] sm:$0xff] %v2274_v35 }
  0xef   :  { %v269_v27 = vpop.f32.mrf.mxu0  ;;  %v382_v39 = vpop.f32.mrf.mxu1 }
  0xf0   :  { %v2281_v38 = vpack.c.bf16 %v269_v27, %v267_v36  ;;  %v2282_v40 = vpack.c.bf16 %v382_v39, %v380_v37 }
  0xf1   :  { %v273_v41 = vpop.f32.mrf.mxu0  ;;  %2070 = vmatmul.mubr.msk.bf16.gmra.mxu0 %vm164_vm0, %v2458_v28  ;;  %v386_v42 = vpop.f32.mrf.mxu1  ;;  %2078 = vmatmul.mubr.msk.bf16.gmra.mxu1 %vm164_vm0, %v2458_v28 }
  0xf2   :  { %1933 = vst [vmem:[%s3028_s2 + $0x240] sm:$0xff] %v2281_v38  ;;  %959 = vmatprep.mubr.bf16.mxu0 %v2346_v3  ;;  %1934 = vst [vmem:[%s3028_s2 + $0x248] sm:$0xff] %v2282_v40  ;;  %1072 = vmatprep.mubr.bf16.mxu1 %v2346_v3 }
  0xf3   :  { %v275_v43 = vpop.f32.mrf.mxu0  ;;  %v388_v45 = vpop.f32.mrf.mxu1 }
  0xf4   :  { %v2289_v44 = vpack.c.bf16 %v275_v43, %v273_v41  ;;  %v2290_v46 = vpack.c.bf16 %v388_v45, %v386_v42 }
  0xf5   :  { %v277_v47 = vpop.f32.mrf.mxu0  ;;  %v390_v48 = vpop.f32.mrf.mxu1 }
  0xf6   :  { %1941 = vst [vmem:[%s3028_s2 + $0x280] sm:$0xff] %v2289_v44  ;;  %1942 = vst [vmem:[%s3028_s2 + $0x288] sm:$0xff] %v2290_v46 }
  0xf7   :  { %v279_v28 = vpop.f32.mrf.mxu0  ;;  %v392_v50 = vpop.f32.mrf.mxu1 }
  0xf8   :  { %v2297_v49 = vpack.c.bf16 %v279_v28, %v277_v47  ;;  %v2298_v51 = vpack.c.bf16 %v392_v50, %v390_v48 }
  0xf9   :  { %v283_v52 = vpop.f32.mrf.mxu0  ;;  %2071 = vmatmul.mubr.msk.bf16.gmra.mxu0 %vm164_vm0, %v2469_v29  ;;  %v396_v53 = vpop.f32.mrf.mxu1  ;;  %2079 = vmatmul.mubr.msk.bf16.gmra.mxu1 %vm164_vm0, %v2469_v29 }
  0xfa   :  { %1949 = vst [vmem:[%s3028_s2 + $0x2c0] sm:$0xff] %v2297_v49  ;;  %969 = vmatprep.mubr.bf16.mxu0 %v2346_v3  ;;  %1950 = vst [vmem:[%s3028_s2 + $0x2c8] sm:$0xff] %v2298_v51  ;;  %1082 = vmatprep.mubr.bf16.mxu1 %v2346_v3 }
  0xfb   :  { %v285_v54 = vpop.f32.mrf.mxu0  ;;  %v398_v56 = vpop.f32.mrf.mxu1 }
  0xfc   :  { %v2305_v55 = vpack.c.bf16 %v285_v54, %v283_v52  ;;  %v2306_v57 = vpack.c.bf16 %v398_v56, %v396_v53 }
  0xfd   :  { %v287_v58 = vpop.f32.mrf.mxu0  ;;  %v400_v59 = vpop.f32.mrf.mxu1 }
  0xfe   :  { %1957 = vst [vmem:[%s3028_s2 + $0x300] sm:$0xff] %v2305_v55  ;;  %1958 = vst [vmem:[%s3028_s2 + $0x308] sm:$0xff] %v2306_v57 }
  0xff   :  { %v289_v29 = vpop.f32.mrf.mxu0  ;;  %v402_v61 = vpop.f32.mrf.mxu1 }
 0x100   :  { %v2313_v60 = vpack.c.bf16 %v289_v29, %v287_v58  ;;  %v2314_v62 = vpack.c.bf16 %v402_v61, %v400_v59 }
 0x101   :  { %v293_v63 = vpop.f32.mrf.mxu0  ;;  %2072 = vmatmul.mubr.msk.bf16.gmra.mxu0 %vm164_vm0, %v2480_v30  ;;  %v406_v3 = vpop.f32.mrf.mxu1  ;;  %2080 = vmatmul.mubr.msk.bf16.gmra.mxu1 %vm164_vm0, %v2480_v30 }
 0x102   :  { %1965 = vst [vmem:[%s3028_s2 + $0x340] sm:$0xff] %v2313_v60  ;;  %1966 = vst [vmem:[%s3028_s2 + $0x348] sm:$0xff] %v2314_v62 }
 0x103   :  { %v295_v0 = vpop.f32.mrf.mxu0  ;;  %v408_v2 = vpop.f32.mrf.mxu1 }
 0x104   :  { %v2321_v1 = vpack.c.bf16 %v295_v0, %v293_v63  ;;  %v2322_v4 = vpack.c.bf16 %v408_v2, %v406_v3 }
 0x105   :  { %v297_v5 = vpop.f32.mrf.mxu0  ;;  %v410_v6 = vpop.f32.mrf.mxu1 }
 0x106   :  { %1973 = vst [vmem:[%s3028_s2 + $0x380] sm:$0xff] %v2321_v1  ;;  %1974 = vst [vmem:[%s3028_s2 + $0x388] sm:$0xff] %v2322_v4 }
 0x107   :  { %v299_v7 = vpop.f32.mrf.mxu0  ;;  %v412_v8 = vpop.f32.mrf.mxu1 }
 0x108   :  { %v2329_v30 = vpack.c.bf16 %v299_v7, %v297_v5  ;;  %v2330_v9 = vpack.c.bf16 %v412_v8, %v410_v6 }
 0x109   :  { %v449_v10 = vpop.f32.mrf.mxu0  ;;  %v562_v11 = vpop.f32.mrf.mxu1 }
 0x10a   :  { %1981 = vst [vmem:[%s3028_s2 + $0x3c0] sm:$0xff] %v2329_v30  ;;  %1982 = vst [vmem:[%s3028_s2 + $0x3c8] sm:$0xff] %v2330_v9 }
 0x10b   :  { %v451_v12 = vpop.f32.mrf.mxu0  ;;  %v564_v14 = vpop.f32.mrf.mxu1 }
 0x10c   :  { %v2211_v13 = vpack.c.bf16 %v451_v12, %v449_v10  ;;  %v2212_v15 = vpack.c.bf16 %v564_v14, %v562_v11 }
 0x10d   :  { %v453_v16 = vpop.f32.mrf.mxu0  ;;  %v566_v17 = vpop.f32.mrf.mxu1 }
 0x10e   :  { %1863 = vst [vmem:[%s3028_s2 + $0x10] sm:$0xff] %v2211_v13  ;;  %1864 = vst [vmem:[%s3028_s2 + $0x18] sm:$0xff] %v2212_v15 }
 0x10f   :  { %v455_v18 = vpop.f32.mrf.mxu0  ;;  %v568_v20 = vpop.f32.mrf.mxu1 }
 0x110   :  { %v2219_v19 = vpack.c.bf16 %v455_v18, %v453_v16  ;;  %v2220_v21 = vpack.c.bf16 %v568_v20, %v566_v17 }
 0x111   :  { %v459_v22 = vpop.f32.mrf.mxu0  ;;  %v572_v23 = vpop.f32.mrf.mxu1 }
 0x112   :  { %1871 = vst [vmem:[%s3028_s2 + $0x50] sm:$0xff] %v2219_v19  ;;  %1872 = vst [vmem:[%s3028_s2 + $0x58] sm:$0xff] %v2220_v21 }
 0x113   :  { %v461_v24 = vpop.f32.mrf.mxu0  ;;  %v574_v26 = vpop.f32.mrf.mxu1 }
 0x114   :  { %v2227_v25 = vpack.c.bf16 %v461_v24, %v459_v22  ;;  %v2228_v31 = vpack.c.bf16 %v574_v26, %v572_v23 }
 0x115   :  { %v463_v32 = vpop.f32.mrf.mxu0  ;;  %v576_v33 = vpop.f32.mrf.mxu1 }
 0x116   :  { %1879 = vst [vmem:[%s3028_s2 + $0x90] sm:$0xff] %v2227_v25  ;;  %1880 = vst [vmem:[%s3028_s2 + $0x98] sm:$0xff] %v2228_v31 }
 0x117   :  { %v465_v34 = vpop.f32.mrf.mxu0  ;;  %v578_v36 = vpop.f32.mrf.mxu1 }
 0x118   :  { %v2235_v35 = vpack.c.bf16 %v465_v34, %v463_v32  ;;  %v2236_v37 = vpack.c.bf16 %v578_v36, %v576_v33 }
 0x119   :  { %v469_v27 = vpop.f32.mrf.mxu0  ;;  %v582_v38 = vpop.f32.mrf.mxu1 }
 0x11a   :  { %1887 = vst [vmem:[%s3028_s2 + $0xd0] sm:$0xff] %v2235_v35  ;;  %1888 = vst [vmem:[%s3028_s2 + $0xd8] sm:$0xff] %v2236_v37 }
 0x11b   :  { %v471_v39 = vpop.f32.mrf.mxu0  ;;  %v584_v41 = vpop.f32.mrf.mxu1 }
 0x11c   :  { %v2243_v40 = vpack.c.bf16 %v471_v39, %v469_v27  ;;  %v2244_v42 = vpack.c.bf16 %v584_v41, %v582_v38 }
 0x11d   :  { %v473_v43 = vpop.f32.mrf.mxu0  ;;  %v586_v44 = vpop.f32.mrf.mxu1 }
 0x11e   :  { %1895 = vst [vmem:[%s3028_s2 + $0x110] sm:$0xff] %v2243_v40  ;;  %1896 = vst [vmem:[%s3028_s2 + $0x118] sm:$0xff] %v2244_v42 }
 0x11f   :  { %v475_v45 = vpop.f32.mrf.mxu0  ;;  %v588_v47 = vpop.f32.mrf.mxu1 }
 0x120   :  { %v2251_v46 = vpack.c.bf16 %v475_v45, %v473_v43  ;;  %v2252_v48 = vpack.c.bf16 %v588_v47, %v586_v44 }
 0x121   :  { %v479_v28 = vpop.f32.mrf.mxu0  ;;  %v592_v49 = vpop.f32.mrf.mxu1 }
 0x122   :  { %1903 = vst [vmem:[%s3028_s2 + $0x150] sm:$0xff] %v2251_v46  ;;  %1904 = vst [vmem:[%s3028_s2 + $0x158] sm:$0xff] %v2252_v48 }
 0x123   :  { %v481_v50 = vpop.f32.mrf.mxu0  ;;  %v594_v52 = vpop.f32.mrf.mxu1 }
 0x124   :  { %v2259_v51 = vpack.c.bf16 %v481_v50, %v479_v28  ;;  %v2260_v53 = vpack.c.bf16 %v594_v52, %v592_v49 }
 0x125   :  { %v483_v54 = vpop.f32.mrf.mxu0  ;;  %v596_v55 = vpop.f32.mrf.mxu1 }
 0x126   :  { %1911 = vst [vmem:[%s3028_s2 + $0x190] sm:$0xff] %v2259_v51  ;;  %1912 = vst [vmem:[%s3028_s2 + $0x198] sm:$0xff] %v2260_v53 }
 0x127   :  { %v485_v56 = vpop.f32.mrf.mxu0  ;;  %v598_v58 = vpop.f32.mrf.mxu1 }
 0x128   :  { %v2267_v57 = vpack.c.bf16 %v485_v56, %v483_v54  ;;  %v2268_v59 = vpack.c.bf16 %v598_v58, %v596_v55 }
 0x129   :  { %v489_v29 = vpop.f32.mrf.mxu0  ;;  %v602_v60 = vpop.f32.mrf.mxu1 }
 0x12a   :  { %1919 = vst [vmem:[%s3028_s2 + $0x1d0] sm:$0xff] %v2267_v57  ;;  %1920 = vst [vmem:[%s3028_s2 + $0x1d8] sm:$0xff] %v2268_v59 }
 0x12b   :  { %v491_v61 = vpop.f32.mrf.mxu0  ;;  %v604_v63 = vpop.f32.mrf.mxu1 }
 0x12c   :  { %v2275_v62 = vpack.c.bf16 %v491_v61, %v489_v29  ;;  %v2276_v3 = vpack.c.bf16 %v604_v63, %v602_v60 }
 0x12d   :  { %v493_v0 = vpop.f32.mrf.mxu0  ;;  %v606_v1 = vpop.f32.mrf.mxu1 }
 0x12e   :  { %1927 = vst [vmem:[%s3028_s2 + $0x210] sm:$0xff] %v2275_v62  ;;  %1928 = vst [vmem:[%s3028_s2 + $0x218] sm:$0xff] %v2276_v3 }
 0x12f   :  { %v495_v2 = vpop.f32.mrf.mxu0  ;;  %v608_v5 = vpop.f32.mrf.mxu1 }
 0x130   :  { %v2283_v4 = vpack.c.bf16 %v495_v2, %v493_v0  ;;  %v2284_v6 = vpack.c.bf16 %v608_v5, %v606_v1 }
 0x131   :  { %v499_v7 = vpop.f32.mrf.mxu0  ;;  %v612_v30 = vpop.f32.mrf.mxu1 }
 0x132   :  { %1935 = vst [vmem:[%s3028_s2 + $0x250] sm:$0xff] %v2283_v4  ;;  %1936 = vst [vmem:[%s3028_s2 + $0x258] sm:$0xff] %v2284_v6 }
 0x133   :  { %v501_v8 = vpop.f32.mrf.mxu0  ;;  %v614_v10 = vpop.f32.mrf.mxu1 }
 0x134   :  { %v2291_v9 = vpack.c.bf16 %v501_v8, %v499_v7  ;;  %v2292_v11 = vpack.c.bf16 %v614_v10, %v612_v30 }
 0x135   :  { %v503_v12 = vpop.f32.mrf.mxu0  ;;  %v616_v13 = vpop.f32.mrf.mxu1 }
 0x136   :  { %1943 = vst [vmem:[%s3028_s2 + $0x290] sm:$0xff] %v2291_v9  ;;  %1944 = vst [vmem:[%s3028_s2 + $0x298] sm:$0xff] %v2292_v11 }
 0x137   :  { %v505_v14 = vpop.f32.mrf.mxu0  ;;  %v618_v16 = vpop.f32.mrf.mxu1 }
 0x138   :  { %v2299_v15 = vpack.c.bf16 %v505_v14, %v503_v12  ;;  %v2300_v17 = vpack.c.bf16 %v618_v16, %v616_v13 }
 0x139   :  { %v509_v18 = vpop.f32.mrf.mxu0  ;;  %v622_v19 = vpop.f32.mrf.mxu1 }
 0x13a   :  { %1951 = vst [vmem:[%s3028_s2 + $0x2d0] sm:$0xff] %v2299_v15  ;;  %1952 = vst [vmem:[%s3028_s2 + $0x2d8] sm:$0xff] %v2300_v17 }
 0x13b   :  { %v511_v20 = vpop.f32.mrf.mxu0  ;;  %v624_v22 = vpop.f32.mrf.mxu1 }
 0x13c   :  { %v2307_v21 = vpack.c.bf16 %v511_v20, %v509_v18  ;;  %v2308_v23 = vpack.c.bf16 %v624_v22, %v622_v19 }
 0x13d   :  { %v513_v24 = vpop.f32.mrf.mxu0  ;;  %v626_v25 = vpop.f32.mrf.mxu1 }
 0x13e   :  { %1959 = vst [vmem:[%s3028_s2 + $0x310] sm:$0xff] %v2307_v21  ;;  %1960 = vst [vmem:[%s3028_s2 + $0x318] sm:$0xff] %v2308_v23 }
 0x13f   :  { %v515_v26 = vpop.f32.mrf.mxu0  ;;  %v628_v32 = vpop.f32.mrf.mxu1 }
 0x140   :  { %v2315_v31 = vpack.c.bf16 %v515_v26, %v513_v24  ;;  %v2316_v33 = vpack.c.bf16 %v628_v32, %v626_v25 }
 0x141   :  { %v519_v34 = vpop.f32.mrf.mxu0  ;;  %v632_v35 = vpop.f32.mrf.mxu1 }
 0x142   :  { %1967 = vst [vmem:[%s3028_s2 + $0x350] sm:$0xff] %v2315_v31  ;;  %1968 = vst [vmem:[%s3028_s2 + $0x358] sm:$0xff] %v2316_v33 }
 0x143   :  { %v521_v36 = vpop.f32.mrf.mxu0  ;;  %v634_v27 = vpop.f32.mrf.mxu1 }
 0x144   :  { %v2323_v37 = vpack.c.bf16 %v521_v36, %v519_v34  ;;  %v2324_v38 = vpack.c.bf16 %v634_v27, %v632_v35 }
 0x145   :  { %v523_v39 = vpop.f32.mrf.mxu0  ;;  %v636_v40 = vpop.f32.mrf.mxu1 }
 0x146   :  { %1975 = vst [vmem:[%s3028_s2 + $0x390] sm:$0xff] %v2323_v37  ;;  %1976 = vst [vmem:[%s3028_s2 + $0x398] sm:$0xff] %v2324_v38 }
 0x147   :  { %v525_v41 = vpop.f32.mrf.mxu0  ;;  %v638_v43 = vpop.f32.mrf.mxu1 }
 0x148   :  { %v2331_v42 = vpack.c.bf16 %v525_v41, %v523_v39  ;;  %v2332_v44 = vpack.c.bf16 %v638_v43, %v636_v40 }
 0x149   :  { %v675_v45 = vpop.f32.mrf.mxu0  ;;  %v788_v46 = vpop.f32.mrf.mxu1 }
 0x14a   :  { %1983 = vst [vmem:[%s3028_s2 + $0x3d0] sm:$0xff] %v2331_v42  ;;  %1984 = vst [vmem:[%s3028_s2 + $0x3d8] sm:$0xff] %v2332_v44 }
 0x14b   :  { %v677_v47 = vpop.f32.mrf.mxu0  ;;  %v790_v28 = vpop.f32.mrf.mxu1 }
 0x14c   :  { %v2213_v48 = vpack.c.bf16 %v677_v47, %v675_v45  ;;  %v2214_v49 = vpack.c.bf16 %v790_v28, %v788_v46 }
 0x14d   :  { %v679_v50 = vpop.f32.mrf.mxu0  ;;  %v792_v51 = vpop.f32.mrf.mxu1 }
 0x14e   :  { %1865 = vst [vmem:[%s3028_s2 + $0x20] sm:$0xff] %v2213_v48  ;;  %1866 = vst [vmem:[%s3028_s2 + $0x28] sm:$0xff] %v2214_v49 }
 0x14f   :  { %v681_v52 = vpop.f32.mrf.mxu0  ;;  %v794_v54 = vpop.f32.mrf.mxu1 }
 0x150   :  { %v2221_v53 = vpack.c.bf16 %v681_v52, %v679_v50  ;;  %v2222_v55 = vpack.c.bf16 %v794_v54, %v792_v51 }
 0x151   :  { %v685_v56 = vpop.f32.mrf.mxu0  ;;  %v798_v57 = vpop.f32.mrf.mxu1 }
 0x152   :  { %1873 = vst [vmem:[%s3028_s2 + $0x60] sm:$0xff] %v2221_v53  ;;  %1874 = vst [vmem:[%s3028_s2 + $0x68] sm:$0xff] %v2222_v55 }
 0x153   :  { %v687_v58 = vpop.f32.mrf.mxu0  ;;  %v800_v29 = vpop.f32.mrf.mxu1 }
 0x154   :  { %v2229_v59 = vpack.c.bf16 %v687_v58, %v685_v56  ;;  %v2230_v60 = vpack.c.bf16 %v800_v29, %v798_v57 }
 0x155   :  { %v689_v61 = vpop.f32.mrf.mxu0  ;;  %v802_v62 = vpop.f32.mrf.mxu1 }
 0x156   :  { %1881 = vst [vmem:[%s3028_s2 + $0xa0] sm:$0xff] %v2229_v59  ;;  %1882 = vst [vmem:[%s3028_s2 + $0xa8] sm:$0xff] %v2230_v60 }
 0x157   :  { %v691_v63 = vpop.f32.mrf.mxu0  ;;  %v804_v0 = vpop.f32.mrf.mxu1 }
 0x158   :  { %v2237_v3 = vpack.c.bf16 %v691_v63, %v689_v61  ;;  %v2238_v1 = vpack.c.bf16 %v804_v0, %v802_v62 }
 0x159   :  { %v695_v2 = vpop.f32.mrf.mxu0  ;;  %v808_v4 = vpop.f32.mrf.mxu1 }
 0x15a   :  { %1889 = vst [vmem:[%s3028_s2 + $0xe0] sm:$0xff] %v2237_v3  ;;  %1890 = vst [vmem:[%s3028_s2 + $0xe8] sm:$0xff] %v2238_v1 }
 0x15b   :  { %v697_v5 = vpop.f32.mrf.mxu0  ;;  %v810_v7 = vpop.f32.mrf.mxu1 }
 0x15c   :  { %v2245_v6 = vpack.c.bf16 %v697_v5, %v695_v2  ;;  %v2246_v30 = vpack.c.bf16 %v810_v7, %v808_v4 }
 0x15d   :  { %v699_v8 = vpop.f32.mrf.mxu0  ;;  %v812_v9 = vpop.f32.mrf.mxu1 }
 0x15e   :  { %1897 = vst [vmem:[%s3028_s2 + $0x120] sm:$0xff] %v2245_v6  ;;  %1898 = vst [vmem:[%s3028_s2 + $0x128] sm:$0xff] %v2246_v30 }
 0x15f   :  { %v701_v10 = vpop.f32.mrf.mxu0  ;;  %v814_v12 = vpop.f32.mrf.mxu1 }
 0x160   :  { %v2253_v11 = vpack.c.bf16 %v701_v10, %v699_v8  ;;  %v2254_v13 = vpack.c.bf16 %v814_v12, %v812_v9 }
 0x161   :  { %v705_v14 = vpop.f32.mrf.mxu0  ;;  %v818_v15 = vpop.f32.mrf.mxu1 }
 0x162   :  { %1905 = vst [vmem:[%s3028_s2 + $0x160] sm:$0xff] %v2253_v11  ;;  %1906 = vst [vmem:[%s3028_s2 + $0x168] sm:$0xff] %v2254_v13 }
 0x163   :  { %v707_v16 = vpop.f32.mrf.mxu0  ;;  %v820_v18 = vpop.f32.mrf.mxu1 }
 0x164   :  { %v2261_v17 = vpack.c.bf16 %v707_v16, %v705_v14  ;;  %v2262_v19 = vpack.c.bf16 %v820_v18, %v818_v15 }
 0x165   :  { %v709_v20 = vpop.f32.mrf.mxu0  ;;  %v822_v21 = vpop.f32.mrf.mxu1 }
 0x166   :  { %1913 = vst [vmem:[%s3028_s2 + $0x1a0] sm:$0xff] %v2261_v17  ;;  %1914 = vst [vmem:[%s3028_s2 + $0x1a8] sm:$0xff] %v2262_v19 }
 0x167   :  { %v711_v22 = vpop.f32.mrf.mxu0  ;;  %v824_v24 = vpop.f32.mrf.mxu1 }
 0x168   :  { %v2269_v23 = vpack.c.bf16 %v711_v22, %v709_v20  ;;  %v2270_v25 = vpack.c.bf16 %v824_v24, %v822_v21 }
 0x169   :  { %v715_v26 = vpop.f32.mrf.mxu0  ;;  %v828_v31 = vpop.f32.mrf.mxu1 }
 0x16a   :  { %1921 = vst [vmem:[%s3028_s2 + $0x1e0] sm:$0xff] %v2269_v23  ;;  %1922 = vst [vmem:[%s3028_s2 + $0x1e8] sm:$0xff] %v2270_v25 }
 0x16b   :  { %v717_v32 = vpop.f32.mrf.mxu0  ;;  %v830_v34 = vpop.f32.mrf.mxu1 }
 0x16c   :  { %v2277_v33 = vpack.c.bf16 %v717_v32, %v715_v26  ;;  %v2278_v35 = vpack.c.bf16 %v830_v34, %v828_v31 }
 0x16d   :  { %v719_v36 = vpop.f32.mrf.mxu0  ;;  %v832_v37 = vpop.f32.mrf.mxu1 }
 0x16e   :  { %1929 = vst [vmem:[%s3028_s2 + $0x220] sm:$0xff] %v2277_v33  ;;  %1930 = vst [vmem:[%s3028_s2 + $0x228] sm:$0xff] %v2278_v35 }
 0x16f   :  { %v721_v27 = vpop.f32.mrf.mxu0  ;;  %v834_v39 = vpop.f32.mrf.mxu1 }
 0x170   :  { %v2285_v38 = vpack.c.bf16 %v721_v27, %v719_v36  ;;  %v2286_v40 = vpack.c.bf16 %v834_v39, %v832_v37 }
 0x171   :  { %v725_v41 = vpop.f32.mrf.mxu0  ;;  %v838_v42 = vpop.f32.mrf.mxu1 }
 0x172   :  { %1937 = vst [vmem:[%s3028_s2 + $0x260] sm:$0xff] %v2285_v38  ;;  %1938 = vst [vmem:[%s3028_s2 + $0x268] sm:$0xff] %v2286_v40 }
 0x173   :  { %v727_v43 = vpop.f32.mrf.mxu0  ;;  %v840_v45 = vpop.f32.mrf.mxu1 }
 0x174   :  { %v2293_v44 = vpack.c.bf16 %v727_v43, %v725_v41  ;;  %v2294_v46 = vpack.c.bf16 %v840_v45, %v838_v42 }
 0x175   :  { %v729_v47 = vpop.f32.mrf.mxu0  ;;  %v842_v48 = vpop.f32.mrf.mxu1 }
 0x176   :  { %1945 = vst [vmem:[%s3028_s2 + $0x2a0] sm:$0xff] %v2293_v44  ;;  %1946 = vst [vmem:[%s3028_s2 + $0x2a8] sm:$0xff] %v2294_v46 }
 0x177   :  { %v731_v28 = vpop.f32.mrf.mxu0  ;;  %v844_v50 = vpop.f32.mrf.mxu1 }
 0x178   :  { %v2301_v49 = vpack.c.bf16 %v731_v28, %v729_v47  ;;  %v2302_v51 = vpack.c.bf16 %v844_v50, %v842_v48 }
 0x179   :  { %v735_v52 = vpop.f32.mrf.mxu0  ;;  %v848_v53 = vpop.f32.mrf.mxu1 }
 0x17a   :  { %1953 = vst [vmem:[%s3028_s2 + $0x2e0] sm:$0xff] %v2301_v49  ;;  %1954 = vst [vmem:[%s3028_s2 + $0x2e8] sm:$0xff] %v2302_v51 }
 0x17b   :  { %v737_v54 = vpop.f32.mrf.mxu0  ;;  %v850_v56 = vpop.f32.mrf.mxu1 }
 0x17c   :  { %v2309_v55 = vpack.c.bf16 %v737_v54, %v735_v52  ;;  %v2310_v57 = vpack.c.bf16 %v850_v56, %v848_v53 }
 0x17d   :  { %v739_v58 = vpop.f32.mrf.mxu0  ;;  %v852_v59 = vpop.f32.mrf.mxu1 }
 0x17e   :  { %1961 = vst [vmem:[%s3028_s2 + $0x320] sm:$0xff] %v2309_v55  ;;  %1962 = vst [vmem:[%s3028_s2 + $0x328] sm:$0xff] %v2310_v57 }
 0x17f   :  { %v741_v29 = vpop.f32.mrf.mxu0  ;;  %v854_v61 = vpop.f32.mrf.mxu1 }
 0x180   :  { %v2317_v60 = vpack.c.bf16 %v741_v29, %v739_v58  ;;  %v2318_v62 = vpack.c.bf16 %v854_v61, %v852_v59 }
 0x181   :  { %v745_v63 = vpop.f32.mrf.mxu0  ;;  %v858_v3 = vpop.f32.mrf.mxu1 }
 0x182   :  { %1969 = vst [vmem:[%s3028_s2 + $0x360] sm:$0xff] %v2317_v60  ;;  %1970 = vst [vmem:[%s3028_s2 + $0x368] sm:$0xff] %v2318_v62 }
 0x183   :  { %v747_v0 = vpop.f32.mrf.mxu0  ;;  %v860_v2 = vpop.f32.mrf.mxu1 }
 0x184   :  { %v2325_v1 = vpack.c.bf16 %v747_v0, %v745_v63  ;;  %v2326_v4 = vpack.c.bf16 %v860_v2, %v858_v3 }
 0x185   :  { %v749_v5 = vpop.f32.mrf.mxu0  ;;  %v862_v6 = vpop.f32.mrf.mxu1 }
 0x186   :  { %1977 = vst [vmem:[%s3028_s2 + $0x3a0] sm:$0xff] %v2325_v1  ;;  %1978 = vst [vmem:[%s3028_s2 + $0x3a8] sm:$0xff] %v2326_v4 }
 0x187   :  { %v751_v7 = vpop.f32.mrf.mxu0  ;;  %v864_v8 = vpop.f32.mrf.mxu1 }
 0x188   :  { %v2333_v30 = vpack.c.bf16 %v751_v7, %v749_v5  ;;  %v2334_v9 = vpack.c.bf16 %v864_v8, %v862_v6 }
 0x189   :  { %v901_v10 = vpop.f32.mrf.mxu0  ;;  %v1014_v11 = vpop.f32.mrf.mxu1 }
 0x18a   :  { %1985 = vst [vmem:[%s3028_s2 + $0x3e0] sm:$0xff] %v2333_v30  ;;  %1986 = vst [vmem:[%s3028_s2 + $0x3e8] sm:$0xff] %v2334_v9 }
 0x18b   :  { %v903_v12 = vpop.f32.mrf.mxu0  ;;  %v1016_v14 = vpop.f32.mrf.mxu1 }
 0x18c   :  { %v2215_v13 = vpack.c.bf16 %v903_v12, %v901_v10  ;;  %v2216_v15 = vpack.c.bf16 %v1016_v14, %v1014_v11 }
 0x18d   :  { %v905_v16 = vpop.f32.mrf.mxu0  ;;  %v1018_v17 = vpop.f32.mrf.mxu1 }
 0x18e   :  { %1867 = vst [vmem:[%s3028_s2 + $0x30] sm:$0xff] %v2215_v13  ;;  %1868 = vst [vmem:[%s3028_s2 + $0x38] sm:$0xff] %v2216_v15 }
 0x18f   :  { %v907_v18 = vpop.f32.mrf.mxu0  ;;  %v1020_v20 = vpop.f32.mrf.mxu1 }
 0x190   :  { %v2223_v19 = vpack.c.bf16 %v907_v18, %v905_v16  ;;  %v2224_v21 = vpack.c.bf16 %v1020_v20, %v1018_v17 }
 0x191   :  { %v911_v22 = vpop.f32.mrf.mxu0  ;;  %v1024_v23 = vpop.f32.mrf.mxu1 }
 0x192   :  { %1875 = vst [vmem:[%s3028_s2 + $0x70] sm:$0xff] %v2223_v19  ;;  %1876 = vst [vmem:[%s3028_s2 + $0x78] sm:$0xff] %v2224_v21 }
 0x193   :  { %v913_v24 = vpop.f32.mrf.mxu0  ;;  %v1026_v26 = vpop.f32.mrf.mxu1 }
 0x194   :  { %v2231_v25 = vpack.c.bf16 %v913_v24, %v911_v22  ;;  %v2232_v31 = vpack.c.bf16 %v1026_v26, %v1024_v23 }
 0x195   :  { %v915_v32 = vpop.f32.mrf.mxu0  ;;  %v1028_v33 = vpop.f32.mrf.mxu1 }
 0x196   :  { %1883 = vst [vmem:[%s3028_s2 + $0xb0] sm:$0xff] %v2231_v25  ;;  %1884 = vst [vmem:[%s3028_s2 + $0xb8] sm:$0xff] %v2232_v31 }
 0x197   :  { %v917_v34 = vpop.f32.mrf.mxu0  ;;  %v1030_v36 = vpop.f32.mrf.mxu1 }
 0x198   :  { %v2239_v35 = vpack.c.bf16 %v917_v34, %v915_v32  ;;  %v2240_v37 = vpack.c.bf16 %v1030_v36, %v1028_v33 }
 0x199   :  { %v921_v27 = vpop.f32.mrf.mxu0  ;;  %v1034_v38 = vpop.f32.mrf.mxu1 }
 0x19a   :  { %1891 = vst [vmem:[%s3028_s2 + $0xf0] sm:$0xff] %v2239_v35  ;;  %1892 = vst [vmem:[%s3028_s2 + $0xf8] sm:$0xff] %v2240_v37 }
 0x19b   :  { %v923_v39 = vpop.f32.mrf.mxu0  ;;  %v1036_v41 = vpop.f32.mrf.mxu1 }
 0x19c   :  { %v2247_v40 = vpack.c.bf16 %v923_v39, %v921_v27  ;;  %v2248_v42 = vpack.c.bf16 %v1036_v41, %v1034_v38 }
 0x19d   :  { %v925_v43 = vpop.f32.mrf.mxu0  ;;  %v1038_v44 = vpop.f32.mrf.mxu1 }
 0x19e   :  { %1899 = vst [vmem:[%s3028_s2 + $0x130] sm:$0xff] %v2247_v40  ;;  %1900 = vst [vmem:[%s3028_s2 + $0x138] sm:$0xff] %v2248_v42 }
 0x19f   :  { %v927_v45 = vpop.f32.mrf.mxu0  ;;  %v1040_v47 = vpop.f32.mrf.mxu1 }
 0x1a0   :  { %v2255_v46 = vpack.c.bf16 %v927_v45, %v925_v43  ;;  %v2256_v48 = vpack.c.bf16 %v1040_v47, %v1038_v44 }
 0x1a1   :  { %v931_v28 = vpop.f32.mrf.mxu0  ;;  %v1044_v49 = vpop.f32.mrf.mxu1 }
 0x1a2   :  { %1907 = vst [vmem:[%s3028_s2 + $0x170] sm:$0xff] %v2255_v46  ;;  %1908 = vst [vmem:[%s3028_s2 + $0x178] sm:$0xff] %v2256_v48 }
 0x1a3   :  { %v933_v50 = vpop.f32.mrf.mxu0  ;;  %v1046_v52 = vpop.f32.mrf.mxu1 }
 0x1a4   :  { %v2263_v51 = vpack.c.bf16 %v933_v50, %v931_v28  ;;  %v2264_v53 = vpack.c.bf16 %v1046_v52, %v1044_v49 }
 0x1a5   :  { %v935_v54 = vpop.f32.mrf.mxu0  ;;  %v1048_v55 = vpop.f32.mrf.mxu1 }
 0x1a6   :  { %1915 = vst [vmem:[%s3028_s2 + $0x1b0] sm:$0xff] %v2263_v51  ;;  %1916 = vst [vmem:[%s3028_s2 + $0x1b8] sm:$0xff] %v2264_v53 }
 0x1a7   :  { %v937_v56 = vpop.f32.mrf.mxu0  ;;  %v1050_v58 = vpop.f32.mrf.mxu1 }
 0x1a8   :  { %v2271_v57 = vpack.c.bf16 %v937_v56, %v935_v54  ;;  %v2272_v59 = vpack.c.bf16 %v1050_v58, %v1048_v55 }
 0x1a9   :  { %v941_v29 = vpop.f32.mrf.mxu0  ;;  %v1054_v60 = vpop.f32.mrf.mxu1 }
 0x1aa   :  { %1923 = vst [vmem:[%s3028_s2 + $0x1f0] sm:$0xff] %v2271_v57  ;;  %1924 = vst [vmem:[%s3028_s2 + $0x1f8] sm:$0xff] %v2272_v59 }
 0x1ab   :  { %v943_v61 = vpop.f32.mrf.mxu0  ;;  %v1056_v63 = vpop.f32.mrf.mxu1 }
 0x1ac   :  { %v2279_v62 = vpack.c.bf16 %v943_v61, %v941_v29  ;;  %v2280_v3 = vpack.c.bf16 %v1056_v63, %v1054_v60 }
 0x1ad   :  { %v945_v0 = vpop.f32.mrf.mxu0  ;;  %v1058_v1 = vpop.f32.mrf.mxu1 }
 0x1ae   :  { %1931 = vst [vmem:[%s3028_s2 + $0x230] sm:$0xff] %v2279_v62  ;;  %1932 = vst [vmem:[%s3028_s2 + $0x238] sm:$0xff] %v2280_v3 }
 0x1af   :  { %v947_v2 = vpop.f32.mrf.mxu0  ;;  %v1060_v5 = vpop.f32.mrf.mxu1 }
 0x1b0   :  { %v2287_v4 = vpack.c.bf16 %v947_v2, %v945_v0  ;;  %v2288_v6 = vpack.c.bf16 %v1060_v5, %v1058_v1 }
 0x1b1   :  { %v951_v7 = vpop.f32.mrf.mxu0  ;;  %v1064_v30 = vpop.f32.mrf.mxu1 }
 0x1b2   :  { %1939 = vst [vmem:[%s3028_s2 + $0x270] sm:$0xff] %v2287_v4  ;;  %1940 = vst [vmem:[%s3028_s2 + $0x278] sm:$0xff] %v2288_v6 }
 0x1b3   :  { %v953_v8 = vpop.f32.mrf.mxu0  ;;  %v1066_v10 = vpop.f32.mrf.mxu1 }
 0x1b4   :  { %v2295_v9 = vpack.c.bf16 %v953_v8, %v951_v7  ;;  %v2296_v11 = vpack.c.bf16 %v1066_v10, %v1064_v30 }
 0x1b5   :  { %v955_v12 = vpop.f32.mrf.mxu0  ;;  %v1068_v13 = vpop.f32.mrf.mxu1 }
 0x1b6   :  { %1947 = vst [vmem:[%s3028_s2 + $0x2b0] sm:$0xff] %v2295_v9  ;;  %1948 = vst [vmem:[%s3028_s2 + $0x2b8] sm:$0xff] %v2296_v11 }
 0x1b7   :  { %v957_v14 = vpop.f32.mrf.mxu0  ;;  %v1070_v16 = vpop.f32.mrf.mxu1 }
 0x1b8   :  { %v2303_v15 = vpack.c.bf16 %v957_v14, %v955_v12  ;;  %v2304_v17 = vpack.c.bf16 %v1070_v16, %v1068_v13 }
 0x1b9   :  { %v961_v18 = vpop.f32.mrf.mxu0  ;;  %v1074_v19 = vpop.f32.mrf.mxu1 }
 0x1ba   :  { %1955 = vst [vmem:[%s3028_s2 + $0x2f0] sm:$0xff] %v2303_v15  ;;  %1956 = vst [vmem:[%s3028_s2 + $0x2f8] sm:$0xff] %v2304_v17 }
 0x1bb   :  { %v963_v20 = vpop.f32.mrf.mxu0  ;;  %v1076_v22 = vpop.f32.mrf.mxu1 }
 0x1bc   :  { %v2311_v21 = vpack.c.bf16 %v963_v20, %v961_v18  ;;  %v2312_v23 = vpack.c.bf16 %v1076_v22, %v1074_v19 }
 0x1bd   :  { %v965_v24 = vpop.f32.mrf.mxu0  ;;  %v1078_v25 = vpop.f32.mrf.mxu1 }
 0x1be   :  { %1963 = vst [vmem:[%s3028_s2 + $0x330] sm:$0xff] %v2311_v21  ;;  %1964 = vst [vmem:[%s3028_s2 + $0x338] sm:$0xff] %v2312_v23 }
 0x1bf   :  { %v967_v26 = vpop.f32.mrf.mxu0  ;;  %v1080_v32 = vpop.f32.mrf.mxu1 }
 0x1c0   :  { %v2319_v31 = vpack.c.bf16 %v967_v26, %v965_v24  ;;  %v2320_v33 = vpack.c.bf16 %v1080_v32, %v1078_v25 }
 0x1c1   :  { %v971_v34 = vpop.f32.mrf.mxu0  ;;  %v1084_v35 = vpop.f32.mrf.mxu1 }
 0x1c2   :  { %1971 = vst [vmem:[%s3028_s2 + $0x370] sm:$0xff] %v2319_v31  ;;  %1972 = vst [vmem:[%s3028_s2 + $0x378] sm:$0xff] %v2320_v33 }
 0x1c3   :  { %v973_v36 = vpop.f32.mrf.mxu0  ;;  %v1086_v27 = vpop.f32.mrf.mxu1 }
 0x1c4   :  { %v2327_v37 = vpack.c.bf16 %v973_v36, %v971_v34  ;;  %v2328_v38 = vpack.c.bf16 %v1086_v27, %v1084_v35 }
 0x1c5   :  { %v975_v39 = vpop.f32.mrf.mxu0  ;;  %v1088_v40 = vpop.f32.mrf.mxu1 }
 0x1c6   :  { %1979 = vst [vmem:[%s3028_s2 + $0x3b0] sm:$0xff] %v2327_v37  ;;  %1980 = vst [vmem:[%s3028_s2 + $0x3b8] sm:$0xff] %v2328_v38 }
 0x1c7   :  { %v977_v41 = vpop.f32.mrf.mxu0  ;;  %v1090_v43 = vpop.f32.mrf.mxu1 }
 0x1c8   :  { %v2335_v42 = vpack.c.bf16 %v977_v41, %v975_v39  ;;  %v2336_v44 = vpack.c.bf16 %v1090_v43, %v1088_v40 }
 0x1ca   :  { %1987 = vst [vmem:[%s3028_s2 + $0x3f0] sm:$0xff] %v2335_v42  ;;  %1988 = vst [vmem:[%s3028_s2 + $0x3f8] sm:$0xff] %v2336_v44 }

// kernel: wave_field_decoder_forward.21
= control target key start
LH: loop header
LB: loop body
LE: loop exit
PB: predicated region body
PF: predicated region fallthrough
CT: control target
= control target key end

     0   :  { %s2073_s0 = inlined_call_operand.vmem [shape: bf16[8,8192], index: 0, kind: input, shape index: {}]   ;;  %s2074_s1 = inlined_call_operand.vmem [shape: f32[8,1], index: 1, kind: input, shape index: {}]   ;;  %s2075_s2 = inlined_call_operand.vmem [shape: f32[8,1], index: 2, kind: input, shape index: {}]   ;;  %s2076_s3 = inlined_call_operand.vmem [shape: bf16[8,8192], index: 3, kind: output, shape index: {}]  }
   0x1   :  { %v14_v0 = vld [vmem:[%s2073_s0] sm:$0xff]  ;;  %v15_v1 = vld [vmem:[%s2073_s0 + $0x8] sm:$0xff]  ;;  %v16_v5 = vld [vmem:[%s2073_s0 + $0x10] sm:$0xff] }
   0x2   :  { %v968_v2 = vunpack.c.l.bf16 %v14_v0  ;;  %v970_v3 = vunpack.c.h.bf16 %v14_v0  ;;  %v972_v4 = vunpack.c.l.bf16 %v15_v1  ;;  %v977_v6 = vunpack.c.h.bf16 %v15_v1  ;;  %v17_v10 = vld [vmem:[%s2073_s0 + $0x18] sm:$0xff]  ;;  %v18_v15 = vld [vmem:[%s2073_s0 + $0x20] sm:$0xff]  ;;  %v19_v20 = vld [vmem:[%s2073_s0 + $0x28] sm:$0xff] }
   0x3   :  { %v981_v8 = vunpack.c.l.bf16 %v16_v5  ;;  %v987_v11 = vunpack.c.h.bf16 %v16_v5  ;;  %v990_v13 = vunpack.c.l.bf16 %v17_v10  ;;  %v996_v16 = vunpack.c.h.bf16 %v17_v10  ;;  %v20_v25 = vld [vmem:[%s2073_s0 + $0x30] sm:$0xff]  ;;  %v21_v30 = vld [vmem:[%s2073_s0 + $0x38] sm:$0xff]  ;;  %v22_v35 = vld [vmem:[%s2073_s0 + $0x40] sm:$0xff] }
   0x4   :  { %2118 = vst [vmem:[#allocation2_spill] sm:$0xff] %v968_v2  ;;  %2119 = vst [vmem:[#allocation3_spill] sm:$0xff] %v970_v3  ;;  %v110_v7 = vadd.f32 %v970_v3, %v968_v2  ;;  %v999_v18 = vunpack.c.l.bf16 %v18_v15  ;;  %v1005_v21 = vunpack.c.h.bf16 %v18_v15  ;;  %v1008_v23 = vunpack.c.l.bf16 %v19_v20  ;;  %v23_v40 = vld [vmem:[%s2073_s0 + $0x48] sm:$0xff]  ;;  %v24_v45 = vld [vmem:[%s2073_s0 + $0x50] sm:$0xff] }
   0x5   :  { %2120 = vst [vmem:[#allocation4_spill] sm:$0xff] %v972_v4  ;;  %2121 = vst [vmem:[#allocation5_spill] sm:$0xff] %v977_v6  ;;  %v1014_v26 = vunpack.c.h.bf16 %v19_v20  ;;  %v1017_v28 = vunpack.c.l.bf16 %v20_v25  ;;  %v1023_v31 = vunpack.c.h.bf16 %v20_v25  ;;  %v1026_v33 = vunpack.c.l.bf16 %v21_v30  ;;  %v25_v50 = vld [vmem:[%s2073_s0 + $0x58] sm:$0xff]  ;;  %v26_v55 = vld [vmem:[%s2073_s0 + $0x60] sm:$0xff] }
   0x6   :  { %2122 = vst [vmem:[#allocation6_spill] sm:$0xff] %v981_v8  ;;  %v111_v9 = vadd.f32 %v110_v7, %v972_v4  ;;  %v1032_v36 = vunpack.c.h.bf16 %v21_v30  ;;  %v1035_v38 = vunpack.c.l.bf16 %v22_v35  ;;  %v1041_v41 = vunpack.c.h.bf16 %v22_v35  ;;  %v27_v60 = vld [vmem:[%s2073_s0 + $0x68] sm:$0xff]  ;;  %v28_v1 = vld [vmem:[%s2073_s0 + $0x70] sm:$0xff]  ;;  %v30_v20 = vld [vmem:[%s2073_s0 + $0x80] sm:$0xff] }
   0x7   :  { %v1044_v43 = vunpack.c.l.bf16 %v23_v40  ;;  %v1050_v46 = vunpack.c.h.bf16 %v23_v40  ;;  %v1053_v48 = vunpack.c.l.bf16 %v24_v45  ;;  %v1059_v51 = vunpack.c.h.bf16 %v24_v45  ;;  %v33_v45 = vld [vmem:[%s2073_s0 + $0x98] sm:$0xff] }
   0x8   :  { %v112_v12 = vadd.f32 %v111_v9, %v977_v6  ;;  %v1062_v53 = vunpack.c.l.bf16 %v25_v50  ;;  %v1068_v56 = vunpack.c.h.bf16 %v25_v50  ;;  %v1071_v58 = vunpack.c.l.bf16 %v26_v55 }
   0x9   :  { %v1077_v61 = vunpack.c.h.bf16 %v26_v55  ;;  %v1080_v63 = vunpack.c.l.bf16 %v27_v60  ;;  %v1086_v5 = vunpack.c.h.bf16 %v27_v60  ;;  %v1089_v9 = vunpack.c.l.bf16 %v28_v1 }
   0xa   :  { %v113_v14 = vadd.f32 %v112_v12, %v981_v8  ;;  %v29_v12 = vld [vmem:[%s2073_s0 + $0x78] sm:$0xff]  ;;  %v1107_v25 = vunpack.c.l.bf16 %v30_v20  ;;  %v1113_v30 = vunpack.c.h.bf16 %v30_v20  ;;  %v1134_v50 = vunpack.c.l.bf16 %v33_v45 }
   0xb   :  { %v1140_v55 = vunpack.c.h.bf16 %v33_v45 }
   0xc   :  { %v114_v17 = vadd.f32 %v113_v14, %v987_v11  ;;  %v1095_v14 = vunpack.c.h.bf16 %v28_v1 }
   0xe   :  { %v115_v19 = vadd.f32 %v114_v17, %v990_v13  ;;  %v1098_v17 = vunpack.c.l.bf16 %v29_v12 }
  0x10   :  { %v116_v22 = vadd.f32 %v115_v19, %v996_v16 }
  0x12   :  { %v117_v24 = vadd.f32 %v116_v22, %v999_v18  ;;  %v1104_v22 = vunpack.c.h.bf16 %v29_v12  ;;  %v36_v12 = vld [vmem:[%s2073_s0 + $0xb0] sm:$0xff] }
  0x13   :  { %v1161_v20 = vunpack.c.l.bf16 %v36_v12 }
  0x14   :  { %v118_v27 = vadd.f32 %v117_v24, %v1005_v21 }
  0x16   :  { %v119_v29 = vadd.f32 %v118_v27, %v1008_v23 }
  0x18   :  { %v120_v32 = vadd.f32 %v119_v29, %v1014_v26  ;;  %v31_v29 = vld [vmem:[%s2073_s0 + $0x88] sm:$0xff] }
  0x1a   :  { %v121_v34 = vadd.f32 %v120_v32, %v1017_v28 }
  0x1c   :  { %v122_v37 = vadd.f32 %v121_v34, %v1023_v31  ;;  %v1116_v34 = vunpack.c.l.bf16 %v31_v29 }
  0x1e   :  { %v123_v39 = vadd.f32 %v122_v37, %v1026_v33  ;;  %v32_v37 = vld [vmem:[%s2073_s0 + $0x90] sm:$0xff] }
  0x20   :  { %v124_v42 = vadd.f32 %v123_v39, %v1032_v36  ;;  %v1122_v39 = vunpack.c.h.bf16 %v31_v29  ;;  %v1167_v29 = vunpack.c.h.bf16 %v36_v12 }
  0x22   :  { %v125_v44 = vadd.f32 %v124_v42, %v1035_v38  ;;  %v1125_v42 = vunpack.c.l.bf16 %v32_v37  ;;  %2123 = vst [vmem:[#allocation7_spill] sm:$0xff] %v1167_v29 }
  0x24   :  { %v126_v47 = vadd.f32 %v125_v44, %v1041_v41 }
  0x26   :  { %v127_v49 = vadd.f32 %v126_v47, %v1044_v43  ;;  %v1131_v47 = vunpack.c.h.bf16 %v32_v37 }
  0x28   :  { %v128_v52 = vadd.f32 %v127_v49, %v1050_v46 }
  0x2a   :  { %v129_v54 = vadd.f32 %v128_v52, %v1053_v48 }
  0x2c   :  { %v130_v57 = vadd.f32 %v129_v54, %v1059_v51  ;;  %v34_v54 = vld [vmem:[%s2073_s0 + $0xa0] sm:$0xff] }
  0x2e   :  { %v131_v59 = vadd.f32 %v130_v57, %v1062_v53 }
  0x30   :  { %v132_v62 = vadd.f32 %v131_v59, %v1068_v56  ;;  %v1143_v59 = vunpack.c.l.bf16 %v34_v54 }
  0x32   :  { %v133_v0 = vadd.f32 %v132_v62, %v1071_v58  ;;  %v35_v62 = vld [vmem:[%s2073_s0 + $0xa8] sm:$0xff] }
  0x34   :  { %v134_v7 = vadd.f32 %v133_v0, %v1077_v61  ;;  %v1149_v0 = vunpack.c.h.bf16 %v34_v54  ;;  %v39_v54 = vld [vmem:[%s2073_s0 + $0xc8] sm:$0xff] }
  0x35   :  { %v1194_v12 = vunpack.c.h.bf16 %v39_v54 }
  0x36   :  { %v135_v10 = vadd.f32 %v134_v7, %v1080_v63  ;;  %v1152_v7 = vunpack.c.l.bf16 %v35_v62 }
  0x37   :  { %2129 = vst [vmem:[#allocation13_spill] sm:$0xff] %v1194_v12 }
  0x38   :  { %v136_v15 = vadd.f32 %v135_v10, %v1086_v5 }
  0x3a   :  { %v137_v19 = vadd.f32 %v136_v15, %v1089_v9  ;;  %v1158_v15 = vunpack.c.h.bf16 %v35_v62  ;;  %v1188_v62 = vunpack.c.l.bf16 %v39_v54  ;;  %v42_v54 = vld [vmem:[%s2073_s0 + $0xe0] sm:$0xff] }
  0x3c   :  { %v138_v24 = vadd.f32 %v137_v19, %v1095_v14  ;;  %2128 = vst [vmem:[#allocation12_spill] sm:$0xff] %v1188_v62 }
  0x3e   :  { %v139_v27 = vadd.f32 %v138_v24, %v1098_v17 }
  0x40   :  { %v140_v32 = vadd.f32 %v139_v27, %v1104_v22  ;;  %v37_v27 = vld [vmem:[%s2073_s0 + $0xb8] sm:$0xff] }
  0x42   :  { %v141_v35 = vadd.f32 %v140_v32, %v1107_v25 }
  0x44   :  { %v142_v40 = vadd.f32 %v141_v35, %v1113_v30  ;;  %v1170_v35 = vunpack.c.l.bf16 %v37_v27 }
  0x46   :  { %v143_v44 = vadd.f32 %v142_v40, %v1116_v34  ;;  %2124 = vst [vmem:[#allocation8_spill] sm:$0xff] %v1170_v35  ;;  %v38_v40 = vld [vmem:[%s2073_s0 + $0xc0] sm:$0xff] }
  0x48   :  { %v144_v49 = vadd.f32 %v143_v44, %v1122_v39  ;;  %v1176_v44 = vunpack.c.h.bf16 %v37_v27 }
  0x4a   :  { %v145_v52 = vadd.f32 %v144_v49, %v1125_v42  ;;  %2125 = vst [vmem:[#allocation9_spill] sm:$0xff] %v1176_v44  ;;  %v1179_v49 = vunpack.c.l.bf16 %v38_v40 }
  0x4c   :  { %v146_v57 = vadd.f32 %v145_v52, %v1131_v47  ;;  %2126 = vst [vmem:[#allocation10_spill] sm:$0xff] %v1179_v49 }
  0x4e   :  { %v147_v60 = vadd.f32 %v146_v57, %v1134_v50  ;;  %v1185_v57 = vunpack.c.h.bf16 %v38_v40 }
  0x50   :  { %v148_v1 = vadd.f32 %v147_v60, %v1140_v55  ;;  %2127 = vst [vmem:[#allocation11_spill] sm:$0xff] %v1185_v57 }
  0x52   :  { %v149_v10 = vadd.f32 %v148_v1, %v1143_v59 }
  0x54   :  { %v150_v19 = vadd.f32 %v149_v10, %v1149_v0  ;;  %v40_v10 = vld [vmem:[%s2073_s0 + $0xd0] sm:$0xff] }
  0x56   :  { %v151_v24 = vadd.f32 %v150_v19, %v1152_v7 }
  0x58   :  { %v152_v32 = vadd.f32 %v151_v24, %v1158_v15  ;;  %v1197_v24 = vunpack.c.l.bf16 %v40_v10 }
  0x5a   :  { %v153_v37 = vadd.f32 %v152_v32, %v1161_v20  ;;  %2130 = vst [vmem:[#allocation14_spill] sm:$0xff] %v1197_v24  ;;  %v41_v32 = vld [vmem:[%s2073_s0 + $0xd8] sm:$0xff] }
  0x5c   :  { %v154_v45 = vadd.f32 %v153_v37, %v1167_v29  ;;  %v1203_v37 = vunpack.c.h.bf16 %v40_v10  ;;  %v43_v10 = vld [vmem:[%s2073_s0 + $0xe8] sm:$0xff] }
  0x5e   :  { %v155_v52 = vadd.f32 %v154_v45, %v1170_v35  ;;  %2131 = vst [vmem:[#allocation15_spill] sm:$0xff] %v1203_v37  ;;  %v1206_v45 = vunpack.c.l.bf16 %v41_v32 }
  0x60   :  { %v156_v60 = vadd.f32 %v155_v52, %v1176_v44  ;;  %2132 = vst [vmem:[#allocation16_spill] sm:$0xff] %v1206_v45 }
  0x62   :  { %v157_v1 = vadd.f32 %v156_v60, %v1179_v49  ;;  %v1212_v60 = vunpack.c.h.bf16 %v41_v32  ;;  %v44_v32 = vld [vmem:[%s2073_s0 + $0xf0] sm:$0xff] }
  0x64   :  { %v158_v19 = vadd.f32 %v157_v1, %v1185_v57  ;;  %2133 = vst [vmem:[#allocation17_spill] sm:$0xff] %v1212_v60 }
  0x66   :  { %v159_v27 = vadd.f32 %v158_v19, %v1188_v62  ;;  %v1215_v19 = vunpack.c.l.bf16 %v42_v54 }
  0x68   :  { %v160_v40 = vadd.f32 %v159_v27, %v1194_v12  ;;  %2134 = vst [vmem:[#allocation18_spill] sm:$0xff] %v1215_v19  ;;  %v1221_v27 = vunpack.c.h.bf16 %v42_v54  ;;  %v1239_v54 = vunpack.c.h.bf16 %v44_v32 }
  0x6a   :  { %v161_v52 = vadd.f32 %v160_v40, %v1197_v24  ;;  %2135 = vst [vmem:[#allocation19_spill] sm:$0xff] %v1221_v27  ;;  %v1224_v24 = vunpack.c.l.bf16 %v43_v10 }
  0x6c   :  { %v162_v1 = vadd.f32 %v161_v52, %v1203_v37  ;;  %2136 = vst [vmem:[#allocation20_spill] sm:$0xff] %v1224_v24  ;;  %v1230_v52 = vunpack.c.h.bf16 %v43_v10 }
  0x6e   :  { %v163_v62 = vadd.f32 %v162_v1, %v1206_v45  ;;  %2137 = vst [vmem:[#allocation21_spill] sm:$0xff] %v1230_v52  ;;  %v1233_v45 = vunpack.c.l.bf16 %v44_v32 }
  0x70   :  { %v164_v40 = vadd.f32 %v163_v62, %v1212_v60  ;;  %2138 = vst [vmem:[#allocation22_spill] sm:$0xff] %v1233_v45  ;;  %v45_v62 = vld [vmem:[%s2073_s0 + $0xf8] sm:$0xff] }
  0x71   :  { %v1245_v10 = vunpack.c.h.bf16 %v45_v62 }
  0x72   :  { %v165_v12 = vadd.f32 %v164_v40, %v1215_v19  ;;  %v1242_v19 = vunpack.c.l.bf16 %v45_v62 }
  0x73   :  { %2140 = vst [vmem:[#allocation24_spill] sm:$0xff] %v1245_v10 }
  0x74   :  { %v166_v1 = vadd.f32 %v165_v12, %v1221_v27  ;;  %2139 = vst [vmem:[#allocation23_spill] sm:$0xff] %v1242_v19 }
  0x76   :  { %v167_v37 = vadd.f32 %v166_v1, %v1224_v24 }
  0x78   :  { %v168_v40 = vadd.f32 %v167_v37, %v1230_v52 }
  0x7a   :  { %v169_v60 = vadd.f32 %v168_v40, %v1233_v45 }
  0x7c   :  { %v170_v12 = vadd.f32 %v169_v60, %v1239_v54 }
  0x7e   :  { %v171_v27 = vadd.f32 %v170_v12, %v1242_v19 }
  0x80   :  { %v172_v1 = vadd.f32 %v171_v27, %v1245_v10 }
  0x82   :  { %173 = vadd.xlane.f32.xlu0 %v172_v1 }
 0x10b   :  { %v174_v24 = vpop.xlane.xlu0 %173 }
 0x10c   :  { %v1250_v57 = vmul.f32 0.00012207031, %v174_v24 }
 0x10e   :  { %v177_v32 = vsub.f32 %v968_v2, %v1250_v57  ;;  %v178_v37 = vsub.f32 %v970_v3, %v1250_v57  ;;  %v179_v62 = vsub.f32 %v972_v4, %v1250_v57  ;;  %v180_v60 = vsub.f32 %v977_v6, %v1250_v57 }
 0x10f   :  { %v181_v27 = vsub.f32 %v981_v8, %v1250_v57  ;;  %v182_v1 = vsub.f32 %v987_v11, %v1250_v57  ;;  %v183_v3 = vsub.f32 %v990_v13, %v1250_v57  ;;  %v185_v8 = vsub.f32 %v999_v18, %v1250_v57 }
 0x110   :  { %v241_v40 = vmul.f32 %v177_v32, %v177_v32  ;;  %v242_v45 = vmul.f32 %v178_v37, %v178_v37  ;;  %v243_v12 = vmul.f32 %v179_v62, %v179_v62  ;;  %v244_v2 = vmul.f32 %v180_v60, %v180_v60 }
 0x111   :  { %v245_v19 = vmul.f32 %v181_v27, %v181_v27  ;;  %v184_v32 = vsub.f32 %v996_v16, %v1250_v57  ;;  %v246_v37 = vmul.f32 %v182_v1, %v182_v1  ;;  %v247_v62 = vmul.f32 %v183_v3, %v183_v3 }
 0x112   :  { %v305_v24 = vadd.f32 %v242_v45, %v241_v40  ;;  %v186_v40 = vsub.f32 %v1005_v21, %v1250_v57  ;;  %v249_v27 = vmul.f32 %v185_v8, %v185_v8 }
 0x113   :  { %v248_v60 = vmul.f32 %v184_v32, %v184_v32 }
 0x114   :  { %v306_v10 = vadd.f32 %v305_v24, %v243_v12  ;;  %v187_v24 = vsub.f32 %v1008_v23, %v1250_v57  ;;  %v250_v1 = vmul.f32 %v186_v40, %v186_v40 }
 0x116   :  { %v307_v4 = vadd.f32 %v306_v10, %v244_v2  ;;  %v188_v10 = vsub.f32 %v1014_v26, %v1250_v57  ;;  %v251_v3 = vmul.f32 %v187_v24, %v187_v24 }
 0x118   :  { %v308_v6 = vadd.f32 %v307_v4, %v245_v19  ;;  %v189_v19 = vsub.f32 %v1017_v28, %v1250_v57  ;;  %v252_v32 = vmul.f32 %v188_v10, %v188_v10 }
 0x11a   :  { %v309_v45 = vadd.f32 %v308_v6, %v246_v37  ;;  %v190_v37 = vsub.f32 %v1023_v31, %v1250_v57  ;;  %v253_v8 = vmul.f32 %v189_v19, %v189_v19 }
 0x11c   :  { %v310_v12 = vadd.f32 %v309_v45, %v247_v62  ;;  %v191_v45 = vsub.f32 %v1026_v33, %v1250_v57  ;;  %v254_v40 = vmul.f32 %v190_v37, %v190_v37 }
 0x11e   :  { %v311_v2 = vadd.f32 %v310_v12, %v248_v60  ;;  %v192_v12 = vsub.f32 %v1032_v36, %v1250_v57  ;;  %v255_v24 = vmul.f32 %v191_v45, %v191_v45 }
 0x120   :  { %v312_v4 = vadd.f32 %v311_v2, %v249_v27  ;;  %v193_v2 = vsub.f32 %v1035_v38, %v1250_v57  ;;  %v256_v10 = vmul.f32 %v192_v12, %v192_v12 }
 0x122   :  { %v313_v6 = vadd.f32 %v312_v4, %v250_v1  ;;  %v194_v4 = vsub.f32 %v1041_v41, %v1250_v57  ;;  %v257_v19 = vmul.f32 %v193_v2, %v193_v2 }
 0x124   :  { %v314_v62 = vadd.f32 %v313_v6, %v251_v3  ;;  %v195_v6 = vsub.f32 %v1044_v43, %v1250_v57  ;;  %v258_v37 = vmul.f32 %v194_v4, %v194_v4 }
 0x126   :  { %v315_v60 = vadd.f32 %v314_v62, %v252_v32  ;;  %v196_v62 = vsub.f32 %v1050_v46, %v1250_v57  ;;  %v259_v45 = vmul.f32 %v195_v6, %v195_v6 }
 0x128   :  { %v316_v27 = vadd.f32 %v315_v60, %v253_v8  ;;  %v197_v60 = vsub.f32 %v1053_v48, %v1250_v57  ;;  %v260_v12 = vmul.f32 %v196_v62, %v196_v62 }
 0x12a   :  { %v317_v1 = vadd.f32 %v316_v27, %v254_v40  ;;  %v198_v27 = vsub.f32 %v1059_v51, %v1250_v57  ;;  %v261_v2 = vmul.f32 %v197_v60, %v197_v60 }
 0x12c   :  { %v318_v3 = vadd.f32 %v317_v1, %v255_v24  ;;  %v199_v1 = vsub.f32 %v1062_v53, %v1250_v57  ;;  %v262_v4 = vmul.f32 %v198_v27, %v198_v27 }
 0x12e   :  { %v319_v32 = vadd.f32 %v318_v3, %v256_v10  ;;  %v200_v3 = vsub.f32 %v1068_v56, %v1250_v57  ;;  %v263_v6 = vmul.f32 %v199_v1, %v199_v1 }
 0x130   :  { %v320_v8 = vadd.f32 %v319_v32, %v257_v19  ;;  %v201_v32 = vsub.f32 %v1071_v58, %v1250_v57  ;;  %v264_v62 = vmul.f32 %v200_v3, %v200_v3 }
 0x132   :  { %v321_v40 = vadd.f32 %v320_v8, %v258_v37  ;;  %v202_v8 = vsub.f32 %v1077_v61, %v1250_v57  ;;  %v265_v60 = vmul.f32 %v201_v32, %v201_v32 }
 0x134   :  { %v322_v24 = vadd.f32 %v321_v40, %v259_v45  ;;  %v203_v40 = vsub.f32 %v1080_v63, %v1250_v57  ;;  %v266_v27 = vmul.f32 %v202_v8, %v202_v8 }
 0x136   :  { %v323_v10 = vadd.f32 %v322_v24, %v260_v12  ;;  %v204_v24 = vsub.f32 %v1086_v5, %v1250_v57  ;;  %v267_v1 = vmul.f32 %v203_v40, %v203_v40 }
 0x138   :  { %v324_v19 = vadd.f32 %v323_v10, %v261_v2  ;;  %v205_v10 = vsub.f32 %v1089_v9, %v1250_v57  ;;  %v268_v3 = vmul.f32 %v204_v24, %v204_v24 }
 0x13a   :  { %v325_v37 = vadd.f32 %v324_v19, %v262_v4  ;;  %v206_v19 = vsub.f32 %v1095_v14, %v1250_v57  ;;  %v269_v32 = vmul.f32 %v205_v10, %v205_v10 }
 0x13c   :  { %v326_v45 = vadd.f32 %v325_v37, %v263_v6  ;;  %v207_v37 = vsub.f32 %v1098_v17, %v1250_v57  ;;  %v270_v8 = vmul.f32 %v206_v19, %v206_v19 }
 0x13e   :  { %v327_v12 = vadd.f32 %v326_v45, %v264_v62  ;;  %v208_v45 = vsub.f32 %v1104_v22, %v1250_v57  ;;  %v271_v40 = vmul.f32 %v207_v37, %v207_v37 }
 0x140   :  { %v328_v2 = vadd.f32 %v327_v12, %v265_v60  ;;  %v209_v12 = vsub.f32 %v1107_v25, %v1250_v57  ;;  %v272_v24 = vmul.f32 %v208_v45, %v208_v45 }
 0x142   :  { %v329_v4 = vadd.f32 %v328_v2, %v266_v27  ;;  %v210_v2 = vsub.f32 %v1113_v30, %v1250_v57  ;;  %v273_v10 = vmul.f32 %v209_v12, %v209_v12 }
 0x144   :  { %v330_v6 = vadd.f32 %v329_v4, %v267_v1  ;;  %v211_v4 = vsub.f32 %v1116_v34, %v1250_v57  ;;  %v274_v19 = vmul.f32 %v210_v2, %v210_v2 }
 0x146   :  { %v331_v62 = vadd.f32 %v330_v6, %v268_v3  ;;  %v212_v6 = vsub.f32 %v1122_v39, %v1250_v57  ;;  %v275_v37 = vmul.f32 %v211_v4, %v211_v4 }
 0x148   :  { %v332_v60 = vadd.f32 %v331_v62, %v269_v32  ;;  %v213_v62 = vsub.f32 %v1125_v42, %v1250_v57  ;;  %v276_v45 = vmul.f32 %v212_v6, %v212_v6 }
 0x14a   :  { %v333_v27 = vadd.f32 %v332_v60, %v270_v8  ;;  %v214_v60 = vsub.f32 %v1131_v47, %v1250_v57  ;;  %v277_v12 = vmul.f32 %v213_v62, %v213_v62 }
 0x14c   :  { %v334_v1 = vadd.f32 %v333_v27, %v271_v40  ;;  %v215_v27 = vsub.f32 %v1134_v50, %v1250_v57  ;;  %v278_v2 = vmul.f32 %v214_v60, %v214_v60 }
 0x14e   :  { %v335_v3 = vadd.f32 %v334_v1, %v272_v24  ;;  %v216_v1 = vsub.f32 %v1140_v55, %v1250_v57  ;;  %v279_v4 = vmul.f32 %v215_v27, %v215_v27 }
 0x150   :  { %v336_v32 = vadd.f32 %v335_v3, %v273_v10  ;;  %v217_v3 = vsub.f32 %v1143_v59, %v1250_v57  ;;  %v280_v6 = vmul.f32 %v216_v1, %v216_v1 }
 0x152   :  { %v337_v8 = vadd.f32 %v336_v32, %v274_v19  ;;  %v218_v32 = vsub.f32 %v1149_v0, %v1250_v57  ;;  %v281_v62 = vmul.f32 %v217_v3, %v217_v3 }
 0x154   :  { %v338_v40 = vadd.f32 %v337_v8, %v275_v37  ;;  %v219_v8 = vsub.f32 %v1152_v7, %v1250_v57  ;;  %v282_v60 = vmul.f32 %v218_v32, %v218_v32 }
 0x156   :  { %v339_v24 = vadd.f32 %v338_v40, %v276_v45  ;;  %v220_v40 = vsub.f32 %v1158_v15, %v1250_v57  ;;  %v283_v27 = vmul.f32 %v219_v8, %v219_v8 }
 0x158   :  { %v340_v10 = vadd.f32 %v339_v24, %v277_v12  ;;  %v221_v24 = vsub.f32 %v1161_v20, %v1250_v57  ;;  %v284_v1 = vmul.f32 %v220_v40, %v220_v40 }
 0x15a   :  { %v341_v19 = vadd.f32 %v340_v10, %v278_v2  ;;  %v222_v10 = vsub.f32 %v1167_v29, %v1250_v57  ;;  %v285_v3 = vmul.f32 %v221_v24, %v221_v24 }
 0x15c   :  { %v342_v37 = vadd.f32 %v341_v19, %v279_v4  ;;  %v223_v19 = vsub.f32 %v1170_v35, %v1250_v57  ;;  %v286_v32 = vmul.f32 %v222_v10, %v222_v10 }
 0x15e   :  { %v343_v45 = vadd.f32 %v342_v37, %v280_v6  ;;  %v224_v37 = vsub.f32 %v1176_v44, %v1250_v57  ;;  %v287_v8 = vmul.f32 %v223_v19, %v223_v19 }
 0x160   :  { %v344_v12 = vadd.f32 %v343_v45, %v281_v62  ;;  %v225_v45 = vsub.f32 %v1179_v49, %v1250_v57  ;;  %v288_v40 = vmul.f32 %v224_v37, %v224_v37 }
 0x162   :  { %v345_v2 = vadd.f32 %v344_v12, %v282_v60  ;;  %v2141_v12 = vld [vmem:[#allocation11_spill] sm:$0xff]  ;;  %v289_v24 = vmul.f32 %v225_v45, %v225_v45 }
 0x163   :  { %v226_v29 = vsub.f32 %v2141_v12, %v1250_v57 }
 0x164   :  { %v346_v4 = vadd.f32 %v345_v2, %v283_v27  ;;  %v2142_v2 = vld [vmem:[#allocation12_spill] sm:$0xff] }
 0x165   :  { %v227_v35 = vsub.f32 %v2142_v2, %v1250_v57  ;;  %v290_v10 = vmul.f32 %v226_v29, %v226_v29 }
 0x166   :  { %v347_v6 = vadd.f32 %v346_v4, %v284_v1  ;;  %v2143_v4 = vld [vmem:[#allocation13_spill] sm:$0xff] }
 0x167   :  { %v228_v44 = vsub.f32 %v2143_v4, %v1250_v57  ;;  %v291_v19 = vmul.f32 %v227_v35, %v227_v35 }
 0x168   :  { %v348_v62 = vadd.f32 %v347_v6, %v285_v3  ;;  %v2144_v6 = vld [vmem:[#allocation14_spill] sm:$0xff] }
 0x169   :  { %v229_v49 = vsub.f32 %v2144_v6, %v1250_v57  ;;  %v292_v37 = vmul.f32 %v228_v44, %v228_v44 }
 0x16a   :  { %v349_v60 = vadd.f32 %v348_v62, %v286_v32  ;;  %v2145_v62 = vld [vmem:[#allocation15_spill] sm:$0xff] }
 0x16b   :  { %v230_v12 = vsub.f32 %v2145_v62, %v1250_v57  ;;  %v293_v45 = vmul.f32 %v229_v49, %v229_v49 }
 0x16c   :  { %v350_v27 = vadd.f32 %v349_v60, %v287_v8  ;;  %v2146_v60 = vld [vmem:[#allocation16_spill] sm:$0xff] }
 0x16d   :  { %v231_v2 = vsub.f32 %v2146_v60, %v1250_v57  ;;  %v294_v29 = vmul.f32 %v230_v12, %v230_v12 }
 0x16e   :  { %v351_v1 = vadd.f32 %v350_v27, %v288_v40  ;;  %v2147_v27 = vld [vmem:[#allocation17_spill] sm:$0xff] }
 0x16f   :  { %v232_v4 = vsub.f32 %v2147_v27, %v1250_v57  ;;  %v295_v35 = vmul.f32 %v231_v2, %v231_v2 }
 0x170   :  { %v352_v3 = vadd.f32 %v351_v1, %v289_v24  ;;  %v2148_v1 = vld [vmem:[#allocation18_spill] sm:$0xff] }
 0x171   :  { %v233_v6 = vsub.f32 %v2148_v1, %v1250_v57  ;;  %v296_v44 = vmul.f32 %v232_v4, %v232_v4 }
 0x172   :  { %v353_v32 = vadd.f32 %v352_v3, %v290_v10  ;;  %v2149_v3 = vld [vmem:[#allocation19_spill] sm:$0xff] }
 0x173   :  { %v234_v62 = vsub.f32 %v2149_v3, %v1250_v57  ;;  %v297_v49 = vmul.f32 %v233_v6, %v233_v6 }
 0x174   :  { %v354_v8 = vadd.f32 %v353_v32, %v291_v19  ;;  %v2150_v32 = vld [vmem:[#allocation20_spill] sm:$0xff] }
 0x175   :  { %v235_v60 = vsub.f32 %v2150_v32, %v1250_v57  ;;  %v298_v12 = vmul.f32 %v234_v62, %v234_v62 }
 0x176   :  { %v355_v40 = vadd.f32 %v354_v8, %v292_v37  ;;  %v236_v8 = vsub.f32 %v1230_v52, %v1250_v57 }
 0x177   :  { %v299_v2 = vmul.f32 %v235_v60, %v235_v60 }
 0x178   :  { %v356_v24 = vadd.f32 %v355_v40, %v293_v45  ;;  %v2151_v40 = vld [vmem:[#allocation22_spill] sm:$0xff]  ;;  %v300_v4 = vmul.f32 %v236_v8, %v236_v8 }
 0x179   :  { %v237_v1 = vsub.f32 %v2151_v40, %v1250_v57 }
 0x17a   :  { %v357_v10 = vadd.f32 %v356_v24, %v294_v29  ;;  %v238_v24 = vsub.f32 %v1239_v54, %v1250_v57 }
 0x17b   :  { %v301_v6 = vmul.f32 %v237_v1, %v237_v1  ;;  %v371_v1 = vld [vmem:[%s2074_s1] sm:$0xff] }
 0x17c   :  { %v358_v19 = vadd.f32 %v357_v10, %v295_v35  ;;  %v2152_v10 = vld [vmem:[#allocation23_spill] sm:$0xff]  ;;  %v302_v62 = vmul.f32 %v238_v24, %v238_v24 }
 0x17d   :  { %v239_v32 = vsub.f32 %v2152_v10, %v1250_v57 }
 0x17e   :  { %v359_v37 = vadd.f32 %v358_v19, %v296_v44  ;;  %v2153_v19 = vld [vmem:[#allocation24_spill] sm:$0xff] }
 0x17f   :  { %v240_v52 = vsub.f32 %v2153_v19, %v1250_v57 }
 0x180   :  { %v360_v45 = vadd.f32 %v359_v37, %v297_v49  ;;  %v303_v37 = vmul.f32 %v239_v32, %v239_v32 }
 0x181   :  { %v304_v40 = vmul.f32 %v240_v52, %v240_v52  ;;  %v375_v52 = vld [vmem:[%s2075_s2] sm:$0xff] }
 0x182   :  { %v361_v29 = vadd.f32 %v360_v45, %v298_v12  ;;  %v941_v45 = vmov 0  }
 0x183   :  { %937 = vset.pattern.permute.xlu1 %v941_v45  ;;  %938 = vset.pattern.permute.xlu0 %v941_v45 }
 0x184   :  { %v362_v35 = vadd.f32 %v361_v29, %v299_v2 }
 0x186   :  { %v363_v44 = vadd.f32 %v362_v35, %v300_v4  ;;  %v2154_v35 = vld [vmem:[#allocation2_spill] sm:$0xff] }
 0x188   :  { %v364_v49 = vadd.f32 %v363_v44, %v301_v6  ;;  %v2155_v44 = vld [vmem:[#allocation3_spill] sm:$0xff] }
 0x18a   :  { %v365_v3 = vadd.f32 %v364_v49, %v302_v62  ;;  %v2156_v49 = vld [vmem:[#allocation4_spill] sm:$0xff] }
 0x18c   :  { %v366_v60 = vadd.f32 %v365_v3, %v303_v37 }
 0x18e   :  { %v367_v12 = vadd.f32 %v366_v60, %v304_v40  ;;  %v2157_v60 = vld [vmem:[#allocation5_spill] sm:$0xff] }
 0x190   :  { %368 = vadd.xlane.f32.xlu0 %v367_v12 }
 0x219   :  { %v369_v8 = vpop.xlane.xlu0 %368 }
 0x21a   :  { %v370_v2 = vmul.f32 0.00012207031, %v369_v8 }
 0x21c   :  { %v372_v29 = vadd.f32 1e-05, %v370_v2 }
 0x21e   :  { %939 = vrsqrt.f32 %v372_v29 }
 0x22b   :  { %v940_v4 = vpop.eup %939 }
 0x22c   :  { %v374_v24 = vmul.f32 %v940_v4, %v371_v1 }
 0x22e   :  { %380 = vperm.xlu1 %937, %v374_v24   ;;  %v376_v3 = vmul.f32 %v374_v24, %v1250_v57  ;;  %v2158_v57 = vld [vmem:[#allocation6_spill] sm:$0xff]  ;;  %v2159_v24 = vld [vmem:[#allocation7_spill] sm:$0xff] }
 0x230   :  { %v377_v32 = vsub.f32 %v375_v52, %v376_v3  ;;  %v2160_v52 = vld [vmem:[#allocation8_spill] sm:$0xff]  ;;  %v2161_v3 = vld [vmem:[#allocation9_spill] sm:$0xff] }
 0x232   :  { %449 = vperm.xlu1 %937, %v377_v32   ;;  %v2162_v32 = vld [vmem:[#allocation10_spill] sm:$0xff] }
 0x2a9   :  { %v1387_v40 = vpop.permute.xlu1 %380 }
 0x2aa   :  { %v1391_v6 = vmul.f32 %v1387_v40, %v2154_v35  ;;  %v1395_v62 = vmul.f32 %v1387_v40, %v2155_v44  ;;  %v1399_v37 = vmul.f32 %v1387_v40, %v2156_v49  ;;  %v1403_v12 = vmul.f32 %v1387_v40, %v2157_v60  ;;  %v2164_v35 = vld [vmem:[#allocation11_spill] sm:$0xff]  ;;  %v2165_v44 = vld [vmem:[#allocation12_spill] sm:$0xff]  ;;  %v2167_v60 = vld [vmem:[#allocation13_spill] sm:$0xff] }
 0x2ab   :  { %v1407_v45 = vmul.f32 %v1387_v40, %v2158_v57  ;;  %v1411_v8 = vmul.f32 %v1387_v40, %v987_v11  ;;  %v1415_v2 = vmul.f32 %v1387_v40, %v990_v13  ;;  %v1419_v29 = vmul.f32 %v1387_v40, %v996_v16 }
 0x2ac   :  { %v1423_v1 = vmul.f32 %v1387_v40, %v999_v18  ;;  %v1427_v4 = vmul.f32 %v1387_v40, %v1005_v21  ;;  %v1431_v11 = vmul.f32 %v1387_v40, %v1008_v23  ;;  %v1435_v13 = vmul.f32 %v1387_v40, %v1014_v26 }
 0x2ad   :  { %v1439_v16 = vmul.f32 %v1387_v40, %v1017_v28  ;;  %v1443_v18 = vmul.f32 %v1387_v40, %v1023_v31  ;;  %v1447_v21 = vmul.f32 %v1387_v40, %v1026_v33  ;;  %v1451_v23 = vmul.f32 %v1387_v40, %v1032_v36 }
 0x2ae   :  { %v1455_v26 = vmul.f32 %v1387_v40, %v1035_v38  ;;  %v1459_v28 = vmul.f32 %v1387_v40, %v1041_v41  ;;  %v1463_v31 = vmul.f32 %v1387_v40, %v1044_v43  ;;  %v1467_v33 = vmul.f32 %v1387_v40, %v1050_v46 }
 0x2af   :  { %v1471_v36 = vmul.f32 %v1387_v40, %v1053_v48  ;;  %v1475_v38 = vmul.f32 %v1387_v40, %v1059_v51  ;;  %v1479_v41 = vmul.f32 %v1387_v40, %v1062_v53  ;;  %v1483_v43 = vmul.f32 %v1387_v40, %v1068_v56 }
 0x2b0   :  { %v1487_v46 = vmul.f32 %v1387_v40, %v1071_v58  ;;  %v1491_v48 = vmul.f32 %v1387_v40, %v1077_v61  ;;  %v1495_v51 = vmul.f32 %v1387_v40, %v1080_v63  ;;  %v1499_v53 = vmul.f32 %v1387_v40, %v1086_v5 }
 0x2b1   :  { %v1503_v56 = vmul.f32 %v1387_v40, %v1089_v9  ;;  %v1507_v58 = vmul.f32 %v1387_v40, %v1095_v14  ;;  %v1511_v61 = vmul.f32 %v1387_v40, %v1098_v17  ;;  %v1515_v63 = vmul.f32 %v1387_v40, %v1104_v22 }
 0x2b2   :  { %v1519_v5 = vmul.f32 %v1387_v40, %v1107_v25  ;;  %v1523_v9 = vmul.f32 %v1387_v40, %v1113_v30  ;;  %v1527_v14 = vmul.f32 %v1387_v40, %v1116_v34  ;;  %v1531_v17 = vmul.f32 %v1387_v40, %v1122_v39 }
 0x2b3   :  { %v1535_v22 = vmul.f32 %v1387_v40, %v1125_v42  ;;  %v1539_v25 = vmul.f32 %v1387_v40, %v1131_v47  ;;  %v1543_v30 = vmul.f32 %v1387_v40, %v1134_v50  ;;  %v1547_v34 = vmul.f32 %v1387_v40, %v1140_v55 }
 0x2b4   :  { %v1551_v39 = vmul.f32 %v1387_v40, %v1143_v59  ;;  %v1555_v42 = vmul.f32 %v1387_v40, %v1149_v0  ;;  %v1559_v47 = vmul.f32 %v1387_v40, %v1152_v7  ;;  %v1563_v50 = vmul.f32 %v1387_v40, %v1158_v15 }
 0x2b5   :  { %v1567_v55 = vmul.f32 %v1387_v40, %v1161_v20  ;;  %v1571_v59 = vmul.f32 %v1387_v40, %v2159_v24  ;;  %v1575_v0 = vmul.f32 %v1387_v40, %v2160_v52  ;;  %v1579_v7 = vmul.f32 %v1387_v40, %v2161_v3  ;;  %v2169_v24 = vld [vmem:[#allocation14_spill] sm:$0xff]  ;;  %v2171_v3 = vld [vmem:[#allocation15_spill] sm:$0xff] }
 0x2b6   :  { %v1583_v15 = vmul.f32 %v1387_v40, %v2162_v32  ;;  %v1587_v20 = vmul.f32 %v1387_v40, %v2164_v35  ;;  %v1591_v49 = vmul.f32 %v1387_v40, %v2165_v44  ;;  %v1595_v57 = vmul.f32 %v1387_v40, %v2167_v60  ;;  %v2176_v60 = vld [vmem:[#allocation18_spill] sm:$0xff] }
 0x2b7   :  { %v1599_v52 = vmul.f32 %v1387_v40, %v2169_v24  ;;  %v1603_v32 = vmul.f32 %v1387_v40, %v2171_v3  ;;  %v1611_v44 = vmul.f32 %v1387_v40, %v2147_v27  ;;  %v2177_v24 = vld [vmem:[#allocation19_spill] sm:$0xff]  ;;  %v2178_v3 = vld [vmem:[#allocation20_spill] sm:$0xff]  ;;  %v2180_v27 = vld [vmem:[#allocation22_spill] sm:$0xff] }
 0x2b8   :  { %2163 = vst [vmem:[#allocation17_spill] sm:$0xff] %v1583_v15  ;;  %2166 = vst [vmem:[#allocation23_spill] sm:$0xff] %v1591_v49  ;;  %v2173_v15 = vld [vmem:[#allocation16_spill] sm:$0xff]  ;;  %v1613_v49 = vpop.permute.xlu1 %449 }
 0x2b9   :  { %2168 = vst [vmem:[#allocation24_spill] sm:$0xff] %v1595_v57  ;;  %2170 = vst [vmem:[#allocation2_spill] sm:$0xff] %v1599_v52  ;;  %v1607_v35 = vmul.f32 %v1387_v40, %v2173_v15  ;;  %v1617_v57 = vmul.f32 %v1387_v40, %v2176_v60  ;;  %v1621_v52 = vmul.f32 %v1387_v40, %v2177_v24  ;;  %v2179_v15 = vld [vmem:[#allocation21_spill] sm:$0xff] }
 0x2ba   :  { %2172 = vst [vmem:[#allocation3_spill] sm:$0xff] %v1603_v32  ;;  %2175 = vst [vmem:[#allocation5_spill] sm:$0xff] %v1611_v44  ;;  %v1625_v32 = vmul.f32 %v1387_v40, %v2178_v3  ;;  %v1633_v44 = vmul.f32 %v1387_v40, %v2180_v27  ;;  %v1637_v60 = vmul.f32 %v1387_v40, %v1239_v54 }
 0x2bb   :  { %2174 = vst [vmem:[#allocation4_spill] sm:$0xff] %v1607_v35  ;;  %v1629_v35 = vmul.f32 %v1387_v40, %v2179_v15  ;;  %v1641_v24 = vmul.f32 %v1387_v40, %v2152_v10  ;;  %v1645_v3 = vmul.f32 %v1387_v40, %v2153_v19  ;;  %v1649_v15 = vadd.f32 %v1613_v49, %v1391_v6 }
 0x2bc   :  { %v1653_v27 = vadd.f32 %v1613_v49, %v1395_v62  ;;  %v1657_v54 = vadd.f32 %v1613_v49, %v1399_v37  ;;  %v1661_v10 = vadd.f32 %v1613_v49, %v1403_v12  ;;  %v1665_v19 = vadd.f32 %v1613_v49, %v1407_v45 }
 0x2bd   :  { %2181 = vst [vmem:[#allocation6_spill] sm:$0xff] %v1649_v15  ;;  %v1669_v40 = vadd.f32 %v1613_v49, %v1411_v8  ;;  %v1673_v6 = vadd.f32 %v1613_v49, %v1415_v2  ;;  %v1677_v62 = vadd.f32 %v1613_v49, %v1419_v29  ;;  %v1681_v37 = vadd.f32 %v1613_v49, %v1423_v1 }
 0x2be   :  { %2182 = vst [vmem:[#allocation7_spill] sm:$0xff] %v1653_v27  ;;  %2183 = vst [vmem:[#allocation8_spill] sm:$0xff] %v1657_v54  ;;  %v1685_v12 = vadd.f32 %v1613_v49, %v1427_v4  ;;  %v1689_v45 = vadd.f32 %v1613_v49, %v1431_v11  ;;  %v1693_v8 = vadd.f32 %v1613_v49, %v1435_v13 }
 0x2bf   :  { %2184 = vst [vmem:[#allocation9_spill] sm:$0xff] %v1661_v10  ;;  %2185 = vst [vmem:[#allocation10_spill] sm:$0xff] %v1665_v19  ;;  %v1697_v2 = vadd.f32 %v1613_v49, %v1439_v16  ;;  %v1701_v29 = vadd.f32 %v1613_v49, %v1443_v18  ;;  %v1705_v1 = vadd.f32 %v1613_v49, %v1447_v21 }
 0x2c0   :  { %v1709_v4 = vadd.f32 %v1613_v49, %v1451_v23  ;;  %v1713_v11 = vadd.f32 %v1613_v49, %v1455_v26  ;;  %v1717_v13 = vadd.f32 %v1613_v49, %v1459_v28  ;;  %v1721_v16 = vadd.f32 %v1613_v49, %v1463_v31 }
 0x2c1   :  { %v1725_v18 = vadd.f32 %v1613_v49, %v1467_v33  ;;  %v1729_v21 = vadd.f32 %v1613_v49, %v1471_v36  ;;  %v1733_v23 = vadd.f32 %v1613_v49, %v1475_v38  ;;  %v1737_v26 = vadd.f32 %v1613_v49, %v1479_v41 }
 0x2c2   :  { %v1741_v28 = vadd.f32 %v1613_v49, %v1483_v43  ;;  %v1745_v31 = vadd.f32 %v1613_v49, %v1487_v46  ;;  %v1749_v33 = vadd.f32 %v1613_v49, %v1491_v48  ;;  %v1753_v36 = vadd.f32 %v1613_v49, %v1495_v51 }
 0x2c3   :  { %v1757_v38 = vadd.f32 %v1613_v49, %v1499_v53  ;;  %v1761_v41 = vadd.f32 %v1613_v49, %v1503_v56  ;;  %v1765_v43 = vadd.f32 %v1613_v49, %v1507_v58  ;;  %v1769_v46 = vadd.f32 %v1613_v49, %v1511_v61 }
 0x2c4   :  { %v1773_v48 = vadd.f32 %v1613_v49, %v1515_v63  ;;  %v1777_v51 = vadd.f32 %v1613_v49, %v1519_v5  ;;  %v1781_v53 = vadd.f32 %v1613_v49, %v1523_v9  ;;  %v1785_v56 = vadd.f32 %v1613_v49, %v1527_v14 }
 0x2c5   :  { %v1789_v58 = vadd.f32 %v1613_v49, %v1531_v17  ;;  %v1793_v61 = vadd.f32 %v1613_v49, %v1535_v22  ;;  %v1797_v63 = vadd.f32 %v1613_v49, %v1539_v25  ;;  %v1801_v5 = vadd.f32 %v1613_v49, %v1543_v30 }
 0x2c6   :  { %v1805_v9 = vadd.f32 %v1613_v49, %v1547_v34  ;;  %v1809_v14 = vadd.f32 %v1613_v49, %v1551_v39  ;;  %v1813_v17 = vadd.f32 %v1613_v49, %v1555_v42  ;;  %v1817_v22 = vadd.f32 %v1613_v49, %v1559_v47  ;;  %v2190_v47 = vld [vmem:[#allocation17_spill] sm:$0xff] }
 0x2c7   :  { %v1821_v25 = vadd.f32 %v1613_v49, %v1563_v50  ;;  %v1825_v30 = vadd.f32 %v1613_v49, %v1567_v55  ;;  %v1829_v34 = vadd.f32 %v1613_v49, %v1571_v59  ;;  %v1833_v39 = vadd.f32 %v1613_v49, %v1575_v0 }
 0x2c8   :  { %v1837_v42 = vadd.f32 %v1613_v49, %v1579_v7  ;;  %v1841_v50 = vadd.f32 %v1613_v49, %v2190_v47  ;;  %v1845_v55 = vadd.f32 %v1613_v49, %v1587_v20 }
 0x2c9   :  { %2186 = vst [vmem:[#allocation11_spill] sm:$0xff] %v1825_v30  ;;  %2187 = vst [vmem:[#allocation12_spill] sm:$0xff] %v1829_v34  ;;  %v2193_v30 = vld [vmem:[#allocation23_spill] sm:$0xff]  ;;  %v2194_v34 = vld [vmem:[#allocation24_spill] sm:$0xff] }
 0x2ca   :  { %2188 = vst [vmem:[#allocation13_spill] sm:$0xff] %v1833_v39  ;;  %2189 = vst [vmem:[#allocation14_spill] sm:$0xff] %v1837_v42  ;;  %v1849_v59 = vadd.f32 %v1613_v49, %v2193_v30  ;;  %v1853_v0 = vadd.f32 %v1613_v49, %v2194_v34  ;;  %v2195_v39 = vld [vmem:[#allocation2_spill] sm:$0xff]  ;;  %v2196_v42 = vld [vmem:[#allocation3_spill] sm:$0xff]  ;;  %v1873_v34 = vadd.f32 %v1613_v49, %v1617_v57 }
 0x2cb   :  { %2191 = vst [vmem:[#allocation15_spill] sm:$0xff] %v1841_v50  ;;  %2192 = vst [vmem:[#allocation16_spill] sm:$0xff] %v1845_v55  ;;  %v1857_v7 = vadd.f32 %v1613_v49, %v2195_v39  ;;  %v1861_v47 = vadd.f32 %v1613_v49, %v2196_v42  ;;  %v2197_v50 = vld [vmem:[#allocation4_spill] sm:$0xff]  ;;  %v2198_v55 = vld [vmem:[#allocation5_spill] sm:$0xff]  ;;  %v1877_v39 = vadd.f32 %v1613_v49, %v1621_v52 }
 0x2cc   :  { %v1865_v20 = vadd.f32 %v1613_v49, %v2197_v50  ;;  %v1869_v30 = vadd.f32 %v1613_v49, %v2198_v55  ;;  %v1881_v42 = vadd.f32 %v1613_v49, %v1625_v32  ;;  %v1885_v50 = vadd.f32 %v1613_v49, %v1629_v35 }
 0x2cd   :  { %v1889_v55 = vadd.f32 %v1613_v49, %v1633_v44  ;;  %v1893_v57 = vadd.f32 %v1613_v49, %v1637_v60  ;;  %v1897_v52 = vadd.f32 %v1613_v49, %v1641_v24  ;;  %v1901_v32 = vadd.f32 %v1613_v49, %v1645_v3 }
 0x2ce   :  { %2199 = vst [vmem:[#allocation18_spill] sm:$0xff] %v1881_v42  ;;  %2200 = vst [vmem:[#allocation19_spill] sm:$0xff] %v1885_v50  ;;  %v521_v60 = vmax.f32 %v1669_v40, 0.0  ;;  %v523_v24 = vmax.f32 %v1677_v62, 0.0  ;;  %v525_v49 = vmax.f32 %v1685_v12, 0.0  ;;  %v526_v3 = vmax.f32 %v1689_v45, 0.0 }
 0x2cf   :  { %2201 = vst [vmem:[#allocation20_spill] sm:$0xff] %v1889_v55  ;;  %2202 = vst [vmem:[#allocation21_spill] sm:$0xff] %v1893_v57  ;;  %v522_v57 = vmax.f32 %v1673_v6, 0.0  ;;  %v527_v35 = vmax.f32 %v1693_v8, 0.0  ;;  %v528_v50 = vmax.f32 %v1697_v2, 0.0  ;;  %v529_v44 = vmax.f32 %v1701_v29, 0.0 }
 0x2d0   :  { %2203 = vst [vmem:[#allocation22_spill] sm:$0xff] %v1897_v52  ;;  %2204 = vst [vmem:[#allocation17_spill] sm:$0xff] %v1901_v32  ;;  %v524_v52 = vmax.f32 %v1681_v37, 0.0  ;;  %v530_v55 = vmax.f32 %v1705_v1, 0.0  ;;  %v531_v40 = vmax.f32 %v1709_v4, 0.0  ;;  %v532_v6 = vmax.f32 %v1713_v11, 0.0 }
 0x2d1   :  { %v533_v62 = vmax.f32 %v1717_v13, 0.0  ;;  %v534_v37 = vmax.f32 %v1721_v16, 0.0  ;;  %v535_v12 = vmax.f32 %v1725_v18, 0.0  ;;  %v536_v45 = vmax.f32 %v1729_v21, 0.0  ;;  %v2205_v42 = vld [vmem:[#allocation11_spill] sm:$0xff]  ;;  %v2206_v19 = vld [vmem:[#allocation12_spill] sm:$0xff] }
 0x2d2   :  { %v537_v8 = vmax.f32 %v1733_v23, 0.0  ;;  %v538_v2 = vmax.f32 %v1737_v26, 0.0  ;;  %v539_v29 = vmax.f32 %v1741_v28, 0.0  ;;  %v540_v1 = vmax.f32 %v1745_v31, 0.0  ;;  %v2207_v10 = vld [vmem:[#allocation13_spill] sm:$0xff]  ;;  %v2208_v54 = vld [vmem:[#allocation14_spill] sm:$0xff] }
 0x2d3   :  { %v541_v4 = vmax.f32 %v1749_v33, 0.0  ;;  %v542_v11 = vmax.f32 %v1753_v36, 0.0  ;;  %v543_v13 = vmax.f32 %v1757_v38, 0.0  ;;  %v544_v16 = vmax.f32 %v1761_v41, 0.0  ;;  %v2209_v27 = vld [vmem:[#allocation15_spill] sm:$0xff]  ;;  %v2210_v15 = vld [vmem:[#allocation16_spill] sm:$0xff] }
 0x2d4   :  { %v545_v18 = vmax.f32 %v1765_v43, 0.0  ;;  %v546_v21 = vmax.f32 %v1769_v46, 0.0  ;;  %v547_v23 = vmax.f32 %v1773_v48, 0.0  ;;  %v548_v26 = vmax.f32 %v1777_v51, 0.0 }
 0x2d5   :  { %v549_v28 = vmax.f32 %v1781_v53, 0.0  ;;  %v550_v31 = vmax.f32 %v1785_v56, 0.0  ;;  %v551_v33 = vmax.f32 %v1789_v58, 0.0  ;;  %v552_v36 = vmax.f32 %v1793_v61, 0.0  ;;  %v2211_v32 = vld [vmem:[#allocation18_spill] sm:$0xff] }
 0x2d6   :  { %v553_v38 = vmax.f32 %v1797_v63, 0.0  ;;  %v554_v41 = vmax.f32 %v1801_v5, 0.0  ;;  %v555_v43 = vmax.f32 %v1805_v9, 0.0  ;;  %v556_v46 = vmax.f32 %v1809_v14, 0.0 }
 0x2d7   :  { %v557_v48 = vmax.f32 %v1813_v17, 0.0  ;;  %v558_v51 = vmax.f32 %v1817_v22, 0.0  ;;  %v559_v53 = vmax.f32 %v1821_v25, 0.0  ;;  %v560_v56 = vmax.f32 %v2205_v42, 0.0 }
 0x2d8   :  { %v561_v58 = vmax.f32 %v2206_v19, 0.0  ;;  %v562_v61 = vmax.f32 %v2207_v10, 0.0  ;;  %v563_v63 = vmax.f32 %v2208_v54, 0.0  ;;  %v564_v5 = vmax.f32 %v2209_v27, 0.0 }
 0x2d9   :  { %v565_v9 = vmax.f32 %v2210_v15, 0.0  ;;  %v566_v14 = vmax.f32 %v1849_v59, 0.0  ;;  %v567_v17 = vmax.f32 %v1853_v0, 0.0  ;;  %v568_v22 = vmax.f32 %v1857_v7, 0.0  ;;  %v2212_v15 = vld [vmem:[#allocation19_spill] sm:$0xff]  ;;  %v2213_v0 = vld [vmem:[#allocation20_spill] sm:$0xff] }
 0x2da   :  { %v569_v25 = vmax.f32 %v1861_v47, 0.0  ;;  %v570_v42 = vmax.f32 %v1865_v20, 0.0  ;;  %v571_v19 = vmax.f32 %v1869_v30, 0.0  ;;  %v572_v10 = vmax.f32 %v1873_v34, 0.0  ;;  %v2214_v47 = vld [vmem:[#allocation21_spill] sm:$0xff]  ;;  %v2215_v30 = vld [vmem:[#allocation22_spill] sm:$0xff] }
 0x2db   :  { %v573_v54 = vmax.f32 %v1877_v39, 0.0  ;;  %v574_v27 = vmax.f32 %v2211_v32, 0.0  ;;  %v575_v59 = vmax.f32 %v2212_v15, 0.0  ;;  %v576_v7 = vmax.f32 %v2213_v0, 0.0  ;;  %v2216_v39 = vld [vmem:[#allocation17_spill] sm:$0xff]  ;;  %v2217_v15 = vld [vmem:[#allocation6_spill] sm:$0xff] }
 0x2dc   :  { %v577_v20 = vmax.f32 %v2214_v47, 0.0  ;;  %v578_v34 = vmax.f32 %v2215_v30, 0.0  ;;  %v579_v32 = vmax.f32 %v2216_v39, 0.0  ;;  %v2218_v0 = vmax.f32 %v2217_v15, 0.0  ;;  %v2219_v47 = vld [vmem:[#allocation7_spill] sm:$0xff]  ;;  %v2221_v15 = vld [vmem:[#allocation8_spill] sm:$0xff] }
 0x2dd   :  { %v2220_v30 = vmax.f32 %v2219_v47, 0.0  ;;  %v2222_v47 = vmax.f32 %v2221_v15, 0.0 }
 0x2df   :  { %v904_v39 = vpack.c.bf16 %v2220_v30, %v2218_v0  ;;  %v2223_v0 = vld [vmem:[#allocation9_spill] sm:$0xff] }
 0x2e0   :  { %v2224_v30 = vmax.f32 %v2223_v0, 0.0  ;;  %v2225_v0 = vld [vmem:[#allocation10_spill] sm:$0xff] }
 0x2e1   :  { %836 = vst [vmem:[%s2076_s3] sm:$0xff] %v904_v39 }
 0x2e2   :  { %v905_v15 = vpack.c.bf16 %v2224_v30, %v2222_v47  ;;  %v2226_v30 = vmax.f32 %v2225_v0, 0.0  ;;  %v907_v0 = vpack.c.bf16 %v523_v24, %v522_v57  ;;  %v910_v24 = vpack.c.bf16 %v529_v44, %v528_v50 }
 0x2e3   :  { %v911_v57 = vpack.c.bf16 %v531_v40, %v530_v55  ;;  %v916_v50 = vpack.c.bf16 %v541_v4, %v540_v1  ;;  %v917_v55 = vpack.c.bf16 %v543_v13, %v542_v11  ;;  %v918_v44 = vpack.c.bf16 %v545_v18, %v544_v16 }
 0x2e4   :  { %v906_v47 = vpack.c.bf16 %v521_v60, %v2226_v30  ;;  %v908_v30 = vpack.c.bf16 %v525_v49, %v524_v52  ;;  %v909_v60 = vpack.c.bf16 %v527_v35, %v526_v3  ;;  %v912_v49 = vpack.c.bf16 %v533_v62, %v532_v6  ;;  %837 = vst [vmem:[%s2076_s3 + $0x8] sm:$0xff] %v905_v15 }
 0x2e5   :  { %v913_v52 = vpack.c.bf16 %v535_v12, %v534_v37  ;;  %v914_v3 = vpack.c.bf16 %v537_v8, %v536_v45  ;;  %v915_v35 = vpack.c.bf16 %v539_v29, %v538_v2  ;;  %839 = vst [vmem:[%s2076_s3 + $0x18] sm:$0xff] %v907_v0  ;;  %v919_v40 = vpack.c.bf16 %v547_v23, %v546_v21 }
 0x2e6   :  { %838 = vst [vmem:[%s2076_s3 + $0x10] sm:$0xff] %v906_v47  ;;  %840 = vst [vmem:[%s2076_s3 + $0x20] sm:$0xff] %v908_v30  ;;  %v920_v6 = vpack.c.bf16 %v549_v28, %v548_v26  ;;  %v921_v62 = vpack.c.bf16 %v551_v33, %v550_v31  ;;  %v922_v37 = vpack.c.bf16 %v553_v38, %v552_v36 }
 0x2e7   :  { %841 = vst [vmem:[%s2076_s3 + $0x28] sm:$0xff] %v909_v60  ;;  %842 = vst [vmem:[%s2076_s3 + $0x30] sm:$0xff] %v910_v24  ;;  %v923_v12 = vpack.c.bf16 %v555_v43, %v554_v41  ;;  %v924_v45 = vpack.c.bf16 %v557_v48, %v556_v46  ;;  %v925_v8 = vpack.c.bf16 %v559_v53, %v558_v51 }
 0x2e8   :  { %843 = vst [vmem:[%s2076_s3 + $0x38] sm:$0xff] %v911_v57  ;;  %844 = vst [vmem:[%s2076_s3 + $0x40] sm:$0xff] %v912_v49  ;;  %v926_v2 = vpack.c.bf16 %v561_v58, %v560_v56  ;;  %v927_v29 = vpack.c.bf16 %v563_v63, %v562_v61  ;;  %v928_v1 = vpack.c.bf16 %v565_v9, %v564_v5 }
 0x2e9   :  { %845 = vst [vmem:[%s2076_s3 + $0x48] sm:$0xff] %v913_v52  ;;  %846 = vst [vmem:[%s2076_s3 + $0x50] sm:$0xff] %v914_v3  ;;  %v929_v4 = vpack.c.bf16 %v567_v17, %v566_v14  ;;  %v930_v11 = vpack.c.bf16 %v569_v25, %v568_v22  ;;  %v931_v13 = vpack.c.bf16 %v571_v19, %v570_v42 }
 0x2ea   :  { %847 = vst [vmem:[%s2076_s3 + $0x58] sm:$0xff] %v915_v35  ;;  %848 = vst [vmem:[%s2076_s3 + $0x60] sm:$0xff] %v916_v50  ;;  %v932_v16 = vpack.c.bf16 %v573_v54, %v572_v10  ;;  %v933_v18 = vpack.c.bf16 %v575_v59, %v574_v27  ;;  %v934_v21 = vpack.c.bf16 %v577_v20, %v576_v7 }
 0x2eb   :  { %849 = vst [vmem:[%s2076_s3 + $0x68] sm:$0xff] %v917_v55  ;;  %850 = vst [vmem:[%s2076_s3 + $0x70] sm:$0xff] %v918_v44  ;;  %v935_v23 = vpack.c.bf16 %v579_v32, %v578_v34 }
 0x2ec   :  { %851 = vst [vmem:[%s2076_s3 + $0x78] sm:$0xff] %v919_v40  ;;  %852 = vst [vmem:[%s2076_s3 + $0x80] sm:$0xff] %v920_v6 }
 0x2ed   :  { %853 = vst [vmem:[%s2076_s3 + $0x88] sm:$0xff] %v921_v62  ;;  %854 = vst [vmem:[%s2076_s3 + $0x90] sm:$0xff] %v922_v37 }
 0x2ee   :  { %855 = vst [vmem:[%s2076_s3 + $0x98] sm:$0xff] %v923_v12  ;;  %856 = vst [vmem:[%s2076_s3 + $0xa0] sm:$0xff] %v924_v45 }
 0x2ef   :  { %857 = vst [vmem:[%s2076_s3 + $0xa8] sm:$0xff] %v925_v8  ;;  %858 = vst [vmem:[%s2076_s3 + $0xb0] sm:$0xff] %v926_v2 }
 0x2f0   :  { %859 = vst [vmem:[%s2076_s3 + $0xb8] sm:$0xff] %v927_v29  ;;  %860 = vst [vmem:[%s2076_s3 + $0xc0] sm:$0xff] %v928_v1 }
 0x2f1   :  { %861 = vst [vmem:[%s2076_s3 + $0xc8] sm:$0xff] %v929_v4  ;;  %862 = vst [vmem:[%s2076_s3 + $0xd0] sm:$0xff] %v930_v11 }
 0x2f2   :  { %863 = vst [vmem:[%s2076_s3 + $0xd8] sm:$0xff] %v931_v13  ;;  %864 = vst [vmem:[%s2076_s3 + $0xe0] sm:$0xff] %v932_v16 }
 0x2f3   :  { %865 = vst [vmem:[%s2076_s3 + $0xe8] sm:$0xff] %v933_v18  ;;  %866 = vst [vmem:[%s2076_s3 + $0xf0] sm:$0xff] %v934_v21 }
 0x2f4   :  { %867 = vst [vmem:[%s2076_s3 + $0xf8] sm:$0xff] %v935_v23 }

// kernel: wave_field_decoder_forward.22
= control target key start
LH: loop header
LB: loop body
LE: loop exit
PB: predicated region body
PF: predicated region fallthrough
CT: control target
= control target key end

     0   :  { %s1902_s9 = smov 0   ;;  %s1904_s10 = smov 0   ;;  %s2309_s0 = inlined_call_operand.vmem [shape: bf16[64,8], index: 0, kind: input, shape index: {}]   ;;  %s2310_s1 = inlined_call_operand.vmem [shape: bf16[8,8192], index: 1, kind: input, shape index: {}]   ;;  %s2311_s2 = inlined_call_operand.vmem [shape: bf16[64,8192], index: 2, kind: output, shape index: {}]  }
   0x1   :  { %s1906_s11 = smov 0   ;;  %s1908_s12 = smov 0  }
   0x2   :  { %s1910_s13 = smov 0  }
   0x3 LB: > { %s1582_s14 = sadd.s32 4294967295, %s1884_s13   ;;  %s21_s15 = sadd.s32 1, %s1880_s12  ;;  %s1884_s13 = sphi %s1910_s13, %s12_s13   ;;  %s1880_s12 = sphi %s1908_s12, %s2316_s12   ;;  %s1876_s11 = sphi %s1906_s11, %s2315_s11   ;;  %s1872_s10 = sphi %s1904_s10, %s2314_s10   ;;  %s1868_s9 = sphi %s1902_s9, %s2313_s9  }
   0x4   : > { %p22_p0 = scmp.ge.s32.totalorder %s21_s15, 4  ;;  %s85_s16 = sadd.s32 1, %s1872_s10 }
   0x5   : > { %p95_p1 = scmp.ne.s32.totalorder %s1872_s10, %s1868_s9  ;;  %p96_p2 = scmp.eq.s32.totalorder %s1582_s14, 3 }
   0x6   : > { %s2318_s15 = smov (%p22_p0, %s21_s15), 0  ;;  %p1587_p4 = scmp.ge.s32.totalorder %s1884_s13, 1 }
   0x7   : > { %p1934_p3 = por %p96_p2, %p95_p1  ;;  %s81_s18 = ssub.s32 %s1880_s12, %s2318_s15 }
   0x8   : > { %p138_p5 = scmp.lt.s32.totalorder %s1884_s13, 5  ;;  %p83_p6 = scmp.eq.s32.totalorder %s81_s18, 0 }
   0xa   : > { %p139_p7 = pnand %p1587_p4, %p138_p5 }
   0xb   : > { %s1943_s19 = scalar_select %p83_p6, %s1872_s10, %s85_s16  }
   0xc   : > { %142 = sbr.rel (%p139_p7) target bundleno = 357 (0x165), region = 28  ;;  %s1589_s20 = sshll.u32 (!%p139_p7), %s1876_s11, 4 }
   0xd   : > { %p171_p8 = scmp.lt.s32.totalorder (!%p139_p7), %s1589_s20, 63  ;;  %s161_s5 = sand.u32 (!%p139_p7), 1, %s1868_s9  }
   0xe   : > { %s1588_s6 = sshll.u32 (!%p139_p7), %s161_s5, 9 }
   0xf   : > { %s2092_s7 = scalar_lea.vmem (!%p139_p7), [#allocation2], %s1588_s6 }
  0x11   : > { %v1886_v0 = vmov 0   ;;  %s2320_s20 = smov (!%p171_p8, %s1589_s20), 63  ;;  %vm268_vm0 = vcmask 1043456   ;;  %v1964_v15 = vld [vmem:[%s2309_s0] sm:$0xff]   ;;  %vm255_vm1 = vcmask 64512   ;;  %v1983_v22 = vld [vmem:[%s2309_s0 + $0x8] sm:$0xff]  }
  0x12   : > { %349 = vmatprep.mubr.bf16.mxu0 %v1886_v0  ;;  %422 = vmatprep.mubr.bf16.mxu1 %v1886_v0  ;;  %s1590_s21 = sshll.u32 %s2320_s20, 2  ;;  %v1994_v23 = vld [vmem:[%s2309_s0 + $0x10] sm:$0xff]   ;;  %v2005_v24 = vld [vmem:[%s2309_s0 + $0x18] sm:$0xff]   ;;  %s1784_s8 = sshll.u32 (%p1934_p3), %s1876_s11, 6 }
  0x13   : > { %s1951_s24 = scalar_lea.vmem %s2310_s1, %s1590_s21  ;;  %s2167_s16 = scalar_lea.vmem (%p1934_p3), %s2311_s2, %s1784_s8 }
  0x14   : > { %v187_v1 = vld [vmem:[%s1951_s24] sm:$0xff]  ;;  %v188_v2 = vld [vmem:[%s1951_s24 + $0x8] sm:$0xff]  ;;  %v189_v3 = vld [vmem:[%s1951_s24 + $0x10] sm:$0xff] }
  0x15   : > { %v1596_v4 = vcombine.high %v187_v1, %v187_v1  ;;  %v1598_v5 = vcombine.high %v188_v2, %v188_v2  ;;  %v1595_v6 = vcombine.low %v187_v1, %v187_v1  ;;  %v1597_v7 = vcombine.low %v188_v2, %v188_v2  ;;  %v190_v8 = vld [vmem:[%s1951_s24 + $0x18] sm:$0xff]  ;;  %v191_v16 = vld [vmem:[%s1951_s24 + $0x20] sm:$0xff]  ;;  %v192_v17 = vld [vmem:[%s1951_s24 + $0x28] sm:$0xff] }
  0x16   : > { %v1600_v9 = vcombine.high %v189_v3, %v189_v3  ;;  %v1602_v10 = vcombine.high %v190_v8, %v190_v8  ;;  %v1599_v11 = vcombine.low %v189_v3, %v189_v3  ;;  %v1601_v12 = vcombine.low %v190_v8, %v190_v8  ;;  %v193_v27 = vld [vmem:[%s1951_s24 + $0x30] sm:$0xff]  ;;  %v194_v28 = vld [vmem:[%s1951_s24 + $0x38] sm:$0xff] }
  0x17   : > { %1611 = vmatprep.subr.msk.bf16.mxu0 %vm268_vm0, %v1596_v4  ;;  %1616 = vmatprep.subr.msk.bf16.mxu1 %vm268_vm0, %v1598_v5  ;;  %v270_v13 = vsel %vm268_vm0, %v1595_v6, 0  ;;  %v276_v14 = vsel %vm268_vm0, %v1597_v7, 0  ;;  %v1604_v20 = vcombine.high %v191_v16, %v191_v16  ;;  %v1606_v21 = vcombine.high %v192_v17, %v192_v17 }
  0x18   : > { %332 = vmatpush1.bf16.msra.mxu0 %v270_v13  ;;  %405 = vmatpush1.bf16.msra.mxu1 %v276_v14  ;;  %v282_v18 = vsel %vm268_vm0, %v1599_v11, 0  ;;  %v288_v19 = vsel %vm268_vm0, %v1601_v12, 0  ;;  %v1603_v25 = vcombine.low %v191_v16, %v191_v16  ;;  %v1605_v26 = vcombine.low %v192_v17, %v192_v17 }
  0x19   : > { %1621 = vmatprep.subr.msk.bf16.mxu0 %vm268_vm0, %v1600_v9  ;;  %1626 = vmatprep.subr.msk.bf16.mxu1 %vm268_vm0, %v1602_v10  ;;  %v1608_v31 = vcombine.high %v193_v27, %v193_v27  ;;  %v1610_v32 = vcombine.high %v194_v28, %v194_v28  ;;  %v1607_v33 = vcombine.low %v193_v27, %v193_v27 }
  0x1a   : > { %v294_v29 = vsel %vm268_vm0, %v1603_v25, 0  ;;  %v300_v30 = vsel %vm268_vm0, %v1605_v26, 0  ;;  %v1609_v34 = vcombine.low %v194_v28, %v194_v28 }
  0x1b   : > { %1612 = vmatmul.mubr.msk.bf16.vlgmr.msra.gmra.mxu0 %vm255_vm1, %v1964_v15  ;;  %1617 = vmatmul.mubr.msk.bf16.vlgmr.msra.gmra.mxu1 %vm255_vm1, %v1964_v15  ;;  %v306_v35 = vsel %vm268_vm0, %v1607_v33, 0 }
  0x1c   : > { %478 = vmatpush1.bf16.msra.mxu0 %v282_v18  ;;  %551 = vmatpush1.bf16.msra.mxu1 %v288_v19  ;;  %v312_v36 = vsel %vm268_vm0, %v1609_v34, 0 }
  0x1d   : > { %359 = vmatprep.mubr.bf16.mxu0 %v1886_v0  ;;  %432 = vmatprep.mubr.bf16.mxu1 %v1886_v0 }
  0x1e   : > { %1631 = vmatprep.subr.msk.bf16.mxu0 %vm268_vm0, %v1604_v20  ;;  %1636 = vmatprep.subr.msk.bf16.mxu1 %vm268_vm0, %v1606_v21 }
  0x23   : > { %1613 = vmatmul.mubr.msk.bf16.gmra.mxu0 %vm255_vm1, %v1983_v22  ;;  %1618 = vmatmul.mubr.msk.bf16.gmra.mxu1 %vm255_vm1, %v1983_v22 }
  0x24   : > { %369 = vmatprep.mubr.bf16.mxu0 %v1886_v0  ;;  %442 = vmatprep.mubr.bf16.mxu1 %v1886_v0 }
  0x2b   : > { %1614 = vmatmul.mubr.msk.bf16.gmra.mxu0 %vm255_vm1, %v1994_v23  ;;  %1619 = vmatmul.mubr.msk.bf16.gmra.mxu1 %vm255_vm1, %v1994_v23 }
  0x2c   : > { %379 = vmatprep.mubr.bf16.mxu0 %v1886_v0  ;;  %452 = vmatprep.mubr.bf16.mxu1 %v1886_v0 }
  0x33   : > { %1615 = vmatmul.mubr.msk.bf16.gmra.mxu0 %vm255_vm1, %v2005_v24  ;;  %1620 = vmatmul.mubr.msk.bf16.gmra.mxu1 %vm255_vm1, %v2005_v24 }
  0x34   : > { %495 = vmatprep.mubr.bf16.mxu0 %v1886_v0  ;;  %568 = vmatprep.mubr.bf16.mxu1 %v1886_v0 }
  0x3b   : > { %1622 = vmatmul.mubr.msk.bf16.vlgmr.msra.gmra.mxu0 %vm255_vm1, %v1964_v15  ;;  %1627 = vmatmul.mubr.msk.bf16.vlgmr.msra.gmra.mxu1 %vm255_vm1, %v1964_v15 }
  0x3c   : > { %624 = vmatpush1.bf16.msra.mxu0 %v294_v29  ;;  %697 = vmatpush1.bf16.msra.mxu1 %v300_v30 }
  0x3d   : > { %505 = vmatprep.mubr.bf16.mxu0 %v1886_v0  ;;  %578 = vmatprep.mubr.bf16.mxu1 %v1886_v0 }
  0x3e   : > { %1641 = vmatprep.subr.msk.bf16.mxu0 %vm268_vm0, %v1608_v31  ;;  %1646 = vmatprep.subr.msk.bf16.mxu1 %vm268_vm0, %v1610_v32 }
  0x43   : > { %1623 = vmatmul.mubr.msk.bf16.gmra.mxu0 %vm255_vm1, %v1983_v22  ;;  %1628 = vmatmul.mubr.msk.bf16.gmra.mxu1 %vm255_vm1, %v1983_v22 }
  0x44   : > { %515 = vmatprep.mubr.bf16.mxu0 %v1886_v0  ;;  %588 = vmatprep.mubr.bf16.mxu1 %v1886_v0 }
  0x4b   : > { %1624 = vmatmul.mubr.msk.bf16.gmra.mxu0 %vm255_vm1, %v1994_v23  ;;  %1629 = vmatmul.mubr.msk.bf16.gmra.mxu1 %vm255_vm1, %v1994_v23 }
  0x4c   : > { %525 = vmatprep.mubr.bf16.mxu0 %v1886_v0  ;;  %598 = vmatprep.mubr.bf16.mxu1 %v1886_v0 }
  0x53   : > { %1625 = vmatmul.mubr.msk.bf16.gmra.mxu0 %vm255_vm1, %v2005_v24  ;;  %1630 = vmatmul.mubr.msk.bf16.gmra.mxu1 %vm255_vm1, %v2005_v24 }
  0x54   : > { %641 = vmatprep.mubr.bf16.mxu0 %v1886_v0  ;;  %714 = vmatprep.mubr.bf16.mxu1 %v1886_v0 }
  0x5b   : > { %1632 = vmatmul.mubr.msk.bf16.vlgmr.msra.gmra.mxu0 %vm255_vm1, %v1964_v15  ;;  %1637 = vmatmul.mubr.msk.bf16.vlgmr.msra.gmra.mxu1 %vm255_vm1, %v1964_v15 }
  0x5c   : > { %770 = vmatpush1.bf16.msra.mxu0 %v306_v35  ;;  %843 = vmatpush1.bf16.msra.mxu1 %v312_v36 }
  0x5d   : > { %651 = vmatprep.mubr.bf16.mxu0 %v1886_v0  ;;  %724 = vmatprep.mubr.bf16.mxu1 %v1886_v0 }
  0x63   : > { %1633 = vmatmul.mubr.msk.bf16.gmra.mxu0 %vm255_vm1, %v1983_v22  ;;  %1638 = vmatmul.mubr.msk.bf16.gmra.mxu1 %vm255_vm1, %v1983_v22 }
  0x64   : > { %661 = vmatprep.mubr.bf16.mxu0 %v1886_v0  ;;  %734 = vmatprep.mubr.bf16.mxu1 %v1886_v0 }
  0x6b   : > { %1634 = vmatmul.mubr.msk.bf16.gmra.mxu0 %vm255_vm1, %v1994_v23  ;;  %1639 = vmatmul.mubr.msk.bf16.gmra.mxu1 %vm255_vm1, %v1994_v23 }
  0x6c   : > { %671 = vmatprep.mubr.bf16.mxu0 %v1886_v0  ;;  %744 = vmatprep.mubr.bf16.mxu1 %v1886_v0 }
  0x73   : > { %1635 = vmatmul.mubr.msk.bf16.gmra.mxu0 %vm255_vm1, %v2005_v24  ;;  %1640 = vmatmul.mubr.msk.bf16.gmra.mxu1 %vm255_vm1, %v2005_v24 }
  0x74   : > { %787 = vmatprep.mubr.bf16.mxu0 %v1886_v0  ;;  %860 = vmatprep.mubr.bf16.mxu1 %v1886_v0 }
  0x7b   : > { %1642 = vmatmul.mubr.msk.bf16.vlgmr.msra.gmra.mxu0 %vm255_vm1, %v1964_v15  ;;  %1647 = vmatmul.mubr.msk.bf16.vlgmr.msra.gmra.mxu1 %vm255_vm1, %v1964_v15 }
  0x7c   : > { %797 = vmatprep.mubr.bf16.mxu0 %v1886_v0  ;;  %870 = vmatprep.mubr.bf16.mxu1 %v1886_v0 }
  0x83   : > { %1643 = vmatmul.mubr.msk.bf16.gmra.mxu0 %vm255_vm1, %v1983_v22  ;;  %1648 = vmatmul.mubr.msk.bf16.gmra.mxu1 %vm255_vm1, %v1983_v22 }
  0x84   : > { %807 = vmatprep.mubr.bf16.mxu0 %v1886_v0  ;;  %880 = vmatprep.mubr.bf16.mxu1 %v1886_v0 }
  0x8b   : > { %1644 = vmatmul.mubr.msk.bf16.gmra.mxu0 %vm255_vm1, %v1994_v23  ;;  %1649 = vmatmul.mubr.msk.bf16.gmra.mxu1 %vm255_vm1, %v1994_v23 }
  0x8c   : > { %817 = vmatprep.mubr.bf16.mxu0 %v1886_v0  ;;  %890 = vmatprep.mubr.bf16.mxu1 %v1886_v0 }
  0x93   : > { %1645 = vmatmul.mubr.msk.bf16.gmra.mxu0 %vm255_vm1, %v2005_v24  ;;  %1650 = vmatmul.mubr.msk.bf16.gmra.mxu1 %vm255_vm1, %v2005_v24 }
  0xdb   : > { %v351_v37 = vpop.f32.mrf.mxu0  ;;  %v424_v38 = vpop.f32.mrf.mxu1 }
  0xdd   : > { %v353_v39 = vpop.f32.mrf.mxu0  ;;  %v426_v40 = vpop.f32.mrf.mxu1 }
  0xde   : > { %v1720_v41 = vpack.c.bf16 %v353_v39, %v351_v37  ;;  %v1721_v42 = vpack.c.bf16 %v426_v40, %v424_v38 }
  0xdf   : > { %v355_v43 = vpop.f32.mrf.mxu0  ;;  %v428_v44 = vpop.f32.mrf.mxu1 }
  0xe0   : > { %1285 = vst [vmem:[%s2092_s7] sm:$0xff] %v1720_v41  ;;  %1286 = vst [vmem:[%s2092_s7 + $0x8] sm:$0xff] %v1721_v42 }
  0xe1   : > { %v357_v45 = vpop.f32.mrf.mxu0  ;;  %v430_v46 = vpop.f32.mrf.mxu1 }
  0xe2   : > { %v1728_v47 = vpack.c.bf16 %v357_v45, %v355_v43  ;;  %v1729_v48 = vpack.c.bf16 %v430_v46, %v428_v44 }
  0xe3   : > { %v361_v49 = vpop.f32.mrf.mxu0  ;;  %v434_v50 = vpop.f32.mrf.mxu1 }
  0xe4   : > { %1293 = vst [vmem:[%s2092_s7 + $0x40] sm:$0xff] %v1728_v47  ;;  %1294 = vst [vmem:[%s2092_s7 + $0x48] sm:$0xff] %v1729_v48 }
  0xe5   : > { %v363_v51 = vpop.f32.mrf.mxu0  ;;  %v436_v52 = vpop.f32.mrf.mxu1 }
  0xe6   : > { %v1736_v53 = vpack.c.bf16 %v363_v51, %v361_v49  ;;  %v1737_v54 = vpack.c.bf16 %v436_v52, %v434_v50 }
  0xe7   : > { %v365_v55 = vpop.f32.mrf.mxu0  ;;  %v438_v56 = vpop.f32.mrf.mxu1 }
  0xe8   : > { %1301 = vst [vmem:[%s2092_s7 + $0x80] sm:$0xff] %v1736_v53  ;;  %1302 = vst [vmem:[%s2092_s7 + $0x88] sm:$0xff] %v1737_v54 }
  0xe9   : > { %v367_v57 = vpop.f32.mrf.mxu0  ;;  %v440_v58 = vpop.f32.mrf.mxu1 }
  0xea   : > { %v1744_v59 = vpack.c.bf16 %v367_v57, %v365_v55  ;;  %v1745_v60 = vpack.c.bf16 %v440_v58, %v438_v56 }
  0xeb   : > { %v371_v61 = vpop.f32.mrf.mxu0  ;;  %v444_v62 = vpop.f32.mrf.mxu1 }
  0xec   : > { %1309 = vst [vmem:[%s2092_s7 + $0xc0] sm:$0xff] %v1744_v59  ;;  %1310 = vst [vmem:[%s2092_s7 + $0xc8] sm:$0xff] %v1745_v60 }
  0xed   : > { %v373_v63 = vpop.f32.mrf.mxu0  ;;  %v446_v0 = vpop.f32.mrf.mxu1 }
  0xee   : > { %v1752_v1 = vpack.c.bf16 %v373_v63, %v371_v61  ;;  %v1753_v2 = vpack.c.bf16 %v446_v0, %v444_v62 }
  0xef   : > { %v375_v3 = vpop.f32.mrf.mxu0  ;;  %v448_v4 = vpop.f32.mrf.mxu1 }
  0xf0   : > { %1317 = vst [vmem:[%s2092_s7 + $0x100] sm:$0xff] %v1752_v1  ;;  %1318 = vst [vmem:[%s2092_s7 + $0x108] sm:$0xff] %v1753_v2 }
  0xf1   : > { %v377_v5 = vpop.f32.mrf.mxu0  ;;  %v450_v6 = vpop.f32.mrf.mxu1 }
  0xf2   : > { %v1760_v7 = vpack.c.bf16 %v377_v5, %v375_v3  ;;  %v1761_v8 = vpack.c.bf16 %v450_v6, %v448_v4 }
  0xf3   : > { %v381_v9 = vpop.f32.mrf.mxu0  ;;  %v454_v10 = vpop.f32.mrf.mxu1 }
  0xf4   : > { %1325 = vst [vmem:[%s2092_s7 + $0x140] sm:$0xff] %v1760_v7  ;;  %1326 = vst [vmem:[%s2092_s7 + $0x148] sm:$0xff] %v1761_v8 }
  0xf5   : > { %v383_v11 = vpop.f32.mrf.mxu0  ;;  %v456_v12 = vpop.f32.mrf.mxu1 }
  0xf6   : > { %v1768_v13 = vpack.c.bf16 %v383_v11, %v381_v9  ;;  %v1769_v14 = vpack.c.bf16 %v456_v12, %v454_v10 }
  0xf7   : > { %v385_v15 = vpop.f32.mrf.mxu0  ;;  %v458_v16 = vpop.f32.mrf.mxu1 }
  0xf8   : > { %1333 = vst [vmem:[%s2092_s7 + $0x180] sm:$0xff] %v1768_v13  ;;  %1334 = vst [vmem:[%s2092_s7 + $0x188] sm:$0xff] %v1769_v14 }
  0xf9   : > { %v387_v17 = vpop.f32.mrf.mxu0  ;;  %v460_v18 = vpop.f32.mrf.mxu1 }
  0xfa   : > { %v1776_v19 = vpack.c.bf16 %v387_v17, %v385_v15  ;;  %v1777_v20 = vpack.c.bf16 %v460_v18, %v458_v16 }
  0xfb   : > { %v497_v21 = vpop.f32.mrf.mxu0  ;;  %v570_v22 = vpop.f32.mrf.mxu1 }
  0xfc   : > { %1341 = vst [vmem:[%s2092_s7 + $0x1c0] sm:$0xff] %v1776_v19  ;;  %1342 = vst [vmem:[%s2092_s7 + $0x1c8] sm:$0xff] %v1777_v20 }
  0xfd   : > { %v499_v23 = vpop.f32.mrf.mxu0  ;;  %v572_v24 = vpop.f32.mrf.mxu1 }
  0xfe   : > { %v1722_v25 = vpack.c.bf16 %v499_v23, %v497_v21  ;;  %v1723_v26 = vpack.c.bf16 %v572_v24, %v570_v22 }
  0xff   : > { %v501_v27 = vpop.f32.mrf.mxu0  ;;  %v574_v28 = vpop.f32.mrf.mxu1 }
 0x100   : > { %1287 = vst [vmem:[%s2092_s7 + $0x10] sm:$0xff] %v1722_v25  ;;  %1288 = vst [vmem:[%s2092_s7 + $0x18] sm:$0xff] %v1723_v26 }
 0x101   : > { %v503_v29 = vpop.f32.mrf.mxu0  ;;  %v576_v30 = vpop.f32.mrf.mxu1 }
 0x102   : > { %v1730_v31 = vpack.c.bf16 %v503_v29, %v501_v27  ;;  %v1731_v32 = vpack.c.bf16 %v576_v30, %v574_v28 }
 0x103   : > { %v507_v33 = vpop.f32.mrf.mxu0  ;;  %v580_v34 = vpop.f32.mrf.mxu1 }
 0x104   : > { %1295 = vst [vmem:[%s2092_s7 + $0x50] sm:$0xff] %v1730_v31  ;;  %1296 = vst [vmem:[%s2092_s7 + $0x58] sm:$0xff] %v1731_v32 }
 0x105   : > { %v509_v35 = vpop.f32.mrf.mxu0  ;;  %v582_v36 = vpop.f32.mrf.mxu1 }
 0x106   : > { %v1738_v37 = vpack.c.bf16 %v509_v35, %v507_v33  ;;  %v1739_v38 = vpack.c.bf16 %v582_v36, %v580_v34 }
 0x107   : > { %v511_v39 = vpop.f32.mrf.mxu0  ;;  %v584_v40 = vpop.f32.mrf.mxu1 }
 0x108   : > { %1303 = vst [vmem:[%s2092_s7 + $0x90] sm:$0xff] %v1738_v37  ;;  %1304 = vst [vmem:[%s2092_s7 + $0x98] sm:$0xff] %v1739_v38 }
 0x109   : > { %v513_v41 = vpop.f32.mrf.mxu0  ;;  %v586_v42 = vpop.f32.mrf.mxu1 }
 0x10a   : > { %v1746_v43 = vpack.c.bf16 %v513_v41, %v511_v39  ;;  %v1747_v44 = vpack.c.bf16 %v586_v42, %v584_v40 }
 0x10b   : > { %v517_v45 = vpop.f32.mrf.mxu0  ;;  %v590_v46 = vpop.f32.mrf.mxu1 }
 0x10c   : > { %1311 = vst [vmem:[%s2092_s7 + $0xd0] sm:$0xff] %v1746_v43  ;;  %1312 = vst [vmem:[%s2092_s7 + $0xd8] sm:$0xff] %v1747_v44 }
 0x10d   : > { %v519_v47 = vpop.f32.mrf.mxu0  ;;  %v592_v48 = vpop.f32.mrf.mxu1 }
 0x10e   : > { %v1754_v49 = vpack.c.bf16 %v519_v47, %v517_v45  ;;  %v1755_v50 = vpack.c.bf16 %v592_v48, %v590_v46 }
 0x10f   : > { %v521_v51 = vpop.f32.mrf.mxu0  ;;  %v594_v52 = vpop.f32.mrf.mxu1 }
 0x110   : > { %1319 = vst [vmem:[%s2092_s7 + $0x110] sm:$0xff] %v1754_v49  ;;  %1320 = vst [vmem:[%s2092_s7 + $0x118] sm:$0xff] %v1755_v50 }
 0x111   : > { %v523_v53 = vpop.f32.mrf.mxu0  ;;  %v596_v54 = vpop.f32.mrf.mxu1 }
 0x112   : > { %v1762_v55 = vpack.c.bf16 %v523_v53, %v521_v51  ;;  %v1763_v56 = vpack.c.bf16 %v596_v54, %v594_v52 }
 0x113   : > { %v527_v57 = vpop.f32.mrf.mxu0  ;;  %v600_v58 = vpop.f32.mrf.mxu1 }
 0x114   : > { %1327 = vst [vmem:[%s2092_s7 + $0x150] sm:$0xff] %v1762_v55  ;;  %1328 = vst [vmem:[%s2092_s7 + $0x158] sm:$0xff] %v1763_v56 }
 0x115   : > { %v529_v59 = vpop.f32.mrf.mxu0  ;;  %v602_v60 = vpop.f32.mrf.mxu1 }
 0x116   : > { %v1770_v61 = vpack.c.bf16 %v529_v59, %v527_v57  ;;  %v1771_v62 = vpack.c.bf16 %v602_v60, %v600_v58 }
 0x117   : > { %v531_v63 = vpop.f32.mrf.mxu0  ;;  %v604_v0 = vpop.f32.mrf.mxu1 }
 0x118   : > { %1335 = vst [vmem:[%s2092_s7 + $0x190] sm:$0xff] %v1770_v61  ;;  %1336 = vst [vmem:[%s2092_s7 + $0x198] sm:$0xff] %v1771_v62 }
 0x119   : > { %v533_v1 = vpop.f32.mrf.mxu0  ;;  %v606_v2 = vpop.f32.mrf.mxu1 }
 0x11a   : > { %v1778_v3 = vpack.c.bf16 %v533_v1, %v531_v63  ;;  %v1779_v4 = vpack.c.bf16 %v606_v2, %v604_v0 }
 0x11b   : > { %v643_v5 = vpop.f32.mrf.mxu0  ;;  %v716_v6 = vpop.f32.mrf.mxu1 }
 0x11c   : > { %1343 = vst [vmem:[%s2092_s7 + $0x1d0] sm:$0xff] %v1778_v3  ;;  %1344 = vst [vmem:[%s2092_s7 + $0x1d8] sm:$0xff] %v1779_v4 }
 0x11d   : > { %v645_v7 = vpop.f32.mrf.mxu0  ;;  %v718_v8 = vpop.f32.mrf.mxu1 }
 0x11e   : > { %v1724_v9 = vpack.c.bf16 %v645_v7, %v643_v5  ;;  %v1725_v10 = vpack.c.bf16 %v718_v8, %v716_v6 }
 0x11f   : > { %v647_v11 = vpop.f32.mrf.mxu0  ;;  %v720_v12 = vpop.f32.mrf.mxu1 }
 0x120   : > { %1289 = vst [vmem:[%s2092_s7 + $0x20] sm:$0xff] %v1724_v9  ;;  %1290 = vst [vmem:[%s2092_s7 + $0x28] sm:$0xff] %v1725_v10 }
 0x121   : > { %v649_v13 = vpop.f32.mrf.mxu0  ;;  %v722_v14 = vpop.f32.mrf.mxu1 }
 0x122   : > { %v1732_v15 = vpack.c.bf16 %v649_v13, %v647_v11  ;;  %v1733_v16 = vpack.c.bf16 %v722_v14, %v720_v12 }
 0x123   : > { %v653_v17 = vpop.f32.mrf.mxu0  ;;  %v726_v18 = vpop.f32.mrf.mxu1 }
 0x124   : > { %1297 = vst [vmem:[%s2092_s7 + $0x60] sm:$0xff] %v1732_v15  ;;  %1298 = vst [vmem:[%s2092_s7 + $0x68] sm:$0xff] %v1733_v16 }
 0x125   : > { %v655_v19 = vpop.f32.mrf.mxu0  ;;  %v728_v20 = vpop.f32.mrf.mxu1 }
 0x126   : > { %v1740_v21 = vpack.c.bf16 %v655_v19, %v653_v17  ;;  %v1741_v22 = vpack.c.bf16 %v728_v20, %v726_v18 }
 0x127   : > { %v657_v23 = vpop.f32.mrf.mxu0  ;;  %v730_v24 = vpop.f32.mrf.mxu1 }
 0x128   : > { %1305 = vst [vmem:[%s2092_s7 + $0xa0] sm:$0xff] %v1740_v21  ;;  %1306 = vst [vmem:[%s2092_s7 + $0xa8] sm:$0xff] %v1741_v22 }
 0x129   : > { %v659_v25 = vpop.f32.mrf.mxu0  ;;  %v732_v26 = vpop.f32.mrf.mxu1 }
 0x12a   : > { %v1748_v27 = vpack.c.bf16 %v659_v25, %v657_v23  ;;  %v1749_v28 = vpack.c.bf16 %v732_v26, %v730_v24 }
 0x12b   : > { %v663_v29 = vpop.f32.mrf.mxu0  ;;  %v736_v30 = vpop.f32.mrf.mxu1 }
 0x12c   : > { %1313 = vst [vmem:[%s2092_s7 + $0xe0] sm:$0xff] %v1748_v27  ;;  %1314 = vst [vmem:[%s2092_s7 + $0xe8] sm:$0xff] %v1749_v28 }
 0x12d   : > { %v665_v31 = vpop.f32.mrf.mxu0  ;;  %v738_v32 = vpop.f32.mrf.mxu1 }
 0x12e   : > { %v1756_v33 = vpack.c.bf16 %v665_v31, %v663_v29  ;;  %v1757_v34 = vpack.c.bf16 %v738_v32, %v736_v30 }
 0x12f   : > { %v667_v35 = vpop.f32.mrf.mxu0  ;;  %v740_v36 = vpop.f32.mrf.mxu1 }
 0x130   : > { %1321 = vst [vmem:[%s2092_s7 + $0x120] sm:$0xff] %v1756_v33  ;;  %1322 = vst [vmem:[%s2092_s7 + $0x128] sm:$0xff] %v1757_v34 }
 0x131   : > { %v669_v37 = vpop.f32.mrf.mxu0  ;;  %v742_v38 = vpop.f32.mrf.mxu1 }
 0x132   : > { %v1764_v39 = vpack.c.bf16 %v669_v37, %v667_v35  ;;  %v1765_v40 = vpack.c.bf16 %v742_v38, %v740_v36  ;;  %v1374_v37 = vld [vmem:[%s2092_s7] sm:$0xff] (%p1934_p3)  ;;  %v1376_v38 = vld [vmem:[%s2092_s7 + $0x8] sm:$0xff] (%p1934_p3) }
 0x133   : > { %v673_v41 = vpop.f32.mrf.mxu0  ;;  %v746_v42 = vpop.f32.mrf.mxu1  ;;  %1375 = vst [vmem:[%s2167_s16] sm:$0xff] (%p1934_p3), %v1374_v37  ;;  %1377 = vst [vmem:[%s2167_s16 + $0x8] sm:$0xff] (%p1934_p3), %v1376_v38 }
 0x134   : > { %1329 = vst [vmem:[%s2092_s7 + $0x160] sm:$0xff] %v1764_v39  ;;  %1330 = vst [vmem:[%s2092_s7 + $0x168] sm:$0xff] %v1765_v40  ;;  %v1378_v39 = vld [vmem:[%s2092_s7 + $0x10] sm:$0xff] (%p1934_p3)  ;;  %v1380_v40 = vld [vmem:[%s2092_s7 + $0x18] sm:$0xff] (%p1934_p3) }
 0x135   : > { %v675_v43 = vpop.f32.mrf.mxu0  ;;  %v748_v44 = vpop.f32.mrf.mxu1  ;;  %1379 = vst [vmem:[%s2167_s16 + $0x10] sm:$0xff] (%p1934_p3), %v1378_v39  ;;  %1381 = vst [vmem:[%s2167_s16 + $0x18] sm:$0xff] (%p1934_p3), %v1380_v40 }
 0x136   : > { %v1772_v45 = vpack.c.bf16 %v675_v43, %v673_v41  ;;  %v1773_v46 = vpack.c.bf16 %v748_v44, %v746_v42  ;;  %v1382_v41 = vld [vmem:[%s2092_s7 + $0x20] sm:$0xff] (%p1934_p3)  ;;  %v1384_v42 = vld [vmem:[%s2092_s7 + $0x28] sm:$0xff] (%p1934_p3) }
 0x137   : > { %v677_v47 = vpop.f32.mrf.mxu0  ;;  %v750_v48 = vpop.f32.mrf.mxu1  ;;  %1383 = vst [vmem:[%s2167_s16 + $0x20] sm:$0xff] (%p1934_p3), %v1382_v41  ;;  %1385 = vst [vmem:[%s2167_s16 + $0x28] sm:$0xff] (%p1934_p3), %v1384_v42 }
 0x138   : > { %1337 = vst [vmem:[%s2092_s7 + $0x1a0] sm:$0xff] %v1772_v45  ;;  %1338 = vst [vmem:[%s2092_s7 + $0x1a8] sm:$0xff] %v1773_v46  ;;  %v1390_v45 = vld [vmem:[%s2092_s7 + $0x40] sm:$0xff] (%p1934_p3)  ;;  %v1392_v46 = vld [vmem:[%s2092_s7 + $0x48] sm:$0xff] (%p1934_p3) }
 0x139   : > { %v679_v49 = vpop.f32.mrf.mxu0  ;;  %v752_v50 = vpop.f32.mrf.mxu1  ;;  %1391 = vst [vmem:[%s2167_s16 + $0x100] sm:$0xff] (%p1934_p3), %v1390_v45  ;;  %1393 = vst [vmem:[%s2167_s16 + $0x108] sm:$0xff] (%p1934_p3), %v1392_v46 }
 0x13a   : > { %v1780_v51 = vpack.c.bf16 %v679_v49, %v677_v47  ;;  %v1781_v52 = vpack.c.bf16 %v752_v50, %v750_v48  ;;  %v1394_v47 = vld [vmem:[%s2092_s7 + $0x50] sm:$0xff] (%p1934_p3)  ;;  %v1396_v48 = vld [vmem:[%s2092_s7 + $0x58] sm:$0xff] (%p1934_p3)  ;;  %v1398_v49 = vld [vmem:[%s2092_s7 + $0x60] sm:$0xff] (%p1934_p3) }
 0x13b   : > { %v789_v53 = vpop.f32.mrf.mxu0  ;;  %v862_v54 = vpop.f32.mrf.mxu1  ;;  %1395 = vst [vmem:[%s2167_s16 + $0x110] sm:$0xff] (%p1934_p3), %v1394_v47  ;;  %1397 = vst [vmem:[%s2167_s16 + $0x118] sm:$0xff] (%p1934_p3), %v1396_v48  ;;  %v1400_v50 = vld [vmem:[%s2092_s7 + $0x68] sm:$0xff] (%p1934_p3) }
 0x13c   : > { %1345 = vst [vmem:[%s2092_s7 + $0x1e0] sm:$0xff] %v1780_v51  ;;  %1346 = vst [vmem:[%s2092_s7 + $0x1e8] sm:$0xff] %v1781_v52 }
 0x13d   : > { %v791_v55 = vpop.f32.mrf.mxu0  ;;  %v864_v56 = vpop.f32.mrf.mxu1  ;;  %1399 = vst [vmem:[%s2167_s16 + $0x120] sm:$0xff] (%p1934_p3), %v1398_v49  ;;  %1401 = vst [vmem:[%s2167_s16 + $0x128] sm:$0xff] (%p1934_p3), %v1400_v50 }
 0x13e   : > { %v1726_v57 = vpack.c.bf16 %v791_v55, %v789_v53  ;;  %v1727_v58 = vpack.c.bf16 %v864_v56, %v862_v54  ;;  %v1406_v53 = vld [vmem:[%s2092_s7 + $0x80] sm:$0xff] (%p1934_p3)  ;;  %v1408_v54 = vld [vmem:[%s2092_s7 + $0x88] sm:$0xff] (%p1934_p3)  ;;  %v1410_v55 = vld [vmem:[%s2092_s7 + $0x90] sm:$0xff] (%p1934_p3) }
 0x13f   : > { %v793_v59 = vpop.f32.mrf.mxu0  ;;  %v866_v60 = vpop.f32.mrf.mxu1  ;;  %1407 = vst [vmem:[%s2167_s16 + $0x200] sm:$0xff] (%p1934_p3), %v1406_v53  ;;  %1409 = vst [vmem:[%s2167_s16 + $0x208] sm:$0xff] (%p1934_p3), %v1408_v54  ;;  %v1412_v56 = vld [vmem:[%s2092_s7 + $0x98] sm:$0xff] (%p1934_p3) }
 0x140   : > { %1291 = vst [vmem:[%s2092_s7 + $0x30] sm:$0xff] %v1726_v57  ;;  %1292 = vst [vmem:[%s2092_s7 + $0x38] sm:$0xff] %v1727_v58  ;;  %v1414_v57 = vld [vmem:[%s2092_s7 + $0xa0] sm:$0xff] (%p1934_p3)  ;;  %v1416_v58 = vld [vmem:[%s2092_s7 + $0xa8] sm:$0xff] (%p1934_p3) }
 0x141   : > { %v795_v61 = vpop.f32.mrf.mxu0  ;;  %v868_v62 = vpop.f32.mrf.mxu1  ;;  %1411 = vst [vmem:[%s2167_s16 + $0x210] sm:$0xff] (%p1934_p3), %v1410_v55  ;;  %1413 = vst [vmem:[%s2167_s16 + $0x218] sm:$0xff] (%p1934_p3), %v1412_v56 }
 0x142   : > { %v1734_v63 = vpack.c.bf16 %v795_v61, %v793_v59  ;;  %v1735_v0 = vpack.c.bf16 %v868_v62, %v866_v60  ;;  %1415 = vst [vmem:[%s2167_s16 + $0x220] sm:$0xff] (%p1934_p3), %v1414_v57  ;;  %1417 = vst [vmem:[%s2167_s16 + $0x228] sm:$0xff] (%p1934_p3), %v1416_v58  ;;  %v1422_v61 = vld [vmem:[%s2092_s7 + $0xc0] sm:$0xff] (%p1934_p3)  ;;  %v1424_v62 = vld [vmem:[%s2092_s7 + $0xc8] sm:$0xff] (%p1934_p3) }
 0x143   : > { %v799_v1 = vpop.f32.mrf.mxu0  ;;  %v872_v2 = vpop.f32.mrf.mxu1  ;;  %1423 = vst [vmem:[%s2167_s16 + $0x300] sm:$0xff] (%p1934_p3), %v1422_v61  ;;  %1425 = vst [vmem:[%s2167_s16 + $0x308] sm:$0xff] (%p1934_p3), %v1424_v62 }
 0x144   : > { %1299 = vst [vmem:[%s2092_s7 + $0x70] sm:$0xff] %v1734_v63  ;;  %1300 = vst [vmem:[%s2092_s7 + $0x78] sm:$0xff] %v1735_v0  ;;  %v1426_v63 = vld [vmem:[%s2092_s7 + $0xd0] sm:$0xff] (%p1934_p3)  ;;  %v1428_v0 = vld [vmem:[%s2092_s7 + $0xd8] sm:$0xff] (%p1934_p3) }
 0x145   : > { %v801_v3 = vpop.f32.mrf.mxu0  ;;  %v874_v4 = vpop.f32.mrf.mxu1  ;;  %1427 = vst [vmem:[%s2167_s16 + $0x310] sm:$0xff] (%p1934_p3), %v1426_v63  ;;  %1429 = vst [vmem:[%s2167_s16 + $0x318] sm:$0xff] (%p1934_p3), %v1428_v0 }
 0x146   : > { %v1742_v5 = vpack.c.bf16 %v801_v3, %v799_v1  ;;  %v1743_v6 = vpack.c.bf16 %v874_v4, %v872_v2  ;;  %v1430_v1 = vld [vmem:[%s2092_s7 + $0xe0] sm:$0xff] (%p1934_p3)  ;;  %v1432_v2 = vld [vmem:[%s2092_s7 + $0xe8] sm:$0xff] (%p1934_p3) }
 0x147   : > { %v803_v7 = vpop.f32.mrf.mxu0  ;;  %v876_v8 = vpop.f32.mrf.mxu1  ;;  %v1386_v43 = vld [vmem:[%s2092_s7 + $0x30] sm:$0xff] (%p1934_p3)  ;;  %v1388_v44 = vld [vmem:[%s2092_s7 + $0x38] sm:$0xff] (%p1934_p3)  ;;  %1431 = vst [vmem:[%s2167_s16 + $0x320] sm:$0xff] (%p1934_p3), %v1430_v1  ;;  %1433 = vst [vmem:[%s2167_s16 + $0x328] sm:$0xff] (%p1934_p3), %v1432_v2 }
 0x148   : > { %1307 = vst [vmem:[%s2092_s7 + $0xb0] sm:$0xff] %v1742_v5  ;;  %1308 = vst [vmem:[%s2092_s7 + $0xb8] sm:$0xff] %v1743_v6  ;;  %v1438_v5 = vld [vmem:[%s2092_s7 + $0x100] sm:$0xff] (%p1934_p3)  ;;  %v1440_v6 = vld [vmem:[%s2092_s7 + $0x108] sm:$0xff] (%p1934_p3) }
 0x149   : > { %v805_v9 = vpop.f32.mrf.mxu0  ;;  %v878_v10 = vpop.f32.mrf.mxu1  ;;  %1387 = vst [vmem:[%s2167_s16 + $0x30] sm:$0xff] (%p1934_p3), %v1386_v43  ;;  %1389 = vst [vmem:[%s2167_s16 + $0x38] sm:$0xff] (%p1934_p3), %v1388_v44 }
 0x14a   : > { %v1750_v11 = vpack.c.bf16 %v805_v9, %v803_v7  ;;  %v1751_v12 = vpack.c.bf16 %v878_v10, %v876_v8  ;;  %1439 = vst [vmem:[%s2167_s16 + $0x400] sm:$0xff] (%p1934_p3), %v1438_v5  ;;  %v1442_v7 = vld [vmem:[%s2092_s7 + $0x110] sm:$0xff] (%p1934_p3)  ;;  %v1444_v8 = vld [vmem:[%s2092_s7 + $0x118] sm:$0xff] (%p1934_p3)  ;;  %1441 = vst [vmem:[%s2167_s16 + $0x408] sm:$0xff] (%p1934_p3), %v1440_v6 }
 0x14b   : > { %v809_v13 = vpop.f32.mrf.mxu0  ;;  %v882_v14 = vpop.f32.mrf.mxu1  ;;  %v1402_v51 = vld [vmem:[%s2092_s7 + $0x70] sm:$0xff] (%p1934_p3)  ;;  %v1404_v52 = vld [vmem:[%s2092_s7 + $0x78] sm:$0xff] (%p1934_p3)  ;;  %1443 = vst [vmem:[%s2167_s16 + $0x410] sm:$0xff] (%p1934_p3), %v1442_v7  ;;  %1445 = vst [vmem:[%s2167_s16 + $0x418] sm:$0xff] (%p1934_p3), %v1444_v8 }
 0x14c   : > { %1315 = vst [vmem:[%s2092_s7 + $0xf0] sm:$0xff] %v1750_v11  ;;  %1316 = vst [vmem:[%s2092_s7 + $0xf8] sm:$0xff] %v1751_v12  ;;  %v1446_v9 = vld [vmem:[%s2092_s7 + $0x120] sm:$0xff] (%p1934_p3)  ;;  %v1448_v10 = vld [vmem:[%s2092_s7 + $0x128] sm:$0xff] (%p1934_p3) }
 0x14d   : > { %v811_v15 = vpop.f32.mrf.mxu0  ;;  %v884_v16 = vpop.f32.mrf.mxu1  ;;  %1403 = vst [vmem:[%s2167_s16 + $0x130] sm:$0xff] (%p1934_p3), %v1402_v51  ;;  %1405 = vst [vmem:[%s2167_s16 + $0x138] sm:$0xff] (%p1934_p3), %v1404_v52 }
 0x14e   : > { %v1758_v17 = vpack.c.bf16 %v811_v15, %v809_v13  ;;  %v1759_v18 = vpack.c.bf16 %v884_v16, %v882_v14  ;;  %1447 = vst [vmem:[%s2167_s16 + $0x420] sm:$0xff] (%p1934_p3), %v1446_v9  ;;  %1449 = vst [vmem:[%s2167_s16 + $0x428] sm:$0xff] (%p1934_p3), %v1448_v10  ;;  %v1454_v13 = vld [vmem:[%s2092_s7 + $0x140] sm:$0xff] (%p1934_p3)  ;;  %v1456_v14 = vld [vmem:[%s2092_s7 + $0x148] sm:$0xff] (%p1934_p3) }
 0x14f   : > { %v813_v19 = vpop.f32.mrf.mxu0  ;;  %v886_v20 = vpop.f32.mrf.mxu1  ;;  %v1418_v59 = vld [vmem:[%s2092_s7 + $0xb0] sm:$0xff] (%p1934_p3)  ;;  %v1420_v60 = vld [vmem:[%s2092_s7 + $0xb8] sm:$0xff] (%p1934_p3)  ;;  %1455 = vst [vmem:[%s2167_s16 + $0x500] sm:$0xff] (%p1934_p3), %v1454_v13  ;;  %1457 = vst [vmem:[%s2167_s16 + $0x508] sm:$0xff] (%p1934_p3), %v1456_v14 }
 0x150   : > { %1323 = vst [vmem:[%s2092_s7 + $0x130] sm:$0xff] %v1758_v17  ;;  %1324 = vst [vmem:[%s2092_s7 + $0x138] sm:$0xff] %v1759_v18  ;;  %v1458_v15 = vld [vmem:[%s2092_s7 + $0x150] sm:$0xff] (%p1934_p3)  ;;  %v1460_v16 = vld [vmem:[%s2092_s7 + $0x158] sm:$0xff] (%p1934_p3) }
 0x151   : > { %v815_v21 = vpop.f32.mrf.mxu0  ;;  %v888_v22 = vpop.f32.mrf.mxu1  ;;  %1419 = vst [vmem:[%s2167_s16 + $0x230] sm:$0xff] (%p1934_p3), %v1418_v59  ;;  %1421 = vst [vmem:[%s2167_s16 + $0x238] sm:$0xff] (%p1934_p3), %v1420_v60  ;;  %v1462_v17 = vld [vmem:[%s2092_s7 + $0x160] sm:$0xff] (%p1934_p3)  ;;  %v1464_v18 = vld [vmem:[%s2092_s7 + $0x168] sm:$0xff] (%p1934_p3) }
 0x152   : > { %v1766_v23 = vpack.c.bf16 %v815_v21, %v813_v19  ;;  %v1767_v24 = vpack.c.bf16 %v888_v22, %v886_v20  ;;  %1459 = vst [vmem:[%s2167_s16 + $0x510] sm:$0xff] (%p1934_p3), %v1458_v15  ;;  %1461 = vst [vmem:[%s2167_s16 + $0x518] sm:$0xff] (%p1934_p3), %v1460_v16  ;;  %v1470_v21 = vld [vmem:[%s2092_s7 + $0x180] sm:$0xff] (%p1934_p3)  ;;  %v1472_v22 = vld [vmem:[%s2092_s7 + $0x188] sm:$0xff] (%p1934_p3) }
 0x153   : > { %v819_v25 = vpop.f32.mrf.mxu0  ;;  %v892_v26 = vpop.f32.mrf.mxu1  ;;  %v1434_v3 = vld [vmem:[%s2092_s7 + $0xf0] sm:$0xff] (%p1934_p3)  ;;  %v1436_v4 = vld [vmem:[%s2092_s7 + $0xf8] sm:$0xff] (%p1934_p3)  ;;  %1463 = vst [vmem:[%s2167_s16 + $0x520] sm:$0xff] (%p1934_p3), %v1462_v17  ;;  %1465 = vst [vmem:[%s2167_s16 + $0x528] sm:$0xff] (%p1934_p3), %v1464_v18 }
 0x154   : > { %1331 = vst [vmem:[%s2092_s7 + $0x170] sm:$0xff] %v1766_v23  ;;  %1332 = vst [vmem:[%s2092_s7 + $0x178] sm:$0xff] %v1767_v24  ;;  %v1474_v23 = vld [vmem:[%s2092_s7 + $0x190] sm:$0xff] (%p1934_p3)  ;;  %v1476_v24 = vld [vmem:[%s2092_s7 + $0x198] sm:$0xff] (%p1934_p3) }
 0x155   : > { %v821_v27 = vpop.f32.mrf.mxu0  ;;  %v894_v28 = vpop.f32.mrf.mxu1  ;;  %1435 = vst [vmem:[%s2167_s16 + $0x330] sm:$0xff] (%p1934_p3), %v1434_v3  ;;  %1437 = vst [vmem:[%s2167_s16 + $0x338] sm:$0xff] (%p1934_p3), %v1436_v4 }
 0x156   : > { %v1774_v29 = vpack.c.bf16 %v821_v27, %v819_v25  ;;  %v1775_v30 = vpack.c.bf16 %v894_v28, %v892_v26  ;;  %1471 = vst [vmem:[%s2167_s16 + $0x600] sm:$0xff] (%p1934_p3), %v1470_v21  ;;  %1473 = vst [vmem:[%s2167_s16 + $0x608] sm:$0xff] (%p1934_p3), %v1472_v22  ;;  %v1478_v25 = vld [vmem:[%s2092_s7 + $0x1a0] sm:$0xff] (%p1934_p3)  ;;  %v1480_v26 = vld [vmem:[%s2092_s7 + $0x1a8] sm:$0xff] (%p1934_p3) }
 0x157   : > { %v823_v31 = vpop.f32.mrf.mxu0  ;;  %v896_v32 = vpop.f32.mrf.mxu1  ;;  %v1450_v11 = vld [vmem:[%s2092_s7 + $0x130] sm:$0xff] (%p1934_p3)  ;;  %v1452_v12 = vld [vmem:[%s2092_s7 + $0x138] sm:$0xff] (%p1934_p3)  ;;  %1475 = vst [vmem:[%s2167_s16 + $0x610] sm:$0xff] (%p1934_p3), %v1474_v23  ;;  %1477 = vst [vmem:[%s2167_s16 + $0x618] sm:$0xff] (%p1934_p3), %v1476_v24 }
 0x158   : > { %1339 = vst [vmem:[%s2092_s7 + $0x1b0] sm:$0xff] %v1774_v29  ;;  %1340 = vst [vmem:[%s2092_s7 + $0x1b8] sm:$0xff] %v1775_v30  ;;  %1355 = sbr.rel (!%p1934_p3) target bundleno = 357 (0x165), region = 32  ;;  %v1486_v29 = vld [vmem:[%s2092_s7 + $0x1c0] sm:$0xff] (%p1934_p3)  ;;  %v1488_v30 = vld [vmem:[%s2092_s7 + $0x1c8] sm:$0xff] (%p1934_p3) }
 0x159   : > { %v825_v33 = vpop.f32.mrf.mxu0  ;;  %v898_v34 = vpop.f32.mrf.mxu1  ;;  %1451 = vst [vmem:[%s2167_s16 + $0x430] sm:$0xff] (%p1934_p3), %v1450_v11  ;;  %1453 = vst [vmem:[%s2167_s16 + $0x438] sm:$0xff] (%p1934_p3), %v1452_v12 }
 0x15a   : > { %v1782_v35 = vpack.c.bf16 %v825_v33, %v823_v31  ;;  %v1783_v36 = vpack.c.bf16 %v898_v34, %v896_v32  ;;  %1479 = vst [vmem:[%s2167_s16 + $0x620] sm:$0xff] (%p1934_p3), %v1478_v25  ;;  %1481 = vst [vmem:[%s2167_s16 + $0x628] sm:$0xff] (%p1934_p3), %v1480_v26  ;;  %v1490_v31 = vld [vmem:[%s2092_s7 + $0x1d0] sm:$0xff] (%p1934_p3)  ;;  %v1492_v32 = vld [vmem:[%s2092_s7 + $0x1d8] sm:$0xff] (%p1934_p3) }
 0x15b   : > { %v1466_v19 = vld [vmem:[%s2092_s7 + $0x170] sm:$0xff] (%p1934_p3)  ;;  %v1468_v20 = vld [vmem:[%s2092_s7 + $0x178] sm:$0xff] (%p1934_p3)  ;;  %1487 = vst [vmem:[%s2167_s16 + $0x700] sm:$0xff] (%p1934_p3), %v1486_v29  ;;  %1489 = vst [vmem:[%s2167_s16 + $0x708] sm:$0xff] (%p1934_p3), %v1488_v30 }
 0x15c   : > { %1347 = vst [vmem:[%s2092_s7 + $0x1f0] sm:$0xff] %v1782_v35  ;;  %1348 = vst [vmem:[%s2092_s7 + $0x1f8] sm:$0xff] %v1783_v36  ;;  %v1494_v33 = vld [vmem:[%s2092_s7 + $0x1e0] sm:$0xff] (%p1934_p3)  ;;  %v1496_v34 = vld [vmem:[%s2092_s7 + $0x1e8] sm:$0xff] (%p1934_p3) }
 0x15d   : > { %1467 = vst [vmem:[%s2167_s16 + $0x530] sm:$0xff] %v1466_v19  ;;  %1469 = vst [vmem:[%s2167_s16 + $0x538] sm:$0xff] %v1468_v20 }
 0x15e   : > { %1491 = vst [vmem:[%s2167_s16 + $0x710] sm:$0xff] %v1490_v31  ;;  %1493 = vst [vmem:[%s2167_s16 + $0x718] sm:$0xff] %v1492_v32 }
 0x15f   : > { %v1482_v27 = vld [vmem:[%s2092_s7 + $0x1b0] sm:$0xff]  ;;  %v1484_v28 = vld [vmem:[%s2092_s7 + $0x1b8] sm:$0xff]  ;;  %1495 = vst [vmem:[%s2167_s16 + $0x720] sm:$0xff] %v1494_v33  ;;  %1497 = vst [vmem:[%s2167_s16 + $0x728] sm:$0xff] %v1496_v34 }
 0x160   : > { %1483 = vst [vmem:[%s2167_s16 + $0x630] sm:$0xff] %v1482_v27  ;;  %1485 = vst [vmem:[%s2167_s16 + $0x638] sm:$0xff] %v1484_v28 }
 0x163   : > { %v1498_v35 = vld [vmem:[%s2092_s7 + $0x1f0] sm:$0xff]  ;;  %v1500_v36 = vld [vmem:[%s2092_s7 + $0x1f8] sm:$0xff] }
 0x164   : > { %1499 = vst [vmem:[%s2167_s16 + $0x730] sm:$0xff] %v1498_v35  ;;  %1501 = vst [vmem:[%s2167_s16 + $0x738] sm:$0xff] %v1500_v36 }
 0x165 PF: > { %s12_s13 = sadd.s32 1, %s1884_s13   ;;  %s2313_s9 = smov %s1872_s10 }
 0x166   : > { %p9_p9 = scmp.ge.s32.totalorder %s12_s13, 6   ;;  %s2314_s10 = smov %s1943_s19 }
 0x167   : > { %s2315_s11 = smov %s1880_s12  ;;  %s2316_s12 = smov %s2318_s15 }
 0x168   :  { %11 = sbr.rel (!%p9_p9) target bundleno = 3 (0x3), region = 84 }

// kernel: wave_field_decoder_forward.23
= control target key start
LH: loop header
LB: loop body
LE: loop exit
PB: predicated region body
PF: predicated region fallthrough
CT: control target
= control target key end

     0   :  { %s603_s9 = smov 0   ;;  %s605_s10 = smov 0   ;;  %s752_s0 = inlined_call_operand.vmem [shape: bf16[4,32768], index: 0, kind: input, shape index: {}]   ;;  %s753_s1 = inlined_call_operand.vmem [shape: f32[4,1], index: 1, kind: input, shape index: {}]   ;;  %s754_s2 = inlined_call_operand.vmem [shape: f32[2,4,16384], index: 2, kind: output, shape index: {}]  }
   0x1   :  { %s607_s11 = smov 0   ;;  %s609_s12 = smov 0  }
   0x2   :  { %s611_s13 = smov 0  }
   0x3 LB: > { %s21_s14 = sadd.s32 1, %s576_s11  ;;  %s24_s15 = sadd.s32 1, %s580_s12  ;;  %s584_s13 = sphi %s611_s13, %s12_s13   ;;  %s580_s12 = sphi %s609_s12, %s758_s12   ;;  %s576_s11 = sphi %s607_s11, %s757_s11   ;;  %s572_s10 = sphi %s605_s10, %s756_s10   ;;  %s568_s9 = sphi %s603_s9, %s755_s9  }
   0x4   : > { %p22_p0 = scmp.ge.s32.totalorder %s21_s14, 2  ;;  %p430_p1 = scmp.ge.s32.totalorder %s584_s13, 1 }
   0x5   : > { %p135_p2 = scmp.lt.s32.totalorder %s584_s13, 5 }
   0x6   : > { %s760_s14 = smov (%p22_p0, %s21_s14), 0  ;;  %s762_s15 = smov (!%p22_p0, %s24_s15), %s580_s12 }
   0x7   : > { %p136_p3 = pnand %p430_p1, %p135_p2  ;;  %p26_p4 = scmp.ge.s32.totalorder %s762_s15, 2 }
   0x8   : > { %s431_s18 = sshll.u32 (!%p136_p3), %s572_s10, 1  ;;  %s434_s25 = sshll.u32 (!%p136_p3), %s568_s9, 6 }
   0x9   : > { %s764_s15 = smov (%p26_p4, %s762_s15), 0  ;;  %139 = sbr.rel (%p136_p3) target bundleno = 190 (0xbe), region = 28 }
   0xa   : > { %s164_s19 = sadd.s32 (!%p136_p3), %s568_s9, %s431_s18  ;;  %p174_p6 = scmp.lt.s32.totalorder (!%p136_p3), %s572_s10, 1 }
   0xb   : > { %s432_s20 = sshll.u32 (!%p136_p3), %s164_s19, 6  ;;  %p176_p7 = scmp.lt.s32.totalorder (!%p136_p3), %s434_s25, 127 }
   0xc   : > { %p166_p5 = scmp.lt.s32.totalorder (!%p136_p3), %s432_s20, 255 }
   0xe   : > { %v231_v0 = vld [vmem:[%s753_s1] sm:$0xf]  ;;  %v586_v1 = vmov 0   ;;  %s766_s20 = smov (!%p166_p5, %s432_s20), 255  ;;  %v587_v2 = vmov 839922192   ;;  %v239_v4 = vlaneseq }
   0xf   : > { %481 = vset.pattern.permute.xlu0 %v586_v1  ;;  %v237_v3 = vunpack.c.l.s4 %v587_v2  ;;  %s433_s21 = sshll.u32 %s766_s20, 1  ;;  %s768_s10 = smov (!%p174_p6, %s572_s10), 1 }
  0x10   : > { %234 = vperm.xlu0 %481, %v231_v0   ;;  %v240_v6 = vshrl.u32 %v239_v4, 7  ;;  %s645_s24 = scalar_lea.vmem %s752_s0, %s433_s21  ;;  %s770_s25 = smov (!%p176_p7, %s434_s25), 127 }
  0x11   : > { %v238_v5 = vunpack.c.0.s8 %v237_v3  ;;  %v183_v9 = vld [vmem:[%s645_s24] sm:$0xff]  ;;  %v184_v10 = vld [vmem:[%s645_s24 + $0x8] sm:$0xff]  ;;  %v185_v13 = vld [vmem:[%s645_s24 + $0x10] sm:$0xff]  ;;  %s435_s26 = sshll.u32 %s768_s10, 7 }
  0x12   : > { %v199_v11 = vunpack.c.l.bf16 %v183_v9  ;;  %v200_v14 = vunpack.c.h.bf16 %v183_v9  ;;  %v201_v15 = vunpack.c.l.bf16 %v184_v10  ;;  %v186_v16 = vld [vmem:[%s645_s24 + $0x18] sm:$0xff]  ;;  %v202_v17 = vunpack.c.h.bf16 %v184_v10  ;;  %v187_v20 = vld [vmem:[%s645_s24 + $0x20] sm:$0xff]  ;;  %v188_v25 = vld [vmem:[%s645_s24 + $0x28] sm:$0xff]  ;;  %s179_s27 = sadd.s32 %s435_s26, %s770_s25 }
  0x13   : > { %v241_v7 = vsub.s32 %v238_v5, %v240_v6  ;;  %v203_v18 = vunpack.c.l.bf16 %v185_v13  ;;  %v204_v21 = vunpack.c.h.bf16 %v185_v13  ;;  %v205_v23 = vunpack.c.l.bf16 %v186_v16  ;;  %v189_v30 = vld [vmem:[%s645_s24 + $0x30] sm:$0xff]  ;;  %v190_v35 = vld [vmem:[%s645_s24 + $0x38] sm:$0xff]  ;;  %v191_v40 = vld [vmem:[%s645_s24 + $0x40] sm:$0xff]  ;;  %s436_s28 = sshll.u32 %s179_s27, 2 }
  0x14   : > { %v206_v26 = vunpack.c.h.bf16 %v186_v16  ;;  %v207_v28 = vunpack.c.l.bf16 %v187_v20  ;;  %v208_v31 = vunpack.c.h.bf16 %v187_v20  ;;  %v209_v33 = vunpack.c.l.bf16 %v188_v25  ;;  %v192_v45 = vld [vmem:[%s645_s24 + $0x48] sm:$0xff]  ;;  %v193_v50 = vld [vmem:[%s645_s24 + $0x50] sm:$0xff]  ;;  %s681_s3 = scalar_lea.vmem %s754_s2, %s436_s28  ;;  %v194_v55 = vld [vmem:[%s645_s24 + $0x58] sm:$0xff] }
  0x15   : > { %v210_v36 = vunpack.c.h.bf16 %v188_v25  ;;  %v211_v38 = vunpack.c.l.bf16 %v189_v30  ;;  %v212_v41 = vunpack.c.h.bf16 %v189_v30  ;;  %v213_v43 = vunpack.c.l.bf16 %v190_v35  ;;  %v195_v61 = vld [vmem:[%s645_s24 + $0x60] sm:$0xff]  ;;  %v196_v4 = vld [vmem:[%s645_s24 + $0x68] sm:$0xff] }
  0x16   : > { %v214_v46 = vunpack.c.h.bf16 %v190_v35  ;;  %v215_v48 = vunpack.c.l.bf16 %v191_v40  ;;  %v216_v51 = vunpack.c.h.bf16 %v191_v40  ;;  %v217_v53 = vunpack.c.l.bf16 %v192_v45 }
  0x17   : > { %v218_v56 = vunpack.c.h.bf16 %v192_v45  ;;  %v219_v58 = vunpack.c.l.bf16 %v193_v50  ;;  %v220_v62 = vunpack.c.h.bf16 %v193_v50  ;;  %v221_v1 = vunpack.c.l.bf16 %v194_v55 }
  0x18   : > { %v222_v5 = vunpack.c.h.bf16 %v194_v55  ;;  %v224_v13 = vunpack.c.h.bf16 %v195_v61  ;;  %v225_v16 = vunpack.c.l.bf16 %v196_v4  ;;  %v226_v20 = vunpack.c.h.bf16 %v196_v4 }
  0x8b   : > { %v235_v8 = vpop.permute.xlu0 %234 }
  0x8c   : > { %v649_v12 = vrot.slane %v235_v8, %v241_v7  ;;  %v223_v8 = vunpack.c.l.bf16 %v195_v61 }
  0x8e   : > { %v244_v19 = vadd.f32 %v649_v12, %v199_v11  ;;  %v245_v22 = vadd.f32 %v649_v12, %v200_v14  ;;  %v246_v24 = vadd.f32 %v649_v12, %v201_v15  ;;  %v247_v27 = vadd.f32 %v649_v12, %v202_v17  ;;  %v197_v11 = vld [vmem:[%s645_s24 + $0x70] sm:$0xff] }
  0x8f   : > { %v248_v29 = vadd.f32 %v649_v12, %v203_v18  ;;  %v249_v32 = vadd.f32 %v649_v12, %v204_v21  ;;  %v250_v34 = vadd.f32 %v649_v12, %v205_v23  ;;  %v251_v37 = vadd.f32 %v649_v12, %v206_v26 }
  0x90   : > { %482 = vtanh.f32 %v244_v19  ;;  %v252_v39 = vadd.f32 %v649_v12, %v207_v28  ;;  %v253_v42 = vadd.f32 %v649_v12, %v208_v31  ;;  %v254_v44 = vadd.f32 %v649_v12, %v209_v33  ;;  %v198_v19 = vld [vmem:[%s645_s24 + $0x78] sm:$0xff] }
  0x91   : > { %484 = vtanh.f32 %v245_v22  ;;  %v255_v47 = vadd.f32 %v649_v12, %v210_v36  ;;  %v256_v49 = vadd.f32 %v649_v12, %v211_v38  ;;  %v257_v52 = vadd.f32 %v649_v12, %v212_v41 }
  0x92   : > { %486 = vtanh.f32 %v246_v24  ;;  %v258_v54 = vadd.f32 %v649_v12, %v213_v43  ;;  %v259_v57 = vadd.f32 %v649_v12, %v214_v46  ;;  %v260_v59 = vadd.f32 %v649_v12, %v215_v48 }
  0x93   : > { %488 = vtanh.f32 %v247_v27  ;;  %v261_v63 = vadd.f32 %v649_v12, %v216_v51  ;;  %v262_v2 = vadd.f32 %v649_v12, %v217_v53  ;;  %v263_v6 = vadd.f32 %v649_v12, %v218_v56 }
  0x94   : > { %490 = vtanh.f32 %v248_v29  ;;  %v264_v9 = vadd.f32 %v649_v12, %v219_v58  ;;  %v265_v14 = vadd.f32 %v649_v12, %v220_v62  ;;  %v266_v17 = vadd.f32 %v649_v12, %v221_v1 }
  0x95   : > { %492 = vtanh.f32 %v249_v32  ;;  %v267_v21 = vadd.f32 %v649_v12, %v222_v5  ;;  %v227_v23 = vunpack.c.l.bf16 %v197_v11  ;;  %v268_v24 = vadd.f32 %v649_v12, %v223_v8 }
  0x96   : > { %494 = vtanh.f32 %v250_v34  ;;  %v228_v26 = vunpack.c.h.bf16 %v197_v11  ;;  %v269_v27 = vadd.f32 %v649_v12, %v224_v13  ;;  %v229_v29 = vunpack.c.l.bf16 %v198_v19 }
  0x97   : > { %496 = vtanh.f32 %v251_v37  ;;  %v270_v30 = vadd.f32 %v649_v12, %v225_v16  ;;  %v230_v32 = vunpack.c.h.bf16 %v198_v19  ;;  %v271_v33 = vadd.f32 %v649_v12, %v226_v20 }
  0x98   : > { %498 = vtanh.f32 %v252_v39  ;;  %v272_v35 = vadd.f32 %v649_v12, %v227_v23  ;;  %v273_v37 = vadd.f32 %v649_v12, %v228_v26  ;;  %v274_v39 = vadd.f32 %v649_v12, %v229_v29 }
  0x99   : > { %500 = vtanh.f32 %v253_v42  ;;  %v275_v41 = vadd.f32 %v649_v12, %v230_v32 }
  0x9a   : > { %502 = vtanh.f32 %v254_v44 }
  0x9b   : > { %504 = vtanh.f32 %v255_v47 }
  0x9c   : > { %506 = vtanh.f32 %v256_v49 }
  0x9d   : > { %v483_v60 = vpop.eup %482  ;;  %508 = vtanh.f32 %v257_v52 }
  0x9e   : > { %v485_v0 = vpop.eup %484  ;;  %510 = vtanh.f32 %v258_v54  ;;  %308 = vst [vmem:[%s681_s3] sm:$0xff] %v483_v60 }
  0x9f   : > { %v487_v3 = vpop.eup %486  ;;  %512 = vtanh.f32 %v259_v57  ;;  %309 = vst [vmem:[%s681_s3 + $0x8] sm:$0xff] %v485_v0 }
  0xa0   : > { %v489_v7 = vpop.eup %488  ;;  %514 = vtanh.f32 %v260_v59  ;;  %310 = vst [vmem:[%s681_s3 + $0x10] sm:$0xff] %v487_v3 }
  0xa1   : > { %v491_v10 = vpop.eup %490  ;;  %516 = vtanh.f32 %v261_v63  ;;  %311 = vst [vmem:[%s681_s3 + $0x18] sm:$0xff] %v489_v7 }
  0xa2   : > { %v493_v15 = vpop.eup %492  ;;  %518 = vtanh.f32 %v262_v2  ;;  %312 = vst [vmem:[%s681_s3 + $0x20] sm:$0xff] %v491_v10 }
  0xa3   : > { %v495_v18 = vpop.eup %494  ;;  %520 = vtanh.f32 %v263_v6  ;;  %313 = vst [vmem:[%s681_s3 + $0x28] sm:$0xff] %v493_v15 }
  0xa4   : > { %v497_v22 = vpop.eup %496  ;;  %522 = vtanh.f32 %v264_v9  ;;  %314 = vst [vmem:[%s681_s3 + $0x30] sm:$0xff] %v495_v18 }
  0xa5   : > { %v499_v25 = vpop.eup %498  ;;  %524 = vtanh.f32 %v265_v14  ;;  %315 = vst [vmem:[%s681_s3 + $0x38] sm:$0xff] %v497_v22 }
  0xa6   : > { %v501_v28 = vpop.eup %500  ;;  %526 = vtanh.f32 %v266_v17  ;;  %316 = vst [vmem:[%s681_s3 + $0x40] sm:$0xff] %v499_v25 }
  0xa7   : > { %v503_v31 = vpop.eup %502  ;;  %528 = vtanh.f32 %v267_v21  ;;  %317 = vst [vmem:[%s681_s3 + $0x48] sm:$0xff] %v501_v28 }
  0xa8   : > { %v505_v34 = vpop.eup %504  ;;  %530 = vtanh.f32 %v268_v24  ;;  %318 = vst [vmem:[%s681_s3 + $0x50] sm:$0xff] %v503_v31 }
  0xa9   : > { %v507_v36 = vpop.eup %506  ;;  %532 = vtanh.f32 %v269_v27  ;;  %319 = vst [vmem:[%s681_s3 + $0x58] sm:$0xff] %v505_v34 }
  0xaa   : > { %v509_v38 = vpop.eup %508  ;;  %534 = vtanh.f32 %v270_v30  ;;  %320 = vst [vmem:[%s681_s3 + $0x60] sm:$0xff] %v507_v36 }
  0xab   : > { %v511_v40 = vpop.eup %510  ;;  %536 = vtanh.f32 %v271_v33  ;;  %321 = vst [vmem:[%s681_s3 + $0x68] sm:$0xff] %v509_v38 }
  0xac   : > { %v513_v42 = vpop.eup %512  ;;  %538 = vtanh.f32 %v272_v35  ;;  %322 = vst [vmem:[%s681_s3 + $0x70] sm:$0xff] %v511_v40 }
  0xad   : > { %v515_v43 = vpop.eup %514  ;;  %540 = vtanh.f32 %v273_v37  ;;  %323 = vst [vmem:[%s681_s3 + $0x78] sm:$0xff] %v513_v42 }
  0xae   : > { %v517_v44 = vpop.eup %516  ;;  %542 = vtanh.f32 %v274_v39  ;;  %324 = vst [vmem:[%s681_s3 + $0x80] sm:$0xff] %v515_v43 }
  0xaf   : > { %v519_v45 = vpop.eup %518  ;;  %544 = vtanh.f32 %v275_v41  ;;  %325 = vst [vmem:[%s681_s3 + $0x88] sm:$0xff] %v517_v44 }
  0xb0   : > { %v521_v12 = vpop.eup %520  ;;  %326 = vst [vmem:[%s681_s3 + $0x90] sm:$0xff] %v519_v45 }
  0xb1   : > { %v523_v46 = vpop.eup %522  ;;  %327 = vst [vmem:[%s681_s3 + $0x98] sm:$0xff] %v521_v12 }
  0xb2   : > { %v525_v47 = vpop.eup %524  ;;  %328 = vst [vmem:[%s681_s3 + $0xa0] sm:$0xff] %v523_v46 }
  0xb3   : > { %v527_v48 = vpop.eup %526  ;;  %329 = vst [vmem:[%s681_s3 + $0xa8] sm:$0xff] %v525_v47 }
  0xb4   : > { %v529_v49 = vpop.eup %528  ;;  %330 = vst [vmem:[%s681_s3 + $0xb0] sm:$0xff] %v527_v48 }
  0xb5   : > { %v531_v50 = vpop.eup %530  ;;  %331 = vst [vmem:[%s681_s3 + $0xb8] sm:$0xff] %v529_v49 }
  0xb6   : > { %v533_v51 = vpop.eup %532  ;;  %332 = vst [vmem:[%s681_s3 + $0xc0] sm:$0xff] %v531_v50 }
  0xb7   : > { %v535_v52 = vpop.eup %534  ;;  %333 = vst [vmem:[%s681_s3 + $0xc8] sm:$0xff] %v533_v51 }
  0xb8   : > { %v537_v53 = vpop.eup %536  ;;  %334 = vst [vmem:[%s681_s3 + $0xd0] sm:$0xff] %v535_v52 }
  0xb9   : > { %v539_v54 = vpop.eup %538  ;;  %335 = vst [vmem:[%s681_s3 + $0xd8] sm:$0xff] %v537_v53 }
  0xba   : > { %v541_v55 = vpop.eup %540  ;;  %336 = vst [vmem:[%s681_s3 + $0xe0] sm:$0xff] %v539_v54 }
  0xbb   : > { %v543_v56 = vpop.eup %542  ;;  %337 = vst [vmem:[%s681_s3 + $0xe8] sm:$0xff] %v541_v55 }
  0xbc   : > { %v545_v57 = vpop.eup %544  ;;  %338 = vst [vmem:[%s681_s3 + $0xf0] sm:$0xff] %v543_v56 }
  0xbd   : > { %339 = vst [vmem:[%s681_s3 + $0xf8] sm:$0xff] %v545_v57 }
  0xbe PF: > { %s12_s13 = sadd.s32 1, %s584_s13   ;;  %s755_s9 = smov %s576_s11 }
  0xbf   : > { %p9_p8 = scmp.ge.s32.totalorder %s12_s13, 6   ;;  %s756_s10 = smov %s580_s12 }
  0xc0   : > { %s757_s11 = smov %s760_s14  ;;  %s758_s12 = smov %s764_s15 }
  0xc1   :  { %11 = sbr.rel (!%p9_p8) target bundleno = 3 (0x3), region = 58 }

</bundles_post_ra>
